<compile_context>
chip_gen: v7x
topology: tpu7x:2x2x1
jax: 0.10.0
libtpu: 0.0.40
codegen_flags: <defaults>
</compile_context>

<pallas_src>
import functools
import math

import jax
import jax.numpy as jnp
from jax.experimental import pallas as pl
from jax.experimental.pallas import tpu as pltpu

LRELU_SLOPE = 0.1     # nn.LeakyReLU(negative_slope=0.1)
BN_EPS = 1e-5         # nn.BatchNorm2d default eps
LANE = 128            # channel dims zero-padded to a multiple of this


def _round_up(x, m):
    return (x + m - 1) // m * m


def _tpu_budget():
    """(vmem_limit_bytes, fallback_row_tile) chosen per TPU generation."""
    try:
        cap = pltpu.get_tpu_info().vmem_capacity_bytes
    except Exception:                      # conservative default (v7x-safe)
        cap = 64 * 1024 * 1024
    if cap >= 100 * 1024 * 1024:           # v5e / v6e: 128 MiB physical VMEM
        return 96 * 1024 * 1024, 512
    return 48 * 1024 * 1024, 256           # v7x: 64 MiB per TensorCore


VMEM_LIMIT, FALLBACK_ROWS = _tpu_budget()


def _cparams(n_axes=1):
    return pltpu.CompilerParams(
        dimension_semantics=("parallel",) * n_axes,
        vmem_limit_bytes=VMEM_LIMIT)


# --------------------------------------------------------------------------
# Shared in-kernel helpers
# --------------------------------------------------------------------------
def _stat_rows(out2d):
    """(rows, C) f32 -> (2, C): row0 = per-channel sum, row1 = sum of squares."""
    c = out2d.shape[-1]
    s = jnp.sum(out2d, axis=0, keepdims=True)
    sq = jnp.sum(out2d * out2d, axis=0, keepdims=True)
    rows = jax.lax.broadcasted_iota(jnp.int32, (2, c), 0)
    return jnp.where(rows == 0, jnp.broadcast_to(s, (2, c)),
                     jnp.broadcast_to(sq, (2, c)))


# --------------------------------------------------------------------------
# Pallas kernels
# --------------------------------------------------------------------------
def _conv_tap_kernel(*refs, kh, kw, pad, ho, wo, cout, fuse_act, add_res):
    """Per-image stride-1 conv: fused BN+LeakyReLU on the input (applied once),
    kh*kw shifted tap matmuls accumulated in f32, optional residual add, bf16
    store, and a BN-stats epilogue (sum / sumsq of this image's output)."""
    it = iter(refs)
    x_ref = next(it)
    s_ref = t_ref = r_ref = None
    if fuse_act:
        s_ref = next(it)
        t_ref = next(it)
    w_ref = next(it)
    if add_res:
        r_ref = next(it)
    o_ref = next(it)
    stat_ref = next(it)

    hp, wp = ho + 2 * pad, wo + 2 * pad
    if fuse_act:
        a = x_ref[...].astype(jnp.float32) * s_ref[...] + t_ref[...]
        a = jnp.maximum(a, LRELU_SLOPE * a)          # LeakyReLU(0.1), slope < 1
        if pad:
            # Reference pads AFTER the activation -> keep the halo ring at 0.
            cin = a.shape[-1]
            rr = jax.lax.broadcasted_iota(jnp.int32, (hp, wp, cin), 0)
            cc = jax.lax.broadcasted_iota(jnp.int32, (hp, wp, cin), 1)
            interior = ((rr >= pad) & (rr < pad + ho)
                        & (cc >= pad) & (cc < pad + wo))
            a = jnp.where(interior, a, 0.0)
        a = a.astype(jnp.bfloat16)
    else:
        a = x_ref[...]                                # halo already zero

    cin = a.shape[-1]
    acc = jnp.zeros((ho * wo, cout), jnp.float32)
    for dy in range(kh):
        for dx in range(kw):
            xt = a[dy:dy + ho, dx:dx + wo, :].reshape(ho * wo, cin)
            acc = acc + jnp.dot(xt, w_ref[dy * kw + dx],
                                preferred_element_type=jnp.float32)
    if add_res:
        acc = acc + r_ref[...].reshape(ho * wo, cout).astype(jnp.float32)

    o_ref[...] = acc.reshape(ho, wo, cout).astype(o_ref.dtype)
    stat_ref[...] = _stat_rows(acc)                   # BN stats of this output


def _matmul_kernel(p_ref, w_ref, o_ref, stat_ref):
    """Fallback conv (stride != 1): bf16 patches @ resident bf16 weight."""
    out = jnp.dot(p_ref[...], w_ref[...], preferred_element_type=jnp.float32)
    o_ref[...] = out.astype(o_ref.dtype)
    stat_ref[...] = _stat_rows(out)


def _bn_act_kernel(x_ref, s_ref, t_ref, o_ref):
    """Standalone BN normalize + LeakyReLU (used only before fallback convs)."""
    a = x_ref[...].astype(jnp.float32) * s_ref[...] + t_ref[...]
    o_ref[...] = jnp.maximum(a, LRELU_SLOPE * a).astype(o_ref.dtype)


def _stats_kernel(x_ref, stat_ref):
    """Standalone per-image BN partial statistics (NetworkBlock input only)."""
    x = x_ref[...].astype(jnp.float32)
    h, w, c = x.shape
    stat_ref[...] = _stat_rows(x.reshape(h * w, c))


# --------------------------------------------------------------------------
# pallas_call wrappers
# --------------------------------------------------------------------------
def conv_tap(x, w, kh, kw, pad, scale=None, shift=None, residual=None):
    """Stride-1 conv as per-image in-VMEM tap accumulation.

    x: (N, H, W, Cin) bf16 (channel-padded); w: (kh*kw, Cin, Cout) bf16.
    Optionally fuses BN normalize + LeakyReLU on the input and a residual add
    on the output (residual buffer aliased to the output).
    Returns (y bf16 (N, H, W, Cout), BN stats partials f32 (N, 2, Cout)).
    """
    n, h, wd, cin = x.shape
    cout = w.shape[-1]
    fuse_act = scale is not None
    add_res = residual is not None
    xp = jnp.pad(x, ((0, 0), (pad, pad), (pad, pad), (0, 0))) if pad else x
    hp, wp = h + 2 * pad, wd + 2 * pad

    kern = functools.partial(_conv_tap_kernel, kh=kh, kw=kw, pad=pad,
                             ho=h, wo=wd, cout=cout,
                             fuse_act=fuse_act, add_res=add_res)
    in_specs = [pl.BlockSpec((None, hp, wp, cin), lambda i: (i, 0, 0, 0))]
    args = [xp]
    if fuse_act:
        vspec = pl.BlockSpec((1, 1, cin), lambda i: (0, 0, 0))
        in_specs += [vspec, vspec]
        args += [scale, shift]
    # Resident weight: constant index_map -> DMA'd once for the whole conv.
    in_specs.append(pl.BlockSpec((kh * kw, cin, cout), lambda i: (0, 0, 0)))
    args.append(w)
    aliases = {}
    if add_res:
        in_specs.append(pl.BlockSpec((None, h, wd, cout), lambda i: (i, 0, 0, 0)))
        args.append(residual)
        aliases = {len(args) - 1: 0}      # residual buffer becomes the output

    y, part = pl.pallas_call(
        kern,
        out_shape=(jax.ShapeDtypeStruct((n, h, wd, cout), jnp.bfloat16),
                   jax.ShapeDtypeStruct((n, 2, cout), jnp.float32)),
        grid=(n,),
        in_specs=in_specs,
        out_specs=(pl.BlockSpec((None, h, wd, cout), lambda i: (i, 0, 0, 0)),
                   pl.BlockSpec((None, 2, cout), lambda i: (i, 0, 0))),
        input_output_aliases=aliases,
        compiler_params=_cparams(),
    )(*args)
    return y, part


def _row_tiling(m, max_rows):
    if m <= max_rows:
        return m, 1, 0
    for t in range(max_rows - max_rows % 8, 7, -8):
        if m % t == 0:
            return t, m // t, 0
    nt = pl.cdiv(m, max_rows)
    return max_rows, nt, nt * max_rows - m


def conv_matmul(patches, w2d, n_imgs, ho, wo):
    """Fallback conv (stride != 1): bf16 im2col patches @ resident weight."""
    m, k = patches.shape
    cout = w2d.shape[1]
    tm, nt, pad_rows = _row_tiling(m, FALLBACK_ROWS)
    if pad_rows:                       # ragged tail only; zero rows are stats-neutral
        patches = jnp.pad(patches, ((0, pad_rows), (0, 0)))
    out2d, part = pl.pallas_call(
        _matmul_kernel,
        out_shape=(jax.ShapeDtypeStruct((m + pad_rows, cout), jnp.bfloat16),
                   jax.ShapeDtypeStruct((nt, 2, cout), jnp.float32)),
        grid=(nt,),
        in_specs=[pl.BlockSpec((tm, k), lambda i: (i, 0)),
                  pl.BlockSpec((k, cout), lambda i: (0, 0))],
        out_specs=(pl.BlockSpec((tm, cout), lambda i: (i, 0)),
                   pl.BlockSpec((None, 2, cout), lambda i: (i, 0, 0))),
        compiler_params=_cparams(),
    )(patches, w2d)
    return out2d[:m].reshape(n_imgs, ho, wo, cout), part


def bn_act_apply(x, scale, shift):
    """lrelu(x * scale + shift) -> bf16 (used only for the stride-2 fallback)."""
    n, h, w, c = x.shape
    return pl.pallas_call(
        _bn_act_kernel,
        out_shape=jax.ShapeDtypeStruct((n, h, w, c), jnp.bfloat16),
        grid=(n,),
        in_specs=[pl.BlockSpec((None, h, w, c), lambda i: (i, 0, 0, 0)),
                  pl.BlockSpec((1, 1, c), lambda i: (0, 0, 0)),
                  pl.BlockSpec((1, 1, c), lambda i: (0, 0, 0))],
        out_specs=pl.BlockSpec((None, h, w, c), lambda i: (i, 0, 0, 0)),
        compiler_params=_cparams(),
    )(x, scale, shift)


def bn_partial_stats(x):
    """Per-image (sum, sumsq) partials (N, 2, C) of an NHWC activation."""
    n, h, w, c = x.shape
    return pl.pallas_call(
        _stats_kernel,
        out_shape=jax.ShapeDtypeStruct((n, 2, c), jnp.float32),
        grid=(n,),
        in_specs=[pl.BlockSpec((None, h, w, c), lambda i: (i, 0, 0, 0))],
        out_specs=pl.BlockSpec((None, 2, c), lambda i: (i, 0, 0)),
        compiler_params=_cparams(),
    )(x)


def bn_finalize(partials, gamma, beta, count):
    """Tiny XLA reduce: partials (T, 2, C) -> per-channel (scale, shift)."""
    s = jnp.sum(partials[:, 0, :], axis=0)
    sq = jnp.sum(partials[:, 1, :], axis=0)
    mean = s / count
    var = jnp.maximum(sq / count - mean * mean, 0.0)
    scale = gamma * jax.lax.rsqrt(var + BN_EPS)
    shift = beta - mean * scale
    c = gamma.shape[0]
    return scale.reshape(1, 1, c), shift.reshape(1, 1, c)


def _im2col(x, kh, kw, stride, pad):
    """im2col for the stride-2 fallback only: NHWC bf16 -> (M, kh*kw*C) bf16."""
    n, h, w, c = x.shape
    if pad:
        x = jnp.pad(x, ((0, 0), (pad, pad), (pad, pad), (0, 0)))
    ho = (h + 2 * pad - kh) // stride + 1
    wo = (w + 2 * pad - kw) // stride + 1
    cols = [x[:, dy:dy + stride * ho:stride, dx:dx + stride * wo:stride, :]
            for dy in range(kh) for dx in range(kw)]
    patches = cols[0] if len(cols) == 1 else jnp.concatenate(cols, axis=-1)
    return patches.reshape(n * ho * wo, kh * kw * c), ho, wo


# --------------------------------------------------------------------------
# BasicBlock / NetworkBlock (parameter init + forward)
# --------------------------------------------------------------------------
def _conv_w_init(key, kh, kw, cin, cout, cinp, coutp):
    # WRN init: normal(0, sqrt(2 / (k*k*out_channels))), zero-padded to lane
    # multiples, stored as a bf16 (kh*kw, cinp, coutp) tap stack.
    std = math.sqrt(2.0 / (kh * kw * cout))
    w = std * jax.random.normal(key, (kh, kw, cin, cout), jnp.float32)
    w = jnp.pad(w, ((0, 0), (0, 0), (0, cinp - cin), (0, coutp - cout)))
    return w.reshape(kh * kw, cinp, coutp).astype(jnp.bfloat16)


def _pad_chan(v, cp):
    return jnp.pad(v, (0, cp - v.shape[0]))


def init_basic_block(key, in_planes, out_planes):
    cinp, coutp = _round_up(in_planes, LANE), _round_up(out_planes, LANE)
    k1, k2, k3 = jax.random.split(key, 3)
    p = {
        "bn1_g": _pad_chan(jnp.ones((in_planes,), jnp.float32), cinp),
        "bn1_b": _pad_chan(jnp.zeros((in_planes,), jnp.float32), cinp),
        "conv1_w": _conv_w_init(k1, 3, 3, in_planes, out_planes, cinp, coutp),
        "bn2_g": _pad_chan(jnp.ones((out_planes,), jnp.float32), coutp),
        "bn2_b": _pad_chan(jnp.zeros((out_planes,), jnp.float32), coutp),
        "conv2_w": _conv_w_init(k2, 3, 3, out_planes, out_planes, coutp, coutp),
    }
    if in_planes != out_planes:
        p["convsc_w"] = _conv_w_init(k3, 1, 1, in_planes, out_planes, cinp, coutp)
    return p


def basic_block_forward(x, p, stride, activate_before_residual, x_partials=None):
    """Faithful to the wideresnet_ssl BasicBlock.forward branching.

    BN+LeakyReLU is fused into the consuming conv; BN batch stats of each
    conv's output come from that conv's fused epilogue (x_partials carries the
    previous block's conv2 epilogue into this block's bn1)."""
    n, h, w, _ = x.shape
    coutp = p["conv1_w"].shape[-1]
    equal_in_out = "convsc_w" not in p
    conv1_activated = equal_in_out or activate_before_residual

    if conv1_activated:
        if x_partials is None:
            x_partials = bn_partial_stats(x)
        s1, t1 = bn_finalize(x_partials, p["bn1_g"], p["bn1_b"], n * h * w)
    else:
        # Reference computes relu1(bn1(x)) here but never uses it when
        # (not equalInOut and not activate_before_residual) — dead for the
        # forward output, so the stats pass is skipped.
        s1 = t1 = None

    ax = None
    if stride == 1:
        mid, mid_part = conv_tap(x, p["conv1_w"], 3, 3, 1, scale=s1, shift=t1)
        ho, wo = h, w
    else:
        # TODO(synk): stride-2 convs still go through a (small) im2col slab.
        ax = bn_act_apply(x, s1, t1) if conv1_activated else x
        patches, ho, wo = _im2col(ax, 3, 3, stride, 1)
        mid, mid_part = conv_matmul(patches, p["conv1_w"].reshape(-1, coutp),
                                    n, ho, wo)

    s2, t2 = bn_finalize(mid_part, p["bn2_g"], p["bn2_b"], n * ho * wo)
    # TODO(synk): dropout skipped — drop_rate=0.0 (module default) is a no-op.

    if equal_in_out:
        shortcut = x                                            # identity
    else:
        w_sc = p["convsc_w"]
        if activate_before_residual:
            if stride == 1:
                shortcut, _ = conv_tap(x, w_sc, 1, 1, 0, scale=s1, shift=t1)
            else:
                pats, _, _ = _im2col(ax, 1, 1, stride, 0)
                shortcut, _ = conv_matmul(pats, w_sc.reshape(-1, coutp),
                                          n, ho, wo)
        else:
            if stride == 1:
                shortcut, _ = conv_tap(x, w_sc, 1, 1, 0)
            else:
                pats, _, _ = _im2col(x, 1, 1, stride, 0)
                shortcut, _ = conv_matmul(pats, w_sc.reshape(-1, coutp),
                                          n, ho, wo)

    # conv2 with fused bn2+LeakyReLU on its input, fused residual add, and a
    # fused stats epilogue consumed by the next block's bn1.
    return conv_tap(mid, p["conv2_w"], 3, 3, 1, scale=s2, shift=t2,
                    residual=shortcut)


def init_network_block(key, nb_layers, in_planes, out_planes):
    keys = jax.random.split(key, nb_layers)
    return [init_basic_block(keys[i],
                             in_planes if i == 0 else out_planes, out_planes)
            for i in range(nb_layers)]


def network_block_forward(x_nchw, params, stride, out_planes,
                          activate_before_residual=False):
    n, c, h, w = x_nchw.shape
    cp = _round_up(c, LANE)
    x = jnp.transpose(x_nchw, (0, 2, 3, 1))                     # NCHW -> NHWC
    x = jnp.pad(x, ((0, 0), (0, 0), (0, 0), (0, cp - c))).astype(jnp.bfloat16)
    part = None
    for i, p in enumerate(params):
        x, part = basic_block_forward(x, p, stride if i == 0 else 1,
                                      activate_before_residual, part)
    x = x[..., :out_planes].astype(jnp.float32)                 # strip padding
    return jnp.transpose(x, (0, 3, 1, 2))                       # NHWC -> NCHW


# --------------------------------------------------------------------------
if __name__ == "__main__":
    key = jax.random.PRNGKey(0)
    kx, kp = jax.random.split(key)

    # NetworkBlock(nb_layers=2, in_planes=4, out_planes=8, block=BasicBlock,
    #              stride=2, drop_rate=0.0, activate_before_residual=True)
    x = jax.random.normal(kx, (2, 4, 16, 16), jnp.float32)       # NCHW input
    params = init_network_block(kp, nb_layers=2, in_planes=4, out_planes=8)

    fwd = jax.jit(lambda xx: network_block_forward(
        xx, params, stride=2, out_planes=8, activate_before_residual=True))
    y = fwd(x)
    jax.block_until_ready(y)

    assert y.shape == (2, 8, 8, 8), y.shape          # (N, out_planes, H/2, W/2)
    assert bool(jnp.all(jnp.isfinite(y)))
    print("KERNEL_OK")
</pallas_src>

<mosaic_0001>
module attributes {stable_mosaic.version = 11 : i64} {
  func.func @_stats_kernel(%arg0: i32, %arg1: memref<1x16x16x128xbf16, #tpu.memory_space<vmem>>, %arg2: memref<1x2x128xf32, #tpu.memory_space<vmem>>) attributes {dimension_semantics = [#tpu.dimension_semantics<parallel>], iteration_bounds = array<i64: 2>, scalar_prefetch = 0 : i64, scratch_operands = 0 : i64, tpu.core_type = #tpu.core_type<tc>, window_params = [{transform_indices = @transform_0, window_bounds = array<i64: 1, 16, 16, 128>}, {transform_indices = @transform_1, window_bounds = array<i64: 1, 2, 128>}]} {
    %c0 = arith.constant 0 : index
    %c0_0 = arith.constant 0 : index
    %c0_1 = arith.constant 0 : index
    %c0_2 = arith.constant 0 : index
    %0 = vector.load %arg1[%c0, %c0_0, %c0_1, %c0_2] : memref<1x16x16x128xbf16, #tpu.memory_space<vmem>>, vector<1x16x16x128xbf16>
    %1 = vector.shape_cast %0 : vector<1x16x16x128xbf16> to vector<16x16x128xbf16>
    %2 = arith.extf %1 : vector<16x16x128xbf16> to vector<16x16x128xf32>
    %3 = vector.shape_cast %2 : vector<16x16x128xf32> to vector<256x128xf32>
    %cst = arith.constant dense<0.000000e+00> : vector<128xf32>
    %4 = vector.multi_reduction <add>, %3, %cst [0] : vector<256x128xf32> to vector<128xf32>
    %5 = vector.shape_cast %4 : vector<128xf32> to vector<1x128xf32>
    %6 = arith.mulf %3, %3 : vector<256x128xf32>
    %cst_3 = arith.constant dense<0.000000e+00> : vector<128xf32>
    %7 = vector.multi_reduction <add>, %6, %cst_3 [0] : vector<256x128xf32> to vector<128xf32>
    %8 = vector.shape_cast %7 : vector<128xf32> to vector<1x128xf32>
    %9 = tpu.iota {dimensions = array<i32: 0>} : vector<2x128xi32>
    %c0_i32 = arith.constant 0 : i32
    %10 = vector.broadcast %c0_i32 : i32 to vector<2x128xi32>
    %11 = arith.cmpi eq, %9, %10 : vector<2x128xi32>
    %12 = vector.shape_cast %5 : vector<1x128xf32> to vector<1x128xf32>
    %13 = vector.broadcast %12 : vector<1x128xf32> to vector<2x128xf32>
    %14 = vector.shape_cast %8 : vector<1x128xf32> to vector<1x128xf32>
    %15 = vector.broadcast %14 : vector<1x128xf32> to vector<2x128xf32>
    %16 = arith.select %11, %13, %15 : vector<2x128xi1>, vector<2x128xf32>
    %c0_4 = arith.constant 0 : index
    %c0_5 = arith.constant 0 : index
    %c0_6 = arith.constant 0 : index
    %17 = vector.load %arg2[%c0_4, %c0_5, %c0_6] : memref<1x2x128xf32, #tpu.memory_space<vmem>>, vector<1x2x128xf32>
    %18 = vector.shape_cast %17 : vector<1x2x128xf32> to vector<2x128xf32>
    %19 = vector.shape_cast %16 : vector<2x128xf32> to vector<1x2x128xf32>
    tpu.vector_store %arg2[%c0_4, %c0_5, %c0_6], %19 {strides = array<i32>} : memref<1x2x128xf32, #tpu.memory_space<vmem>>, vector<1x2x128xf32>,
    return
  }
  func.func @transform_0(%arg0: i32) -> (i32, i32, i32, i32) {
    %c0_i32 = arith.constant 0 : i32
    %c0_i32_0 = arith.constant 0 : i32
    %c0_i32_1 = arith.constant 0 : i32
    %c0_i32_2 = arith.constant 0 : i32
    return %arg0, %c0_i32, %c0_i32_0, %c0_i32_1 : i32, i32, i32, i32
  }
  func.func @transform_1(%arg0: i32) -> (i32, i32, i32) {
    %c0_i32 = arith.constant 0 : i32
    %c0_i32_0 = arith.constant 0 : i32
    %c0_i32_1 = arith.constant 0 : i32
    return %arg0, %c0_i32, %c0_i32_0 : i32, i32, i32
  }
}

module attributes {stable_mosaic.version = 11 : i64} {
  func.func @_bn_act_kernel(%arg0: i32, %arg1: memref<1x16x16x128xbf16, #tpu.memory_space<vmem>>, %arg2: memref<1x1x128xf32, #tpu.memory_space<vmem>>, %arg3: memref<1x1x128xf32, #tpu.memory_space<vmem>>, %arg4: memref<1x16x16x128xbf16, #tpu.memory_space<vmem>>) attributes {dimension_semantics = [#tpu.dimension_semantics<parallel>], iteration_bounds = array<i64: 2>, scalar_prefetch = 0 : i64, scratch_operands = 0 : i64, tpu.core_type = #tpu.core_type<tc>, window_params = [{transform_indices = @transform_0, window_bounds = array<i64: 1, 16, 16, 128>}, {pipeline_mode = #tpu.pipeline_mode<synchronous>, transform_indices = @transform_1, window_bounds = array<i64: 1, 1, 128>}, {pipeline_mode = #tpu.pipeline_mode<synchronous>, transform_indices = @transform_2, window_bounds = array<i64: 1, 1, 128>}, {transform_indices = @transform_3, window_bounds = array<i64: 1, 16, 16, 128>}]} {
    %c0 = arith.constant 0 : index
    %c0_0 = arith.constant 0 : index
    %c0_1 = arith.constant 0 : index
    %c0_2 = arith.constant 0 : index
    %0 = vector.load %arg1[%c0, %c0_0, %c0_1, %c0_2] : memref<1x16x16x128xbf16, #tpu.memory_space<vmem>>, vector<1x16x16x128xbf16>
    %1 = vector.shape_cast %0 : vector<1x16x16x128xbf16> to vector<16x16x128xbf16>
    %2 = arith.extf %1 : vector<16x16x128xbf16> to vector<16x16x128xf32>
    %c0_3 = arith.constant 0 : index
    %c0_4 = arith.constant 0 : index
    %c0_5 = arith.constant 0 : index
    %3 = vector.load %arg2[%c0_3, %c0_4, %c0_5] : memref<1x1x128xf32, #tpu.memory_space<vmem>>, vector<1x1x128xf32>
    %4 = vector.broadcast %3 : vector<1x1x128xf32> to vector<16x16x128xf32>
    %5 = arith.mulf %2, %4 : vector<16x16x128xf32>
    %c0_6 = arith.constant 0 : index
    %c0_7 = arith.constant 0 : index
    %c0_8 = arith.constant 0 : index
    %6 = vector.load %arg3[%c0_6, %c0_7, %c0_8] : memref<1x1x128xf32, #tpu.memory_space<vmem>>, vector<1x1x128xf32>
    %7 = vector.broadcast %6 : vector<1x1x128xf32> to vector<16x16x128xf32>
    %8 = arith.addf %5, %7 : vector<16x16x128xf32>
    %cst = arith.constant 1.000000e-01 : f32
    %9 = vector.broadcast %cst : f32 to vector<16x16x128xf32>
    %10 = arith.mulf %9, %8 : vector<16x16x128xf32>
    %11 = arith.maximumf %8, %10 : vector<16x16x128xf32>
    %12 = arith.truncf %11 : vector<16x16x128xf32> to vector<16x16x128xbf16>
    %c0_9 = arith.constant 0 : index
    %c0_10 = arith.constant 0 : index
    %c0_11 = arith.constant 0 : index
    %c0_12 = arith.constant 0 : index
    %13 = vector.load %arg4[%c0_9, %c0_10, %c0_11, %c0_12] : memref<1x16x16x128xbf16, #tpu.memory_space<vmem>>, vector<1x16x16x128xbf16>
    %14 = vector.shape_cast %13 : vector<1x16x16x128xbf16> to vector<16x16x128xbf16>
    %15 = vector.shape_cast %12 : vector<16x16x128xbf16> to vector<1x16x16x128xbf16>
    tpu.vector_store %arg4[%c0_9, %c0_10, %c0_11, %c0_12], %15 {strides = array<i32>} : memref<1x16x16x128xbf16, #tpu.memory_space<vmem>>, vector<1x16x16x128xbf16>,
    return
  }
  func.func @transform_0(%arg0: i32) -> (i32, i32, i32, i32) {
    %c0_i32 = arith.constant 0 : i32
    %c0_i32_0 = arith.constant 0 : i32
    %c0_i32_1 = arith.constant 0 : i32
    %c0_i32_2 = arith.constant 0 : i32
    return %arg0, %c0_i32, %c0_i32_0, %c0_i32_1 : i32, i32, i32, i32
  }
  func.func @transform_1(%arg0: i32) -> (i32, i32, i32) {
    %c0_i32 = arith.constant 0 : i32
    %c0_i32_0 = arith.constant 0 : i32
    %c0_i32_1 = arith.constant 0 : i32
    %c0_i32_2 = arith.constant 0 : i32
    return %c0_i32, %c0_i32_0, %c0_i32_1 : i32, i32, i32
  }
  func.func @transform_2(%arg0: i32) -> (i32, i32, i32) {
    %c0_i32 = arith.constant 0 : i32
    %c0_i32_0 = arith.constant 0 : i32
    %c0_i32_1 = arith.constant 0 : i32
    %c0_i32_2 = arith.constant 0 : i32
    return %c0_i32, %c0_i32_0, %c0_i32_1 : i32, i32, i32
  }
  func.func @transform_3(%arg0: i32) -> (i32, i32, i32, i32) {
    %c0_i32 = arith.constant 0 : i32
    %c0_i32_0 = arith.constant 0 : i32
    %c0_i32_1 = arith.constant 0 : i32
    %c0_i32_2 = arith.constant 0 : i32
    return %arg0, %c0_i32, %c0_i32_0, %c0_i32_1 : i32, i32, i32, i32
  }
}

module attributes {stable_mosaic.version = 11 : i64} {
  func.func @_matmul_kernel(%arg0: i32, %arg1: memref<128x128xbf16, #tpu.memory_space<vmem>>, %arg2: memref<128x128xbf16, #tpu.memory_space<vmem>>, %arg3: memref<128x128xbf16, #tpu.memory_space<vmem>>, %arg4: memref<1x2x128xf32, #tpu.memory_space<vmem>>) attributes {dimension_semantics = [#tpu.dimension_semantics<parallel>], iteration_bounds = array<i64: 1>, scalar_prefetch = 0 : i64, scratch_operands = 0 : i64, tpu.core_type = #tpu.core_type<tc>, window_params = [{transform_indices = @transform_0, window_bounds = array<i64: 128, 128>}, {pipeline_mode = #tpu.pipeline_mode<synchronous>, transform_indices = @transform_1, window_bounds = array<i64: 128, 128>}, {transform_indices = @transform_2, window_bounds = array<i64: 128, 128>}, {transform_indices = @transform_3, window_bounds = array<i64: 1, 2, 128>}]} {
    %c0 = arith.constant 0 : index
    %c0_0 = arith.constant 0 : index
    %0 = vector.load %arg1[%c0, %c0_0] : memref<128x128xbf16, #tpu.memory_space<vmem>>, vector<128x128xbf16>
    %c0_1 = arith.constant 0 : index
    %c0_2 = arith.constant 0 : index
    %1 = vector.load %arg2[%c0_1, %c0_2] : memref<128x128xbf16, #tpu.memory_space<vmem>>, vector<128x128xbf16>
    %cst = arith.constant dense<0.000000e+00> : vector<128x128xf32>
    %2 = tpu.matmul %0, %1, %cst {dimension_numbers = #tpu.dot_dimension_numbers<[1], [0], [0], [1], [0, 0, 1, 1], [], []>} : vector<128x128xbf16>, vector<128x128xbf16>, vector<128x128xf32> -> vector<128x128xf32>
    %3 = arith.truncf %2 : vector<128x128xf32> to vector<128x128xbf16>
    %c0_3 = arith.constant 0 : index
    %c0_4 = arith.constant 0 : index
    %4 = vector.load %arg3[%c0_3, %c0_4] : memref<128x128xbf16, #tpu.memory_space<vmem>>, vector<128x128xbf16>
    tpu.vector_store %arg3[%c0_3, %c0_4], %3 {strides = array<i32>} : memref<128x128xbf16, #tpu.memory_space<vmem>>, vector<128x128xbf16>,
    %cst_5 = arith.constant dense<0.000000e+00> : vector<128xf32>
    %5 = vector.multi_reduction <add>, %2, %cst_5 [0] : vector<128x128xf32> to vector<128xf32>
    %6 = vector.shape_cast %5 : vector<128xf32> to vector<1x128xf32>
    %7 = arith.mulf %2, %2 : vector<128x128xf32>
    %cst_6 = arith.constant dense<0.000000e+00> : vector<128xf32>
    %8 = vector.multi_reduction <add>, %7, %cst_6 [0] : vector<128x128xf32> to vector<128xf32>
    %9 = vector.shape_cast %8 : vector<128xf32> to vector<1x128xf32>
    %10 = tpu.iota {dimensions = array<i32: 0>} : vector<2x128xi32>
    %c0_i32 = arith.constant 0 : i32
    %11 = vector.broadcast %c0_i32 : i32 to vector<2x128xi32>
    %12 = arith.cmpi eq, %10, %11 : vector<2x128xi32>
    %13 = vector.shape_cast %6 : vector<1x128xf32> to vector<1x128xf32>
    %14 = vector.broadcast %13 : vector<1x128xf32> to vector<2x128xf32>
    %15 = vector.shape_cast %9 : vector<1x128xf32> to vector<1x128xf32>
    %16 = vector.broadcast %15 : vector<1x128xf32> to vector<2x128xf32>
    %17 = arith.select %12, %14, %16 : vector<2x128xi1>, vector<2x128xf32>
    %c0_7 = arith.constant 0 : index
    %c0_8 = arith.constant 0 : index
    %c0_9 = arith.constant 0 : index
    %18 = vector.load %arg4[%c0_7, %c0_8, %c0_9] : memref<1x2x128xf32, #tpu.memory_space<vmem>>, vector<1x2x128xf32>
    %19 = vector.shape_cast %18 : vector<1x2x128xf32> to vector<2x128xf32>
    %20 = vector.shape_cast %17 : vector<2x128xf32> to vector<1x2x128xf32>
    tpu.vector_store %arg4[%c0_7, %c0_8, %c0_9], %20 {strides = array<i32>} : memref<1x2x128xf32, #tpu.memory_space<vmem>>, vector<1x2x128xf32>,
    return
  }
  func.func @transform_0(%arg0: i32) -> (i32, i32) {
    %c0_i32 = arith.constant 0 : i32
    %c0_i32_0 = arith.constant 0 : i32
    return %arg0, %c0_i32 : i32, i32
  }
  func.func @transform_1(%arg0: i32) -> (i32, i32) {
    %c0_i32 = arith.constant 0 : i32
    %c0_i32_0 = arith.constant 0 : i32
    %c0_i32_1 = arith.constant 0 : i32
    return %c0_i32, %c0_i32_0 : i32, i32
  }
  func.func @transform_2(%arg0: i32) -> (i32, i32) {
    %c0_i32 = arith.constant 0 : i32
    %c0_i32_0 = arith.constant 0 : i32
    return %arg0, %c0_i32 : i32, i32
  }
  func.func @transform_3(%arg0: i32) -> (i32, i32, i32) {
    %c0_i32 = arith.constant 0 : i32
    %c0_i32_0 = arith.constant 0 : i32
    %c0_i32_1 = arith.constant 0 : i32
    return %arg0, %c0_i32, %c0_i32_0 : i32, i32, i32
  }
}

module attributes {stable_mosaic.version = 11 : i64} {
  func.func @_conv_tap_kernel(%arg0: i32, %arg1: memref<1x10x10x128xbf16, #tpu.memory_space<vmem>>, %arg2: memref<1x1x128xf32, #tpu.memory_space<vmem>>, %arg3: memref<1x1x128xf32, #tpu.memory_space<vmem>>, %arg4: memref<9x128x128xbf16, #tpu.memory_space<vmem>>, %arg5: memref<1x8x8x128xbf16, #tpu.memory_space<vmem>>, %arg6: memref<1x8x8x128xbf16, #tpu.memory_space<vmem>>, %arg7: memref<1x2x128xf32, #tpu.memory_space<vmem>>) attributes {dimension_semantics = [#tpu.dimension_semantics<parallel>], iteration_bounds = array<i64: 2>, scalar_prefetch = 0 : i64, scratch_operands = 0 : i64, tpu.core_type = #tpu.core_type<tc>, window_params = [{transform_indices = @transform_0, window_bounds = array<i64: 1, 10, 10, 128>}, {pipeline_mode = #tpu.pipeline_mode<synchronous>, transform_indices = @transform_1, window_bounds = array<i64: 1, 1, 128>}, {pipeline_mode = #tpu.pipeline_mode<synchronous>, transform_indices = @transform_2, window_bounds = array<i64: 1, 1, 128>}, {pipeline_mode = #tpu.pipeline_mode<synchronous>, transform_indices = @transform_3, window_bounds = array<i64: 9, 128, 128>}, {transform_indices = @transform_4, window_bounds = array<i64: 1, 8, 8, 128>}, {transform_indices = @transform_5, window_bounds = array<i64: 1, 8, 8, 128>}, {transform_indices = @transform_6, window_bounds = array<i64: 1, 2, 128>}]} {
    %c0 = arith.constant 0 : index
    %c0_0 = arith.constant 0 : index
    %c0_1 = arith.constant 0 : index
    %c0_2 = arith.constant 0 : index
    %0 = vector.load %arg1[%c0, %c0_0, %c0_1, %c0_2] : memref<1x10x10x128xbf16, #tpu.memory_space<vmem>>, vector<1x10x10x128xbf16>
    %1 = vector.shape_cast %0 : vector<1x10x10x128xbf16> to vector<10x10x128xbf16>
    %2 = arith.extf %1 : vector<10x10x128xbf16> to vector<10x10x128xf32>
    %c0_3 = arith.constant 0 : index
    %c0_4 = arith.constant 0 : index
    %c0_5 = arith.constant 0 : index
    %3 = vector.load %arg2[%c0_3, %c0_4, %c0_5] : memref<1x1x128xf32, #tpu.memory_space<vmem>>, vector<1x1x128xf32>
    %4 = vector.broadcast %3 : vector<1x1x128xf32> to vector<10x10x128xf32>
    %5 = arith.mulf %2, %4 : vector<10x10x128xf32>
    %c0_6 = arith.constant 0 : index
    %c0_7 = arith.constant 0 : index
    %c0_8 = arith.constant 0 : index
    %6 = vector.load %arg3[%c0_6, %c0_7, %c0_8] : memref<1x1x128xf32, #tpu.memory_space<vmem>>, vector<1x1x128xf32>
    %7 = vector.broadcast %6 : vector<1x1x128xf32> to vector<10x10x128xf32>
    %8 = arith.addf %5, %7 : vector<10x10x128xf32>
    %cst = arith.constant 1.000000e-01 : f32
    %9 = vector.broadcast %cst : f32 to vector<10x10x128xf32>
    %10 = arith.mulf %9, %8 : vector<10x10x128xf32>
    %11 = arith.maximumf %8, %10 : vector<10x10x128xf32>
    %12 = tpu.iota {dimensions = array<i32: 0>} : vector<10x10x128xi32>
    %13 = tpu.iota {dimensions = array<i32: 1>} : vector<10x10x128xi32>
    %c1_i32 = arith.constant 1 : i32
    %14 = vector.broadcast %c1_i32 : i32 to vector<10x10x128xi32>
    %15 = arith.cmpi sge, %12, %14 : vector<10x10x128xi32>
    %c9_i32 = arith.constant 9 : i32
    %16 = vector.broadcast %c9_i32 : i32 to vector<10x10x128xi32>
    %17 = arith.cmpi slt, %12, %16 : vector<10x10x128xi32>
    %18 = arith.andi %15, %17 : vector<10x10x128xi1>
    %c1_i32_9 = arith.constant 1 : i32
    %19 = vector.broadcast %c1_i32_9 : i32 to vector<10x10x128xi32>
    %20 = arith.cmpi sge, %13, %19 : vector<10x10x128xi32>
    %21 = arith.andi %18, %20 : vector<10x10x128xi1>
    %c9_i32_10 = arith.constant 9 : i32
    %22 = vector.broadcast %c9_i32_10 : i32 to vector<10x10x128xi32>
    %23 = arith.cmpi slt, %13, %22 : vector<10x10x128xi32>
    %24 = arith.andi %21, %23 : vector<10x10x128xi1>
    %cst_11 = arith.constant 0.000000e+00 : f32
    %25 = vector.broadcast %cst_11 : f32 to vector<10x10x128xf32>
    %26 = arith.select %24, %11, %25 : vector<10x10x128xi1>, vector<10x10x128xf32>
    %27 = arith.truncf %26 : vector<10x10x128xf32> to vector<10x10x128xbf16>
    %cst_12 = arith.constant 0.000000e+00 : f32
    %28 = vector.broadcast %cst_12 : f32 to vector<64x128xf32>
    %29 = vector.extract_strided_slice %27 {offsets = [0, 0, 0], sizes = [8, 8, 128], strides = [1, 1, 1]} : vector<10x10x128xbf16> to vector<8x8x128xbf16>
    %30 = vector.shape_cast %29 : vector<8x8x128xbf16> to vector<64x128xbf16>
    %c0_13 = arith.constant 0 : index
    %c0_14 = arith.constant 0 : index
    %c0_15 = arith.constant 0 : index
    %31 = vector.load %arg4[%c0_13, %c0_14, %c0_15] : memref<9x128x128xbf16, #tpu.memory_space<vmem>>, vector<1x128x128xbf16>
    %32 = vector.shape_cast %31 : vector<1x128x128xbf16> to vector<128x128xbf16>
    %cst_16 = arith.constant dense<0.000000e+00> : vector<64x128xf32>
    %33 = tpu.matmul %30, %32, %cst_16 {dimension_numbers = #tpu.dot_dimension_numbers<[1], [0], [0], [1], [0, 0, 1, 1], [], []>} : vector<64x128xbf16>, vector<128x128xbf16>, vector<64x128xf32> -> vector<64x128xf32>
    %34 = arith.addf %28, %33 : vector<64x128xf32>
    %35 = vector.extract_strided_slice %27 {offsets = [0, 1, 0], sizes = [8, 8, 128], strides = [1, 1, 1]} : vector<10x10x128xbf16> to vector<8x8x128xbf16>
    %36 = vector.shape_cast %35 : vector<8x8x128xbf16> to vector<64x128xbf16>
    %c1 = arith.constant 1 : index
    %c0_17 = arith.constant 0 : index
    %c0_18 = arith.constant 0 : index
    %37 = vector.load %arg4[%c1, %c0_17, %c0_18] : memref<9x128x128xbf16, #tpu.memory_space<vmem>>, vector<1x128x128xbf16>
    %38 = vector.shape_cast %37 : vector<1x128x128xbf16> to vector<128x128xbf16>
    %cst_19 = arith.constant dense<0.000000e+00> : vector<64x128xf32>
    %39 = tpu.matmul %36, %38, %cst_19 {dimension_numbers = #tpu.dot_dimension_numbers<[1], [0], [0], [1], [0, 0, 1, 1], [], []>} : vector<64x128xbf16>, vector<128x128xbf16>, vector<64x128xf32> -> vector<64x128xf32>
    %40 = arith.addf %34, %39 : vector<64x128xf32>
    %41 = vector.extract_strided_slice %27 {offsets = [0, 2, 0], sizes = [8, 8, 128], strides = [1, 1, 1]} : vector<10x10x128xbf16> to vector<8x8x128xbf16>
    %42 = vector.shape_cast %41 : vector<8x8x128xbf16> to vector<64x128xbf16>
    %c2 = arith.constant 2 : index
    %c0_20 = arith.constant 0 : index
    %c0_21 = arith.constant 0 : index
    %43 = vector.load %arg4[%c2, %c0_20, %c0_21] : memref<9x128x128xbf16, #tpu.memory_space<vmem>>, vector<1x128x128xbf16>
    %44 = vector.shape_cast %43 : vector<1x128x128xbf16> to vector<128x128xbf16>
    %cst_22 = arith.constant dense<0.000000e+00> : vector<64x128xf32>
    %45 = tpu.matmul %42, %44, %cst_22 {dimension_numbers = #tpu.dot_dimension_numbers<[1], [0], [0], [1], [0, 0, 1, 1], [], []>} : vector<64x128xbf16>, vector<128x128xbf16>, vector<64x128xf32> -> vector<64x128xf32>
    %46 = arith.addf %40, %45 : vector<64x128xf32>
    %47 = vector.extract_strided_slice %27 {offsets = [1, 0, 0], sizes = [8, 8, 128], strides = [1, 1, 1]} : vector<10x10x128xbf16> to vector<8x8x128xbf16>
    %48 = vector.shape_cast %47 : vector<8x8x128xbf16> to vector<64x128xbf16>
    %c3 = arith.constant 3 : index
    %c0_23 = arith.constant 0 : index
    %c0_24 = arith.constant 0 : index
    %49 = vector.load %arg4[%c3, %c0_23, %c0_24] : memref<9x128x128xbf16, #tpu.memory_space<vmem>>, vector<1x128x128xbf16>
    %50 = vector.shape_cast %49 : vector<1x128x128xbf16> to vector<128x128xbf16>
    %cst_25 = arith.constant dense<0.000000e+00> : vector<64x128xf32>
    %51 = tpu.matmul %48, %50, %cst_25 {dimension_numbers = #tpu.dot_dimension_numbers<[1], [0], [0], [1], [0, 0, 1, 1], [], []>} : vector<64x128xbf16>, vector<128x128xbf16>, vector<64x128xf32> -> vector<64x128xf32>
    %52 = arith.addf %46, %51 : vector<64x128xf32>
    %53 = vector.extract_strided_slice %27 {offsets = [1, 1, 0], sizes = [8, 8, 128], strides = [1, 1, 1]} : vector<10x10x128xbf16> to vector<8x8x128xbf16>
    %54 = vector.shape_cast %53 : vector<8x8x128xbf16> to vector<64x128xbf16>
    %c4 = arith.constant 4 : index
    %c0_26 = arith.constant 0 : index
    %c0_27 = arith.constant 0 : index
    %55 = vector.load %arg4[%c4, %c0_26, %c0_27] : memref<9x128x128xbf16, #tpu.memory_space<vmem>>, vector<1x128x128xbf16>
    %56 = vector.shape_cast %55 : vector<1x128x128xbf16> to vector<128x128xbf16>
    %cst_28 = arith.constant dense<0.000000e+00> : vector<64x128xf32>
    %57 = tpu.matmul %54, %56, %cst_28 {dimension_numbers = #tpu.dot_dimension_numbers<[1], [0], [0], [1], [0, 0, 1, 1], [], []>} : vector<64x128xbf16>, vector<128x128xbf16>, vector<64x128xf32> -> vector<64x128xf32>
    %58 = arith.addf %52, %57 : vector<64x128xf32>
    %59 = vector.extract_strided_slice %27 {offsets = [1, 2, 0], sizes = [8, 8, 128], strides = [1, 1, 1]} : vector<10x10x128xbf16> to vector<8x8x128xbf16>
    %60 = vector.shape_cast %59 : vector<8x8x128xbf16> to vector<64x128xbf16>
    %c5 = arith.constant 5 : index
    %c0_29 = arith.constant 0 : index
    %c0_30 = arith.constant 0 : index
    %61 = vector.load %arg4[%c5, %c0_29, %c0_30] : memref<9x128x128xbf16, #tpu.memory_space<vmem>>, vector<1x128x128xbf16>
    %62 = vector.shape_cast %61 : vector<1x128x128xbf16> to vector<128x128xbf16>
    %cst_31 = arith.constant dense<0.000000e+00> : vector<64x128xf32>
    %63 = tpu.matmul %60, %62, %cst_31 {dimension_numbers = #tpu.dot_dimension_numbers<[1], [0], [0], [1], [0, 0, 1, 1], [], []>} : vector<64x128xbf16>, vector<128x128xbf16>, vector<64x128xf32> -> vector<64x128xf32>
    %64 = arith.addf %58, %63 : vector<64x128xf32>
    %65 = vector.extract_strided_slice %27 {offsets = [2, 0, 0], sizes = [8, 8, 128], strides = [1, 1, 1]} : vector<10x10x128xbf16> to vector<8x8x128xbf16>
    %66 = vector.shape_cast %65 : vector<8x8x128xbf16> to vector<64x128xbf16>
    %c6 = arith.constant 6 : index
    %c0_32 = arith.constant 0 : index
    %c0_33 = arith.constant 0 : index
    %67 = vector.load %arg4[%c6, %c0_32, %c0_33] : memref<9x128x128xbf16, #tpu.memory_space<vmem>>, vector<1x128x128xbf16>
    %68 = vector.shape_cast %67 : vector<1x128x128xbf16> to vector<128x128xbf16>
    %cst_34 = arith.constant dense<0.000000e+00> : vector<64x128xf32>
    %69 = tpu.matmul %66, %68, %cst_34 {dimension_numbers = #tpu.dot_dimension_numbers<[1], [0], [0], [1], [0, 0, 1, 1], [], []>} : vector<64x128xbf16>, vector<128x128xbf16>, vector<64x128xf32> -> vector<64x128xf32>
    %70 = arith.addf %64, %69 : vector<64x128xf32>
    %71 = vector.extract_strided_slice %27 {offsets = [2, 1, 0], sizes = [8, 8, 128], strides = [1, 1, 1]} : vector<10x10x128xbf16> to vector<8x8x128xbf16>
    %72 = vector.shape_cast %71 : vector<8x8x128xbf16> to vector<64x128xbf16>
    %c7 = arith.constant 7 : index
    %c0_35 = arith.constant 0 : index
    %c0_36 = arith.constant 0 : index
    %73 = vector.load %arg4[%c7, %c0_35, %c0_36] : memref<9x128x128xbf16, #tpu.memory_space<vmem>>, vector<1x128x128xbf16>
    %74 = vector.shape_cast %73 : vector<1x128x128xbf16> to vector<128x128xbf16>
    %cst_37 = arith.constant dense<0.000000e+00> : vector<64x128xf32>
    %75 = tpu.matmul %72, %74, %cst_37 {dimension_numbers = #tpu.dot_dimension_numbers<[1], [0], [0], [1], [0, 0, 1, 1], [], []>} : vector<64x128xbf16>, vector<128x128xbf16>, vector<64x128xf32> -> vector<64x128xf32>
    %76 = arith.addf %70, %75 : vector<64x128xf32>
    %77 = vector.extract_strided_slice %27 {offsets = [2, 2, 0], sizes = [8, 8, 128], strides = [1, 1, 1]} : vector<10x10x128xbf16> to vector<8x8x128xbf16>
    %78 = vector.shape_cast %77 : vector<8x8x128xbf16> to vector<64x128xbf16>
    %c8 = arith.constant 8 : index
    %c0_38 = arith.constant 0 : index
    %c0_39 = arith.constant 0 : index
    %79 = vector.load %arg4[%c8, %c0_38, %c0_39] : memref<9x128x128xbf16, #tpu.memory_space<vmem>>, vector<1x128x128xbf16>
    %80 = vector.shape_cast %79 : vector<1x128x128xbf16> to vector<128x128xbf16>
    %cst_40 = arith.constant dense<0.000000e+00> : vector<64x128xf32>
    %81 = tpu.matmul %78, %80, %cst_40 {dimension_numbers = #tpu.dot_dimension_numbers<[1], [0], [0], [1], [0, 0, 1, 1], [], []>} : vector<64x128xbf16>, vector<128x128xbf16>, vector<64x128xf32> -> vector<64x128xf32>
    %82 = arith.addf %76, %81 : vector<64x128xf32>
    %c0_41 = arith.constant 0 : index
    %c0_42 = arith.constant 0 : index
    %c0_43 = arith.constant 0 : index
    %c0_44 = arith.constant 0 : index
    %83 = vector.load %arg5[%c0_41, %c0_42, %c0_43, %c0_44] : memref<1x8x8x128xbf16, #tpu.memory_space<vmem>>, vector<1x8x8x128xbf16>
    %84 = vector.shape_cast %83 : vector<1x8x8x128xbf16> to vector<8x8x128xbf16>
    %85 = vector.shape_cast %84 : vector<8x8x128xbf16> to vector<64x128xbf16>
    %86 = arith.extf %85 : vector<64x128xbf16> to vector<64x128xf32>
    %87 = arith.addf %82, %86 : vector<64x128xf32>
    %88 = vector.shape_cast %87 : vector<64x128xf32> to vector<8x8x128xf32>
    %89 = arith.truncf %88 : vector<8x8x128xf32> to vector<8x8x128xbf16>
    %c0_45 = arith.constant 0 : index
    %c0_46 = arith.constant 0 : index
    %c0_47 = arith.constant 0 : index
    %c0_48 = arith.constant 0 : index
    %90 = vector.load %arg6[%c0_45, %c0_46, %c0_47, %c0_48] : memref<1x8x8x128xbf16, #tpu.memory_space<vmem>>, vector<1x8x8x128xbf16>
    %91 = vector.shape_cast %90 : vector<1x8x8x128xbf16> to vector<8x8x128xbf16>
    %92 = vector.shape_cast %89 : vector<8x8x128xbf16> to vector<1x8x8x128xbf16>
    tpu.vector_store %arg6[%c0_45, %c0_46, %c0_47, %c0_48], %92 {strides = array<i32>} : memref<1x8x8x128xbf16, #tpu.memory_space<vmem>>, vector<1x8x8x128xbf16>,
    %cst_49 = arith.constant dense<0.000000e+00> : vector<128xf32>
    %93 = vector.multi_reduction <add>, %87, %cst_49 [0] : vector<64x128xf32> to vector<128xf32>
    %94 = vector.shape_cast %93 : vector<128xf32> to vector<1x128xf32>
    %95 = arith.mulf %87, %87 : vector<64x128xf32>
    %cst_50 = arith.constant dense<0.000000e+00> : vector<128xf32>
    %96 = vector.multi_reduction <add>, %95, %cst_50 [0] : vector<64x128xf32> to vector<128xf32>
    %97 = vector.shape_cast %96 : vector<128xf32> to vector<1x128xf32>
    %98 = tpu.iota {dimensions = array<i32: 0>} : vector<2x128xi32>
    %c0_i32 = arith.constant 0 : i32
    %99 = vector.broadcast %c0_i32 : i32 to vector<2x128xi32>
    %100 = arith.cmpi eq, %98, %99 : vector<2x128xi32>
    %101 = vector.shape_cast %94 : vector<1x128xf32> to vector<1x128xf32>
    %102 = vector.broadcast %101 : vector<1x128xf32> to vector<2x128xf32>
    %103 = vector.shape_cast %97 : vector<1x128xf32> to vector<1x128xf32>
    %104 = vector.broadcast %103 : vector<1x128xf32> to vector<2x128xf32>
    %105 = arith.select %100, %102, %104 : vector<2x128xi1>, vector<2x128xf32>
    %c0_51 = arith.constant 0 : index
    %c0_52 = arith.constant 0 : index
    %c0_53 = arith.constant 0 : index
    %106 = vector.load %arg7[%c0_51, %c0_52, %c0_53] : memref<1x2x128xf32, #tpu.memory_space<vmem>>, vector<1x2x128xf32>
    %107 = vector.shape_cast %106 : vector<1x2x128xf32> to vector<2x128xf32>
    %108 = vector.shape_cast %105 : vector<2x128xf32> to vector<1x2x128xf32>
    tpu.vector_store %arg7[%c0_51, %c0_52, %c0_53], %108 {strides = array<i32>} : memref<1x2x128xf32, #tpu.memory_space<vmem>>, vector<1x2x128xf32>,
    return
  }
  func.func @transform_0(%arg0: i32) -> (i32, i32, i32, i32) {
    %c0_i32 = arith.constant 0 : i32
    %c0_i32_0 = arith.constant 0 : i32
    %c0_i32_1 = arith.constant 0 : i32
    %c0_i32_2 = arith.constant 0 : i32
    return %arg0, %c0_i32, %c0_i32_0, %c0_i32_1 : i32, i32, i32, i32
  }
  func.func @transform_1(%arg0: i32) -> (i32, i32, i32) {
    %c0_i32 = arith.constant 0 : i32
    %c0_i32_0 = arith.constant 0 : i32
    %c0_i32_1 = arith.constant 0 : i32
    %c0_i32_2 = arith.constant 0 : i32
    return %c0_i32, %c0_i32_0, %c0_i32_1 : i32, i32, i32
  }
  func.func @transform_2(%arg0: i32) -> (i32, i32, i32) {
    %c0_i32 = arith.constant 0 : i32
    %c0_i32_0 = arith.constant 0 : i32
    %c0_i32_1 = arith.constant 0 : i32
    %c0_i32_2 = arith.constant 0 : i32
    return %c0_i32, %c0_i32_0, %c0_i32_1 : i32, i32, i32
  }
  func.func @transform_3(%arg0: i32) -> (i32, i32, i32) {
    %c0_i32 = arith.constant 0 : i32
    %c0_i32_0 = arith.constant 0 : i32
    %c0_i32_1 = arith.constant 0 : i32
    %c0_i32_2 = arith.constant 0 : i32
    return %c0_i32, %c0_i32_0, %c0_i32_1 : i32, i32, i32
  }
  func.func @transform_4(%arg0: i32) -> (i32, i32, i32, i32) {
    %c0_i32 = arith.constant 0 : i32
    %c0_i32_0 = arith.constant 0 : i32
    %c0_i32_1 = arith.constant 0 : i32
    %c0_i32_2 = arith.constant 0 : i32
    return %arg0, %c0_i32, %c0_i32_0, %c0_i32_1 : i32, i32, i32, i32
  }
  func.func @transform_5(%arg0: i32) -> (i32, i32, i32, i32) {
    %c0_i32 = arith.constant 0 : i32
    %c0_i32_0 = arith.constant 0 : i32
    %c0_i32_1 = arith.constant 0 : i32
    %c0_i32_2 = arith.constant 0 : i32
    return %arg0, %c0_i32, %c0_i32_0, %c0_i32_1 : i32, i32, i32, i32
  }
  func.func @transform_6(%arg0: i32) -> (i32, i32, i32) {
    %c0_i32 = arith.constant 0 : i32
    %c0_i32_0 = arith.constant 0 : i32
    %c0_i32_1 = arith.constant 0 : i32
    return %arg0, %c0_i32, %c0_i32_0 : i32, i32, i32
  }
}

module attributes {stable_mosaic.version = 11 : i64} {
  func.func @_matmul_kernel(%arg0: i32, %arg1: memref<128x1152xbf16, #tpu.memory_space<vmem>>, %arg2: memref<1152x128xbf16, #tpu.memory_space<vmem>>, %arg3: memref<128x128xbf16, #tpu.memory_space<vmem>>, %arg4: memref<1x2x128xf32, #tpu.memory_space<vmem>>) attributes {dimension_semantics = [#tpu.dimension_semantics<parallel>], iteration_bounds = array<i64: 1>, scalar_prefetch = 0 : i64, scratch_operands = 0 : i64, tpu.core_type = #tpu.core_type<tc>, window_params = [{transform_indices = @transform_0, window_bounds = array<i64: 128, 1152>}, {pipeline_mode = #tpu.pipeline_mode<synchronous>, transform_indices = @transform_1, window_bounds = array<i64: 1152, 128>}, {transform_indices = @transform_2, window_bounds = array<i64: 128, 128>}, {transform_indices = @transform_3, window_bounds = array<i64: 1, 2, 128>}]} {
    %c0 = arith.constant 0 : index
    %c0_0 = arith.constant 0 : index
    %0 = vector.load %arg1[%c0, %c0_0] : memref<128x1152xbf16, #tpu.memory_space<vmem>>, vector<128x1152xbf16>
    %c0_1 = arith.constant 0 : index
    %c0_2 = arith.constant 0 : index
    %1 = vector.load %arg2[%c0_1, %c0_2] : memref<1152x128xbf16, #tpu.memory_space<vmem>>, vector<1152x128xbf16>
    %cst = arith.constant dense<0.000000e+00> : vector<128x128xf32>
    %2 = tpu.matmul %0, %1, %cst {dimension_numbers = #tpu.dot_dimension_numbers<[1], [0], [0], [1], [0, 0, 1, 1], [], []>} : vector<128x1152xbf16>, vector<1152x128xbf16>, vector<128x128xf32> -> vector<128x128xf32>
    %3 = arith.truncf %2 : vector<128x128xf32> to vector<128x128xbf16>
    %c0_3 = arith.constant 0 : index
    %c0_4 = arith.constant 0 : index
    %4 = vector.load %arg3[%c0_3, %c0_4] : memref<128x128xbf16, #tpu.memory_space<vmem>>, vector<128x128xbf16>
    tpu.vector_store %arg3[%c0_3, %c0_4], %3 {strides = array<i32>} : memref<128x128xbf16, #tpu.memory_space<vmem>>, vector<128x128xbf16>,
    %cst_5 = arith.constant dense<0.000000e+00> : vector<128xf32>
    %5 = vector.multi_reduction <add>, %2, %cst_5 [0] : vector<128x128xf32> to vector<128xf32>
    %6 = vector.shape_cast %5 : vector<128xf32> to vector<1x128xf32>
    %7 = arith.mulf %2, %2 : vector<128x128xf32>
    %cst_6 = arith.constant dense<0.000000e+00> : vector<128xf32>
    %8 = vector.multi_reduction <add>, %7, %cst_6 [0] : vector<128x128xf32> to vector<128xf32>
    %9 = vector.shape_cast %8 : vector<128xf32> to vector<1x128xf32>
    %10 = tpu.iota {dimensions = array<i32: 0>} : vector<2x128xi32>
    %c0_i32 = arith.constant 0 : i32
    %11 = vector.broadcast %c0_i32 : i32 to vector<2x128xi32>
    %12 = arith.cmpi eq, %10, %11 : vector<2x128xi32>
    %13 = vector.shape_cast %6 : vector<1x128xf32> to vector<1x128xf32>
    %14 = vector.broadcast %13 : vector<1x128xf32> to vector<2x128xf32>
    %15 = vector.shape_cast %9 : vector<1x128xf32> to vector<1x128xf32>
    %16 = vector.broadcast %15 : vector<1x128xf32> to vector<2x128xf32>
    %17 = arith.select %12, %14, %16 : vector<2x128xi1>, vector<2x128xf32>
    %c0_7 = arith.constant 0 : index
    %c0_8 = arith.constant 0 : index
    %c0_9 = arith.constant 0 : index
    %18 = vector.load %arg4[%c0_7, %c0_8, %c0_9] : memref<1x2x128xf32, #tpu.memory_space<vmem>>, vector<1x2x128xf32>
    %19 = vector.shape_cast %18 : vector<1x2x128xf32> to vector<2x128xf32>
    %20 = vector.shape_cast %17 : vector<2x128xf32> to vector<1x2x128xf32>
    tpu.vector_store %arg4[%c0_7, %c0_8, %c0_9], %20 {strides = array<i32>} : memref<1x2x128xf32, #tpu.memory_space<vmem>>, vector<1x2x128xf32>,
    return
  }
  func.func @transform_0(%arg0: i32) -> (i32, i32) {
    %c0_i32 = arith.constant 0 : i32
    %c0_i32_0 = arith.constant 0 : i32
    return %arg0, %c0_i32 : i32, i32
  }
  func.func @transform_1(%arg0: i32) -> (i32, i32) {
    %c0_i32 = arith.constant 0 : i32
    %c0_i32_0 = arith.constant 0 : i32
    %c0_i32_1 = arith.constant 0 : i32
    return %c0_i32, %c0_i32_0 : i32, i32
  }
  func.func @transform_2(%arg0: i32) -> (i32, i32) {
    %c0_i32 = arith.constant 0 : i32
    %c0_i32_0 = arith.constant 0 : i32
    return %arg0, %c0_i32 : i32, i32
  }
  func.func @transform_3(%arg0: i32) -> (i32, i32, i32) {
    %c0_i32 = arith.constant 0 : i32
    %c0_i32_0 = arith.constant 0 : i32
    %c0_i32_1 = arith.constant 0 : i32
    return %arg0, %c0_i32, %c0_i32_0 : i32, i32, i32
  }
}

module attributes {stable_mosaic.version = 11 : i64} {
  func.func @_conv_tap_kernel(%arg0: i32, %arg1: memref<1x10x10x128xbf16, #tpu.memory_space<vmem>>, %arg2: memref<1x1x128xf32, #tpu.memory_space<vmem>>, %arg3: memref<1x1x128xf32, #tpu.memory_space<vmem>>, %arg4: memref<9x128x128xbf16, #tpu.memory_space<vmem>>, %arg5: memref<1x8x8x128xbf16, #tpu.memory_space<vmem>>, %arg6: memref<1x8x8x128xbf16, #tpu.memory_space<vmem>>, %arg7: memref<1x2x128xf32, #tpu.memory_space<vmem>>) attributes {dimension_semantics = [#tpu.dimension_semantics<parallel>], iteration_bounds = array<i64: 2>, scalar_prefetch = 0 : i64, scratch_operands = 0 : i64, tpu.core_type = #tpu.core_type<tc>, window_params = [{transform_indices = @transform_0, window_bounds = array<i64: 1, 10, 10, 128>}, {pipeline_mode = #tpu.pipeline_mode<synchronous>, transform_indices = @transform_1, window_bounds = array<i64: 1, 1, 128>}, {pipeline_mode = #tpu.pipeline_mode<synchronous>, transform_indices = @transform_2, window_bounds = array<i64: 1, 1, 128>}, {pipeline_mode = #tpu.pipeline_mode<synchronous>, transform_indices = @transform_3, window_bounds = array<i64: 9, 128, 128>}, {transform_indices = @transform_4, window_bounds = array<i64: 1, 8, 8, 128>}, {transform_indices = @transform_5, window_bounds = array<i64: 1, 8, 8, 128>}, {transform_indices = @transform_6, window_bounds = array<i64: 1, 2, 128>}]} {
    %c0 = arith.constant 0 : index
    %c0_0 = arith.constant 0 : index
    %c0_1 = arith.constant 0 : index
    %c0_2 = arith.constant 0 : index
    %0 = vector.load %arg1[%c0, %c0_0, %c0_1, %c0_2] : memref<1x10x10x128xbf16, #tpu.memory_space<vmem>>, vector<1x10x10x128xbf16>
    %1 = vector.shape_cast %0 : vector<1x10x10x128xbf16> to vector<10x10x128xbf16>
    %2 = arith.extf %1 : vector<10x10x128xbf16> to vector<10x10x128xf32>
    %c0_3 = arith.constant 0 : index
    %c0_4 = arith.constant 0 : index
    %c0_5 = arith.constant 0 : index
    %3 = vector.load %arg2[%c0_3, %c0_4, %c0_5] : memref<1x1x128xf32, #tpu.memory_space<vmem>>, vector<1x1x128xf32>
    %4 = vector.broadcast %3 : vector<1x1x128xf32> to vector<10x10x128xf32>
    %5 = arith.mulf %2, %4 : vector<10x10x128xf32>
    %c0_6 = arith.constant 0 : index
    %c0_7 = arith.constant 0 : index
    %c0_8 = arith.constant 0 : index
    %6 = vector.load %arg3[%c0_6, %c0_7, %c0_8] : memref<1x1x128xf32, #tpu.memory_space<vmem>>, vector<1x1x128xf32>
    %7 = vector.broadcast %6 : vector<1x1x128xf32> to vector<10x10x128xf32>
    %8 = arith.addf %5, %7 : vector<10x10x128xf32>
    %cst = arith.constant 1.000000e-01 : f32
    %9 = vector.broadcast %cst : f32 to vector<10x10x128xf32>
    %10 = arith.mulf %9, %8 : vector<10x10x128xf32>
    %11 = arith.maximumf %8, %10 : vector<10x10x128xf32>
    %12 = tpu.iota {dimensions = array<i32: 0>} : vector<10x10x128xi32>
    %13 = tpu.iota {dimensions = array<i32: 1>} : vector<10x10x128xi32>
    %c1_i32 = arith.constant 1 : i32
    %14 = vector.broadcast %c1_i32 : i32 to vector<10x10x128xi32>
    %15 = arith.cmpi sge, %12, %14 : vector<10x10x128xi32>
    %c9_i32 = arith.constant 9 : i32
    %16 = vector.broadcast %c9_i32 : i32 to vector<10x10x128xi32>
    %17 = arith.cmpi slt, %12, %16 : vector<10x10x128xi32>
    %18 = arith.andi %15, %17 : vector<10x10x128xi1>
    %c1_i32_9 = arith.constant 1 : i32
    %19 = vector.broadcast %c1_i32_9 : i32 to vector<10x10x128xi32>
    %20 = arith.cmpi sge, %13, %19 : vector<10x10x128xi32>
    %21 = arith.andi %18, %20 : vector<10x10x128xi1>
    %c9_i32_10 = arith.constant 9 : i32
    %22 = vector.broadcast %c9_i32_10 : i32 to vector<10x10x128xi32>
    %23 = arith.cmpi slt, %13, %22 : vector<10x10x128xi32>
    %24 = arith.andi %21, %23 : vector<10x10x128xi1>
    %cst_11 = arith.constant 0.000000e+00 : f32
    %25 = vector.broadcast %cst_11 : f32 to vector<10x10x128xf32>
    %26 = arith.select %24, %11, %25 : vector<10x10x128xi1>, vector<10x10x128xf32>
    %27 = arith.truncf %26 : vector<10x10x128xf32> to vector<10x10x128xbf16>
    %cst_12 = arith.constant 0.000000e+00 : f32
    %28 = vector.broadcast %cst_12 : f32 to vector<64x128xf32>
    %29 = vector.extract_strided_slice %27 {offsets = [0, 0, 0], sizes = [8, 8, 128], strides = [1, 1, 1]} : vector<10x10x128xbf16> to vector<8x8x128xbf16>
    %30 = vector.shape_cast %29 : vector<8x8x128xbf16> to vector<64x128xbf16>
    %c0_13 = arith.constant 0 : index
    %c0_14 = arith.constant 0 : index
    %c0_15 = arith.constant 0 : index
    %31 = vector.load %arg4[%c0_13, %c0_14, %c0_15] : memref<9x128x128xbf16, #tpu.memory_space<vmem>>, vector<1x128x128xbf16>
    %32 = vector.shape_cast %31 : vector<1x128x128xbf16> to vector<128x128xbf16>
    %cst_16 = arith.constant dense<0.000000e+00> : vector<64x128xf32>
    %33 = tpu.matmul %30, %32, %cst_16 {dimension_numbers = #tpu.dot_dimension_numbers<[1], [0], [0], [1], [0, 0, 1, 1], [], []>} : vector<64x128xbf16>, vector<128x128xbf16>, vector<64x128xf32> -> vector<64x128xf32>
    %34 = arith.addf %28, %33 : vector<64x128xf32>
    %35 = vector.extract_strided_slice %27 {offsets = [0, 1, 0], sizes = [8, 8, 128], strides = [1, 1, 1]} : vector<10x10x128xbf16> to vector<8x8x128xbf16>
    %36 = vector.shape_cast %35 : vector<8x8x128xbf16> to vector<64x128xbf16>
    %c1 = arith.constant 1 : index
    %c0_17 = arith.constant 0 : index
    %c0_18 = arith.constant 0 : index
    %37 = vector.load %arg4[%c1, %c0_17, %c0_18] : memref<9x128x128xbf16, #tpu.memory_space<vmem>>, vector<1x128x128xbf16>
    %38 = vector.shape_cast %37 : vector<1x128x128xbf16> to vector<128x128xbf16>
    %cst_19 = arith.constant dense<0.000000e+00> : vector<64x128xf32>
    %39 = tpu.matmul %36, %38, %cst_19 {dimension_numbers = #tpu.dot_dimension_numbers<[1], [0], [0], [1], [0, 0, 1, 1], [], []>} : vector<64x128xbf16>, vector<128x128xbf16>, vector<64x128xf32> -> vector<64x128xf32>
    %40 = arith.addf %34, %39 : vector<64x128xf32>
    %41 = vector.extract_strided_slice %27 {offsets = [0, 2, 0], sizes = [8, 8, 128], strides = [1, 1, 1]} : vector<10x10x128xbf16> to vector<8x8x128xbf16>
    %42 = vector.shape_cast %41 : vector<8x8x128xbf16> to vector<64x128xbf16>
    %c2 = arith.constant 2 : index
    %c0_20 = arith.constant 0 : index
    %c0_21 = arith.constant 0 : index
    %43 = vector.load %arg4[%c2, %c0_20, %c0_21] : memref<9x128x128xbf16, #tpu.memory_space<vmem>>, vector<1x128x128xbf16>
    %44 = vector.shape_cast %43 : vector<1x128x128xbf16> to vector<128x128xbf16>
    %cst_22 = arith.constant dense<0.000000e+00> : vector<64x128xf32>
    %45 = tpu.matmul %42, %44, %cst_22 {dimension_numbers = #tpu.dot_dimension_numbers<[1], [0], [0], [1], [0, 0, 1, 1], [], []>} : vector<64x128xbf16>, vector<128x128xbf16>, vector<64x128xf32> -> vector<64x128xf32>
    %46 = arith.addf %40, %45 : vector<64x128xf32>
    %47 = vector.extract_strided_slice %27 {offsets = [1, 0, 0], sizes = [8, 8, 128], strides = [1, 1, 1]} : vector<10x10x128xbf16> to vector<8x8x128xbf16>
    %48 = vector.shape_cast %47 : vector<8x8x128xbf16> to vector<64x128xbf16>
    %c3 = arith.constant 3 : index
    %c0_23 = arith.constant 0 : index
    %c0_24 = arith.constant 0 : index
    %49 = vector.load %arg4[%c3, %c0_23, %c0_24] : memref<9x128x128xbf16, #tpu.memory_space<vmem>>, vector<1x128x128xbf16>
    %50 = vector.shape_cast %49 : vector<1x128x128xbf16> to vector<128x128xbf16>
    %cst_25 = arith.constant dense<0.000000e+00> : vector<64x128xf32>
    %51 = tpu.matmul %48, %50, %cst_25 {dimension_numbers = #tpu.dot_dimension_numbers<[1], [0], [0], [1], [0, 0, 1, 1], [], []>} : vector<64x128xbf16>, vector<128x128xbf16>, vector<64x128xf32> -> vector<64x128xf32>
    %52 = arith.addf %46, %51 : vector<64x128xf32>
    %53 = vector.extract_strided_slice %27 {offsets = [1, 1, 0], sizes = [8, 8, 128], strides = [1, 1, 1]} : vector<10x10x128xbf16> to vector<8x8x128xbf16>
    %54 = vector.shape_cast %53 : vector<8x8x128xbf16> to vector<64x128xbf16>
    %c4 = arith.constant 4 : index
    %c0_26 = arith.constant 0 : index
    %c0_27 = arith.constant 0 : index
    %55 = vector.load %arg4[%c4, %c0_26, %c0_27] : memref<9x128x128xbf16, #tpu.memory_space<vmem>>, vector<1x128x128xbf16>
    %56 = vector.shape_cast %55 : vector<1x128x128xbf16> to vector<128x128xbf16>
    %cst_28 = arith.constant dense<0.000000e+00> : vector<64x128xf32>
    %57 = tpu.matmul %54, %56, %cst_28 {dimension_numbers = #tpu.dot_dimension_numbers<[1], [0], [0], [1], [0, 0, 1, 1], [], []>} : vector<64x128xbf16>, vector<128x128xbf16>, vector<64x128xf32> -> vector<64x128xf32>
    %58 = arith.addf %52, %57 : vector<64x128xf32>
    %59 = vector.extract_strided_slice %27 {offsets = [1, 2, 0], sizes = [8, 8, 128], strides = [1, 1, 1]} : vector<10x10x128xbf16> to vector<8x8x128xbf16>
    %60 = vector.shape_cast %59 : vector<8x8x128xbf16> to vector<64x128xbf16>
    %c5 = arith.constant 5 : index
    %c0_29 = arith.constant 0 : index
    %c0_30 = arith.constant 0 : index
    %61 = vector.load %arg4[%c5, %c0_29, %c0_30] : memref<9x128x128xbf16, #tpu.memory_space<vmem>>, vector<1x128x128xbf16>
    %62 = vector.shape_cast %61 : vector<1x128x128xbf16> to vector<128x128xbf16>
    %cst_31 = arith.constant dense<0.000000e+00> : vector<64x128xf32>
    %63 = tpu.matmul %60, %62, %cst_31 {dimension_numbers = #tpu.dot_dimension_numbers<[1], [0], [0], [1], [0, 0, 1, 1], [], []>} : vector<64x128xbf16>, vector<128x128xbf16>, vector<64x128xf32> -> vector<64x128xf32>
    %64 = arith.addf %58, %63 : vector<64x128xf32>
    %65 = vector.extract_strided_slice %27 {offsets = [2, 0, 0], sizes = [8, 8, 128], strides = [1, 1, 1]} : vector<10x10x128xbf16> to vector<8x8x128xbf16>
    %66 = vector.shape_cast %65 : vector<8x8x128xbf16> to vector<64x128xbf16>
    %c6 = arith.constant 6 : index
    %c0_32 = arith.constant 0 : index
    %c0_33 = arith.constant 0 : index
    %67 = vector.load %arg4[%c6, %c0_32, %c0_33] : memref<9x128x128xbf16, #tpu.memory_space<vmem>>, vector<1x128x128xbf16>
    %68 = vector.shape_cast %67 : vector<1x128x128xbf16> to vector<128x128xbf16>
    %cst_34 = arith.constant dense<0.000000e+00> : vector<64x128xf32>
    %69 = tpu.matmul %66, %68, %cst_34 {dimension_numbers = #tpu.dot_dimension_numbers<[1], [0], [0], [1], [0, 0, 1, 1], [], []>} : vector<64x128xbf16>, vector<128x128xbf16>, vector<64x128xf32> -> vector<64x128xf32>
    %70 = arith.addf %64, %69 : vector<64x128xf32>
    %71 = vector.extract_strided_slice %27 {offsets = [2, 1, 0], sizes = [8, 8, 128], strides = [1, 1, 1]} : vector<10x10x128xbf16> to vector<8x8x128xbf16>
    %72 = vector.shape_cast %71 : vector<8x8x128xbf16> to vector<64x128xbf16>
    %c7 = arith.constant 7 : index
    %c0_35 = arith.constant 0 : index
    %c0_36 = arith.constant 0 : index
    %73 = vector.load %arg4[%c7, %c0_35, %c0_36] : memref<9x128x128xbf16, #tpu.memory_space<vmem>>, vector<1x128x128xbf16>
    %74 = vector.shape_cast %73 : vector<1x128x128xbf16> to vector<128x128xbf16>
    %cst_37 = arith.constant dense<0.000000e+00> : vector<64x128xf32>
    %75 = tpu.matmul %72, %74, %cst_37 {dimension_numbers = #tpu.dot_dimension_numbers<[1], [0], [0], [1], [0, 0, 1, 1], [], []>} : vector<64x128xbf16>, vector<128x128xbf16>, vector<64x128xf32> -> vector<64x128xf32>
    %76 = arith.addf %70, %75 : vector<64x128xf32>
    %77 = vector.extract_strided_slice %27 {offsets = [2, 2, 0], sizes = [8, 8, 128], strides = [1, 1, 1]} : vector<10x10x128xbf16> to vector<8x8x128xbf16>
    %78 = vector.shape_cast %77 : vector<8x8x128xbf16> to vector<64x128xbf16>
    %c8 = arith.constant 8 : index
    %c0_38 = arith.constant 0 : index
    %c0_39 = arith.constant 0 : index
    %79 = vector.load %arg4[%c8, %c0_38, %c0_39] : memref<9x128x128xbf16, #tpu.memory_space<vmem>>, vector<1x128x128xbf16>
    %80 = vector.shape_cast %79 : vector<1x128x128xbf16> to vector<128x128xbf16>
    %cst_40 = arith.constant dense<0.000000e+00> : vector<64x128xf32>
    %81 = tpu.matmul %78, %80, %cst_40 {dimension_numbers = #tpu.dot_dimension_numbers<[1], [0], [0], [1], [0, 0, 1, 1], [], []>} : vector<64x128xbf16>, vector<128x128xbf16>, vector<64x128xf32> -> vector<64x128xf32>
    %82 = arith.addf %76, %81 : vector<64x128xf32>
    %c0_41 = arith.constant 0 : index
    %c0_42 = arith.constant 0 : index
    %c0_43 = arith.constant 0 : index
    %c0_44 = arith.constant 0 : index
    %83 = vector.load %arg5[%c0_41, %c0_42, %c0_43, %c0_44] : memref<1x8x8x128xbf16, #tpu.memory_space<vmem>>, vector<1x8x8x128xbf16>
    %84 = vector.shape_cast %83 : vector<1x8x8x128xbf16> to vector<8x8x128xbf16>
    %85 = vector.shape_cast %84 : vector<8x8x128xbf16> to vector<64x128xbf16>
    %86 = arith.extf %85 : vector<64x128xbf16> to vector<64x128xf32>
    %87 = arith.addf %82, %86 : vector<64x128xf32>
    %88 = vector.shape_cast %87 : vector<64x128xf32> to vector<8x8x128xf32>
    %89 = arith.truncf %88 : vector<8x8x128xf32> to vector<8x8x128xbf16>
    %c0_45 = arith.constant 0 : index
    %c0_46 = arith.constant 0 : index
    %c0_47 = arith.constant 0 : index
    %c0_48 = arith.constant 0 : index
    %90 = vector.load %arg6[%c0_45, %c0_46, %c0_47, %c0_48] : memref<1x8x8x128xbf16, #tpu.memory_space<vmem>>, vector<1x8x8x128xbf16>
    %91 = vector.shape_cast %90 : vector<1x8x8x128xbf16> to vector<8x8x128xbf16>
    %92 = vector.shape_cast %89 : vector<8x8x128xbf16> to vector<1x8x8x128xbf16>
    tpu.vector_store %arg6[%c0_45, %c0_46, %c0_47, %c0_48], %92 {strides = array<i32>} : memref<1x8x8x128xbf16, #tpu.memory_space<vmem>>, vector<1x8x8x128xbf16>,
    %cst_49 = arith.constant dense<0.000000e+00> : vector<128xf32>
    %93 = vector.multi_reduction <add>, %87, %cst_49 [0] : vector<64x128xf32> to vector<128xf32>
    %94 = vector.shape_cast %93 : vector<128xf32> to vector<1x128xf32>
    %95 = arith.mulf %87, %87 : vector<64x128xf32>
    %cst_50 = arith.constant dense<0.000000e+00> : vector<128xf32>
    %96 = vector.multi_reduction <add>, %95, %cst_50 [0] : vector<64x128xf32> to vector<128xf32>
    %97 = vector.shape_cast %96 : vector<128xf32> to vector<1x128xf32>
    %98 = tpu.iota {dimensions = array<i32: 0>} : vector<2x128xi32>
    %c0_i32 = arith.constant 0 : i32
    %99 = vector.broadcast %c0_i32 : i32 to vector<2x128xi32>
    %100 = arith.cmpi eq, %98, %99 : vector<2x128xi32>
    %101 = vector.shape_cast %94 : vector<1x128xf32> to vector<1x128xf32>
    %102 = vector.broadcast %101 : vector<1x128xf32> to vector<2x128xf32>
    %103 = vector.shape_cast %97 : vector<1x128xf32> to vector<1x128xf32>
    %104 = vector.broadcast %103 : vector<1x128xf32> to vector<2x128xf32>
    %105 = arith.select %100, %102, %104 : vector<2x128xi1>, vector<2x128xf32>
    %c0_51 = arith.constant 0 : index
    %c0_52 = arith.constant 0 : index
    %c0_53 = arith.constant 0 : index
    %106 = vector.load %arg7[%c0_51, %c0_52, %c0_53] : memref<1x2x128xf32, #tpu.memory_space<vmem>>, vector<1x2x128xf32>
    %107 = vector.shape_cast %106 : vector<1x2x128xf32> to vector<2x128xf32>
    %108 = vector.shape_cast %105 : vector<2x128xf32> to vector<1x2x128xf32>
    tpu.vector_store %arg7[%c0_51, %c0_52, %c0_53], %108 {strides = array<i32>} : memref<1x2x128xf32, #tpu.memory_space<vmem>>, vector<1x2x128xf32>,
    return
  }
  func.func @transform_0(%arg0: i32) -> (i32, i32, i32, i32) {
    %c0_i32 = arith.constant 0 : i32
    %c0_i32_0 = arith.constant 0 : i32
    %c0_i32_1 = arith.constant 0 : i32
    %c0_i32_2 = arith.constant 0 : i32
    return %arg0, %c0_i32, %c0_i32_0, %c0_i32_1 : i32, i32, i32, i32
  }
  func.func @transform_1(%arg0: i32) -> (i32, i32, i32) {
    %c0_i32 = arith.constant 0 : i32
    %c0_i32_0 = arith.constant 0 : i32
    %c0_i32_1 = arith.constant 0 : i32
    %c0_i32_2 = arith.constant 0 : i32
    return %c0_i32, %c0_i32_0, %c0_i32_1 : i32, i32, i32
  }
  func.func @transform_2(%arg0: i32) -> (i32, i32, i32) {
    %c0_i32 = arith.constant 0 : i32
    %c0_i32_0 = arith.constant 0 : i32
    %c0_i32_1 = arith.constant 0 : i32
    %c0_i32_2 = arith.constant 0 : i32
    return %c0_i32, %c0_i32_0, %c0_i32_1 : i32, i32, i32
  }
  func.func @transform_3(%arg0: i32) -> (i32, i32, i32) {
    %c0_i32 = arith.constant 0 : i32
    %c0_i32_0 = arith.constant 0 : i32
    %c0_i32_1 = arith.constant 0 : i32
    %c0_i32_2 = arith.constant 0 : i32
    return %c0_i32, %c0_i32_0, %c0_i32_1 : i32, i32, i32
  }
  func.func @transform_4(%arg0: i32) -> (i32, i32, i32, i32) {
    %c0_i32 = arith.constant 0 : i32
    %c0_i32_0 = arith.constant 0 : i32
    %c0_i32_1 = arith.constant 0 : i32
    %c0_i32_2 = arith.constant 0 : i32
    return %arg0, %c0_i32, %c0_i32_0, %c0_i32_1 : i32, i32, i32, i32
  }
  func.func @transform_5(%arg0: i32) -> (i32, i32, i32, i32) {
    %c0_i32 = arith.constant 0 : i32
    %c0_i32_0 = arith.constant 0 : i32
    %c0_i32_1 = arith.constant 0 : i32
    %c0_i32_2 = arith.constant 0 : i32
    return %arg0, %c0_i32, %c0_i32_0, %c0_i32_1 : i32, i32, i32, i32
  }
  func.func @transform_6(%arg0: i32) -> (i32, i32, i32) {
    %c0_i32 = arith.constant 0 : i32
    %c0_i32_0 = arith.constant 0 : i32
    %c0_i32_1 = arith.constant 0 : i32
    return %arg0, %c0_i32, %c0_i32_0 : i32, i32, i32
  }
}

module attributes {stable_mosaic.version = 11 : i64} {
  func.func @_conv_tap_kernel(%arg0: i32, %arg1: memref<1x10x10x128xbf16, #tpu.memory_space<vmem>>, %arg2: memref<1x1x128xf32, #tpu.memory_space<vmem>>, %arg3: memref<1x1x128xf32, #tpu.memory_space<vmem>>, %arg4: memref<9x128x128xbf16, #tpu.memory_space<vmem>>, %arg5: memref<1x8x8x128xbf16, #tpu.memory_space<vmem>>, %arg6: memref<1x2x128xf32, #tpu.memory_space<vmem>>) attributes {dimension_semantics = [#tpu.dimension_semantics<parallel>], iteration_bounds = array<i64: 2>, scalar_prefetch = 0 : i64, scratch_operands = 0 : i64, tpu.core_type = #tpu.core_type<tc>, window_params = [{transform_indices = @transform_0, window_bounds = array<i64: 1, 10, 10, 128>}, {pipeline_mode = #tpu.pipeline_mode<synchronous>, transform_indices = @transform_1, window_bounds = array<i64: 1, 1, 128>}, {pipeline_mode = #tpu.pipeline_mode<synchronous>, transform_indices = @transform_2, window_bounds = array<i64: 1, 1, 128>}, {pipeline_mode = #tpu.pipeline_mode<synchronous>, transform_indices = @transform_3, window_bounds = array<i64: 9, 128, 128>}, {transform_indices = @transform_4, window_bounds = array<i64: 1, 8, 8, 128>}, {transform_indices = @transform_5, window_bounds = array<i64: 1, 2, 128>}]} {
    %c0 = arith.constant 0 : index
    %c0_0 = arith.constant 0 : index
    %c0_1 = arith.constant 0 : index
    %c0_2 = arith.constant 0 : index
    %0 = vector.load %arg1[%c0, %c0_0, %c0_1, %c0_2] : memref<1x10x10x128xbf16, #tpu.memory_space<vmem>>, vector<1x10x10x128xbf16>
    %1 = vector.shape_cast %0 : vector<1x10x10x128xbf16> to vector<10x10x128xbf16>
    %2 = arith.extf %1 : vector<10x10x128xbf16> to vector<10x10x128xf32>
    %c0_3 = arith.constant 0 : index
    %c0_4 = arith.constant 0 : index
    %c0_5 = arith.constant 0 : index
    %3 = vector.load %arg2[%c0_3, %c0_4, %c0_5] : memref<1x1x128xf32, #tpu.memory_space<vmem>>, vector<1x1x128xf32>
    %4 = vector.broadcast %3 : vector<1x1x128xf32> to vector<10x10x128xf32>
    %5 = arith.mulf %2, %4 : vector<10x10x128xf32>
    %c0_6 = arith.constant 0 : index
    %c0_7 = arith.constant 0 : index
    %c0_8 = arith.constant 0 : index
    %6 = vector.load %arg3[%c0_6, %c0_7, %c0_8] : memref<1x1x128xf32, #tpu.memory_space<vmem>>, vector<1x1x128xf32>
    %7 = vector.broadcast %6 : vector<1x1x128xf32> to vector<10x10x128xf32>
    %8 = arith.addf %5, %7 : vector<10x10x128xf32>
    %cst = arith.constant 1.000000e-01 : f32
    %9 = vector.broadcast %cst : f32 to vector<10x10x128xf32>
    %10 = arith.mulf %9, %8 : vector<10x10x128xf32>
    %11 = arith.maximumf %8, %10 : vector<10x10x128xf32>
    %12 = tpu.iota {dimensions = array<i32: 0>} : vector<10x10x128xi32>
    %13 = tpu.iota {dimensions = array<i32: 1>} : vector<10x10x128xi32>
    %c1_i32 = arith.constant 1 : i32
    %14 = vector.broadcast %c1_i32 : i32 to vector<10x10x128xi32>
    %15 = arith.cmpi sge, %12, %14 : vector<10x10x128xi32>
    %c9_i32 = arith.constant 9 : i32
    %16 = vector.broadcast %c9_i32 : i32 to vector<10x10x128xi32>
    %17 = arith.cmpi slt, %12, %16 : vector<10x10x128xi32>
    %18 = arith.andi %15, %17 : vector<10x10x128xi1>
    %c1_i32_9 = arith.constant 1 : i32
    %19 = vector.broadcast %c1_i32_9 : i32 to vector<10x10x128xi32>
    %20 = arith.cmpi sge, %13, %19 : vector<10x10x128xi32>
    %21 = arith.andi %18, %20 : vector<10x10x128xi1>
    %c9_i32_10 = arith.constant 9 : i32
    %22 = vector.broadcast %c9_i32_10 : i32 to vector<10x10x128xi32>
    %23 = arith.cmpi slt, %13, %22 : vector<10x10x128xi32>
    %24 = arith.andi %21, %23 : vector<10x10x128xi1>
    %cst_11 = arith.constant 0.000000e+00 : f32
    %25 = vector.broadcast %cst_11 : f32 to vector<10x10x128xf32>
    %26 = arith.select %24, %11, %25 : vector<10x10x128xi1>, vector<10x10x128xf32>
    %27 = arith.truncf %26 : vector<10x10x128xf32> to vector<10x10x128xbf16>
    %cst_12 = arith.constant 0.000000e+00 : f32
    %28 = vector.broadcast %cst_12 : f32 to vector<64x128xf32>
    %29 = vector.extract_strided_slice %27 {offsets = [0, 0, 0], sizes = [8, 8, 128], strides = [1, 1, 1]} : vector<10x10x128xbf16> to vector<8x8x128xbf16>
    %30 = vector.shape_cast %29 : vector<8x8x128xbf16> to vector<64x128xbf16>
    %c0_13 = arith.constant 0 : index
    %c0_14 = arith.constant 0 : index
    %c0_15 = arith.constant 0 : index
    %31 = vector.load %arg4[%c0_13, %c0_14, %c0_15] : memref<9x128x128xbf16, #tpu.memory_space<vmem>>, vector<1x128x128xbf16>
    %32 = vector.shape_cast %31 : vector<1x128x128xbf16> to vector<128x128xbf16>
    %cst_16 = arith.constant dense<0.000000e+00> : vector<64x128xf32>
    %33 = tpu.matmul %30, %32, %cst_16 {dimension_numbers = #tpu.dot_dimension_numbers<[1], [0], [0], [1], [0, 0, 1, 1], [], []>} : vector<64x128xbf16>, vector<128x128xbf16>, vector<64x128xf32> -> vector<64x128xf32>
    %34 = arith.addf %28, %33 : vector<64x128xf32>
    %35 = vector.extract_strided_slice %27 {offsets = [0, 1, 0], sizes = [8, 8, 128], strides = [1, 1, 1]} : vector<10x10x128xbf16> to vector<8x8x128xbf16>
    %36 = vector.shape_cast %35 : vector<8x8x128xbf16> to vector<64x128xbf16>
    %c1 = arith.constant 1 : index
    %c0_17 = arith.constant 0 : index
    %c0_18 = arith.constant 0 : index
    %37 = vector.load %arg4[%c1, %c0_17, %c0_18] : memref<9x128x128xbf16, #tpu.memory_space<vmem>>, vector<1x128x128xbf16>
    %38 = vector.shape_cast %37 : vector<1x128x128xbf16> to vector<128x128xbf16>
    %cst_19 = arith.constant dense<0.000000e+00> : vector<64x128xf32>
    %39 = tpu.matmul %36, %38, %cst_19 {dimension_numbers = #tpu.dot_dimension_numbers<[1], [0], [0], [1], [0, 0, 1, 1], [], []>} : vector<64x128xbf16>, vector<128x128xbf16>, vector<64x128xf32> -> vector<64x128xf32>
    %40 = arith.addf %34, %39 : vector<64x128xf32>
    %41 = vector.extract_strided_slice %27 {offsets = [0, 2, 0], sizes = [8, 8, 128], strides = [1, 1, 1]} : vector<10x10x128xbf16> to vector<8x8x128xbf16>
    %42 = vector.shape_cast %41 : vector<8x8x128xbf16> to vector<64x128xbf16>
    %c2 = arith.constant 2 : index
    %c0_20 = arith.constant 0 : index
    %c0_21 = arith.constant 0 : index
    %43 = vector.load %arg4[%c2, %c0_20, %c0_21] : memref<9x128x128xbf16, #tpu.memory_space<vmem>>, vector<1x128x128xbf16>
    %44 = vector.shape_cast %43 : vector<1x128x128xbf16> to vector<128x128xbf16>
    %cst_22 = arith.constant dense<0.000000e+00> : vector<64x128xf32>
    %45 = tpu.matmul %42, %44, %cst_22 {dimension_numbers = #tpu.dot_dimension_numbers<[1], [0], [0], [1], [0, 0, 1, 1], [], []>} : vector<64x128xbf16>, vector<128x128xbf16>, vector<64x128xf32> -> vector<64x128xf32>
    %46 = arith.addf %40, %45 : vector<64x128xf32>
    %47 = vector.extract_strided_slice %27 {offsets = [1, 0, 0], sizes = [8, 8, 128], strides = [1, 1, 1]} : vector<10x10x128xbf16> to vector<8x8x128xbf16>
    %48 = vector.shape_cast %47 : vector<8x8x128xbf16> to vector<64x128xbf16>
    %c3 = arith.constant 3 : index
    %c0_23 = arith.constant 0 : index
    %c0_24 = arith.constant 0 : index
    %49 = vector.load %arg4[%c3, %c0_23, %c0_24] : memref<9x128x128xbf16, #tpu.memory_space<vmem>>, vector<1x128x128xbf16>
    %50 = vector.shape_cast %49 : vector<1x128x128xbf16> to vector<128x128xbf16>
    %cst_25 = arith.constant dense<0.000000e+00> : vector<64x128xf32>
    %51 = tpu.matmul %48, %50, %cst_25 {dimension_numbers = #tpu.dot_dimension_numbers<[1], [0], [0], [1], [0, 0, 1, 1], [], []>} : vector<64x128xbf16>, vector<128x128xbf16>, vector<64x128xf32> -> vector<64x128xf32>
    %52 = arith.addf %46, %51 : vector<64x128xf32>
    %53 = vector.extract_strided_slice %27 {offsets = [1, 1, 0], sizes = [8, 8, 128], strides = [1, 1, 1]} : vector<10x10x128xbf16> to vector<8x8x128xbf16>
    %54 = vector.shape_cast %53 : vector<8x8x128xbf16> to vector<64x128xbf16>
    %c4 = arith.constant 4 : index
    %c0_26 = arith.constant 0 : index
    %c0_27 = arith.constant 0 : index
    %55 = vector.load %arg4[%c4, %c0_26, %c0_27] : memref<9x128x128xbf16, #tpu.memory_space<vmem>>, vector<1x128x128xbf16>
    %56 = vector.shape_cast %55 : vector<1x128x128xbf16> to vector<128x128xbf16>
    %cst_28 = arith.constant dense<0.000000e+00> : vector<64x128xf32>
    %57 = tpu.matmul %54, %56, %cst_28 {dimension_numbers = #tpu.dot_dimension_numbers<[1], [0], [0], [1], [0, 0, 1, 1], [], []>} : vector<64x128xbf16>, vector<128x128xbf16>, vector<64x128xf32> -> vector<64x128xf32>
    %58 = arith.addf %52, %57 : vector<64x128xf32>
    %59 = vector.extract_strided_slice %27 {offsets = [1, 2, 0], sizes = [8, 8, 128], strides = [1, 1, 1]} : vector<10x10x128xbf16> to vector<8x8x128xbf16>
    %60 = vector.shape_cast %59 : vector<8x8x128xbf16> to vector<64x128xbf16>
    %c5 = arith.constant 5 : index
    %c0_29 = arith.constant 0 : index
    %c0_30 = arith.constant 0 : index
    %61 = vector.load %arg4[%c5, %c0_29, %c0_30] : memref<9x128x128xbf16, #tpu.memory_space<vmem>>, vector<1x128x128xbf16>
    %62 = vector.shape_cast %61 : vector<1x128x128xbf16> to vector<128x128xbf16>
    %cst_31 = arith.constant dense<0.000000e+00> : vector<64x128xf32>
    %63 = tpu.matmul %60, %62, %cst_31 {dimension_numbers = #tpu.dot_dimension_numbers<[1], [0], [0], [1], [0, 0, 1, 1], [], []>} : vector<64x128xbf16>, vector<128x128xbf16>, vector<64x128xf32> -> vector<64x128xf32>
    %64 = arith.addf %58, %63 : vector<64x128xf32>
    %65 = vector.extract_strided_slice %27 {offsets = [2, 0, 0], sizes = [8, 8, 128], strides = [1, 1, 1]} : vector<10x10x128xbf16> to vector<8x8x128xbf16>
    %66 = vector.shape_cast %65 : vector<8x8x128xbf16> to vector<64x128xbf16>
    %c6 = arith.constant 6 : index
    %c0_32 = arith.constant 0 : index
    %c0_33 = arith.constant 0 : index
    %67 = vector.load %arg4[%c6, %c0_32, %c0_33] : memref<9x128x128xbf16, #tpu.memory_space<vmem>>, vector<1x128x128xbf16>
    %68 = vector.shape_cast %67 : vector<1x128x128xbf16> to vector<128x128xbf16>
    %cst_34 = arith.constant dense<0.000000e+00> : vector<64x128xf32>
    %69 = tpu.matmul %66, %68, %cst_34 {dimension_numbers = #tpu.dot_dimension_numbers<[1], [0], [0], [1], [0, 0, 1, 1], [], []>} : vector<64x128xbf16>, vector<128x128xbf16>, vector<64x128xf32> -> vector<64x128xf32>
    %70 = arith.addf %64, %69 : vector<64x128xf32>
    %71 = vector.extract_strided_slice %27 {offsets = [2, 1, 0], sizes = [8, 8, 128], strides = [1, 1, 1]} : vector<10x10x128xbf16> to vector<8x8x128xbf16>
    %72 = vector.shape_cast %71 : vector<8x8x128xbf16> to vector<64x128xbf16>
    %c7 = arith.constant 7 : index
    %c0_35 = arith.constant 0 : index
    %c0_36 = arith.constant 0 : index
    %73 = vector.load %arg4[%c7, %c0_35, %c0_36] : memref<9x128x128xbf16, #tpu.memory_space<vmem>>, vector<1x128x128xbf16>
    %74 = vector.shape_cast %73 : vector<1x128x128xbf16> to vector<128x128xbf16>
    %cst_37 = arith.constant dense<0.000000e+00> : vector<64x128xf32>
    %75 = tpu.matmul %72, %74, %cst_37 {dimension_numbers = #tpu.dot_dimension_numbers<[1], [0], [0], [1], [0, 0, 1, 1], [], []>} : vector<64x128xbf16>, vector<128x128xbf16>, vector<64x128xf32> -> vector<64x128xf32>
    %76 = arith.addf %70, %75 : vector<64x128xf32>
    %77 = vector.extract_strided_slice %27 {offsets = [2, 2, 0], sizes = [8, 8, 128], strides = [1, 1, 1]} : vector<10x10x128xbf16> to vector<8x8x128xbf16>
    %78 = vector.shape_cast %77 : vector<8x8x128xbf16> to vector<64x128xbf16>
    %c8 = arith.constant 8 : index
    %c0_38 = arith.constant 0 : index
    %c0_39 = arith.constant 0 : index
    %79 = vector.load %arg4[%c8, %c0_38, %c0_39] : memref<9x128x128xbf16, #tpu.memory_space<vmem>>, vector<1x128x128xbf16>
    %80 = vector.shape_cast %79 : vector<1x128x128xbf16> to vector<128x128xbf16>
    %cst_40 = arith.constant dense<0.000000e+00> : vector<64x128xf32>
    %81 = tpu.matmul %78, %80, %cst_40 {dimension_numbers = #tpu.dot_dimension_numbers<[1], [0], [0], [1], [0, 0, 1, 1], [], []>} : vector<64x128xbf16>, vector<128x128xbf16>, vector<64x128xf32> -> vector<64x128xf32>
    %82 = arith.addf %76, %81 : vector<64x128xf32>
    %83 = vector.shape_cast %82 : vector<64x128xf32> to vector<8x8x128xf32>
    %84 = arith.truncf %83 : vector<8x8x128xf32> to vector<8x8x128xbf16>
    %c0_41 = arith.constant 0 : index
    %c0_42 = arith.constant 0 : index
    %c0_43 = arith.constant 0 : index
    %c0_44 = arith.constant 0 : index
    %85 = vector.load %arg5[%c0_41, %c0_42, %c0_43, %c0_44] : memref<1x8x8x128xbf16, #tpu.memory_space<vmem>>, vector<1x8x8x128xbf16>
    %86 = vector.shape_cast %85 : vector<1x8x8x128xbf16> to vector<8x8x128xbf16>
    %87 = vector.shape_cast %84 : vector<8x8x128xbf16> to vector<1x8x8x128xbf16>
    tpu.vector_store %arg5[%c0_41, %c0_42, %c0_43, %c0_44], %87 {strides = array<i32>} : memref<1x8x8x128xbf16, #tpu.memory_space<vmem>>, vector<1x8x8x128xbf16>,
    %cst_45 = arith.constant dense<0.000000e+00> : vector<128xf32>
    %88 = vector.multi_reduction <add>, %82, %cst_45 [0] : vector<64x128xf32> to vector<128xf32>
    %89 = vector.shape_cast %88 : vector<128xf32> to vector<1x128xf32>
    %90 = arith.mulf %82, %82 : vector<64x128xf32>
    %cst_46 = arith.constant dense<0.000000e+00> : vector<128xf32>
    %91 = vector.multi_reduction <add>, %90, %cst_46 [0] : vector<64x128xf32> to vector<128xf32>
    %92 = vector.shape_cast %91 : vector<128xf32> to vector<1x128xf32>
    %93 = tpu.iota {dimensions = array<i32: 0>} : vector<2x128xi32>
    %c0_i32 = arith.constant 0 : i32
    %94 = vector.broadcast %c0_i32 : i32 to vector<2x128xi32>
    %95 = arith.cmpi eq, %93, %94 : vector<2x128xi32>
    %96 = vector.shape_cast %89 : vector<1x128xf32> to vector<1x128xf32>
    %97 = vector.broadcast %96 : vector<1x128xf32> to vector<2x128xf32>
    %98 = vector.shape_cast %92 : vector<1x128xf32> to vector<1x128xf32>
    %99 = vector.broadcast %98 : vector<1x128xf32> to vector<2x128xf32>
    %100 = arith.select %95, %97, %99 : vector<2x128xi1>, vector<2x128xf32>
    %c0_47 = arith.constant 0 : index
    %c0_48 = arith.constant 0 : index
    %c0_49 = arith.constant 0 : index
    %101 = vector.load %arg6[%c0_47, %c0_48, %c0_49] : memref<1x2x128xf32, #tpu.memory_space<vmem>>, vector<1x2x128xf32>
    %102 = vector.shape_cast %101 : vector<1x2x128xf32> to vector<2x128xf32>
    %103 = vector.shape_cast %100 : vector<2x128xf32> to vector<1x2x128xf32>
    tpu.vector_store %arg6[%c0_47, %c0_48, %c0_49], %103 {strides = array<i32>} : memref<1x2x128xf32, #tpu.memory_space<vmem>>, vector<1x2x128xf32>,
    return
  }
  func.func @transform_0(%arg0: i32) -> (i32, i32, i32, i32) {
    %c0_i32 = arith.constant 0 : i32
    %c0_i32_0 = arith.constant 0 : i32
    %c0_i32_1 = arith.constant 0 : i32
    %c0_i32_2 = arith.constant 0 : i32
    return %arg0, %c0_i32, %c0_i32_0, %c0_i32_1 : i32, i32, i32, i32
  }
  func.func @transform_1(%arg0: i32) -> (i32, i32, i32) {
    %c0_i32 = arith.constant 0 : i32
    %c0_i32_0 = arith.constant 0 : i32
    %c0_i32_1 = arith.constant 0 : i32
    %c0_i32_2 = arith.constant 0 : i32
    return %c0_i32, %c0_i32_0, %c0_i32_1 : i32, i32, i32
  }
  func.func @transform_2(%arg0: i32) -> (i32, i32, i32) {
    %c0_i32 = arith.constant 0 : i32
    %c0_i32_0 = arith.constant 0 : i32
    %c0_i32_1 = arith.constant 0 : i32
    %c0_i32_2 = arith.constant 0 : i32
    return %c0_i32, %c0_i32_0, %c0_i32_1 : i32, i32, i32
  }
  func.func @transform_3(%arg0: i32) -> (i32, i32, i32) {
    %c0_i32 = arith.constant 0 : i32
    %c0_i32_0 = arith.constant 0 : i32
    %c0_i32_1 = arith.constant 0 : i32
    %c0_i32_2 = arith.constant 0 : i32
    return %c0_i32, %c0_i32_0, %c0_i32_1 : i32, i32, i32
  }
  func.func @transform_4(%arg0: i32) -> (i32, i32, i32, i32) {
    %c0_i32 = arith.constant 0 : i32
    %c0_i32_0 = arith.constant 0 : i32
    %c0_i32_1 = arith.constant 0 : i32
    %c0_i32_2 = arith.constant 0 : i32
    return %arg0, %c0_i32, %c0_i32_0, %c0_i32_1 : i32, i32, i32, i32
  }
  func.func @transform_5(%arg0: i32) -> (i32, i32, i32) {
    %c0_i32 = arith.constant 0 : i32
    %c0_i32_0 = arith.constant 0 : i32
    %c0_i32_1 = arith.constant 0 : i32
    return %arg0, %c0_i32, %c0_i32_0 : i32, i32, i32
  }
}

</mosaic_0001>

<bundles_post_ra>
// kernel: _lambda_.7
= control target key start
LH: loop header
LB: loop body
LE: loop exit
PB: predicated region body
PF: predicated region fallthrough
CT: control target
= control target key end

     0   :  { %s459_s6 = smov 0   ;;  %s498_s0 = inlined_call_operand.vmem [shape: bf16[2,16,16,128], index: 0, kind: input, shape index: {}]   ;;  %s499_s1 = inlined_call_operand.vmem [shape: f32[2,2,128], index: 1, kind: output, shape index: {}]  }
   0x1 LB: > { %s343_s7 = sadd.s32 4294967295, %s447_s6   ;;  %p347_p0 = scmp.ge.s32.totalorder %s447_s6, 1  ;;  %s447_s6 = sphi %s459_s6, %s11_s6  }
   0x2   : > { %p87_p1 = scmp.lt.s32.totalorder %s447_s6, 3 }
   0x4   : > { %p88_p2 = pnand %p347_p0, %p87_p1 }
   0x5   : > { %p106_p3 = scmp.lt.s32.totalorder (!%p88_p2), %s343_s7, 1 }
   0x6   : > { %91 = sbr.rel (%p88_p2) target bundleno = 97 (0x61), region = 24 }
   0xd   : > { %s501_s7 = smov (!%p106_p3, %s343_s7), 1 }
   0xe   : > { %s353_s8 = sshll.u32 %s501_s7, 7  ;;  %s350_s12 = sshll.u32 %s501_s7, 1 }
   0xf   : > { %s473_s11 = scalar_lea.vmem %s498_s0, %s353_s8  ;;  %s114_s15 = scalar_lea.vmem %s499_s1, %s350_s12 }
  0x10   : > { %v355_v0 = vld [vmem:[%s473_s11] sm:$0xff]   ;;  %v418_v1 = vld [vmem:[%s473_s11 + $0x8] sm:$0xff]   ;;  %v419_v6 = vld [vmem:[%s473_s11 + $0x10] sm:$0xff]  }
  0x11   : > { %v356_v2 = vunpack.c.l.bf16 %v355_v0  ;;  %v357_v3 = vunpack.c.h.bf16 %v355_v0  ;;  %v360_v4 = vunpack.c.l.bf16 %v418_v1  ;;  %v361_v7 = vunpack.c.h.bf16 %v418_v1  ;;  %v420_v11 = vld [vmem:[%s473_s11 + $0x18] sm:$0xff]   ;;  %v421_v19 = vld [vmem:[%s473_s11 + $0x20] sm:$0xff]   ;;  %v422_v28 = vld [vmem:[%s473_s11 + $0x28] sm:$0xff]  }
  0x12   : > { %v364_v9 = vunpack.c.l.bf16 %v419_v6  ;;  %v365_v14 = vunpack.c.h.bf16 %v419_v6  ;;  %v368_v17 = vunpack.c.l.bf16 %v420_v11  ;;  %v369_v22 = vunpack.c.h.bf16 %v420_v11  ;;  %v423_v37 = vld [vmem:[%s473_s11 + $0x30] sm:$0xff]   ;;  %v424_v46 = vld [vmem:[%s473_s11 + $0x38] sm:$0xff]   ;;  %v425_v55 = vld [vmem:[%s473_s11 + $0x40] sm:$0xff]  }
  0x13   : > { %v179_v5 = vadd.f32 %v357_v3, %v356_v2  ;;  %v216_v12 = vmul.f32 %v356_v2, %v356_v2  ;;  %v217_v13 = vmul.f32 %v357_v3, %v357_v3  ;;  %v218_v16 = vmul.f32 %v360_v4, %v360_v4  ;;  %v426_v0 = vld [vmem:[%s473_s11 + $0x48] sm:$0xff]  }
  0x14   : > { %v219_v20 = vmul.f32 %v361_v7, %v361_v7  ;;  %v220_v24 = vmul.f32 %v364_v9, %v364_v9  ;;  %v372_v26 = vunpack.c.l.bf16 %v421_v19  ;;  %v221_v29 = vmul.f32 %v365_v14, %v365_v14 }
  0x15   : > { %v180_v8 = vadd.f32 %v360_v4, %v179_v5  ;;  %v248_v21 = vadd.f32 %v217_v13, %v216_v12  ;;  %v373_v31 = vunpack.c.h.bf16 %v421_v19  ;;  %v222_v33 = vmul.f32 %v368_v17, %v368_v17 }
  0x16   : > { %v376_v35 = vunpack.c.l.bf16 %v422_v28  ;;  %v223_v38 = vmul.f32 %v369_v22, %v369_v22  ;;  %v377_v40 = vunpack.c.h.bf16 %v422_v28  ;;  %v224_v42 = vmul.f32 %v372_v26, %v372_v26 }
  0x17   : > { %v181_v10 = vadd.f32 %v361_v7, %v180_v8  ;;  %v249_v25 = vadd.f32 %v248_v21, %v218_v16  ;;  %v380_v44 = vunpack.c.l.bf16 %v423_v37  ;;  %v225_v47 = vmul.f32 %v373_v31, %v373_v31 }
  0x18   : > { %v381_v49 = vunpack.c.h.bf16 %v423_v37  ;;  %v226_v51 = vmul.f32 %v376_v35, %v376_v35  ;;  %v384_v53 = vunpack.c.l.bf16 %v424_v46  ;;  %v227_v56 = vmul.f32 %v377_v40, %v377_v40 }
  0x19   : > { %v182_v15 = vadd.f32 %v364_v9, %v181_v10  ;;  %v250_v30 = vadd.f32 %v249_v25, %v219_v20  ;;  %v385_v58 = vunpack.c.h.bf16 %v424_v46  ;;  %v228_v60 = vmul.f32 %v380_v44, %v380_v44  ;;  %v427_v9 = vld [vmem:[%s473_s11 + $0x50] sm:$0xff]  }
  0x1a   : > { %v388_v62 = vunpack.c.l.bf16 %v425_v55  ;;  %v229_v1 = vmul.f32 %v381_v49, %v381_v49  ;;  %v389_v3 = vunpack.c.h.bf16 %v425_v55  ;;  %v230_v5 = vmul.f32 %v384_v53, %v384_v53 }
  0x1b   : > { %v183_v18 = vadd.f32 %v365_v14, %v182_v15  ;;  %v251_v34 = vadd.f32 %v250_v30, %v220_v24  ;;  %v392_v7 = vunpack.c.l.bf16 %v426_v0  ;;  %v231_v10 = vmul.f32 %v385_v58, %v385_v58 }
  0x1c   : > { %v393_v12 = vunpack.c.h.bf16 %v426_v0  ;;  %v232_v14 = vmul.f32 %v388_v62, %v388_v62  ;;  %v396_v16 = vunpack.c.l.bf16 %v427_v9  ;;  %v233_v19 = vmul.f32 %v389_v3, %v389_v3 }
  0x1d   : > { %v184_v23 = vadd.f32 %v368_v17, %v183_v18  ;;  %v252_v39 = vadd.f32 %v251_v34, %v221_v29  ;;  %v428_v18 = vld [vmem:[%s473_s11 + $0x58] sm:$0xff]   ;;  %v397_v21 = vunpack.c.h.bf16 %v427_v9 }
  0x1e   : > { %v400_v25 = vunpack.c.l.bf16 %v428_v18  ;;  %v235_v28 = vmul.f32 %v393_v12, %v393_v12  ;;  %v401_v30 = vunpack.c.h.bf16 %v428_v18 }
  0x1f   : > { %v185_v27 = vadd.f32 %v369_v22, %v184_v23  ;;  %v253_v43 = vadd.f32 %v252_v39, %v222_v33  ;;  %v234_v23 = vmul.f32 %v392_v7, %v392_v7  ;;  %v237_v37 = vmul.f32 %v397_v21, %v397_v21 }
  0x20   : > { %v239_v46 = vmul.f32 %v401_v30, %v401_v30 }
  0x21   : > { %v186_v32 = vadd.f32 %v372_v26, %v185_v27  ;;  %v254_v48 = vadd.f32 %v253_v43, %v223_v38  ;;  %v429_v27 = vld [vmem:[%s473_s11 + $0x60] sm:$0xff]  }
  0x22   : > { %v404_v34 = vunpack.c.l.bf16 %v429_v27  ;;  %v405_v39 = vunpack.c.h.bf16 %v429_v27 }
  0x23   : > { %v187_v36 = vadd.f32 %v373_v31, %v186_v32  ;;  %v255_v52 = vadd.f32 %v254_v48, %v224_v42  ;;  %v236_v32 = vmul.f32 %v396_v16, %v396_v16 }
  0x24   : > { %v241_v55 = vmul.f32 %v405_v39, %v405_v39 }
  0x25   : > { %v188_v41 = vadd.f32 %v376_v35, %v187_v36  ;;  %v256_v57 = vadd.f32 %v255_v52, %v225_v47  ;;  %v430_v36 = vld [vmem:[%s473_s11 + $0x68] sm:$0xff]  }
  0x26   : > { %v408_v43 = vunpack.c.l.bf16 %v430_v36  ;;  %v409_v48 = vunpack.c.h.bf16 %v430_v36 }
  0x27   : > { %v189_v45 = vadd.f32 %v377_v40, %v188_v41  ;;  %v257_v61 = vadd.f32 %v256_v57, %v226_v51  ;;  %v238_v41 = vmul.f32 %v400_v25, %v400_v25 }
  0x29   : > { %v190_v50 = vadd.f32 %v380_v44, %v189_v45  ;;  %v258_v2 = vadd.f32 %v257_v61, %v227_v56  ;;  %v431_v45 = vld [vmem:[%s473_s11 + $0x70] sm:$0xff]  }
  0x2a   : > { %v412_v52 = vunpack.c.l.bf16 %v431_v45  ;;  %v413_v57 = vunpack.c.h.bf16 %v431_v45 }
  0x2b   : > { %v191_v54 = vadd.f32 %v381_v49, %v190_v50  ;;  %v259_v6 = vadd.f32 %v258_v2, %v228_v60  ;;  %v240_v50 = vmul.f32 %v404_v34, %v404_v34 }
  0x2d   : > { %v192_v59 = vadd.f32 %v384_v53, %v191_v54  ;;  %v260_v11 = vadd.f32 %v259_v6, %v229_v1  ;;  %v432_v54 = vld [vmem:[%s473_s11 + $0x78] sm:$0xff]   ;;  %v245_v6 = vmul.f32 %v413_v57, %v413_v57 }
  0x2e   : > { %v416_v61 = vunpack.c.l.bf16 %v432_v54  ;;  %v417_v1 = vunpack.c.h.bf16 %v432_v54 }
  0x2f   : > { %v193_v63 = vadd.f32 %v385_v58, %v192_v59  ;;  %v261_v15 = vadd.f32 %v260_v11, %v230_v5  ;;  %v242_v59 = vmul.f32 %v408_v43, %v408_v43 }
  0x30   : > { %v246_v9 = vmul.f32 %v416_v61, %v416_v61 }
  0x31   : > { %v194_v4 = vadd.f32 %v388_v62, %v193_v63  ;;  %v262_v20 = vadd.f32 %v261_v15, %v231_v10  ;;  %v243_v63 = vmul.f32 %v409_v48, %v409_v48 }
  0x33   : > { %v195_v8 = vadd.f32 %v389_v3, %v194_v4  ;;  %v263_v24 = vadd.f32 %v262_v20, %v232_v14  ;;  %v244_v3 = vmul.f32 %v412_v52, %v412_v52 }
  0x35   : > { %v196_v13 = vadd.f32 %v392_v7, %v195_v8  ;;  %v264_v29 = vadd.f32 %v263_v24, %v233_v19  ;;  %v285_v19 = vlaneseq }
  0x37   : > { %v197_v17 = vadd.f32 %v393_v12, %v196_v13  ;;  %v265_v33 = vadd.f32 %v264_v29, %v234_v23  ;;  %v247_v12 = vmul.f32 %v417_v1, %v417_v1  ;;  %v286_v23 = vshrl.u32 %v285_v19, 7 }
  0x39   : > { %v198_v22 = vadd.f32 %v396_v16, %v197_v17  ;;  %v266_v38 = vadd.f32 %v265_v33, %v235_v28  ;;  %vm287_vm0 = vcmp.eq.s32.totalorder %v286_v23, 0 }
  0x3b   : > { %v199_v26 = vadd.f32 %v397_v21, %v198_v22  ;;  %v267_v42 = vadd.f32 %v266_v38, %v236_v32 }
  0x3d   : > { %v200_v31 = vadd.f32 %v400_v25, %v199_v26  ;;  %v268_v47 = vadd.f32 %v267_v42, %v237_v37 }
  0x3f   : > { %v201_v35 = vadd.f32 %v401_v30, %v200_v31  ;;  %v269_v51 = vadd.f32 %v268_v47, %v238_v41 }
  0x41   : > { %v202_v40 = vadd.f32 %v404_v34, %v201_v35  ;;  %v270_v56 = vadd.f32 %v269_v51, %v239_v46 }
  0x43   : > { %v203_v44 = vadd.f32 %v405_v39, %v202_v40  ;;  %v271_v60 = vadd.f32 %v270_v56, %v240_v50 }
  0x45   : > { %v204_v49 = vadd.f32 %v408_v43, %v203_v44  ;;  %v272_v0 = vadd.f32 %v271_v60, %v241_v55 }
  0x47   : > { %v205_v53 = vadd.f32 %v409_v48, %v204_v49  ;;  %v273_v4 = vadd.f32 %v272_v0, %v242_v59 }
  0x49   : > { %v206_v58 = vadd.f32 %v412_v52, %v205_v53  ;;  %v274_v7 = vadd.f32 %v273_v4, %v243_v63 }
  0x4b   : > { %v207_v62 = vadd.f32 %v413_v57, %v206_v58  ;;  %v275_v10 = vadd.f32 %v274_v7, %v244_v3 }
  0x4d   : > { %v208_v2 = vadd.f32 %v416_v61, %v207_v62  ;;  %v276_v13 = vadd.f32 %v275_v10, %v245_v6 }
  0x4f   : > { %v209_v5 = vadd.f32 %v417_v1, %v208_v2  ;;  %v277_v15 = vadd.f32 %v276_v13, %v246_v9 }
  0x51   : > { %v210_v8 = vrot.slane %v209_v5, 4  ;;  %v278_v16 = vadd.f32 %v277_v15, %v247_v12 }
  0x53   : > { %v211_v11 = vadd.f32 %v210_v8, %v209_v5  ;;  %v279_v18 = vrot.slane %v278_v16, 4 }
  0x55   : > { %v212_v14 = vrot.slane %v211_v11, 2  ;;  %v280_v20 = vadd.f32 %v279_v18, %v278_v16 }
  0x57   : > { %v213_v17 = vadd.f32 %v212_v14, %v211_v11  ;;  %v281_v22 = vrot.slane %v280_v20, 2 }
  0x59   : > { %v214_v21 = vrot.slane %v213_v17, 1  ;;  %v282_v24 = vadd.f32 %v281_v22, %v280_v20 }
  0x5b   : > { %v215_v25 = vadd.f32 %v214_v21, %v213_v17  ;;  %v283_v26 = vrot.slane %v282_v24, 1 }
  0x5d   : > { %v284_v27 = vadd.f32 %v283_v26, %v282_v24 }
  0x5f   : > { %v288_v28 = vsel %vm287_vm0, %v215_v25, %v284_v27 }
  0x60   : > { %289 = vst [vmem:[%s114_s15] sm:$0x3] %v288_v28 }
  0x61 PF: > { %s11_s6 = sadd.s32 1, %s447_s6  }
  0x62   : > { %p8_p4 = scmp.ge.s32.totalorder %s11_s6, 4  }
  0x64   :  { %10 = sbr.rel (!%p8_p4) target bundleno = 1 (0x1), region = 54 }

// kernel: _lambda_.8
= control target key start
LH: loop header
LB: loop body
LE: loop exit
PB: predicated region body
PF: predicated region fallthrough
CT: control target
= control target key end

     0   :  { %s881_s12 = smov 0   ;;  %s1015_s0 = inlined_call_operand.vmem [shape: bf16[2,16,16,128], index: 0, kind: input, shape index: {}]   ;;  %s1016_s1 = inlined_call_operand.vmem [shape: f32[1,1,128], index: 1, kind: input, shape index: {}]   ;;  %s1017_s2 = inlined_call_operand.vmem [shape: f32[1,1,128], index: 2, kind: input, shape index: {}]   ;;  %s1018_s3 = inlined_call_operand.vmem [shape: bf16[2,16,16,128], index: 3, kind: output, shape index: {}]  }
   0x1 LB: > { %s592_s13 = sadd.s32 4294967295, %s859_s12   ;;  %p596_p0 = scmp.ge.s32.totalorder %s859_s12, 1  ;;  %s859_s12 = sphi %s881_s12, %s13_s12  }
   0x2   : > { %p137_p1 = scmp.lt.s32.totalorder %s859_s12, 3 }
   0x4   : > { %p138_p2 = pnand %p596_p0, %p137_p1 }
   0x5   : > { %p161_p3 = scmp.lt.s32.totalorder (!%p138_p2), %s592_s13, 1  ;;  %v902_v0 = vld [vmem:[%s1016_s1] ss:$0 sm:$0xff] (!%p138_p2) }
   0x6   : > { %141 = sbr.rel (%p138_p2) target bundleno = 68 (0x44), region = 32  ;;  %v911_v9 = vld [vmem:[%s1017_s2] ss:$0 sm:$0xff] (!%p138_p2) }
   0xd   : > { %s1020_s13 = smov (!%p161_p3, %s592_s13), 1 }
   0xe   : > { %s637_s14 = sshll.u32 %s1020_s13, 7 }
   0xf   : > { %s897_s17 = scalar_lea.vmem %s1015_s0, %s637_s14  ;;  %s936_s24 = scalar_lea.vmem %s1018_s3, %s637_s14 }
  0x10   : > { %v672_v1 = vld [vmem:[%s897_s17] sm:$0xff]   ;;  %v815_v2 = vld [vmem:[%s897_s17 + $0x8] sm:$0xff]   ;;  %v816_v3 = vld [vmem:[%s897_s17 + $0x10] sm:$0xff]  }
  0x11   : > { %v673_v4 = vunpack.c.l.bf16 %v672_v1  ;;  %v674_v5 = vunpack.c.h.bf16 %v672_v1  ;;  %v677_v6 = vunpack.c.l.bf16 %v815_v2  ;;  %v678_v7 = vunpack.c.h.bf16 %v815_v2  ;;  %v817_v8 = vld [vmem:[%s897_s17 + $0x18] sm:$0xff]   ;;  %v818_v22 = vld [vmem:[%s897_s17 + $0x20] sm:$0xff]   ;;  %v819_v43 = vld [vmem:[%s897_s17 + $0x28] sm:$0xff]  }
  0x12   : > { %v681_v10 = vunpack.c.l.bf16 %v816_v3  ;;  %v682_v11 = vunpack.c.h.bf16 %v816_v3  ;;  %v685_v12 = vunpack.c.l.bf16 %v817_v8  ;;  %v686_v13 = vunpack.c.h.bf16 %v817_v8  ;;  %v820_v48 = vld [vmem:[%s897_s17 + $0x30] sm:$0xff]   ;;  %v821_v53 = vld [vmem:[%s897_s17 + $0x38] sm:$0xff]  }
  0x13   : > { %v242_v14 = vmul.f32 %v673_v4, %v902_v0  ;;  %v243_v15 = vmul.f32 %v674_v5, %v902_v0  ;;  %v244_v16 = vmul.f32 %v677_v6, %v902_v0  ;;  %v245_v17 = vmul.f32 %v678_v7, %v902_v0 }
  0x14   : > { %v246_v18 = vmul.f32 %v681_v10, %v902_v0  ;;  %v247_v19 = vmul.f32 %v682_v11, %v902_v0  ;;  %v248_v20 = vmul.f32 %v685_v12, %v902_v0  ;;  %v249_v21 = vmul.f32 %v686_v13, %v902_v0  ;;  %v822_v12 = vld [vmem:[%s897_s17 + $0x40] sm:$0xff]  }
  0x15   : > { %v281_v23 = vadd.f32 %v911_v9, %v242_v14  ;;  %v282_v24 = vadd.f32 %v911_v9, %v243_v15  ;;  %v283_v25 = vadd.f32 %v911_v9, %v244_v16  ;;  %v284_v26 = vadd.f32 %v911_v9, %v245_v17 }
  0x16   : > { %v285_v27 = vadd.f32 %v911_v9, %v246_v18  ;;  %v286_v28 = vadd.f32 %v911_v9, %v247_v19  ;;  %v287_v29 = vadd.f32 %v911_v9, %v248_v20  ;;  %v288_v30 = vadd.f32 %v911_v9, %v249_v21 }
  0x17   : > { %v313_v31 = vmul.f32 0.1, %v281_v23  ;;  %v314_v32 = vmul.f32 0.1, %v282_v24  ;;  %v315_v33 = vmul.f32 0.1, %v283_v25  ;;  %v689_v34 = vunpack.c.l.bf16 %v818_v22 }
  0x18   : > { %v316_v35 = vmul.f32 0.1, %v284_v26  ;;  %v317_v36 = vmul.f32 0.1, %v285_v27  ;;  %v318_v37 = vmul.f32 0.1, %v286_v28  ;;  %v690_v38 = vunpack.c.h.bf16 %v818_v22 }
  0x19   : > { %v345_v39 = vmax.f32 %v281_v23, %v313_v31  ;;  %v346_v40 = vmax.f32 %v282_v24, %v314_v32  ;;  %v347_v41 = vmax.f32 %v283_v25, %v315_v33  ;;  %v319_v42 = vmul.f32 0.1, %v287_v29  ;;  %v823_v25 = vld [vmem:[%s897_s17 + $0x48] sm:$0xff]  }
  0x1a   : > { %v348_v44 = vmax.f32 %v284_v26, %v316_v35  ;;  %v349_v45 = vmax.f32 %v285_v27, %v317_v36  ;;  %v350_v46 = vmax.f32 %v286_v28, %v318_v37  ;;  %v320_v47 = vmul.f32 0.1, %v288_v30 }
  0x1b   : > { %v738_v49 = vpack.c.bf16 %v346_v40, %v345_v39  ;;  %v351_v50 = vmax.f32 %v287_v29, %v319_v42  ;;  %v250_v51 = vmul.f32 %v689_v34, %v902_v0  ;;  %v251_v52 = vmul.f32 %v690_v38, %v902_v0  ;;  %v824_v34 = vld [vmem:[%s897_s17 + $0x50] sm:$0xff]  }
  0x1c   : > { %v743_v54 = vpack.c.bf16 %v348_v44, %v347_v41  ;;  %v748_v55 = vpack.c.bf16 %v350_v46, %v349_v45  ;;  %v352_v56 = vmax.f32 %v288_v30, %v320_v47  ;;  %v693_v57 = vunpack.c.l.bf16 %v819_v43 }
  0x1d   : > { %739 = vst [vmem:[%s936_s24] sm:$0xff] %v738_v49   ;;  %v289_v58 = vadd.f32 %v911_v9, %v250_v51  ;;  %v290_v59 = vadd.f32 %v911_v9, %v251_v52  ;;  %v694_v60 = vunpack.c.h.bf16 %v819_v43  ;;  %v697_v61 = vunpack.c.l.bf16 %v820_v48  ;;  %v825_v43 = vld [vmem:[%s897_s17 + $0x58] sm:$0xff]  }
  0x1e   : > { %830 = vst [vmem:[%s936_s24 + $0x8] sm:$0xff] %v743_v54   ;;  %831 = vst [vmem:[%s936_s24 + $0x10] sm:$0xff] %v748_v55   ;;  %v753_v62 = vpack.c.bf16 %v352_v56, %v351_v50  ;;  %v252_v63 = vmul.f32 %v693_v57, %v902_v0  ;;  %v698_v1 = vunpack.c.h.bf16 %v820_v48  ;;  %v701_v2 = vunpack.c.l.bf16 %v821_v53  ;;  %v826_v56 = vld [vmem:[%s897_s17 + $0x60] sm:$0xff]  }
  0x1f   : > { %v321_v3 = vmul.f32 0.1, %v289_v58  ;;  %v322_v4 = vmul.f32 0.1, %v290_v59  ;;  %v253_v5 = vmul.f32 %v694_v60, %v902_v0  ;;  %v254_v6 = vmul.f32 %v697_v61, %v902_v0 }
  0x20   : > { %832 = vst [vmem:[%s936_s24 + $0x18] sm:$0xff] %v753_v62   ;;  %v291_v7 = vadd.f32 %v911_v9, %v252_v63  ;;  %v255_v8 = vmul.f32 %v698_v1, %v902_v0  ;;  %v702_v10 = vunpack.c.h.bf16 %v821_v53  ;;  %v256_v11 = vmul.f32 %v701_v2, %v902_v0 }
  0x21   : > { %v353_v13 = vmax.f32 %v289_v58, %v321_v3  ;;  %v354_v14 = vmax.f32 %v290_v59, %v322_v4  ;;  %v292_v15 = vadd.f32 %v911_v9, %v253_v5  ;;  %v293_v16 = vadd.f32 %v911_v9, %v254_v6 }
  0x22   : > { %v323_v17 = vmul.f32 0.1, %v291_v7  ;;  %v294_v18 = vadd.f32 %v911_v9, %v255_v8  ;;  %v257_v19 = vmul.f32 %v702_v10, %v902_v0  ;;  %v295_v20 = vadd.f32 %v911_v9, %v256_v11  ;;  %v827_v11 = vld [vmem:[%s897_s17 + $0x68] sm:$0xff]  }
  0x23   : > { %v758_v21 = vpack.c.bf16 %v354_v14, %v353_v13  ;;  %v324_v22 = vmul.f32 0.1, %v292_v15  ;;  %v325_v23 = vmul.f32 0.1, %v293_v16  ;;  %v705_v24 = vunpack.c.l.bf16 %v822_v12 }
  0x24   : > { %v355_v26 = vmax.f32 %v291_v7, %v323_v17  ;;  %v326_v27 = vmul.f32 0.1, %v294_v18  ;;  %v296_v28 = vadd.f32 %v911_v9, %v257_v19  ;;  %v327_v29 = vmul.f32 0.1, %v295_v20 }
  0x25   : > { %833 = vst [vmem:[%s936_s24 + $0x20] sm:$0xff] %v758_v21   ;;  %v356_v30 = vmax.f32 %v292_v15, %v324_v22  ;;  %v357_v31 = vmax.f32 %v293_v16, %v325_v23  ;;  %v706_v32 = vunpack.c.h.bf16 %v822_v12  ;;  %v258_v33 = vmul.f32 %v705_v24, %v902_v0 }
  0x26   : > { %v358_v35 = vmax.f32 %v294_v18, %v326_v27  ;;  %v328_v36 = vmul.f32 0.1, %v296_v28  ;;  %v359_v37 = vmax.f32 %v295_v20, %v327_v29  ;;  %v709_v38 = vunpack.c.l.bf16 %v823_v25  ;;  %v828_v20 = vld [vmem:[%s897_s17 + $0x70] sm:$0xff]   ;;  %v829_v29 = vld [vmem:[%s897_s17 + $0x78] sm:$0xff]  }
  0x27   : > { %v763_v39 = vpack.c.bf16 %v356_v30, %v355_v26  ;;  %v259_v40 = vmul.f32 %v706_v32, %v902_v0  ;;  %v297_v41 = vadd.f32 %v911_v9, %v258_v33  ;;  %v710_v42 = vunpack.c.h.bf16 %v823_v25 }
  0x28   : > { %v768_v44 = vpack.c.bf16 %v358_v35, %v357_v31  ;;  %v360_v45 = vmax.f32 %v296_v28, %v328_v36  ;;  %v260_v46 = vmul.f32 %v709_v38, %v902_v0  ;;  %v713_v47 = vunpack.c.l.bf16 %v824_v34 }
  0x29   : > { %834 = vst [vmem:[%s936_s24 + $0x28] sm:$0xff] %v763_v39   ;;  %v298_v48 = vadd.f32 %v911_v9, %v259_v40  ;;  %v329_v49 = vmul.f32 0.1, %v297_v41  ;;  %v261_v50 = vmul.f32 %v710_v42, %v902_v0  ;;  %v714_v51 = vunpack.c.h.bf16 %v824_v34 }
  0x2a   : > { %835 = vst [vmem:[%s936_s24 + $0x30] sm:$0xff] %v768_v44   ;;  %v773_v52 = vpack.c.bf16 %v360_v45, %v359_v37  ;;  %v299_v53 = vadd.f32 %v911_v9, %v260_v46  ;;  %v262_v54 = vmul.f32 %v713_v47, %v902_v0  ;;  %v717_v55 = vunpack.c.l.bf16 %v825_v43 }
  0x2b   : > { %v330_v57 = vmul.f32 0.1, %v298_v48  ;;  %v361_v58 = vmax.f32 %v297_v41, %v329_v49  ;;  %v300_v59 = vadd.f32 %v911_v9, %v261_v50  ;;  %v263_v60 = vmul.f32 %v714_v51, %v902_v0 }
  0x2c   : > { %836 = vst [vmem:[%s936_s24 + $0x38] sm:$0xff] %v773_v52   ;;  %v331_v61 = vmul.f32 0.1, %v299_v53  ;;  %v301_v62 = vadd.f32 %v911_v9, %v262_v54  ;;  %v718_v63 = vunpack.c.h.bf16 %v825_v43  ;;  %v264_v1 = vmul.f32 %v717_v55, %v902_v0 }
  0x2d   : > { %v362_v2 = vmax.f32 %v298_v48, %v330_v57  ;;  %v332_v3 = vmul.f32 0.1, %v300_v59  ;;  %v302_v4 = vadd.f32 %v911_v9, %v263_v60  ;;  %v721_v5 = vunpack.c.l.bf16 %v826_v56 }
  0x2e   : > { %v363_v6 = vmax.f32 %v299_v53, %v331_v61  ;;  %v333_v7 = vmul.f32 0.1, %v301_v62  ;;  %v265_v8 = vmul.f32 %v718_v63, %v902_v0  ;;  %v303_v10 = vadd.f32 %v911_v9, %v264_v1 }
  0x2f   : > { %v778_v12 = vpack.c.bf16 %v362_v2, %v361_v58  ;;  %v364_v13 = vmax.f32 %v300_v59, %v332_v3  ;;  %v334_v14 = vmul.f32 0.1, %v302_v4  ;;  %v722_v15 = vunpack.c.h.bf16 %v826_v56 }
  0x30   : > { %v365_v16 = vmax.f32 %v301_v62, %v333_v7  ;;  %v304_v17 = vadd.f32 %v911_v9, %v265_v8  ;;  %v335_v18 = vmul.f32 0.1, %v303_v10  ;;  %v266_v19 = vmul.f32 %v721_v5, %v902_v0 }
  0x31   : > { %837 = vst [vmem:[%s936_s24 + $0x40] sm:$0xff] %v778_v12   ;;  %v783_v21 = vpack.c.bf16 %v364_v13, %v363_v6  ;;  %v366_v22 = vmax.f32 %v302_v4, %v334_v14  ;;  %v267_v23 = vmul.f32 %v722_v15, %v902_v0  ;;  %v725_v24 = vunpack.c.l.bf16 %v827_v11 }
  0x32   : > { %v336_v25 = vmul.f32 0.1, %v304_v17  ;;  %v367_v26 = vmax.f32 %v303_v10, %v335_v18  ;;  %v305_v27 = vadd.f32 %v911_v9, %v266_v19  ;;  %v726_v28 = vunpack.c.h.bf16 %v827_v11 }
  0x33   : > { %838 = vst [vmem:[%s936_s24 + $0x48] sm:$0xff] %v783_v21   ;;  %v788_v30 = vpack.c.bf16 %v366_v22, %v365_v16  ;;  %v306_v31 = vadd.f32 %v911_v9, %v267_v23  ;;  %v268_v32 = vmul.f32 %v725_v24, %v902_v0  ;;  %v729_v33 = vunpack.c.l.bf16 %v828_v20 }
  0x34   : > { %v368_v34 = vmax.f32 %v304_v17, %v336_v25  ;;  %v337_v35 = vmul.f32 0.1, %v305_v27  ;;  %v269_v36 = vmul.f32 %v726_v28, %v902_v0  ;;  %v730_v37 = vunpack.c.h.bf16 %v828_v20 }
  0x35   : > { %839 = vst [vmem:[%s936_s24 + $0x50] sm:$0xff] %v788_v30   ;;  %v338_v38 = vmul.f32 0.1, %v306_v31  ;;  %v307_v39 = vadd.f32 %v911_v9, %v268_v32  ;;  %v270_v40 = vmul.f32 %v729_v33, %v902_v0  ;;  %v733_v41 = vunpack.c.l.bf16 %v829_v29 }
  0x36   : > { %v793_v42 = vpack.c.bf16 %v368_v34, %v367_v26  ;;  %v369_v43 = vmax.f32 %v305_v27, %v337_v35  ;;  %v308_v44 = vadd.f32 %v911_v9, %v269_v36  ;;  %v271_v45 = vmul.f32 %v730_v37, %v902_v0 }
  0x37   : > { %v370_v46 = vmax.f32 %v306_v31, %v338_v38  ;;  %v339_v47 = vmul.f32 0.1, %v307_v39  ;;  %v309_v48 = vadd.f32 %v911_v9, %v270_v40  ;;  %v734_v49 = vunpack.c.h.bf16 %v829_v29 }
  0x38   : > { %840 = vst [vmem:[%s936_s24 + $0x58] sm:$0xff] %v793_v42   ;;  %v340_v50 = vmul.f32 0.1, %v308_v44  ;;  %v310_v51 = vadd.f32 %v911_v9, %v271_v45  ;;  %v272_v52 = vmul.f32 %v733_v41, %v902_v0 }
  0x39   : > { %v798_v53 = vpack.c.bf16 %v370_v46, %v369_v43  ;;  %v371_v54 = vmax.f32 %v307_v39, %v339_v47  ;;  %v341_v55 = vmul.f32 0.1, %v309_v48  ;;  %v273_v56 = vmul.f32 %v734_v49, %v902_v0 }
  0x3a   : > { %v372_v57 = vmax.f32 %v308_v44, %v340_v50  ;;  %v342_v58 = vmul.f32 0.1, %v310_v51  ;;  %v311_v59 = vadd.f32 %v911_v9, %v272_v52 }
  0x3b   : > { %841 = vst [vmem:[%s936_s24 + $0x60] sm:$0xff] %v798_v53   ;;  %v373_v60 = vmax.f32 %v309_v48, %v341_v55  ;;  %v312_v61 = vadd.f32 %v911_v9, %v273_v56 }
  0x3c   : > { %v803_v62 = vpack.c.bf16 %v372_v57, %v371_v54  ;;  %v374_v63 = vmax.f32 %v310_v51, %v342_v58  ;;  %v343_v1 = vmul.f32 0.1, %v311_v59 }
  0x3d   : > { %v344_v2 = vmul.f32 0.1, %v312_v61 }
  0x3e   : > { %842 = vst [vmem:[%s936_s24 + $0x68] sm:$0xff] %v803_v62   ;;  %v808_v3 = vpack.c.bf16 %v374_v63, %v373_v60  ;;  %v375_v4 = vmax.f32 %v311_v59, %v343_v1 }
  0x3f   : > { %v376_v5 = vmax.f32 %v312_v61, %v344_v2 }
  0x40   : > { %843 = vst [vmem:[%s936_s24 + $0x70] sm:$0xff] %v808_v3  }
  0x41   : > { %v813_v6 = vpack.c.bf16 %v376_v5, %v375_v4 }
  0x43   : > { %844 = vst [vmem:[%s936_s24 + $0x78] sm:$0xff] %v813_v6  }
  0x44 PF: > { %s13_s12 = sadd.s32 1, %s859_s12  }
  0x45   : > { %p10_p4 = scmp.ge.s32.totalorder %s13_s12, 4  }
  0x47   :  { %12 = sbr.rel (!%p10_p4) target bundleno = 1 (0x1), region = 62 }

// kernel: _lambda_.10
= control target key start
LH: loop header
LB: loop body
LE: loop exit
PB: predicated region body
PF: predicated region fallthrough
CT: control target
= control target key end

     0   :  { %s706_s0 = inlined_call_operand.vmem [shape: bf16[128,128], index: 0, kind: input, shape index: {}]   ;;  %s707_s1 = inlined_call_operand.vmem [shape: bf16[128,128], index: 1, kind: input, shape index: {}]   ;;  %s708_s2 = inlined_call_operand.vmem [shape: bf16[128,128], index: 2, kind: output, shape index: {0}]   ;;  %s709_s3 = inlined_call_operand.hbm [shape: f32[1,2,128], index: 3, kind: output, shape index: {1}]  }
   0x1   :  { %v561_v0 = vld [vmem:[%s707_s1] sm:$0xff]   ;;  %v562_v1 = vld [vmem:[%s707_s1 + $0x8] sm:$0xff]   ;;  %v563_v2 = vld [vmem:[%s707_s1 + $0x10] sm:$0xff]  }
   0x2   :  { %512 = vmatprep.subr.bf16.mxu0 %v561_v0  ;;  %544 = vmatprep.subr.bf16.mxu1 %v561_v0  ;;  %v564_v3 = vld [vmem:[%s707_s1 + $0x18] sm:$0xff]   ;;  %v569_v4 = vld [vmem:[%s706_s0] sm:$0xff]   ;;  %v566_v7 = vld [vmem:[%s707_s1 + $0x28] sm:$0xff]  }
   0x3   :  { %513 = vmatpush3.bf16.msra.mxu0 %v561_v0  ;;  %552 = vmatpush3.bf16.msra.mxu1 %v561_v0  ;;  %v565_v5 = vld [vmem:[%s707_s1 + $0x20] sm:$0xff]  }
   0x4   :  { %514 = vmatprep.subr.bf16.mxu0 %v562_v1  ;;  %545 = vmatprep.subr.bf16.mxu1 %v562_v1  ;;  %v573_v6 = vld [vmem:[%s706_s0 + $0x20] sm:$0xff]  }
   0x5   :  { %528 = vmatprep.mubr.bf16.mxu0 %v569_v4  ;;  %536 = vmatprep.mubr.bf16.mxu1 %v573_v6 }
   0x7   :  { %515 = vmatpush3.bf16.msra.mxu0 %v562_v1  ;;  %553 = vmatpush3.bf16.msra.mxu1 %v562_v1 }
   0x8   :  { %516 = vmatprep.subr.bf16.mxu0 %v563_v2  ;;  %546 = vmatprep.subr.bf16.mxu1 %v563_v2 }
   0xb   :  { %517 = vmatpush3.bf16.msra.mxu0 %v563_v2  ;;  %554 = vmatpush3.bf16.msra.mxu1 %v563_v2 }
   0xc   :  { %518 = vmatprep.subr.bf16.mxu0 %v564_v3  ;;  %547 = vmatprep.subr.bf16.mxu1 %v564_v3 }
   0xf   :  { %519 = vmatpush3.bf16.msra.mxu0 %v564_v3  ;;  %555 = vmatpush3.bf16.msra.mxu1 %v564_v3 }
  0x10   :  { %520 = vmatprep.subr.bf16.mxu0 %v565_v5  ;;  %548 = vmatprep.subr.bf16.mxu1 %v565_v5 }
  0x11   :  { %9 = vsyncpa [#allocation3], 0  ;;  %v567_v8 = vld [vmem:[%s707_s1 + $0x30] sm:$0xff]   ;;  %v568_v9 = vld [vmem:[%s707_s1 + $0x38] sm:$0xff]  }
  0x12   :  { %v570_v10 = vld [vmem:[%s706_s0 + $0x8] sm:$0xff]   ;;  %v571_v12 = vld [vmem:[%s706_s0 + $0x10] sm:$0xff]   ;;  %v572_v14 = vld [vmem:[%s706_s0 + $0x18] sm:$0xff]  }
  0x13   :  { %521 = vmatpush3.bf16.msra.mxu0 %v565_v5  ;;  %556 = vmatpush3.bf16.msra.mxu1 %v565_v5  ;;  %v574_v11 = vld [vmem:[%s706_s0 + $0x28] sm:$0xff]   ;;  %v575_v13 = vld [vmem:[%s706_s0 + $0x30] sm:$0xff]   ;;  %v576_v15 = vld [vmem:[%s706_s0 + $0x38] sm:$0xff]  }
  0x14   :  { %522 = vmatprep.subr.bf16.mxu0 %v566_v7  ;;  %549 = vmatprep.subr.bf16.mxu1 %v566_v7 }
  0x17   :  { %523 = vmatpush3.bf16.msra.mxu0 %v566_v7  ;;  %557 = vmatpush3.bf16.msra.mxu1 %v566_v7 }
  0x18   :  { %524 = vmatprep.subr.bf16.mxu0 %v567_v8  ;;  %550 = vmatprep.subr.bf16.mxu1 %v567_v8 }
  0x1b   :  { %525 = vmatpush3.bf16.msra.mxu0 %v567_v8  ;;  %558 = vmatpush3.bf16.msra.mxu1 %v567_v8 }
  0x1c   :  { %526 = vmatprep.subr.bf16.mxu0 %v568_v9  ;;  %551 = vmatprep.subr.bf16.mxu1 %v568_v9 }
  0x1f   :  { %527 = vmatpush3.bf16.msra.mxu0 %v568_v9  ;;  %559 = vmatpush3.bf16.msra.mxu1 %v568_v9 }
  0x22   :  { %529 = vmatmul.mubr.bf16.vlgmr.msra.gmra.mrb[0].mxu0 %v570_v10  ;;  %537 = vmatmul.mubr.bf16.vlgmr.msra.gmra.mrb[0].mxu1 %v574_v11 }
  0x23   :  { %532 = vmatprep.mubr.bf16.mxu0 %v571_v12  ;;  %540 = vmatprep.mubr.bf16.mxu1 %v575_v13 }
  0x2a   :  { %533 = vmatmul.mubr.bf16.gmra.mrb[4].mxu0 %v572_v14  ;;  %541 = vmatmul.mubr.bf16.gmra.mrb[4].mxu1 %v576_v15 }
  0xf5   :  { %v530_v16 = vpop.f32.mrb[0].mxu0  ;;  %v538_v17 = vpop.f32.mrb[0].mxu1 }
  0xf6   :  { %v177_v18 = vpop.f32.mrb[1].mxu0  ;;  %v209_v19 = vpop.f32.mrb[1].mxu1  ;;  %v343_v31 = vmul.f32 %v530_v16, %v530_v16  ;;  %v351_v3 = vmul.f32 %v538_v17, %v538_v17 }
  0xf7   :  { %v531_v20 = vpop.f32.mrb[2].mxu0  ;;  %v539_v21 = vpop.f32.mrb[2].mxu1  ;;  %v341_v22 = vmul.f32 %v177_v18, %v177_v18  ;;  %v349_v61 = vmul.f32 %v209_v19, %v209_v19 }
  0xf8   :  { %v457_v23 = vpack.c.bf16 %v531_v20, %v530_v16  ;;  %v180_v24 = vpop.f32.mrb[3].mxu0  ;;  %v477_v25 = vpack.c.bf16 %v539_v21, %v538_v17  ;;  %v212_v26 = vpop.f32.mrb[3].mxu1  ;;  %v344_v34 = vmul.f32 %v531_v20, %v531_v20  ;;  %v352_v6 = vmul.f32 %v539_v21, %v539_v21 }
  0xf9   :  { %v452_v27 = vpack.c.bf16 %v180_v24, %v177_v18  ;;  %v320_v28 = vadd.f32 %v180_v24, %v177_v18  ;;  %v342_v29 = vmul.f32 %v180_v24, %v180_v24  ;;  %v472_v30 = vpack.c.bf16 %v212_v26, %v209_v19 }
  0xfa   :  { %489 = vst [vmem:[%s708_s2 + $0x8] sm:$0xff] %v457_v23   ;;  %493 = vst [vmem:[%s708_s2 + $0x28] sm:$0xff] %v477_v25   ;;  %v350_v2 = vmul.f32 %v212_v26, %v212_v26 }
  0xfb   :  { %453 = vst [vmem:[%s708_s2] sm:$0xff] %v452_v27   ;;  %v321_v32 = vadd.f32 %v530_v16, %v320_v28  ;;  %v357_v33 = vadd.f32 %v342_v29, %v341_v22  ;;  %492 = vst [vmem:[%s708_s2 + $0x20] sm:$0xff] %v472_v30  }
  0xfd   :  { %v358_v35 = vadd.f32 %v357_v33, %v343_v31  ;;  %v534_v36 = vpop.f32.mrb[4].mxu0  ;;  %v322_v37 = vadd.f32 %v531_v20, %v321_v32  ;;  %v542_v38 = vpop.f32.mrb[4].mxu1 }
  0xfe   :  { %v193_v39 = vpop.f32.mrb[5].mxu0  ;;  %v225_v40 = vpop.f32.mrb[5].mxu1  ;;  %v347_v55 = vmul.f32 %v534_v36, %v534_v36  ;;  %v355_v15 = vmul.f32 %v542_v38, %v542_v38 }
  0xff   :  { %v323_v41 = vadd.f32 %v322_v37, %v193_v39  ;;  %v345_v42 = vmul.f32 %v193_v39, %v193_v39  ;;  %v359_v43 = vadd.f32 %v358_v35, %v344_v34  ;;  %v535_v44 = vpop.f32.mrb[6].mxu0  ;;  %v543_v45 = vpop.f32.mrb[6].mxu1  ;;  %v353_v9 = vmul.f32 %v225_v40, %v225_v40 }
 0x100   :  { %v467_v46 = vpack.c.bf16 %v535_v44, %v534_v36  ;;  %v196_v47 = vpop.f32.mrb[7].mxu0  ;;  %v487_v48 = vpack.c.bf16 %v543_v45, %v542_v38  ;;  %v228_v49 = vpop.f32.mrb[7].mxu1  ;;  %v348_v58 = vmul.f32 %v535_v44, %v535_v44 }
 0x101   :  { %v360_v50 = vadd.f32 %v359_v43, %v345_v42  ;;  %v462_v51 = vpack.c.bf16 %v196_v47, %v193_v39  ;;  %v324_v52 = vadd.f32 %v323_v41, %v196_v47  ;;  %v346_v53 = vmul.f32 %v196_v47, %v196_v47 }
 0x102   :  { %491 = vst [vmem:[%s708_s2 + $0x18] sm:$0xff] %v467_v46   ;;  %495 = vst [vmem:[%s708_s2 + $0x38] sm:$0xff] %v487_v48   ;;  %v482_v54 = vpack.c.bf16 %v228_v49, %v225_v40  ;;  %v354_v14 = vmul.f32 %v228_v49, %v228_v49 }
 0x103   :  { %490 = vst [vmem:[%s708_s2 + $0x10] sm:$0xff] %v462_v51   ;;  %v325_v56 = vadd.f32 %v534_v36, %v324_v52  ;;  %v361_v57 = vadd.f32 %v360_v50, %v346_v53 }
 0x104   :  { %494 = vst [vmem:[%s708_s2 + $0x30] sm:$0xff] %v482_v54   ;;  %s601_s2 = smov [#allocation2]  }
 0x105   :  { %v362_v59 = vadd.f32 %v361_v57, %v347_v55  ;;  %v326_v60 = vadd.f32 %v535_v44, %v325_v56  ;;  %s391_s4 = sshll.u32 %s601_s2, 4  ;;  %s392_s4 = int_to_ptr.vmem [resolvable:$true] %s391_s4 }
 0x106   :  { %s577_s5 = scalar_lea.vmem %s392_s4, 32  ;;  %p582_p1 = scmp.lt.s32.totalorder %s392_s4, %s392_s4 }
 0x107   :  { %v327_v62 = vadd.f32 %v326_v60, %v209_v19  ;;  %v363_v63 = vadd.f32 %v362_v59, %v348_v58  ;;  %v356_v19 = vmul.f32 %v543_v45, %v543_v45  ;;  %p578_p0 = scmp.ne.s32.totalorder %s392_s4, %s577_s5  ;;  %p583_p2 = scmp.lt.s32.totalorder %s577_s5, %s577_s5 }
 0x109   :  { %v364_v0 = vadd.f32 %v363_v63, %v349_v61  ;;  %v328_v1 = vadd.f32 %v327_v62, %v212_v26  ;;  %v378_v26 = vlaneseq  ;;  %p584_p3 = por %p583_p2, %p582_p1 }
 0x10b   :  { %v329_v4 = vadd.f32 %v538_v17, %v328_v1  ;;  %v365_v5 = vadd.f32 %v364_v0, %v350_v2  ;;  %v379_v30 = vshrl.u32 %v378_v26, 7  ;;  %p585_p4 = pnand %p584_p3, %p578_p0 }
 0x10d   :  { %v366_v7 = vadd.f32 %v365_v5, %v351_v3  ;;  %v330_v8 = vadd.f32 %v539_v21, %v329_v4  ;;  %vm380_vm0 = vcmp.eq.s32.totalorder %v379_v30, 0 }
 0x10f   :  { %v331_v10 = vadd.f32 %v330_v8, %v225_v40  ;;  %v367_v11 = vadd.f32 %v366_v7, %v352_v6 }
 0x111   :  { %v368_v12 = vadd.f32 %v367_v11, %v353_v9  ;;  %v332_v13 = vadd.f32 %v331_v10, %v228_v49 }
 0x113   :  { %v333_v16 = vadd.f32 %v542_v38, %v332_v13  ;;  %v369_v18 = vadd.f32 %v368_v12, %v354_v14 }
 0x115   :  { %v334_v20 = vadd.f32 %v543_v45, %v333_v16  ;;  %v370_v22 = vadd.f32 %v369_v18, %v355_v15 }
 0x117   :  { %v335_v23 = vrot.slane %v334_v20, 4  ;;  %v371_v24 = vadd.f32 %v370_v22, %v356_v19 }
 0x119   :  { %v336_v25 = vadd.f32 %v335_v23, %v334_v20  ;;  %v372_v17 = vrot.slane %v371_v24, 4 }
 0x11b   :  { %v337_v27 = vrot.slane %v336_v25, 2  ;;  %v373_v28 = vadd.f32 %v372_v17, %v371_v24 }
 0x11d   :  { %v338_v21 = vadd.f32 %v337_v27, %v336_v25  ;;  %v374_v29 = vrot.slane %v373_v28, 2 }
 0x11f   :  { %v339_v31 = vrot.slane %v338_v21, 1  ;;  %v375_v32 = vadd.f32 %v374_v29, %v373_v28 }
 0x121   :  { %v376_v33 = vrot.slane %v375_v32, 1  ;;  %v340_v34 = vadd.f32 %v339_v31, %v338_v21 }
 0x123   :  { %v377_v35 = vadd.f32 %v376_v33, %v375_v32 }
 0x125   :  { %v381_v36 = vsel %vm380_vm0, %v340_v34, %v377_v35 }
 0x126   :  { %382 = vst [vmem:[#allocation2] sm:$0x3] %v381_v36 }
 0x127   :  { %588 = shalt.err (!%p585_p4)
}
 0x128   :  { %s589_s8 = scalar_lea.hbm %s709_s3, 32 }
 0x129   :  { %p590_p5 = scmp.ne.s32.totalorder %s709_s3, %s589_s8  ;;  %p593_p6 = scmp.lt.u32.totalorder %s589_s8, %s709_s3 }
 0x12b   :  { %p595_p7 = pnand %p593_p6, %p590_p5 }
 0x12d   :  { %598 = shalt.err (!%p595_p7)
}
 0x12e   :  { %394 = dma.vmem_to_hbm [thread:$0]  %s392_s4, 32, %s709_s3, [#allocation3]  }
 0x12f   :  { %599 = dma.done.wait [#allocation3], 32  }
 0x130   :  { %600 = vsyncadd [#allocation3], 4294967264 }
 0x131   :  { %400 = vsyncpa [#allocation3], 1 }

// kernel: _lambda_.11
= control target key start
LH: loop header
LB: loop body
LE: loop exit
PB: predicated region body
PF: predicated region fallthrough
CT: control target
= control target key end

     0   :  { %s3072_s21 = smov 0   ;;  %s3735_s0 = inlined_call_operand.vmem [shape: bf16[2,10,10,128], index: 0, kind: input, shape index: {}]   ;;  %s3736_s1 = inlined_call_operand.vmem [shape: f32[1,1,128], index: 1, kind: input, shape index: {}]   ;;  %s3737_s2 = inlined_call_operand.vmem [shape: f32[1,1,128], index: 2, kind: input, shape index: {}]   ;;  %s3738_s3 = inlined_call_operand.vmem [shape: bf16[9,128,128], index: 3, kind: input, shape index: {}]   ;;  %s3739_s4 = inlined_call_operand.vmem [shape: bf16[2,8,8,128], index: 4, kind: input, shape index: {}, may-alias: {4,5}]   ;;  %s3740_s5 = inlined_call_operand.vmem [shape: bf16[2,8,8,128], index: 5, kind: output, shape index: {0}, may-alias: {4,5}]   ;;  %s3741_s6 = inlined_call_operand.vmem [shape: f32[2,2,128], index: 6, kind: output, shape index: {1}]  }
   0x1 LB: > { %s2173_s22 = sadd.s32 4294967295, %s3034_s21   ;;  %p2177_p0 = scmp.ge.s32.totalorder %s3034_s21, 1  ;;  %s3034_s21 = sphi %s3072_s21, %s17_s21  }
   0x2   : > { %p225_p1 = scmp.lt.s32.totalorder %s3034_s21, 3 }
   0x4   : > { %p226_p2 = pnand %p2177_p0, %p225_p1 }
   0x5   : > { %v2956_v0 = vld [vmem:[%s3738_s3 + $0x40] sm:$0xff] (!%p226_p2)   ;;  %p264_p3 = scmp.lt.s32.totalorder (!%p226_p2), %s2173_s22, 1  ;;  %v2958_v2 = vld [vmem:[%s3738_s3 + $0x48] sm:$0xff] (!%p226_p2)   ;;  %v418_v4 = vlaneseq (!%p226_p2)  ;;  %v2960_v5 = vld [vmem:[%s3738_s3 + $0x50] sm:$0xff] (!%p226_p2)   ;;  %v3036_v6 = vmov (!%p226_p2), 0.0|0.0   ;;  %vm901_vm5 = vcmask (!%p226_p2), 1042432  }
   0x6   : > { %229 = sbr.rel (%p226_p2) target bundleno = 440 (0x1b8), region = 40  ;;  %v2957_v1 = vld [vmem:[%s3738_s3 + $0x100] sm:$0xff] (!%p226_p2)   ;;  %2650 = vmatprep.subr.bf16.mxu1 (!%p226_p2), %v2956_v0  ;;  %v2959_v3 = vld [vmem:[%s3738_s3 + $0x108] sm:$0xff] (!%p226_p2)   ;;  %v3099_v7 = vcombine.low (!%p226_p2), %v3036_v6, %v3036_v6  ;;  %v2961_v8 = vld [vmem:[%s3738_s3 + $0x110] sm:$0xff] (!%p226_p2)   ;;  %v3112_v11 = vcombine.high (!%p226_p2), %v3036_v6, %v3036_v6  ;;  %vm519_vm2 = vsmask.f32 (!%p226_p2), 3328 }
   0x7   : > { %2746 = vmatprep.subr.bf16.mxu0 (!%p226_p2), %v2957_v1  ;;  %2651 = vmatpush3.bf16.msra.mxu1 (!%p226_p2), %v2956_v0  ;;  %v3105_v9 = vshrl.u32 (!%p226_p2), %v418_v4, 7  ;;  %v2962_v10 = vld [vmem:[%s3738_s3 + $0x58] sm:$0xff] (!%p226_p2)   ;;  %v2964_v18 = vld [vmem:[%s3738_s3 + $0x60] sm:$0xff] (!%p226_p2)   ;;  %v2966_v22 = vld [vmem:[%s3738_s3 + $0x68] sm:$0xff] (!%p226_p2)   ;;  %vm520_vm3 = vsmask.f32 (!%p226_p2), 7440 }
   0x8   : > { %2747 = vmatpush3.bf16.msra.mxu0 (!%p226_p2), %v2957_v1  ;;  %2652 = vmatprep.subr.bf16.mxu1 (!%p226_p2), %v2958_v2  ;;  %v523_v12 = vshrl.u32 (!%p226_p2), %v3099_v7, 16  ;;  %v2963_v13 = vld [vmem:[%s3738_s3 + $0x118] sm:$0xff] (!%p226_p2)   ;;  %v526_v14 = vshll.u32 (!%p226_p2), %v3099_v7, 16  ;;  %v532_v19 = vshll.u32 (!%p226_p2), %v3112_v11, 16  ;;  %v2965_v20 = vld [vmem:[%s3738_s3 + $0x120] sm:$0xff] (!%p226_p2)   ;;  %v2967_v23 = vld [vmem:[%s3738_s3 + $0x128] sm:$0xff] (!%p226_p2)  }
   0x9   : > { %2748 = vmatprep.subr.bf16.mxu0 (!%p226_p2), %v2959_v3  ;;  %v3120_v16 = vadd.s32 (!%p226_p2), 8, %v3105_v9  ;;  %vm421_vm0 = vcmp.ge.s32.totalorder (!%p226_p2), %v3105_v9, 1  ;;  %v3148_v33 = vld [vmem:[%s3736_s1] ss:$0 sm:$0xff] (!%p226_p2)  ;;  %v2968_v35 = vld [vmem:[%s3738_s3 + $0x70] sm:$0xff] (!%p226_p2)   ;;  %vm3162_vm4 = vmor (!%p226_p2), %vm519_vm2, %vm520_vm3  ;;  %vm902_vm6 = vcmask (!%p226_p2), 1046532  }
   0xa   : > { %v525_v15 = vrot.slane (!%p226_p2), %v523_v12, 4  ;;  %v528_v17 = vrot.slane (!%p226_p2), %v526_v14, 5  ;;  %v534_v25 = vrot.slane (!%p226_p2), %v532_v19, 5  ;;  %v3153_v34 = vld [vmem:[%s3737_s2] ss:$0 sm:$0xff] (!%p226_p2)  ;;  %v2969_v47 = vld [vmem:[%s3738_s3 + $0x130] sm:$0xff] (!%p226_p2)   ;;  %vm3430_vm7 = vmor (!%p226_p2), %vm901_vm5, %vm902_vm6 }
   0xb   : > { %2653 = vmatpush3.bf16.msra.mxu1 (!%p226_p2), %v2958_v2  ;;  %vm428_vm1 = vcmp.lt.s32.totalorder (!%p226_p2), %v3120_v16, 9  ;;  %v2970_v61 = vld [vmem:[%s3738_s3 + $0x78] sm:$0xff] (!%p226_p2)   ;;  %v3219_v19 = vld [vmem:[%s3738_s3] sm:$0xff] (!%p226_p2)   ;;  %vm3500_vm8 = vmpackc.low (!%p226_p2), %vm421_vm0, %vm421_vm0  ;;  %vm2072_vm9 = vcmp.eq.s32.totalorder (!%p226_p2), %v3105_v9, 0 }
   0xc   : > { %2749 = vmatpush3.bf16.msra.mxu0 (!%p226_p2), %v2959_v3  ;;  %2654 = vmatprep.subr.bf16.mxu1 (!%p226_p2), %v2960_v5  ;;  %v529_v21 = vor.u32 (!%p226_p2), %v528_v17, %v525_v15  ;;  %v2971_v62 = vld [vmem:[%s3738_s3 + $0x138] sm:$0xff] (!%p226_p2)  }
   0xd   : > { %s3749_s22 = smov (!%p264_p3, %s2173_s22), 1  ;;  %2750 = vmatprep.subr.bf16.mxu0 %v2961_v8 }
   0xe   : > { %s2946_s11 = smul.u32 80, %s3749_s22  ;;  %v530_v24 = vrot.slane %v529_v21, 4  ;;  %s2445_s19 = sshll.u32 %s3749_s22, 5 }
   0xf   : > { %2655 = vmatpush3.bf16.msra.mxu1 %v2960_v5  ;;  %s273_s25 = scalar_lea.vmem %s3739_s4, %s2445_s19  ;;  %s3721_s27 = scalar_lea.vmem %s3740_s5, %s2445_s19 }
  0x10   : > { %2751 = vmatpush3.bf16.msra.mxu0 %v2961_v8  ;;  %2656 = vmatprep.subr.bf16.mxu1 %v2962_v10  ;;  %s3132_s24 = scalar_lea.vmem %s3735_s0, %s2946_s11  ;;  %v3169_v42 = vsel %vm3162_vm4, %v530_v24, %v534_v25  ;;  %v3240_v25 = vld [vmem:[%s3738_s3 + $0x140] sm:$0xff]   ;;  %s2183_s28 = sshll.u32 %s3749_s22, 1 }
  0x11   : > { %2752 = vmatprep.subr.bf16.mxu0 %v2963_v13  ;;  %v286_v26 = vld [vmem:[%s3132_s24 + $0x8] ss:$56 sps:$4 sm:$0xff]   ;;  %v287_v27 = vld [vmem:[%s3132_s24 + $0xc] sm:$0x1]  ;;  %v301_v28 = vld [vmem:[%s3132_s24 + $0x44] sm:$0x1]  ;;  %s282_s7 = scalar_lea.vmem %s3741_s6, %s2183_s28 }
  0x12   : > { %v306_v29 = vunpack.c.l.bf16 %v286_v26  ;;  %v307_v30 = vunpack.c.l.bf16 %v287_v27  ;;  %v320_v31 = vunpack.c.h.bf16 %v286_v26  ;;  %v321_v32 = vunpack.c.l.bf16 %v301_v28  ;;  %v288_v41 = vld [vmem:[%s3132_s24 + $0x10] ss:$8 sps:$4 sm:$0xff]   ;;  %v289_v43 = vld [vmem:[%s3132_s24 + $0x14] sm:$0x1]  ;;  %v291_v44 = vld [vmem:[%s3132_s24 + $0x1c] sm:$0x1] }
  0x13   : > { %2657 = vmatpush3.bf16.msra.mxu1 %v2962_v10  ;;  %v308_v45 = vunpack.c.l.bf16 %v288_v41  ;;  %v310_v46 = vunpack.c.h.bf16 %v288_v41  ;;  %v3181_v52 = vld [vmem:[%s3132_s24 + $0x20] ss:$8 sps:$4 sm:$0xff]   ;;  %v309_v53 = vunpack.c.l.bf16 %v289_v43  ;;  %v311_v54 = vunpack.c.l.bf16 %v291_v44 }
  0x14   : > { %2753 = vmatpush3.bf16.msra.mxu0 %v2963_v13  ;;  %2658 = vmatprep.subr.bf16.mxu1 %v2964_v18  ;;  %v333_v36 = vmul.f32 %v3148_v33, %v306_v29  ;;  %v334_v37 = vmul.f32 %v3148_v33, %v307_v30  ;;  %v347_v38 = vmul.f32 %v3148_v33, %v320_v31  ;;  %v312_v60 = vunpack.c.l.bf16 %v3181_v52 }
  0x15   : > { %2754 = vmatprep.subr.bf16.mxu0 %v2965_v20  ;;  %v348_v39 = vmul.f32 %v3148_v33, %v321_v32  ;;  %v335_v55 = vmul.f32 %v3148_v33, %v308_v45  ;;  %v337_v56 = vmul.f32 %v3148_v33, %v310_v46  ;;  %v336_v0 = vmul.f32 %v3148_v33, %v309_v53 }
  0x16   : > { %v360_v48 = vadd.f32 %v3153_v34, %v333_v36  ;;  %v361_v49 = vadd.f32 %v3153_v34, %v334_v37  ;;  %v374_v50 = vadd.f32 %v3153_v34, %v347_v38  ;;  %v338_v1 = vmul.f32 %v3148_v33, %v311_v54 }
  0x17   : > { %2659 = vmatpush3.bf16.msra.mxu1 %v2964_v18  ;;  %v375_v51 = vadd.f32 %v3153_v34, %v348_v39  ;;  %v362_v2 = vadd.f32 %v3153_v34, %v335_v55  ;;  %v364_v8 = vadd.f32 %v3153_v34, %v337_v56  ;;  %v363_v12 = vadd.f32 %v3153_v34, %v336_v0  ;;  %v293_v0 = vld [vmem:[%s3132_s24 + $0x24] sm:$0x1] }
  0x18   : > { %2755 = vmatpush3.bf16.msra.mxu0 %v2965_v20  ;;  %2660 = vmatprep.subr.bf16.mxu1 %v2966_v22  ;;  %v380_v57 = vmul.f32 0.1, %v360_v48  ;;  %v381_v58 = vmul.f32 0.1, %v361_v49  ;;  %v394_v59 = vmul.f32 0.1, %v374_v50  ;;  %v365_v13 = vadd.f32 %v3153_v34, %v338_v1 }
  0x19   : > { %2756 = vmatprep.subr.bf16.mxu0 %v2967_v23  ;;  %v395_v63 = vmul.f32 0.1, %v375_v51  ;;  %v382_v14 = vmul.f32 0.1, %v362_v2  ;;  %v384_v20 = vmul.f32 0.1, %v364_v8 }
  0x1a   : > { %v3195_v3 = vmax.f32 %v360_v48, %v380_v57  ;;  %v401_v4 = vmax.f32 %v361_v49, %v381_v58  ;;  %v3197_v5 = vmax.f32 %v374_v50, %v394_v59  ;;  %v383_v27 = vmul.f32 0.1, %v363_v12 }
  0x1b   : > { %2661 = vmatpush3.bf16.msra.mxu1 %v2966_v22  ;;  %v415_v10 = vmax.f32 %v375_v51, %v395_v63  ;;  %v385_v28 = vmul.f32 0.1, %v365_v13  ;;  %v3246_v29 = vmax.f32 %v362_v2, %v382_v14  ;;  %v3254_v39 = vmax.f32 %v364_v8, %v384_v20  ;;  %v295_v20 = vld [vmem:[%s3132_s24 + $0x2c] sm:$0x1] }
  0x1c   : > { %2757 = vmatpush3.bf16.msra.mxu0 %v2967_v23  ;;  %2662 = vmatprep.subr.bf16.mxu1 %v2968_v35  ;;  %v3205_v15 = vsel %vm421_vm0, %v3195_v3, 0.0  ;;  %v3209_v17 = vsel %vm428_vm1, %v401_v4, 0.0  ;;  %v3214_v18 = vsel %vm421_vm0, %v3197_v5, 0.0  ;;  %v403_v38 = vmax.f32 %v363_v12, %v383_v27 }
  0x1d   : > { %2758 = vmatprep.subr.bf16.mxu0 %v2969_v47  ;;  %v3223_v21 = vsel %vm428_vm1, %v415_v10, 0.0  ;;  %v3227_v22 = vpack.c.bf16 %v3205_v15, %v3205_v15  ;;  %v3231_v23 = vpack.c.bf16 %v3209_v17, %v3209_v17  ;;  %v3235_v24 = vpack.c.bf16 %v3214_v18, %v3214_v18 }
  0x1e   : > { %v3244_v26 = vpack.c.bf16 %v3223_v21, %v3223_v21  ;;  %v405_v48 = vmax.f32 %v365_v13, %v385_v28  ;;  %v437_v49 = vsel %vm421_vm0, %v3246_v29, 0.0  ;;  %v438_v51 = vsel %vm428_vm1, %v403_v38, 0.0  ;;  %v296_v38 = vld [vmem:[%s3132_s24 + $0x30] ss:$8 sps:$4 sm:$0xff]  }
  0x1f   : > { %2663 = vmatpush3.bf16.msra.mxu1 %v2968_v35  ;;  %v537_v30 = vshrl.u32 %v3227_v22, 16  ;;  %v540_v31 = vshll.u32 %v3227_v22, 16  ;;  %v546_v32 = vshll.u32 %v3231_v23, 16  ;;  %v1242_v35 = vshrl.u32 %v3235_v24, 16 }
  0x20   : > { %2759 = vmatpush3.bf16.msra.mxu0 %v2969_v47  ;;  %2664 = vmatprep.subr.bf16.mxu1 %v2970_v61  ;;  %v1245_v36 = vshll.u32 %v3235_v24, 16  ;;  %v1251_v37 = vshll.u32 %v3244_v26, 16  ;;  %v439_v53 = vsel %vm421_vm0, %v3254_v39, 0.0  ;;  %v3266_v54 = vpack.c.bf16 %v437_v49, %v437_v49 }
  0x21   : > { %2760 = vmatprep.subr.bf16.mxu0 %v2971_v62  ;;  %v539_v41 = vrot.slane %v537_v30, 4  ;;  %v542_v43 = vrot.slane %v540_v31, 5  ;;  %v548_v44 = vrot.slane %v546_v32, 5  ;;  %v1244_v45 = vrot.slane %v1242_v35, 4 }
  0x22   : > { %v1247_v46 = vrot.slane %v1245_v36, 5  ;;  %v1253_v47 = vrot.slane %v1251_v37, 5  ;;  %v440_v56 = vsel %vm428_vm1, %v405_v48, 0.0  ;;  %v3270_v57 = vpack.c.bf16 %v438_v51, %v438_v51 }
  0x23   : > { %2665 = vmatpush3.bf16.msra.mxu1 %v2970_v61  ;;  %v543_v50 = vor.u32 %v542_v43, %v539_v41  ;;  %v3272_v58 = vpack.c.bf16 %v439_v53, %v439_v53  ;;  %v3274_v61 = vpack.c.bf16 %v440_v56, %v440_v56  ;;  %v554_v63 = vshll.u32 %v3266_v54, 16  ;;  %v297_v41 = vld [vmem:[%s3132_s24 + $0x34] sm:$0x1] }
  0x24   : > { %2761 = vmatpush3.bf16.msra.mxu0 %v2971_v62  ;;  %2674 = vmatprep.subr.bf16.mxu1 %v3219_v19  ;;  %v1248_v55 = vor.u32 %v1247_v46, %v1244_v45  ;;  %v551_v62 = vshrl.u32 %v3266_v54, 16  ;;  %v560_v2 = vshll.u32 %v3270_v57, 16  ;;  %v313_v43 = vunpack.c.l.bf16 %v293_v0 }
  0x25   : > { %2770 = vmatprep.subr.bf16.mxu0 %v3240_v25  ;;  %v544_v59 = vrot.slane %v543_v50, 4  ;;  %v565_v4 = vshrl.u32 %v3272_v58, 16  ;;  %v568_v8 = vshll.u32 %v3272_v58, 16  ;;  %v556_v13 = vrot.slane %v554_v63, 5 }
  0x26   : > { %v1249_v1 = vrot.slane %v1248_v55, 4  ;;  %v553_v12 = vrot.slane %v551_v62, 4  ;;  %v574_v14 = vshll.u32 %v3274_v61, 16  ;;  %v562_v30 = vrot.slane %v560_v2, 5 }
  0x27   : > { %v549_v10 = vsel %vm3162_vm4, %v544_v59, %v548_v44  ;;  %v567_v31 = vrot.slane %v565_v4, 4  ;;  %v570_v36 = vrot.slane %v568_v8, 5  ;;  %v339_v44 = vmul.f32 %v3148_v33, %v312_v60 }
  0x28   : > { %v2218_v27 = vcombine.low %v3169_v42, %v549_v10  ;;  %v3289_v28 = vsel %vm3162_vm4, %v1249_v1, %v1253_v47  ;;  %v557_v35 = vor.u32 %v556_v13, %v553_v12  ;;  %v576_v37 = vrot.slane %v574_v14, 5  ;;  %v299_v14 = vld [vmem:[%s3132_s24 + $0x3c] sm:$0x1] }
  0x29   : > { %v2408_v32 = vcombine.low %v3289_v28, %v3169_v42  ;;  %v314_v45 = vunpack.c.h.bf16 %v3181_v52  ;;  %v315_v46 = vunpack.c.l.bf16 %v295_v20  ;;  %v571_v48 = vor.u32 %v570_v36, %v567_v31 }
  0x2a   : > { %2666 = vmatprep.mubr.bf16.mxu1 %v2218_v27  ;;  %v558_v47 = vrot.slane %v557_v35, 4  ;;  %v316_v49 = vunpack.c.l.bf16 %v296_v38  ;;  %v317_v50 = vunpack.c.l.bf16 %v297_v41  ;;  %v340_v51 = vmul.f32 %v3148_v33, %v313_v43 }
  0x2b   : > { %v366_v53 = vadd.f32 %v3153_v34, %v339_v44  ;;  %v341_v55 = vmul.f32 %v3148_v33, %v314_v45  ;;  %v342_v56 = vmul.f32 %v3148_v33, %v315_v46  ;;  %v572_v60 = vrot.slane %v571_v48, 4 }
  0x2c   : > { %v563_v59 = vsel %vm3162_vm4, %v558_v47, %v562_v30  ;;  %v343_v52 = vmul.f32 %v3148_v33, %v316_v49  ;;  %v344_v62 = vmul.f32 %v3148_v33, %v317_v50  ;;  %v367_v0 = vadd.f32 %v3153_v34, %v340_v51  ;;  %v2974_v30 = vld [vmem:[%s3738_s3 + $0x8] sm:$0xff]   ;;  %v2976_v51 = vld [vmem:[%s3738_s3 + $0x10] sm:$0xff]  }
  0x2d   : > { %v2324_v63 = vcombine.low %v549_v10, %v563_v59  ;;  %v386_v1 = vmul.f32 0.1, %v366_v53  ;;  %v368_v2 = vadd.f32 %v3153_v34, %v341_v55  ;;  %v3311_v4 = vsel %vm3162_vm4, %v572_v60, %v576_v37 }
  0x2e   : > { %v369_v8 = vadd.f32 %v3153_v34, %v342_v56  ;;  %v370_v12 = vadd.f32 %v3153_v34, %v343_v52  ;;  %v371_v13 = vadd.f32 %v3153_v34, %v344_v62  ;;  %v3318_v20 = vcombine.low %v563_v59, %v3311_v4 }
  0x2f   : > { %2762 = vmatprep.mubr.bf16.mxu0 %v2324_v63  ;;  %v387_v10 = vmul.f32 0.1, %v367_v0  ;;  %v3320_v27 = vmax.f32 %v366_v53, %v386_v1  ;;  %v388_v31 = vmul.f32 0.1, %v368_v2  ;;  %v318_v41 = vunpack.c.h.bf16 %v296_v38 }
  0x30   : > { %v389_v35 = vmul.f32 0.1, %v369_v8  ;;  %v390_v36 = vmul.f32 0.1, %v370_v12  ;;  %v391_v37 = vmul.f32 0.1, %v371_v13  ;;  %2667 = vmatmul.mubr.bf16.vlgmr.msra.gmra.mrb[0].mxu1 %v3318_v20  ;;  %v319_v46 = vunpack.c.l.bf16 %v299_v14 }
  0x31   : > { %v407_v43 = vmax.f32 %v367_v0, %v387_v10  ;;  %v441_v44 = vsel %vm421_vm0, %v3320_v27, 0.0  ;;  %v3329_v45 = vmax.f32 %v368_v2, %v388_v31  ;;  %2675 = vmatpush3.bf16.msra.mxu1 %v3219_v19  ;;  %v345_v19 = vmul.f32 %v3148_v33, %v318_v41 }
  0x32   : > { %v3332_v47 = vpack.c.bf16 %v441_v44, %v441_v44  ;;  %v409_v48 = vmax.f32 %v369_v8, %v389_v35  ;;  %v3334_v49 = vmax.f32 %v370_v12, %v390_v36  ;;  %v411_v50 = vmax.f32 %v371_v13, %v391_v37  ;;  %2676 = vmatprep.subr.bf16.mxu1 %v2974_v30  ;;  %v2978_v13 = vld [vmem:[%s3738_s3 + $0x18] sm:$0xff]  }
  0x33   : > { %v442_v38 = vsel %vm428_vm1, %v407_v43, 0.0  ;;  %v443_v53 = vsel %vm421_vm0, %v3329_v45, 0.0  ;;  %v346_v55 = vmul.f32 %v3148_v33, %v319_v46 }
  0x34   : > { %v3346_v56 = vpack.c.bf16 %v442_v38, %v442_v38  ;;  %v579_v59 = vshrl.u32 %v3332_v47, 16  ;;  %v582_v60 = vshll.u32 %v3332_v47, 16  ;;  %v444_v52 = vsel %vm428_vm1, %v409_v48, 0.0 }
  0x35   : > { %v3352_v62 = vpack.c.bf16 %v443_v53, %v443_v53  ;;  %v3354_v63 = vpack.c.bf16 %v444_v52, %v444_v52  ;;  %v445_v0 = vsel %vm421_vm0, %v3334_v49, 0.0  ;;  %v446_v33 = vsel %vm428_vm1, %v411_v50, 0.0  ;;  %2677 = vmatpush3.bf16.msra.mxu1 %v2974_v30 }
  0x36   : > { %v581_v1 = vrot.slane %v579_v59, 4  ;;  %v584_v2 = vrot.slane %v582_v60, 5  ;;  %v588_v8 = vshll.u32 %v3346_v56, 16  ;;  %v3362_v12 = vpack.c.bf16 %v445_v0, %v445_v0  ;;  %2678 = vmatprep.subr.bf16.mxu1 %v2976_v51  ;;  %v2980_v59 = vld [vmem:[%s3738_s3 + $0x20] sm:$0xff]  }
  0x37   : > { %v593_v14 = vshrl.u32 %v3352_v62, 16  ;;  %v596_v10 = vshll.u32 %v3352_v62, 16  ;;  %v602_v31 = vshll.u32 %v3354_v63, 16  ;;  %v3370_v35 = vpack.c.bf16 %v446_v33, %v446_v33 }
  0x38   : > { %v585_v36 = vor.u32 %v584_v2, %v581_v1  ;;  %v590_v37 = vrot.slane %v588_v8, 5  ;;  %v607_v41 = vshrl.u32 %v3362_v12, 16  ;;  %v610_v30 = vshll.u32 %v3362_v12, 16 }
  0x39   : > { %v595_v43 = vrot.slane %v593_v14, 4  ;;  %v598_v44 = vrot.slane %v596_v10, 5  ;;  %v616_v46 = vshll.u32 %v3370_v35, 16  ;;  %2679 = vmatpush3.bf16.msra.mxu1 %v2976_v51  ;;  %v372_v53 = vadd.f32 %v3153_v34, %v345_v19  ;;  %v2975_v19 = vld [vmem:[%s3738_s3 + $0x148] sm:$0xff]  }
  0x3a   : > { %v586_v48 = vrot.slane %v585_v36, 4  ;;  %v609_v50 = vrot.slane %v607_v41, 4  ;;  %v612_v38 = vrot.slane %v610_v30, 5  ;;  %2680 = vmatprep.subr.bf16.mxu1 %v2978_v13  ;;  %v604_v52 = vrot.slane %v602_v31, 5  ;;  %v2977_v30 = vld [vmem:[%s3738_s3 + $0x150] sm:$0xff]  }
  0x3b   : > { %v599_v60 = vor.u32 %v598_v44, %v595_v43  ;;  %v373_v0 = vadd.f32 %v3153_v34, %v346_v55  ;;  %v618_v2 = vrot.slane %v616_v46, 5  ;;  %v392_v8 = vmul.f32 0.1, %v372_v53  ;;  %v2982_v34 = vld [vmem:[%s3738_s3 + $0x28] sm:$0xff]  }
  0x3c   : > { %v591_v33 = vsel %vm3162_vm4, %v586_v48, %v590_v37  ;;  %v613_v1 = vor.u32 %v612_v38, %v609_v50  ;;  %v2979_v48 = vld [vmem:[%s3738_s3 + $0x158] sm:$0xff]   ;;  %v2984_v50 = vld [vmem:[%s3738_s3 + $0x30] sm:$0xff]  }
  0x3d   : > { %v2325_v51 = vcombine.low %v3311_v4, %v591_v33  ;;  %v600_v14 = vrot.slane %v599_v60, 4  ;;  %v393_v10 = vmul.f32 0.1, %v373_v0  ;;  %2681 = vmatpush3.bf16.msra.mxu1 %v2978_v13  ;;  %v3386_v41 = vmax.f32 %v372_v53, %v392_v8 }
  0x3e   : > { %v614_v36 = vrot.slane %v613_v1, 4  ;;  %2682 = vmatprep.subr.bf16.mxu1 %v2980_v59  ;;  %v2244_v1 = vrot.slane %v3266_v54, 9 }
  0x3f   : > { %2763 = vmatmul.mubr.bf16.vlgmr.msra.gmra.mrb[0].mxu0 %v2325_v51  ;;  %v605_v55 = vsel %vm3162_vm4, %v600_v14, %v604_v52  ;;  %v413_v4 = vmax.f32 %v373_v0, %v393_v10  ;;  %v447_v37 = vsel %vm421_vm0, %v3386_v41, 0.0  ;;  %v2986_v52 = vld [vmem:[%s3738_s3 + $0x38] sm:$0xff]   ;;  %v2243_v0 = vrot.slane %v3227_v22, 9 }
  0x40   : > { %2771 = vmatpush3.bf16.msra.mxu0 %v3240_v25  ;;  %v3394_v31 = vcombine.low %v591_v33, %v605_v55  ;;  %v619_v13 = vsel %vm3162_vm4, %v614_v36, %v618_v2  ;;  %v3406_v46 = vpack.c.bf16 %v447_v37, %v447_v37  ;;  %v910_v33 = vrot.slane %v3231_v23, 5  ;;  %v2981_v23 = vld [vmem:[%s3738_s3 + $0x160] sm:$0xff]   ;;  %v2995_v14 = vld [vmem:[%s3738_s3 + $0x198] sm:$0xff]  }
  0x41   : > { %2772 = vmatprep.subr.bf16.mxu0 %v2975_v19  ;;  %v2326_v43 = vcombine.low %v605_v55, %v619_v13  ;;  %v448_v44 = vsel %vm428_vm1, %v413_v4, 0.0  ;;  %2683 = vmatpush3.bf16.msra.mxu1 %v2980_v59  ;;  %v914_v2 = vrot.slane %v3270_v57, 5  ;;  %v2336_v22 = vrot.slane %v3235_v24, 9 }
  0x42   : > { %2670 = vmatprep.mubr.bf16.mxu1 %v3394_v31  ;;  %v3409_v25 = vpack.c.bf16 %v448_v44, %v448_v44  ;;  %2684 = vmatprep.subr.bf16.mxu1 %v2982_v34  ;;  %v621_v16 = vshrl.u32 %v3406_v46, 16  ;;  %v624_v38 = vshll.u32 %v3406_v46, 16  ;;  %v1404_v57 = vrot.slane %v3244_v26, 5 }
  0x43   : > { %2766 = vmatprep.mubr.bf16.mxu0 %v2326_v43  ;;  %v2242_v10 = vrot.slane %v3099_v7, 9  ;;  %v3449_v24 = vsel %vm3430_vm7, %v2244_v1, %v914_v2  ;;  %v906_v36 = vrot.slane %v3112_v11, 5  ;;  %v2983_v11 = vld [vmem:[%s3738_s3 + $0x168] sm:$0xff]   ;;  %v2481_v43 = vpack.c.bf16 %v3320_v27, %v3254_v39 }
  0x44   : > { %2773 = vmatpush3.bf16.msra.mxu0 %v2975_v19  ;;  %v630_v53 = vshll.u32 %v3409_v25, 16  ;;  %v623_v59 = vrot.slane %v621_v16, 4  ;;  %v626_v60 = vrot.slane %v624_v38, 5  ;;  %v454_v19 = vpack.c.bf16 %v3209_v17, %v3205_v15  ;;  %v2988_v15 = vld [vmem:[%s3738_s3 + $0x80] sm:$0xff]   ;;  %v2990_v38 = vld [vmem:[%s3738_s3 + $0x88] sm:$0xff]  }
  0x45   : > { %2774 = vmatprep.subr.bf16.mxu0 %v2977_v30  ;;  %2685 = vmatpush3.bf16.msra.mxu1 %v2982_v34  ;;  %v3445_v17 = vsel %vm3430_vm7, %v2243_v0, %v910_v33  ;;  %v3460_v4 = vsel %vm3430_vm7, %v2336_v22, %v1404_v57  ;;  %v3464_v37 = vsel %vm3430_vm7, %v2242_v10, %v906_v36  ;;  %v2246_v33 = vrot.slane %v3332_v47, 9  ;;  %v2994_v22 = vld [vmem:[%s3738_s3 + $0x98] sm:$0xff]   ;;  %v2991_v57 = vld [vmem:[%s3738_s3 + $0x188] sm:$0xff]   ;;  %v2993_v36 = vld [vmem:[%s3738_s3 + $0x190] sm:$0xff]  }
  0x46   : > { %2686 = vmatprep.subr.bf16.mxu1 %v2984_v50  ;;  %v627_v8 = vor.u32 %v626_v60, %v623_v59  ;;  %v632_v51 = vrot.slane %v630_v53, 5  ;;  %v2230_v7 = vcombine.low %v3036_v6, %v454_v19  ;;  %v2353_v40 = vcombine.low %v3445_v17, %v3449_v24  ;;  %v2987_v53 = vld [vmem:[%s3738_s3 + $0x178] sm:$0xff]  }
  0x47   : > { %v2484_v44 = vpack.c.bf16 %v3334_v49, %v3329_v45  ;;  %v3487_v16 = vpack.c.bf16 %v3254_v39, %v3246_v29  ;;  %v2245_v59 = vrot.slane %v3272_v58, 9  ;;  %v918_v60 = vrot.slane %v3274_v61, 5  ;;  %v3023_v39 = vld [vmem:[%s3738_s3 + $0x218] sm:$0xff]  }
  0x48   : > { %2775 = vmatpush3.bf16.msra.mxu0 %v2977_v30  ;;  %v628_v54 = vrot.slane %v627_v8, 4  ;;  %v2478_v30 = vpack.c.bf16 %v3246_v29, %v3195_v3  ;;  %v3506_v0 = vpack.c.bf16 %v3329_v45, %v3320_v27  ;;  %v922_v1 = vrot.slane %v3346_v56, 5  ;;  %v3016_v3 = vld [vmem:[%s3738_s3 + $0xf0] sm:$0xff]   ;;  %v3018_v29 = vld [vmem:[%s3738_s3 + $0xf8] sm:$0xff]   ;;  %v3024_v27 = vld [vmem:[%s3738_s3 + $0x220] sm:$0xff]  }
  0x49   : > { %2776 = vmatprep.subr.bf16.mxu0 %v2979_v48  ;;  %2687 = vmatpush3.bf16.msra.mxu1 %v2984_v50  ;;  %v2985_v50 = vld [vmem:[%s3738_s3 + $0x170] sm:$0xff]   ;;  %v2247_v58 = vrot.slane %v3352_v62, 9  ;;  %v926_v61 = vrot.slane %v3354_v63, 5  ;;  %v2248_v2 = vrot.slane %v3362_v12, 9  ;;  %v930_v8 = vrot.slane %v3370_v35, 5  ;;  %v2989_v63 = vld [vmem:[%s3738_s3 + $0x180] sm:$0xff]  }
  0x4a   : > { %v633_v26 = vsel %vm3162_vm4, %v628_v54, %v632_v51  ;;  %2688 = vmatprep.subr.bf16.mxu1 %v2986_v52  ;;  %v919_v47 = vsel %vm3430_vm7, %v2245_v59, %v918_v60  ;;  %v923_v56 = vsel %vm3430_vm7, %v2246_v33, %v922_v1  ;;  %v2992_v62 = vld [vmem:[%s3738_s3 + $0x90] sm:$0xff]   ;;  %v3538_v51 = vpack.c.bf16 %v3386_v41, %v3334_v49  ;;  %v3006_v59 = vld [vmem:[%s3738_s3 + $0xc8] sm:$0xff]   ;;  %v3003_v60 = vld [vmem:[%s3738_s3 + $0x1b8] sm:$0xff]  }
  0x4b   : > { %v3455_v34 = vcombine.low %v619_v13, %v633_v26  ;;  %v2327_v55 = vcombine.low %v633_v26, %v3289_v28  ;;  %v2434_v13 = vcombine.low %v3460_v4, %v3464_v37  ;;  %v927_v12 = vsel %vm3430_vm7, %v2247_v58, %v926_v61  ;;  %v2998_v26 = vld [vmem:[%s3738_s3 + $0xa8] sm:$0xff]   ;;  %v3005_v33 = vld [vmem:[%s3738_s3 + $0x1c0] sm:$0xff]   ;;  %v3010_v58 = vld [vmem:[%s3738_s3 + $0xd8] sm:$0xff]  }
  0x4c   : > { %2777 = vmatpush3.bf16.msra.mxu0 %v2979_v48  ;;  %v2487_v48 = vpack.c.bf16 %v3197_v5, %v3386_v41  ;;  %v3534_v35 = vsel %vm3430_vm7, %v2248_v2, %v930_v8  ;;  %v2354_v19 = vcombine.low %v919_v47, %v923_v56  ;;  %v934_v54 = vrot.slane %v3409_v25, 5  ;;  %v3007_v61 = vld [vmem:[%s3738_s3 + $0x1c8] sm:$0xff]   ;;  %v3012_v8 = vld [vmem:[%s3738_s3 + $0xe0] sm:$0xff]   ;;  %v3026_v45 = vld [vmem:[%s3738_s3 + $0x230] sm:$0xff]  }
  0x4d   : > { %2778 = vmatprep.subr.bf16.mxu0 %v2981_v23  ;;  %2671 = vmatmul.mubr.bf16.gmra.mrb[4].mxu1 %v3455_v34  ;;  %v2355_v10 = vcombine.low %v927_v12, %v3534_v35  ;;  %v461_v2 = vpack.c.bf16 %v3223_v21, %v3214_v18  ;;  %v3014_v21 = vld [vmem:[%s3738_s3 + $0xe8] sm:$0xff]   ;;  %v3027_v49 = vld [vmem:[%s3738_s3 + $0x238] sm:$0xff]  }
  0x4e   : > { %2767 = vmatmul.mubr.bf16.gmra.mrb[4].mxu0 %v2327_v55  ;;  %2689 = vmatpush3.bf16.msra.mxu1 %v2986_v52  ;;  %v2997_v55 = vld [vmem:[%s3738_s3 + $0x1a0] sm:$0xff]   ;;  %v3025_v5 = vld [vmem:[%s3738_s3 + $0x228] sm:$0xff]  }
  0x4f   : > { %2690 = vmatprep.mubr.bf16.mxu1 %v2230_v7  ;;  %2698 = vmatprep.subr.bf16.mxu1 %v2988_v15  ;;  %v3000_v7 = vld [vmem:[%s3738_s3 + $0xb0] sm:$0xff]   ;;  %v2381_v18 = vcombine.low %v461_v2, %v3036_v6  ;;  %v3013_v6 = vld [vmem:[%s3738_s3 + $0x1e0] sm:$0xff]  }
  0x50   : > { %2779 = vmatpush3.bf16.msra.mxu0 %v2981_v23  ;;  %2786 = vmatprep.mubr.bf16.mxu0 %v2353_v40  ;;  %v2249_v23 = vrot.slane %v3406_v46, 9  ;;  %v2996_v46 = vld [vmem:[%s3738_s3 + $0xa0] sm:$0xff]   ;;  %v2999_v40 = vld [vmem:[%s3738_s3 + $0x1a8] sm:$0xff]  }
  0x51   : > { %2780 = vmatprep.subr.bf16.mxu0 %v2983_v11 }
  0x52   : > { %v935_v25 = vsel %vm3430_vm7, %v2249_v23, %v934_v54  ;;  %v2537_v23 = vld [vmem:[%s273_s25 + $0x10] sm:$0xff]  }
  0x53   : > { %v3610_v1 = vcombine.low %v3534_v35, %v935_v25 }
  0x54   : > { %2781 = vmatpush3.bf16.msra.mxu0 %v2983_v11  ;;  %v3002_v11 = vld [vmem:[%s3738_s3 + $0xb8] sm:$0xff]  }
  0x55   : > { %2782 = vmatprep.subr.bf16.mxu0 %v2985_v50  ;;  %2691 = vmatmul.mubr.msk.bf16.vlgmr.msra.gmra.mrb[0].mxu1 %vm3500_vm8, %v3487_v16 }
  0x56   : > { %2699 = vmatpush3.bf16.msra.mxu1 %v2988_v15  ;;  %2694 = vmatprep.mubr.msk.bf16.mxu1 %vm3500_vm8, %v3506_v0  ;;  %v2266_v15 = vcombine.low %v3464_v37, %v3445_v17  ;;  %v2356_v17 = vcombine.low %v935_v25, %v3460_v4 }
  0x57   : > { %2700 = vmatprep.subr.bf16.mxu1 %v2990_v38 }
  0x58   : > { %2783 = vmatpush3.bf16.msra.mxu0 %v2985_v50  ;;  %v3004_v50 = vld [vmem:[%s3738_s3 + $0xc0] sm:$0xff]  }
  0x59   : > { %2784 = vmatprep.subr.bf16.mxu0 %v2987_v53 }
  0x5a   : > { %2701 = vmatpush3.bf16.msra.mxu1 %v2990_v38  ;;  %v3591_v38 = vcombine.low %v3449_v24, %v919_v47  ;;  %v3008_v24 = vld [vmem:[%s3738_s3 + $0xd0] sm:$0xff]  }
  0x5b   : > { %2702 = vmatprep.subr.bf16.mxu1 %v2992_v62  ;;  %v3009_v47 = vld [vmem:[%s3738_s3 + $0x1d0] sm:$0xff]  }
  0x5c   : > { %2785 = vmatpush3.bf16.msra.mxu0 %v2987_v53  ;;  %v3593_v53 = vcombine.low %v923_v56, %v927_v12  ;;  %v3020_v56 = vld [vmem:[%s3738_s3 + $0x200] sm:$0xff]   ;;  %v3022_v12 = vld [vmem:[%s3738_s3 + $0x210] sm:$0xff]  }
  0x5d   : > { %2794 = vmatprep.subr.bf16.mxu0 %v2989_v63  ;;  %2695 = vmatmul.mubr.msk.bf16.gmra.mrb[4].mxu1 %vm3500_vm8, %v3538_v51 }
  0x5e   : > { %2703 = vmatpush3.bf16.msra.mxu1 %v2992_v62  ;;  %2714 = vmatprep.mubr.bf16.mxu1 %v2266_v15  ;;  %v3021_v62 = vld [vmem:[%s3738_s3 + $0x208] sm:$0xff]  }
  0x5f   : > { %2787 = vmatmul.mubr.bf16.vlgmr.msra.gmra.mrb[0].mxu0 %v2354_v19  ;;  %2704 = vmatprep.subr.bf16.mxu1 %v2994_v22 }
  0x60   : > { %2795 = vmatpush3.bf16.msra.mxu0 %v2989_v63  ;;  %2790 = vmatprep.mubr.bf16.mxu0 %v2355_v10  ;;  %v3019_v63 = vld [vmem:[%s3738_s3 + $0x1f8] sm:$0xff]  }
  0x61   : > { %2796 = vmatprep.subr.bf16.mxu0 %v2991_v57 }
  0x62   : > { %2705 = vmatpush3.bf16.msra.mxu1 %v2994_v22  ;;  %v2538_v22 = vld [vmem:[%s273_s25 + $0x18] sm:$0xff]  }
  0x63   : > { %2706 = vmatprep.subr.bf16.mxu1 %v2996_v46  ;;  %v2514_v10 = vunpack.c.l.bf16 %v2538_v22 }
  0x64   : > { %2797 = vmatpush3.bf16.msra.mxu0 %v2991_v57 }
  0x65   : > { %2798 = vmatprep.subr.bf16.mxu0 %v2993_v36 }
  0x66   : > { %2707 = vmatpush3.bf16.msra.mxu1 %v2996_v46  ;;  %v2515_v46 = vunpack.c.h.bf16 %v2538_v22 }
  0x67   : > { %2791 = vmatmul.mubr.bf16.gmra.mrb[4].mxu0 %v2356_v17  ;;  %2708 = vmatprep.subr.bf16.mxu1 %v2998_v26 }
  0x68   : > { %2799 = vmatpush3.bf16.msra.mxu0 %v2993_v36  ;;  %2810 = vmatprep.mubr.msk.bf16.mxu0 %vm3500_vm8, %v3487_v16  ;;  %v3001_v16 = vld [vmem:[%s3738_s3 + $0x1b0] sm:$0xff]   ;;  %v2510_v36 = vunpack.c.l.bf16 %v2537_v23 }
  0x69   : > { %2800 = vmatprep.subr.bf16.mxu0 %v2995_v14 }
  0x6a   : > { %2709 = vmatpush3.bf16.msra.mxu1 %v2998_v26  ;;  %v2511_v26 = vunpack.c.h.bf16 %v2537_v23 }
  0x6b   : > { %2710 = vmatprep.subr.bf16.mxu1 %v3000_v7 }
  0x6c   : > { %2801 = vmatpush3.bf16.msra.mxu0 %v2995_v14 }
  0x6d   : > { %2802 = vmatprep.subr.bf16.mxu0 %v2997_v55 }
  0x6e   : > { %2711 = vmatpush3.bf16.msra.mxu1 %v3000_v7 }
  0x6f   : > { %2712 = vmatprep.subr.bf16.mxu1 %v3002_v11 }
  0x70   : > { %2803 = vmatpush3.bf16.msra.mxu0 %v2997_v55 }
  0x71   : > { %2804 = vmatprep.subr.bf16.mxu0 %v2999_v40 }
  0x72   : > { %2713 = vmatpush3.bf16.msra.mxu1 %v3002_v11 }
  0x73   : > { %2722 = vmatprep.subr.bf16.mxu1 %v3004_v50 }
  0x74   : > { %2805 = vmatpush3.bf16.msra.mxu0 %v2999_v40 }
  0x75   : > { %2806 = vmatprep.subr.bf16.mxu0 %v3001_v16  ;;  %2715 = vmatmul.mubr.bf16.vlgmr.msra.gmra.mrb[0].mxu1 %v3591_v38 }
  0x76   : > { %2723 = vmatpush3.bf16.msra.mxu1 %v3004_v50  ;;  %2718 = vmatprep.mubr.bf16.mxu1 %v3593_v53  ;;  %v2501_v50 = vld [vmem:[%s273_s25] sm:$0xff]  }
  0x77   : > { %2724 = vmatprep.subr.bf16.mxu1 %v3006_v59 }
  0x78   : > { %2807 = vmatpush3.bf16.msra.mxu0 %v3001_v16 }
  0x79   : > { %2808 = vmatprep.subr.bf16.mxu0 %v3003_v60 }
  0x7a   : > { %2725 = vmatpush3.bf16.msra.mxu1 %v3006_v59 }
  0x7b   : > { %2726 = vmatprep.subr.bf16.mxu1 %v3008_v24 }
  0x7c   : > { %2809 = vmatpush3.bf16.msra.mxu0 %v3003_v60 }
  0x7d   : > { %2818 = vmatprep.subr.bf16.mxu0 %v3005_v33  ;;  %2719 = vmatmul.mubr.bf16.gmra.mrb[4].mxu1 %v3610_v1 }
  0x7e   : > { %2727 = vmatpush3.bf16.msra.mxu1 %v3008_v24  ;;  %2738 = vmatprep.mubr.msk.bf16.mxu1 %vm3500_vm8, %v2478_v30  ;;  %v3015_v30 = vld [vmem:[%s3738_s3 + $0x1e8] sm:$0xff]  }
  0x7f   : > { %2811 = vmatmul.mubr.msk.bf16.vlgmr.msra.gmra.mrb[0].mxu0 %vm3500_vm8, %v3506_v0  ;;  %2728 = vmatprep.subr.bf16.mxu1 %v3010_v58  ;;  %v3011_v0 = vld [vmem:[%s3738_s3 + $0x1d8] sm:$0xff]  }
  0x80   : > { %2819 = vmatpush3.bf16.msra.mxu0 %v3005_v33  ;;  %2814 = vmatprep.mubr.msk.bf16.mxu0 %vm3500_vm8, %v3538_v51  ;;  %v2502_v33 = vunpack.c.l.bf16 %v2501_v50 }
  0x81   : > { %2820 = vmatprep.subr.bf16.mxu0 %v3007_v61 }
  0x82   : > { %2729 = vmatpush3.bf16.msra.mxu1 %v3010_v58 }
  0x83   : > { %2730 = vmatprep.subr.bf16.mxu1 %v3012_v8 }
  0x84   : > { %2821 = vmatpush3.bf16.msra.mxu0 %v3007_v61 }
  0x85   : > { %2822 = vmatprep.subr.bf16.mxu0 %v3009_v47 }
  0x86   : > { %2731 = vmatpush3.bf16.msra.mxu1 %v3012_v8 }
  0x87   : > { %2815 = vmatmul.mubr.bf16.gmra.mrb[4].mxu0 %v2381_v18  ;;  %2732 = vmatprep.subr.bf16.mxu1 %v3014_v21  ;;  %v2503_v18 = vunpack.c.h.bf16 %v2501_v50 }
  0x88   : > { %2823 = vmatpush3.bf16.msra.mxu0 %v3009_v47  ;;  %2834 = vmatprep.mubr.bf16.mxu0 %v3318_v20  ;;  %v3017_v20 = vld [vmem:[%s3738_s3 + $0x1f0] sm:$0xff]  }
  0x89   : > { %2824 = vmatprep.subr.bf16.mxu0 %v3011_v0 }
  0x8a   : > { %2733 = vmatpush3.bf16.msra.mxu1 %v3014_v21 }
  0x8b   : > { %2734 = vmatprep.subr.bf16.mxu1 %v3016_v3 }
  0x8c   : > { %2825 = vmatpush3.bf16.msra.mxu0 %v3011_v0 }
  0x8d   : > { %2826 = vmatprep.subr.bf16.mxu0 %v3013_v6 }
  0x8e   : > { %2735 = vmatpush3.bf16.msra.mxu1 %v3016_v3 }
  0x8f   : > { %2736 = vmatprep.subr.bf16.mxu1 %v3018_v29 }
  0x90   : > { %2827 = vmatpush3.bf16.msra.mxu0 %v3013_v6 }
  0x91   : > { %2828 = vmatprep.subr.bf16.mxu0 %v3015_v30 }
  0x92   : > { %2737 = vmatpush3.bf16.msra.mxu1 %v3018_v29 }
  0x93   : > { %2866 = vmatprep.subr.bf16.mxu1 %v3020_v56 }
  0x94   : > { %2829 = vmatpush3.bf16.msra.mxu0 %v3015_v30 }
  0x95   : > { %2830 = vmatprep.subr.bf16.mxu0 %v3017_v20  ;;  %2739 = vmatmul.mubr.msk.bf16.vlgmr.msra.gmra.mrb[0].mxu1 %vm3500_vm8, %v2481_v43 }
  0x96   : > { %2874 = vmatpush3.bf16.msra.mxu1 %v3020_v56  ;;  %2742 = vmatprep.mubr.msk.bf16.mxu1 %vm3500_vm8, %v2484_v44 }
  0x97   : > { %2867 = vmatprep.subr.bf16.mxu1 %v3021_v62 }
  0x98   : > { %2831 = vmatpush3.bf16.msra.mxu0 %v3017_v20 }
  0x99   : > { %2832 = vmatprep.subr.bf16.mxu0 %v3019_v63 }
  0x9a   : > { %2875 = vmatpush3.bf16.msra.mxu1 %v3021_v62 }
  0x9b   : > { %2868 = vmatprep.subr.bf16.mxu1 %v3022_v12 }
  0x9c   : > { %2833 = vmatpush3.bf16.msra.mxu0 %v3019_v63 }
  0x9d   : > { %2842 = vmatprep.subr.bf16.mxu0 %v3020_v56  ;;  %2743 = vmatmul.mubr.msk.bf16.gmra.mrb[4].mxu1 %vm3500_vm8, %v2487_v48 }
  0x9e   : > { %2876 = vmatpush3.bf16.msra.mxu1 %v3022_v12  ;;  %2862 = vmatprep.mubr.bf16.mxu1 %v3610_v1 }
  0x9f   : > { %2835 = vmatmul.mubr.bf16.vlgmr.msra.gmra.mrb[0].mxu0 %v3394_v31  ;;  %2869 = vmatprep.subr.bf16.mxu1 %v3023_v39 }
  0xa0   : > { %2843 = vmatpush3.bf16.msra.mxu0 %v3020_v56  ;;  %2838 = vmatprep.mubr.bf16.mxu0 %v3455_v34 }
  0xa1   : > { %2844 = vmatprep.subr.bf16.mxu0 %v3021_v62 }
  0xa2   : > { %2877 = vmatpush3.bf16.msra.mxu1 %v3023_v39 }
  0xa3   : > { %2870 = vmatprep.subr.bf16.mxu1 %v3024_v27 }
  0xa4   : > { %2845 = vmatpush3.bf16.msra.mxu0 %v3021_v62 }
  0xa5   : > { %2846 = vmatprep.subr.bf16.mxu0 %v3022_v12 }
  0xa6   : > { %2878 = vmatpush3.bf16.msra.mxu1 %v3024_v27 }
  0xa7   : > { %2839 = vmatmul.mubr.bf16.gmra.mrb[4].mxu0 %v2408_v32  ;;  %2871 = vmatprep.subr.bf16.mxu1 %v3025_v5 }
  0xa8   : > { %2847 = vmatpush3.bf16.msra.mxu0 %v3022_v12  ;;  %2858 = vmatprep.mubr.bf16.mxu0 %v3591_v38 }
  0xa9   : > { %2848 = vmatprep.subr.bf16.mxu0 %v3023_v39 }
  0xaa   : > { %2879 = vmatpush3.bf16.msra.mxu1 %v3025_v5 }
  0xab   : > { %2872 = vmatprep.subr.bf16.mxu1 %v3026_v45 }
  0xac   : > { %2849 = vmatpush3.bf16.msra.mxu0 %v3023_v39 }
  0xad   : > { %2850 = vmatprep.subr.bf16.mxu0 %v3024_v27 }
  0xae   : > { %2880 = vmatpush3.bf16.msra.mxu1 %v3026_v45 }
  0xaf   : > { %2873 = vmatprep.subr.bf16.mxu1 %v3027_v49 }
  0xb0   : > { %2851 = vmatpush3.bf16.msra.mxu0 %v3024_v27 }
  0xb1   : > { %2852 = vmatprep.subr.bf16.mxu0 %v3025_v5 }
  0xb2   : > { %2881 = vmatpush3.bf16.msra.mxu1 %v3027_v49 }
  0xb4   : > { %2853 = vmatpush3.bf16.msra.mxu0 %v3025_v5 }
  0xb5   : > { %2854 = vmatprep.subr.bf16.mxu0 %v3026_v45  ;;  %2863 = vmatmul.mubr.bf16.vlgmr.msra.gmra.mrb[8].mxu1 %v2434_v13 }
  0xb8   : > { %2855 = vmatpush3.bf16.msra.mxu0 %v3026_v45 }
  0xb9   : > { %2856 = vmatprep.subr.bf16.mxu0 %v3027_v49 }
  0xbc   : > { %2857 = vmatpush3.bf16.msra.mxu0 %v3027_v49 }
  0xbf   : > { %2859 = vmatmul.mubr.bf16.vlgmr.msra.gmra.mrb[0].mxu0 %v3593_v53  ;;  %v2536_v53 = vld [vmem:[%s273_s25 + $0x8] sm:$0xff]  }
  0xc0   : > { %v2506_v58 = vunpack.c.l.bf16 %v2536_v53  ;;  %v2507_v2 = vunpack.c.h.bf16 %v2536_v53 }
 0x168   : > { %v2740_v42 = vpop.f32.mrb[0].mxu1 }
 0x169   : > { %v1199_v28 = vpop.f32.mrb[1].mxu1 }
 0x16a   : > { %v2741_v32 = vpop.f32.mrb[2].mxu1 }
 0x16b   : > { %v1202_v41 = vpop.f32.mrb[3].mxu1 }
 0x170   : > { %v2744_v31 = vpop.f32.mrb[4].mxu1 }
 0x171   : > { %v1215_v34 = vpop.f32.mrb[5].mxu1 }
 0x172   : > { %v2745_v43 = vpop.f32.mrb[6].mxu1 }
 0x173   : > { %v1218_v44 = vpop.f32.mrb[7].mxu1 }
 0x17a   : > { %v2840_v48 = vpop.f32.mrb[4].mxu0 }
 0x17b   : > { %v2886_v52 = vadd.f32 %v2840_v48, %v2744_v31  ;;  %v1830_v35 = vpop.f32.mrb[5].mxu0 }
 0x17c   : > { %v2888_v51 = vadd.f32 %v1830_v35, %v1215_v34  ;;  %v2841_v4 = vpop.f32.mrb[6].mxu0 }
 0x17d   : > { %v2890_v37 = vadd.f32 %v2841_v4, %v2745_v43  ;;  %v1833_v13 = vpop.f32.mrb[7].mxu0 }
 0x17e   : > { %v2892_v19 = vadd.f32 %v1833_v13, %v1218_v44 }
 0x188   : > { %v2864_v54 = vpop.f32.mrb[8].mxu1 }
 0x189   : > { %v2887_v57 = vadd.f32 %v2886_v52, %v2864_v54  ;;  %v1975_v15 = vpop.f32.mrb[9].mxu1 }
 0x18a   : > { %v2889_v25 = vadd.f32 %v2888_v51, %v1975_v15  ;;  %v2865_v17 = vpop.f32.mrb[10].mxu1 }
 0x18b   : > { %v2891_v14 = vadd.f32 %v2890_v37, %v2865_v17  ;;  %v1978_v7 = vpop.f32.mrb[11].mxu1  ;;  %v2020_v11 = vadd.f32 %v2887_v57, %v2514_v10 }
 0x18c   : > { %v2893_v55 = vadd.f32 %v2892_v19, %v1978_v7  ;;  %v2018_v16 = vadd.f32 %v2889_v25, %v2510_v36 }
 0x18d   : > { %v2021_v40 = vadd.f32 %v2891_v14, %v2515_v46  ;;  %v2057_v48 = vmul.f32 %v2020_v11, %v2020_v11 }
 0x18e   : > { %v2019_v38 = vadd.f32 %v2893_v55, %v2511_v26 }
 0x18f   : > { %v2534_v59 = vpack.c.bf16 %v2021_v40, %v2020_v11  ;;  %v2058_v51 = vmul.f32 %v2021_v40, %v2021_v40 }
 0x190   : > { %v2529_v60 = vpack.c.bf16 %v2019_v38, %v2018_v16  ;;  %v2056_v43 = vmul.f32 %v2019_v38, %v2019_v38 }
 0x191   : > { %2541 = vst [vmem:[%s3721_s27 + $0x18] sm:$0xff] %v2534_v59  }
 0x192   : > { %v2860_v24 = vpop.f32.mrb[0].mxu0  ;;  %2540 = vst [vmem:[%s3721_s27 + $0x10] sm:$0xff] %v2529_v60  }
 0x193   : > { %v2882_v1 = vadd.f32 %v2860_v24, %v2740_v42  ;;  %v1959_v61 = vpop.f32.mrb[1].mxu0 }
 0x194   : > { %v2883_v8 = vadd.f32 %v1959_v61, %v1199_v28  ;;  %v2861_v47 = vpop.f32.mrb[2].mxu0 }
 0x195   : > { %v2884_v21 = vadd.f32 %v2861_v47, %v2741_v32  ;;  %v1962_v0 = vpop.f32.mrb[3].mxu0  ;;  %v2016_v29 = vadd.f32 %v2882_v1, %v2506_v58  ;;  %v2055_v32 = vmul.f32 %v2018_v16, %v2018_v16 }
 0x196   : > { %v2014_v3 = vadd.f32 %v2883_v8, %v2502_v33  ;;  %v2885_v6 = vadd.f32 %v1962_v0, %v1202_v41 }
 0x197   : > { %v2017_v30 = vadd.f32 %v2884_v21, %v2507_v2  ;;  %v2053_v27 = vmul.f32 %v2016_v29, %v2016_v29 }
 0x198   : > { %v2015_v56 = vadd.f32 %v2885_v6, %v2503_v18  ;;  %v2051_v62 = vmul.f32 %v2014_v3, %v2014_v3 }
 0x199   : > { %v2524_v20 = vpack.c.bf16 %v2017_v30, %v2016_v29  ;;  %v2054_v49 = vmul.f32 %v2017_v30, %v2017_v30 }
 0x19a   : > { %v2519_v63 = vpack.c.bf16 %v2015_v56, %v2014_v3  ;;  %v2038_v12 = vadd.f32 %v2015_v56, %v2014_v3  ;;  %v2052_v39 = vmul.f32 %v2015_v56, %v2015_v56 }
 0x19b   : > { %2539 = vst [vmem:[%s3721_s27 + $0x8] sm:$0xff] %v2524_v20  }
 0x19c   : > { %2520 = vst [vmem:[%s3721_s27] sm:$0xff] %v2519_v63   ;;  %v2039_v5 = vadd.f32 %v2038_v12, %v2016_v29  ;;  %v2059_v45 = vadd.f32 %v2052_v39, %v2051_v62 }
 0x19e   : > { %v2060_v42 = vadd.f32 %v2059_v45, %v2053_v27  ;;  %v2040_v28 = vadd.f32 %v2039_v5, %v2017_v30 }
 0x1a0   : > { %v2041_v31 = vadd.f32 %v2040_v28, %v2018_v16  ;;  %v2061_v34 = vadd.f32 %v2060_v42, %v2054_v49 }
 0x1a2   : > { %v2042_v41 = vadd.f32 %v2041_v31, %v2019_v38  ;;  %v2062_v44 = vadd.f32 %v2061_v34, %v2055_v32 }
 0x1a4   : > { %v2043_v52 = vadd.f32 %v2042_v41, %v2020_v11  ;;  %v2063_v35 = vadd.f32 %v2062_v44, %v2056_v43 }
 0x1a6   : > { %v2044_v4 = vadd.f32 %v2043_v52, %v2021_v40  ;;  %v2064_v37 = vadd.f32 %v2063_v35, %v2057_v48 }
 0x1a8   : > { %v2045_v13 = vrot.slane %v2044_v4, 4  ;;  %v2065_v19 = vadd.f32 %v2064_v37, %v2058_v51 }
 0x1aa   : > { %v2046_v22 = vadd.f32 %v2045_v13, %v2044_v4  ;;  %v2066_v23 = vrot.slane %v2065_v19, 4 }
 0x1ac   : > { %v2047_v54 = vrot.slane %v2046_v22, 2  ;;  %v2067_v57 = vadd.f32 %v2066_v23, %v2065_v19 }
 0x1ae   : > { %v2048_v10 = vadd.f32 %v2047_v54, %v2046_v22  ;;  %v2068_v15 = vrot.slane %v2067_v57, 2 }
 0x1b0   : > { %v2049_v46 = vrot.slane %v2048_v10, 1  ;;  %v2069_v25 = vadd.f32 %v2068_v15, %v2067_v57 }
 0x1b2   : > { %v2070_v36 = vrot.slane %v2069_v25, 1  ;;  %v2050_v17 = vadd.f32 %v2049_v46, %v2048_v10 }
 0x1b4   : > { %v2071_v26 = vadd.f32 %v2070_v36, %v2069_v25 }
 0x1b6   : > { %v2073_v14 = vsel %vm2072_vm9, %v2050_v17, %v2071_v26 }
 0x1b7   : > { %2074 = vst [vmem:[%s282_s7] sm:$0x3] %v2073_v14 }
 0x1b8 PF: > { %s17_s21 = sadd.s32 1, %s3034_s21  }
 0x1b9   : > { %p14_p4 = scmp.ge.s32.totalorder %s17_s21, 4  }
 0x1bb   :  { %16 = sbr.rel (!%p14_p4) target bundleno = 1 (0x1), region = 93 }

// kernel: _lambda_.13
= control target key start
LH: loop header
LB: loop body
LE: loop exit
PB: predicated region body
PF: predicated region fallthrough
CT: control target
= control target key end

     0   :  { %12 = vsyncpa [#allocation3], 0  ;;  %s3926_s0 = inlined_call_operand.vmem [shape: bf16[2,10,10,128], index: 0, kind: input, shape index: {}]   ;;  %s3927_s1 = inlined_call_operand.vmem [shape: f32[1,1,128], index: 1, kind: input, shape index: {}]   ;;  %s3928_s2 = inlined_call_operand.vmem [shape: f32[1,1,128], index: 2, kind: input, shape index: {}]   ;;  %s3929_s3 = inlined_call_operand.vmem [shape: bf16[9,128,128], index: 3, kind: input, shape index: {}]   ;;  %s3930_s4 = inlined_call_operand.vmem [shape: bf16[2,8,8,128], index: 4, kind: input, shape index: {}, may-alias: {4,5}]   ;;  %s3931_s5 = inlined_call_operand.vmem [shape: bf16[2,8,8,128], index: 5, kind: output, shape index: {0}, may-alias: {4,5}]   ;;  %s3932_s6 = inlined_call_operand.hbm [shape: f32[2,2,128], index: 6, kind: output, shape index: {1}]  }
   0x1   :  { %14 = vsyncpa [#allocation3 + $0x1], 0  ;;  %s3181_s21 = smov 0   ;;  %s3183_s22 = smov 0  }
   0x2   :  { %s3185_s23 = smov 0   ;;  %s3187_s24 = smov 0  }
   0x3 LB: > { %s3202_s25 = sadd.s32 4294967295, %s3142_s24   ;;  %s2193_s26 = sadd.s32 4294967294, %s3142_s24   ;;  %s3142_s24 = sphi %s3187_s24, %s3944_s24   ;;  %s3138_s23 = sphi %s3185_s23, %s3943_s23   ;;  %s3134_s22 = sphi %s3183_s22, %s3942_s22   ;;  %s3130_s21 = sphi %s3181_s21, %s3941_s21  }
   0x4   : > { %s3206_s27 = sadd.s32 1, %s3142_s24   ;;  %s168_s28 = sadd.s32 1, %s3138_s23 }
   0x5   : > { %s165_s29 = ssub.s32 %s3142_s24, %s3206_s27  ;;  %p178_p0 = scmp.ne.s32.totalorder %s3138_s23, %s3134_s22 }
   0x6   : > { %p166_p1 = scmp.eq.s32.totalorder %s165_s29, 0  ;;  %p179_p2 = scmp.eq.s32.totalorder %s3202_s25, 1 }
   0x7   : > { %p184_p3 = scmp.ne.s32.totalorder %s3134_s22, %s3130_s21  ;;  %p185_p4 = scmp.eq.s32.totalorder %s2193_s26, 1 }
   0x8   : > { %s3217_s30 = scalar_select %p166_p1, %s3138_s23, %s168_s28  }
   0x9   : > { %p3219_p5 = por %p179_p2, %p178_p0  ;;  %p3223_p6 = por %p185_p4, %p184_p3 }
   0xa   : > { %p2196_p7 = scmp.ge.s32.totalorder %s3142_s24, 1  ;;  %p228_p8 = scmp.lt.s32.totalorder %s3142_s24, 3 }
   0xc   : > { %p229_p9 = pnand %p2196_p7, %p228_p8 }
   0xd   : > { %v3008_v0 = vld [vmem:[%s3929_s3 + $0x40] sm:$0xff] (!%p229_p9)   ;;  %p268_p10 = scmp.lt.s32.totalorder (!%p229_p9), %s3202_s25, 1  ;;  %v3010_v2 = vld [vmem:[%s3929_s3 + $0x48] sm:$0xff] (!%p229_p9)   ;;  %v418_v4 = vlaneseq (!%p229_p9)  ;;  %v3012_v5 = vld [vmem:[%s3929_s3 + $0x50] sm:$0xff] (!%p229_p9)   ;;  %v3144_v6 = vmov (!%p229_p9), 0.0|0.0   ;;  %vm901_vm5 = vcmask (!%p229_p9), 1042432  }
   0xe   : > { %232 = sbr.rel (%p229_p9) target bundleno = 462 (0x1ce), region = 40  ;;  %v3009_v1 = vld [vmem:[%s3929_s3 + $0x100] sm:$0xff] (!%p229_p9)   ;;  %2671 = vmatprep.subr.bf16.mxu1 (!%p229_p9), %v3008_v0  ;;  %v3011_v3 = vld [vmem:[%s3929_s3 + $0x108] sm:$0xff] (!%p229_p9)   ;;  %v3250_v7 = vcombine.low (!%p229_p9), %v3144_v6, %v3144_v6  ;;  %v3013_v8 = vld [vmem:[%s3929_s3 + $0x110] sm:$0xff] (!%p229_p9)   ;;  %v3263_v11 = vcombine.high (!%p229_p9), %v3144_v6, %v3144_v6  ;;  %vm519_vm2 = vsmask.f32 (!%p229_p9), 3328 }
   0xf   : > { %2767 = vmatprep.subr.bf16.mxu0 (!%p229_p9), %v3009_v1  ;;  %2672 = vmatpush3.bf16.msra.mxu1 (!%p229_p9), %v3008_v0  ;;  %v3256_v9 = vshrl.u32 (!%p229_p9), %v418_v4, 7  ;;  %v3014_v10 = vld [vmem:[%s3929_s3 + $0x58] sm:$0xff] (!%p229_p9)   ;;  %v3016_v18 = vld [vmem:[%s3929_s3 + $0x60] sm:$0xff] (!%p229_p9)   ;;  %v3018_v22 = vld [vmem:[%s3929_s3 + $0x68] sm:$0xff] (!%p229_p9)   ;;  %vm520_vm3 = vsmask.f32 (!%p229_p9), 7440 }
  0x10   : > { %2768 = vmatpush3.bf16.msra.mxu0 (!%p229_p9), %v3009_v1  ;;  %2673 = vmatprep.subr.bf16.mxu1 (!%p229_p9), %v3010_v2  ;;  %v523_v12 = vshrl.u32 (!%p229_p9), %v3250_v7, 16  ;;  %v3015_v13 = vld [vmem:[%s3929_s3 + $0x118] sm:$0xff] (!%p229_p9)   ;;  %v526_v14 = vshll.u32 (!%p229_p9), %v3250_v7, 16  ;;  %v532_v19 = vshll.u32 (!%p229_p9), %v3263_v11, 16  ;;  %v3017_v20 = vld [vmem:[%s3929_s3 + $0x120] sm:$0xff] (!%p229_p9)   ;;  %v3019_v23 = vld [vmem:[%s3929_s3 + $0x128] sm:$0xff] (!%p229_p9)  }
  0x11   : > { %2769 = vmatprep.subr.bf16.mxu0 (!%p229_p9), %v3011_v3  ;;  %v3271_v16 = vadd.s32 (!%p229_p9), 8, %v3256_v9  ;;  %vm421_vm0 = vcmp.ge.s32.totalorder (!%p229_p9), %v3256_v9, 1  ;;  %v3299_v33 = vld [vmem:[%s3927_s1] ss:$0 sm:$0xff] (!%p229_p9)  ;;  %v3020_v35 = vld [vmem:[%s3929_s3 + $0x70] sm:$0xff] (!%p229_p9)   ;;  %vm3313_vm4 = vmor (!%p229_p9), %vm519_vm2, %vm520_vm3  ;;  %vm902_vm6 = vcmask (!%p229_p9), 1046532  }
  0x12   : > { %v525_v15 = vrot.slane (!%p229_p9), %v523_v12, 4  ;;  %v528_v17 = vrot.slane (!%p229_p9), %v526_v14, 5  ;;  %v534_v25 = vrot.slane (!%p229_p9), %v532_v19, 5  ;;  %v3304_v34 = vld [vmem:[%s3928_s2] ss:$0 sm:$0xff] (!%p229_p9)  ;;  %v3021_v47 = vld [vmem:[%s3929_s3 + $0x130] sm:$0xff] (!%p229_p9)   ;;  %vm3581_vm7 = vmor (!%p229_p9), %vm901_vm5, %vm902_vm6 }
  0x13   : > { %2674 = vmatpush3.bf16.msra.mxu1 (!%p229_p9), %v3010_v2  ;;  %vm428_vm1 = vcmp.lt.s32.totalorder (!%p229_p9), %v3271_v16, 9  ;;  %v3022_v61 = vld [vmem:[%s3929_s3 + $0x78] sm:$0xff] (!%p229_p9)   ;;  %v3370_v19 = vld [vmem:[%s3929_s3] sm:$0xff] (!%p229_p9)   ;;  %vm3651_vm8 = vmpackc.low (!%p229_p9), %vm421_vm0, %vm421_vm0  ;;  %s2463_s15 = sshll.u32 (!%p229_p9), %s3202_s25, 5  ;;  %vm2072_vm9 = vcmp.eq.s32.totalorder (!%p229_p9), %v3256_v9, 0 }
  0x14   : > { %2770 = vmatpush3.bf16.msra.mxu0 (!%p229_p9), %v3011_v3  ;;  %2675 = vmatprep.subr.bf16.mxu1 (!%p229_p9), %v3012_v5  ;;  %v529_v21 = vor.u32 (!%p229_p9), %v528_v17, %v525_v15  ;;  %v3023_v62 = vld [vmem:[%s3929_s3 + $0x138] sm:$0xff] (!%p229_p9)   ;;  %s3884_s29 = scalar_lea.hbm (!%p229_p9), %s3932_s6, %s2463_s15 }
  0x15   : > { %s3243_s17 = scalar_select %p268_p10, %s3202_s25, 1  ;;  %2771 = vmatprep.subr.bf16.mxu0 %v3013_v8 }
  0x16   : > { %v530_v24 = vrot.slane %v529_v21, 4 }
  0x17   : > { %s2967_s28 = smul.u32 80, %s3243_s17  ;;  %2676 = vmatpush3.bf16.msra.mxu1 %v3012_v5  ;;  %s2466_s9 = sshll.u32 %s3243_s17, 5 }
  0x18   : > { %2772 = vmatpush3.bf16.msra.mxu0 %v3013_v8  ;;  %2677 = vmatprep.subr.bf16.mxu1 %v3014_v10  ;;  %v3320_v42 = vsel %vm3313_vm4, %v530_v24, %v534_v25  ;;  %v3391_v25 = vld [vmem:[%s3929_s3 + $0x140] sm:$0xff]   ;;  %s277_s11 = scalar_lea.vmem %s3930_s4, %s2466_s9  ;;  %s3872_s13 = scalar_lea.vmem %s3931_s5, %s2466_s9 }
  0x19   : > { %2773 = vmatprep.subr.bf16.mxu0 %v3015_v13  ;;  %s3283_s19 = scalar_lea.vmem %s3926_s0, %s2967_s28  ;;  %s3145_s28 = smov [#allocation2]  }
  0x1a   : > { %v286_v26 = vld [vmem:[%s3283_s19 + $0x8] ss:$56 sps:$4 sm:$0xff]   ;;  %v287_v27 = vld [vmem:[%s3283_s19 + $0xc] sm:$0x1]  ;;  %v301_v28 = vld [vmem:[%s3283_s19 + $0x44] sm:$0x1] }
  0x1b   : > { %2678 = vmatpush3.bf16.msra.mxu1 %v3014_v10  ;;  %v306_v29 = vunpack.c.l.bf16 %v286_v26  ;;  %v307_v30 = vunpack.c.l.bf16 %v287_v27  ;;  %v320_v31 = vunpack.c.h.bf16 %v286_v26  ;;  %v321_v32 = vunpack.c.l.bf16 %v301_v28  ;;  %v288_v41 = vld [vmem:[%s3283_s19 + $0x10] ss:$8 sps:$4 sm:$0xff]   ;;  %v289_v43 = vld [vmem:[%s3283_s19 + $0x14] sm:$0x1]  ;;  %v291_v44 = vld [vmem:[%s3283_s19 + $0x1c] sm:$0x1] }
  0x1c   : > { %2774 = vmatpush3.bf16.msra.mxu0 %v3015_v13  ;;  %2679 = vmatprep.subr.bf16.mxu1 %v3016_v18  ;;  %v308_v45 = vunpack.c.l.bf16 %v288_v41  ;;  %v310_v46 = vunpack.c.h.bf16 %v288_v41  ;;  %v3332_v52 = vld [vmem:[%s3283_s19 + $0x20] ss:$8 sps:$4 sm:$0xff]   ;;  %v309_v53 = vunpack.c.l.bf16 %v289_v43  ;;  %v311_v54 = vunpack.c.l.bf16 %v291_v44  ;;  %s3084_s10 = sshll.u32 %s3145_s28, 4  ;;  %s3085_s10 = int_to_ptr.vmem [resolvable:$false] %s3084_s10 }
  0x1d   : > { %2775 = vmatprep.subr.bf16.mxu0 %v3017_v20  ;;  %v333_v36 = vmul.f32 %v3299_v33, %v306_v29  ;;  %v334_v37 = vmul.f32 %v3299_v33, %v307_v30  ;;  %v347_v38 = vmul.f32 %v3299_v33, %v320_v31  ;;  %v348_v39 = vmul.f32 %v3299_v33, %v321_v32 }
  0x1e   : > { %v335_v55 = vmul.f32 %v3299_v33, %v308_v45  ;;  %v337_v56 = vmul.f32 %v3299_v33, %v310_v46  ;;  %v312_v60 = vunpack.c.l.bf16 %v3332_v52  ;;  %v336_v0 = vmul.f32 %v3299_v33, %v309_v53 }
  0x1f   : > { %2680 = vmatpush3.bf16.msra.mxu1 %v3016_v18  ;;  %v360_v48 = vadd.f32 %v3304_v34, %v333_v36  ;;  %v361_v49 = vadd.f32 %v3304_v34, %v334_v37  ;;  %v374_v50 = vadd.f32 %v3304_v34, %v347_v38  ;;  %v375_v51 = vadd.f32 %v3304_v34, %v348_v39 }
  0x20   : > { %2776 = vmatpush3.bf16.msra.mxu0 %v3017_v20  ;;  %2681 = vmatprep.subr.bf16.mxu1 %v3018_v22  ;;  %v338_v1 = vmul.f32 %v3299_v33, %v311_v54  ;;  %v362_v2 = vadd.f32 %v3304_v34, %v335_v55  ;;  %v364_v8 = vadd.f32 %v3304_v34, %v337_v56 }
  0x21   : > { %2777 = vmatprep.subr.bf16.mxu0 %v3019_v23  ;;  %v380_v57 = vmul.f32 0.1, %v360_v48  ;;  %v381_v58 = vmul.f32 0.1, %v361_v49  ;;  %v394_v59 = vmul.f32 0.1, %v374_v50  ;;  %v363_v12 = vadd.f32 %v3304_v34, %v336_v0 }
  0x22   : > { %v395_v63 = vmul.f32 0.1, %v375_v51  ;;  %v365_v13 = vadd.f32 %v3304_v34, %v338_v1  ;;  %v382_v14 = vmul.f32 0.1, %v362_v2  ;;  %v384_v20 = vmul.f32 0.1, %v364_v8 }
  0x23   : > { %2682 = vmatpush3.bf16.msra.mxu1 %v3018_v22  ;;  %v3346_v3 = vmax.f32 %v360_v48, %v380_v57  ;;  %v401_v4 = vmax.f32 %v361_v49, %v381_v58  ;;  %v3348_v5 = vmax.f32 %v374_v50, %v394_v59  ;;  %v383_v27 = vmul.f32 0.1, %v363_v12  ;;  %v293_v0 = vld [vmem:[%s3283_s19 + $0x24] sm:$0x1] }
  0x24   : > { %2778 = vmatpush3.bf16.msra.mxu0 %v3019_v23  ;;  %2683 = vmatprep.subr.bf16.mxu1 %v3020_v35  ;;  %v415_v10 = vmax.f32 %v375_v51, %v395_v63  ;;  %v385_v28 = vmul.f32 0.1, %v365_v13  ;;  %v3397_v29 = vmax.f32 %v362_v2, %v382_v14  ;;  %v3405_v39 = vmax.f32 %v364_v8, %v384_v20  ;;  %v295_v20 = vld [vmem:[%s3283_s19 + $0x2c] sm:$0x1] }
  0x25   : > { %2779 = vmatprep.subr.bf16.mxu0 %v3021_v47  ;;  %v3356_v15 = vsel %vm421_vm0, %v3346_v3, 0.0  ;;  %v3360_v17 = vsel %vm428_vm1, %v401_v4, 0.0  ;;  %v3365_v18 = vsel %vm421_vm0, %v3348_v5, 0.0  ;;  %v403_v38 = vmax.f32 %v363_v12, %v383_v27 }
  0x26   : > { %v3374_v21 = vsel %vm428_vm1, %v415_v10, 0.0  ;;  %v3378_v22 = vpack.c.bf16 %v3356_v15, %v3356_v15  ;;  %v3382_v23 = vpack.c.bf16 %v3360_v17, %v3360_v17  ;;  %v3386_v24 = vpack.c.bf16 %v3365_v18, %v3365_v18 }
  0x27   : > { %2684 = vmatpush3.bf16.msra.mxu1 %v3020_v35  ;;  %v3395_v26 = vpack.c.bf16 %v3374_v21, %v3374_v21  ;;  %v405_v48 = vmax.f32 %v365_v13, %v385_v28  ;;  %v437_v49 = vsel %vm421_vm0, %v3397_v29, 0.0  ;;  %v438_v51 = vsel %vm428_vm1, %v403_v38, 0.0  ;;  %v296_v38 = vld [vmem:[%s3283_s19 + $0x30] ss:$8 sps:$4 sm:$0xff]  }
  0x28   : > { %2780 = vmatpush3.bf16.msra.mxu0 %v3021_v47  ;;  %2685 = vmatprep.subr.bf16.mxu1 %v3022_v61  ;;  %v537_v30 = vshrl.u32 %v3378_v22, 16  ;;  %v540_v31 = vshll.u32 %v3378_v22, 16  ;;  %v546_v32 = vshll.u32 %v3382_v23, 16  ;;  %v1242_v35 = vshrl.u32 %v3386_v24, 16 }
  0x29   : > { %2781 = vmatprep.subr.bf16.mxu0 %v3023_v62  ;;  %v1245_v36 = vshll.u32 %v3386_v24, 16  ;;  %v1251_v37 = vshll.u32 %v3395_v26, 16  ;;  %v439_v53 = vsel %vm421_vm0, %v3405_v39, 0.0  ;;  %v3417_v54 = vpack.c.bf16 %v437_v49, %v437_v49 }
  0x2a   : > { %v539_v41 = vrot.slane %v537_v30, 4  ;;  %v542_v43 = vrot.slane %v540_v31, 5  ;;  %v548_v44 = vrot.slane %v546_v32, 5  ;;  %v1244_v45 = vrot.slane %v1242_v35, 4 }
  0x2b   : > { %2686 = vmatpush3.bf16.msra.mxu1 %v3022_v61  ;;  %v1247_v46 = vrot.slane %v1245_v36, 5  ;;  %v1253_v47 = vrot.slane %v1251_v37, 5  ;;  %v440_v56 = vsel %vm428_vm1, %v405_v48, 0.0  ;;  %v3421_v57 = vpack.c.bf16 %v438_v51, %v438_v51 }
  0x2c   : > { %2782 = vmatpush3.bf16.msra.mxu0 %v3023_v62  ;;  %2695 = vmatprep.subr.bf16.mxu1 %v3370_v19  ;;  %v543_v50 = vor.u32 %v542_v43, %v539_v41  ;;  %v3423_v58 = vpack.c.bf16 %v439_v53, %v439_v53  ;;  %v3425_v61 = vpack.c.bf16 %v440_v56, %v440_v56  ;;  %v551_v62 = vshrl.u32 %v3417_v54, 16  ;;  %v297_v41 = vld [vmem:[%s3283_s19 + $0x34] sm:$0x1] }
  0x2d   : > { %2791 = vmatprep.subr.bf16.mxu0 %v3391_v25  ;;  %v1248_v55 = vor.u32 %v1247_v46, %v1244_v45  ;;  %v554_v63 = vshll.u32 %v3417_v54, 16  ;;  %v560_v2 = vshll.u32 %v3421_v57, 16  ;;  %v313_v43 = vunpack.c.l.bf16 %v293_v0 }
  0x2e   : > { %v544_v59 = vrot.slane %v543_v50, 4  ;;  %v565_v4 = vshrl.u32 %v3423_v58, 16  ;;  %v568_v8 = vshll.u32 %v3423_v58, 16  ;;  %v553_v12 = vrot.slane %v551_v62, 4 }
  0x2f   : > { %v1249_v1 = vrot.slane %v1248_v55, 4  ;;  %v556_v13 = vrot.slane %v554_v63, 5  ;;  %v574_v14 = vshll.u32 %v3425_v61, 16  ;;  %v562_v30 = vrot.slane %v560_v2, 5 }
  0x30   : > { %v549_v10 = vsel %vm3313_vm4, %v544_v59, %v548_v44  ;;  %v567_v31 = vrot.slane %v565_v4, 4  ;;  %v570_v36 = vrot.slane %v568_v8, 5  ;;  %v339_v44 = vmul.f32 %v3299_v33, %v312_v60 }
  0x31   : > { %v2237_v27 = vcombine.low %v3320_v42, %v549_v10  ;;  %v3440_v28 = vsel %vm3313_vm4, %v1249_v1, %v1253_v47  ;;  %v557_v35 = vor.u32 %v556_v13, %v553_v12  ;;  %v576_v37 = vrot.slane %v574_v14, 5  ;;  %v299_v14 = vld [vmem:[%s3283_s19 + $0x3c] sm:$0x1]  ;;  %s265_s19 = sand.u32 1, %s3134_s22  }
  0x32   : > { %v2427_v32 = vcombine.low %v3440_v28, %v3320_v42  ;;  %v314_v45 = vunpack.c.h.bf16 %v3332_v52  ;;  %v315_v46 = vunpack.c.l.bf16 %v295_v20  ;;  %v571_v48 = vor.u32 %v570_v36, %v567_v31  ;;  %s2197_s14 = sshll.u32 %s265_s19, 1  ;;  %s2081_s9 = scalar_lea.sflag [#allocation3], %s265_s19 }
  0x33   : > { %2687 = vmatprep.mubr.bf16.mxu1 %v2237_v27  ;;  %v558_v47 = vrot.slane %v557_v35, 4  ;;  %v316_v49 = vunpack.c.l.bf16 %v296_v38  ;;  %v317_v50 = vunpack.c.l.bf16 %v297_v41  ;;  %v340_v51 = vmul.f32 %v3299_v33, %v313_v43  ;;  %s267_s16 = scalar_lea.vmem [#allocation2], %s2197_s14 }
  0x34   : > { %v366_v53 = vadd.f32 %v3304_v34, %v339_v44  ;;  %v341_v55 = vmul.f32 %v3299_v33, %v314_v45  ;;  %v342_v56 = vmul.f32 %v3299_v33, %v315_v46  ;;  %v572_v60 = vrot.slane %v571_v48, 4  ;;  %s2097_s18 = sshll.u32 %s267_s16, 4  ;;  %s3886_s18 = int_to_ptr.vmem [resolvable:$true] %s2097_s18 }
  0x35   : > { %v563_v59 = vsel %vm3313_vm4, %v558_v47, %v562_v30  ;;  %v343_v52 = vmul.f32 %v3299_v33, %v316_v49  ;;  %v344_v62 = vmul.f32 %v3299_v33, %v317_v50  ;;  %v367_v0 = vadd.f32 %v3304_v34, %v340_v51  ;;  %v3026_v30 = vld [vmem:[%s3929_s3 + $0x8] sm:$0xff]   ;;  %v3028_v51 = vld [vmem:[%s3929_s3 + $0x10] sm:$0xff]   ;;  %s3080_s25 = scalar_lea.vmem %s3886_s18, 32  ;;  %p3087_p0 = scmp.lt.s32.totalorder %s3886_s18, %s3085_s10 }
  0x36   : > { %v2343_v63 = vcombine.low %v549_v10, %v563_v59  ;;  %v386_v1 = vmul.f32 0.1, %v366_v53  ;;  %v368_v2 = vadd.f32 %v3304_v34, %v341_v55  ;;  %v3462_v4 = vsel %vm3313_vm4, %v572_v60, %v576_v37  ;;  %p3081_p11 = scmp.ne.s32.totalorder %s3886_s18, %s3080_s25 }
  0x37   : > { %v369_v8 = vadd.f32 %v3304_v34, %v342_v56  ;;  %v370_v12 = vadd.f32 %v3304_v34, %v343_v52  ;;  %v371_v13 = vadd.f32 %v3304_v34, %v344_v62  ;;  %v3469_v20 = vcombine.low %v563_v59, %v3462_v4 }
  0x38   : > { %2783 = vmatprep.mubr.bf16.mxu0 %v2343_v63  ;;  %v387_v10 = vmul.f32 0.1, %v367_v0  ;;  %v3471_v27 = vmax.f32 %v366_v53, %v386_v1  ;;  %v388_v31 = vmul.f32 0.1, %v368_v2  ;;  %v318_v41 = vunpack.c.h.bf16 %v296_v38  ;;  %p3082_p12 = pnand %p3081_p11, %p3219_p5 }
  0x39   : > { %v389_v35 = vmul.f32 0.1, %v369_v8  ;;  %v390_v36 = vmul.f32 0.1, %v370_v12  ;;  %v391_v37 = vmul.f32 0.1, %v371_v13  ;;  %2688 = vmatmul.mubr.bf16.vlgmr.msra.gmra.mrb[0].mxu1 %v3469_v20  ;;  %v319_v46 = vunpack.c.l.bf16 %v299_v14 }
  0x3a   : > { %v407_v43 = vmax.f32 %v367_v0, %v387_v10  ;;  %v441_v44 = vsel %vm421_vm0, %v3471_v27, 0.0  ;;  %v3480_v45 = vmax.f32 %v368_v2, %v388_v31  ;;  %2696 = vmatpush3.bf16.msra.mxu1 %v3370_v19  ;;  %v345_v19 = vmul.f32 %v3299_v33, %v318_v41  ;;  %p3083_p13 = pneg %p3082_p12 }
  0x3b   : > { %v3483_v47 = vpack.c.bf16 %v441_v44, %v441_v44  ;;  %v409_v48 = vmax.f32 %v369_v8, %v389_v35  ;;  %v3485_v49 = vmax.f32 %v370_v12, %v390_v36  ;;  %v411_v50 = vmax.f32 %v371_v13, %v391_v37  ;;  %2697 = vmatprep.subr.bf16.mxu1 %v3026_v30  ;;  %v3030_v13 = vld [vmem:[%s3929_s3 + $0x18] sm:$0xff]  }
  0x3c   : > { %v442_v38 = vsel %vm428_vm1, %v407_v43, 0.0  ;;  %v443_v53 = vsel %vm421_vm0, %v3480_v45, 0.0  ;;  %v346_v55 = vmul.f32 %v3299_v33, %v319_v46 }
  0x3d   : > { %v3497_v56 = vpack.c.bf16 %v442_v38, %v442_v38  ;;  %v579_v59 = vshrl.u32 %v3483_v47, 16  ;;  %v582_v60 = vshll.u32 %v3483_v47, 16  ;;  %v444_v52 = vsel %vm428_vm1, %v409_v48, 0.0 }
  0x3e   : > { %v3503_v62 = vpack.c.bf16 %v443_v53, %v443_v53  ;;  %v3505_v63 = vpack.c.bf16 %v444_v52, %v444_v52  ;;  %v445_v0 = vsel %vm421_vm0, %v3485_v49, 0.0  ;;  %v446_v33 = vsel %vm428_vm1, %v411_v50, 0.0  ;;  %2698 = vmatpush3.bf16.msra.mxu1 %v3026_v30 }
  0x3f   : > { %v581_v1 = vrot.slane %v579_v59, 4  ;;  %v584_v2 = vrot.slane %v582_v60, 5  ;;  %v588_v8 = vshll.u32 %v3497_v56, 16  ;;  %v3513_v12 = vpack.c.bf16 %v445_v0, %v445_v0  ;;  %2699 = vmatprep.subr.bf16.mxu1 %v3028_v51  ;;  %v3032_v59 = vld [vmem:[%s3929_s3 + $0x20] sm:$0xff]  }
  0x40   : > { %v593_v14 = vshrl.u32 %v3503_v62, 16  ;;  %v596_v10 = vshll.u32 %v3503_v62, 16  ;;  %v602_v31 = vshll.u32 %v3505_v63, 16  ;;  %v3521_v35 = vpack.c.bf16 %v446_v33, %v446_v33 }
  0x41   : > { %v585_v36 = vor.u32 %v584_v2, %v581_v1  ;;  %v590_v37 = vrot.slane %v588_v8, 5  ;;  %v607_v41 = vshrl.u32 %v3513_v12, 16  ;;  %v610_v30 = vshll.u32 %v3513_v12, 16 }
  0x42   : > { %v595_v43 = vrot.slane %v593_v14, 4  ;;  %v598_v44 = vrot.slane %v596_v10, 5  ;;  %v616_v46 = vshll.u32 %v3521_v35, 16  ;;  %2700 = vmatpush3.bf16.msra.mxu1 %v3028_v51  ;;  %v372_v53 = vadd.f32 %v3304_v34, %v345_v19  ;;  %v3027_v19 = vld [vmem:[%s3929_s3 + $0x148] sm:$0xff]  }
  0x43   : > { %v586_v48 = vrot.slane %v585_v36, 4  ;;  %v609_v50 = vrot.slane %v607_v41, 4  ;;  %v612_v38 = vrot.slane %v610_v30, 5  ;;  %2701 = vmatprep.subr.bf16.mxu1 %v3030_v13  ;;  %v604_v52 = vrot.slane %v602_v31, 5  ;;  %v3029_v30 = vld [vmem:[%s3929_s3 + $0x150] sm:$0xff]  }
  0x44   : > { %v599_v60 = vor.u32 %v598_v44, %v595_v43  ;;  %v373_v0 = vadd.f32 %v3304_v34, %v346_v55  ;;  %v618_v2 = vrot.slane %v616_v46, 5  ;;  %v392_v8 = vmul.f32 0.1, %v372_v53  ;;  %v3034_v34 = vld [vmem:[%s3929_s3 + $0x28] sm:$0xff]  }
  0x45   : > { %v591_v33 = vsel %vm3313_vm4, %v586_v48, %v590_v37  ;;  %v613_v1 = vor.u32 %v612_v38, %v609_v50  ;;  %v3031_v48 = vld [vmem:[%s3929_s3 + $0x158] sm:$0xff]   ;;  %v3036_v50 = vld [vmem:[%s3929_s3 + $0x30] sm:$0xff]  }
  0x46   : > { %v2344_v51 = vcombine.low %v3462_v4, %v591_v33  ;;  %v600_v14 = vrot.slane %v599_v60, 4  ;;  %v393_v10 = vmul.f32 0.1, %v373_v0  ;;  %2702 = vmatpush3.bf16.msra.mxu1 %v3030_v13  ;;  %v3537_v41 = vmax.f32 %v372_v53, %v392_v8 }
  0x47   : > { %v614_v36 = vrot.slane %v613_v1, 4  ;;  %2703 = vmatprep.subr.bf16.mxu1 %v3032_v59  ;;  %v2263_v1 = vrot.slane %v3417_v54, 9 }
  0x48   : > { %2784 = vmatmul.mubr.bf16.vlgmr.msra.gmra.mrb[0].mxu0 %v2344_v51  ;;  %v605_v55 = vsel %vm3313_vm4, %v600_v14, %v604_v52  ;;  %v413_v4 = vmax.f32 %v373_v0, %v393_v10  ;;  %v447_v37 = vsel %vm421_vm0, %v3537_v41, 0.0  ;;  %v3038_v52 = vld [vmem:[%s3929_s3 + $0x38] sm:$0xff]   ;;  %v2262_v0 = vrot.slane %v3378_v22, 9 }
  0x49   : > { %2792 = vmatpush3.bf16.msra.mxu0 %v3391_v25  ;;  %v3545_v31 = vcombine.low %v591_v33, %v605_v55  ;;  %v619_v13 = vsel %vm3313_vm4, %v614_v36, %v618_v2  ;;  %v3557_v46 = vpack.c.bf16 %v447_v37, %v447_v37  ;;  %v910_v33 = vrot.slane %v3382_v23, 5  ;;  %v3033_v23 = vld [vmem:[%s3929_s3 + $0x160] sm:$0xff]   ;;  %v3047_v14 = vld [vmem:[%s3929_s3 + $0x198] sm:$0xff]  }
  0x4a   : > { %2793 = vmatprep.subr.bf16.mxu0 %v3027_v19  ;;  %v2345_v43 = vcombine.low %v605_v55, %v619_v13  ;;  %v448_v44 = vsel %vm428_vm1, %v413_v4, 0.0  ;;  %2704 = vmatpush3.bf16.msra.mxu1 %v3032_v59  ;;  %v914_v2 = vrot.slane %v3421_v57, 5  ;;  %v2355_v22 = vrot.slane %v3386_v24, 9 }
  0x4b   : > { %2691 = vmatprep.mubr.bf16.mxu1 %v3545_v31  ;;  %v3560_v25 = vpack.c.bf16 %v448_v44, %v448_v44  ;;  %2705 = vmatprep.subr.bf16.mxu1 %v3034_v34  ;;  %v621_v16 = vshrl.u32 %v3557_v46, 16  ;;  %v624_v38 = vshll.u32 %v3557_v46, 16  ;;  %v1404_v57 = vrot.slane %v3395_v26, 5 }
  0x4c   : > { %2787 = vmatprep.mubr.bf16.mxu0 %v2345_v43  ;;  %v2261_v10 = vrot.slane %v3250_v7, 9  ;;  %v3600_v24 = vsel %vm3581_vm7, %v2263_v1, %v914_v2  ;;  %v906_v36 = vrot.slane %v3263_v11, 5  ;;  %v3035_v11 = vld [vmem:[%s3929_s3 + $0x168] sm:$0xff]   ;;  %v2502_v43 = vpack.c.bf16 %v3471_v27, %v3405_v39 }
  0x4d   : > { %2794 = vmatpush3.bf16.msra.mxu0 %v3027_v19  ;;  %v630_v53 = vshll.u32 %v3560_v25, 16  ;;  %v623_v59 = vrot.slane %v621_v16, 4  ;;  %v626_v60 = vrot.slane %v624_v38, 5  ;;  %v454_v19 = vpack.c.bf16 %v3360_v17, %v3356_v15  ;;  %v3040_v15 = vld [vmem:[%s3929_s3 + $0x80] sm:$0xff]   ;;  %v3042_v38 = vld [vmem:[%s3929_s3 + $0x88] sm:$0xff]  }
  0x4e   : > { %2795 = vmatprep.subr.bf16.mxu0 %v3029_v30  ;;  %2706 = vmatpush3.bf16.msra.mxu1 %v3034_v34  ;;  %v3596_v17 = vsel %vm3581_vm7, %v2262_v0, %v910_v33  ;;  %v3611_v4 = vsel %vm3581_vm7, %v2355_v22, %v1404_v57  ;;  %v3615_v37 = vsel %vm3581_vm7, %v2261_v10, %v906_v36  ;;  %v2265_v33 = vrot.slane %v3483_v47, 9  ;;  %v3046_v22 = vld [vmem:[%s3929_s3 + $0x98] sm:$0xff]   ;;  %v3043_v57 = vld [vmem:[%s3929_s3 + $0x188] sm:$0xff]   ;;  %v3045_v36 = vld [vmem:[%s3929_s3 + $0x190] sm:$0xff]  }
  0x4f   : > { %2707 = vmatprep.subr.bf16.mxu1 %v3036_v50  ;;  %v627_v8 = vor.u32 %v626_v60, %v623_v59  ;;  %v632_v51 = vrot.slane %v630_v53, 5  ;;  %v2249_v7 = vcombine.low %v3144_v6, %v454_v19  ;;  %v2372_v40 = vcombine.low %v3596_v17, %v3600_v24  ;;  %v3039_v53 = vld [vmem:[%s3929_s3 + $0x178] sm:$0xff]  }
  0x50   : > { %v2505_v44 = vpack.c.bf16 %v3485_v49, %v3480_v45  ;;  %v3638_v16 = vpack.c.bf16 %v3405_v39, %v3397_v29  ;;  %v2264_v59 = vrot.slane %v3423_v58, 9  ;;  %v918_v60 = vrot.slane %v3425_v61, 5  ;;  %v3075_v39 = vld [vmem:[%s3929_s3 + $0x218] sm:$0xff]  }
  0x51   : > { %2796 = vmatpush3.bf16.msra.mxu0 %v3029_v30  ;;  %v628_v54 = vrot.slane %v627_v8, 4  ;;  %v2499_v30 = vpack.c.bf16 %v3397_v29, %v3346_v3  ;;  %v3657_v0 = vpack.c.bf16 %v3480_v45, %v3471_v27  ;;  %v922_v1 = vrot.slane %v3497_v56, 5  ;;  %v3068_v3 = vld [vmem:[%s3929_s3 + $0xf0] sm:$0xff]   ;;  %v3070_v29 = vld [vmem:[%s3929_s3 + $0xf8] sm:$0xff]   ;;  %v3076_v27 = vld [vmem:[%s3929_s3 + $0x220] sm:$0xff]  }
  0x52   : > { %2797 = vmatprep.subr.bf16.mxu0 %v3031_v48  ;;  %2708 = vmatpush3.bf16.msra.mxu1 %v3036_v50  ;;  %v3037_v50 = vld [vmem:[%s3929_s3 + $0x170] sm:$0xff]   ;;  %v2266_v58 = vrot.slane %v3503_v62, 9  ;;  %v926_v61 = vrot.slane %v3505_v63, 5  ;;  %v2267_v2 = vrot.slane %v3513_v12, 9  ;;  %v930_v8 = vrot.slane %v3521_v35, 5  ;;  %v3041_v63 = vld [vmem:[%s3929_s3 + $0x180] sm:$0xff]  }
  0x53   : > { %v633_v26 = vsel %vm3313_vm4, %v628_v54, %v632_v51  ;;  %2709 = vmatprep.subr.bf16.mxu1 %v3038_v52  ;;  %v919_v47 = vsel %vm3581_vm7, %v2264_v59, %v918_v60  ;;  %v923_v56 = vsel %vm3581_vm7, %v2265_v33, %v922_v1  ;;  %v3044_v62 = vld [vmem:[%s3929_s3 + $0x90] sm:$0xff]   ;;  %v3689_v51 = vpack.c.bf16 %v3537_v41, %v3485_v49  ;;  %v3058_v59 = vld [vmem:[%s3929_s3 + $0xc8] sm:$0xff]   ;;  %v3055_v60 = vld [vmem:[%s3929_s3 + $0x1b8] sm:$0xff]  }
  0x54   : > { %v3606_v34 = vcombine.low %v619_v13, %v633_v26  ;;  %v2346_v55 = vcombine.low %v633_v26, %v3440_v28  ;;  %v2453_v13 = vcombine.low %v3611_v4, %v3615_v37  ;;  %v927_v12 = vsel %vm3581_vm7, %v2266_v58, %v926_v61  ;;  %v3050_v26 = vld [vmem:[%s3929_s3 + $0xa8] sm:$0xff]   ;;  %v3057_v33 = vld [vmem:[%s3929_s3 + $0x1c0] sm:$0xff]   ;;  %v3062_v58 = vld [vmem:[%s3929_s3 + $0xd8] sm:$0xff]  }
  0x55   : > { %2798 = vmatpush3.bf16.msra.mxu0 %v3031_v48  ;;  %v2508_v48 = vpack.c.bf16 %v3348_v5, %v3537_v41  ;;  %v3685_v35 = vsel %vm3581_vm7, %v2267_v2, %v930_v8  ;;  %v2373_v19 = vcombine.low %v919_v47, %v923_v56  ;;  %v934_v54 = vrot.slane %v3560_v25, 5  ;;  %v3059_v61 = vld [vmem:[%s3929_s3 + $0x1c8] sm:$0xff]   ;;  %v3064_v8 = vld [vmem:[%s3929_s3 + $0xe0] sm:$0xff]   ;;  %v3078_v45 = vld [vmem:[%s3929_s3 + $0x230] sm:$0xff]  }
  0x56   : > { %2799 = vmatprep.subr.bf16.mxu0 %v3033_v23  ;;  %2692 = vmatmul.mubr.bf16.gmra.mrb[4].mxu1 %v3606_v34  ;;  %v2374_v10 = vcombine.low %v927_v12, %v3685_v35  ;;  %v461_v2 = vpack.c.bf16 %v3374_v21, %v3365_v18  ;;  %v3066_v21 = vld [vmem:[%s3929_s3 + $0xe8] sm:$0xff]   ;;  %v3079_v49 = vld [vmem:[%s3929_s3 + $0x238] sm:$0xff]  }
  0x57   : > { %2788 = vmatmul.mubr.bf16.gmra.mrb[4].mxu0 %v2346_v55  ;;  %2710 = vmatpush3.bf16.msra.mxu1 %v3038_v52  ;;  %v3049_v55 = vld [vmem:[%s3929_s3 + $0x1a0] sm:$0xff]   ;;  %v3077_v5 = vld [vmem:[%s3929_s3 + $0x228] sm:$0xff]  }
  0x58   : > { %2711 = vmatprep.mubr.bf16.mxu1 %v2249_v7  ;;  %2719 = vmatprep.subr.bf16.mxu1 %v3040_v15  ;;  %v3052_v7 = vld [vmem:[%s3929_s3 + $0xb0] sm:$0xff]   ;;  %v2400_v18 = vcombine.low %v461_v2, %v3144_v6  ;;  %v3065_v6 = vld [vmem:[%s3929_s3 + $0x1e0] sm:$0xff]  }
  0x59   : > { %2800 = vmatpush3.bf16.msra.mxu0 %v3033_v23  ;;  %2807 = vmatprep.mubr.bf16.mxu0 %v2372_v40  ;;  %v2268_v23 = vrot.slane %v3557_v46, 9  ;;  %v3048_v46 = vld [vmem:[%s3929_s3 + $0xa0] sm:$0xff]   ;;  %v3051_v40 = vld [vmem:[%s3929_s3 + $0x1a8] sm:$0xff]  }
  0x5a   : > { %2801 = vmatprep.subr.bf16.mxu0 %v3035_v11 }
  0x5b   : > { %v935_v25 = vsel %vm3581_vm7, %v2268_v23, %v934_v54  ;;  %v2558_v23 = vld [vmem:[%s277_s11 + $0x10] sm:$0xff]  }
  0x5c   : > { %v3761_v1 = vcombine.low %v3685_v35, %v935_v25 }
  0x5d   : > { %2802 = vmatpush3.bf16.msra.mxu0 %v3035_v11  ;;  %v3054_v11 = vld [vmem:[%s3929_s3 + $0xb8] sm:$0xff]  }
  0x5e   : > { %2803 = vmatprep.subr.bf16.mxu0 %v3037_v50  ;;  %2712 = vmatmul.mubr.msk.bf16.vlgmr.msra.gmra.mrb[0].mxu1 %vm3651_vm8, %v3638_v16 }
  0x5f   : > { %2720 = vmatpush3.bf16.msra.mxu1 %v3040_v15  ;;  %2715 = vmatprep.mubr.msk.bf16.mxu1 %vm3651_vm8, %v3657_v0  ;;  %v2285_v15 = vcombine.low %v3615_v37, %v3596_v17  ;;  %v2375_v17 = vcombine.low %v935_v25, %v3611_v4 }
  0x60   : > { %2721 = vmatprep.subr.bf16.mxu1 %v3042_v38 }
  0x61   : > { %2804 = vmatpush3.bf16.msra.mxu0 %v3037_v50  ;;  %v3056_v50 = vld [vmem:[%s3929_s3 + $0xc0] sm:$0xff]  }
  0x62   : > { %2805 = vmatprep.subr.bf16.mxu0 %v3039_v53 }
  0x63   : > { %2722 = vmatpush3.bf16.msra.mxu1 %v3042_v38  ;;  %v3742_v38 = vcombine.low %v3600_v24, %v919_v47  ;;  %v3060_v24 = vld [vmem:[%s3929_s3 + $0xd0] sm:$0xff]  }
  0x64   : > { %2723 = vmatprep.subr.bf16.mxu1 %v3044_v62  ;;  %v3061_v47 = vld [vmem:[%s3929_s3 + $0x1d0] sm:$0xff]  }
  0x65   : > { %2806 = vmatpush3.bf16.msra.mxu0 %v3039_v53  ;;  %v3744_v53 = vcombine.low %v923_v56, %v927_v12  ;;  %v3072_v56 = vld [vmem:[%s3929_s3 + $0x200] sm:$0xff]   ;;  %v3074_v12 = vld [vmem:[%s3929_s3 + $0x210] sm:$0xff]  }
  0x66   : > { %2815 = vmatprep.subr.bf16.mxu0 %v3041_v63  ;;  %2716 = vmatmul.mubr.msk.bf16.gmra.mrb[4].mxu1 %vm3651_vm8, %v3689_v51 }
  0x67   : > { %2724 = vmatpush3.bf16.msra.mxu1 %v3044_v62  ;;  %2735 = vmatprep.mubr.bf16.mxu1 %v2285_v15  ;;  %v3073_v62 = vld [vmem:[%s3929_s3 + $0x208] sm:$0xff]  }
  0x68   : > { %2808 = vmatmul.mubr.bf16.vlgmr.msra.gmra.mrb[0].mxu0 %v2373_v19  ;;  %2725 = vmatprep.subr.bf16.mxu1 %v3046_v22 }
  0x69   : > { %2816 = vmatpush3.bf16.msra.mxu0 %v3041_v63  ;;  %2811 = vmatprep.mubr.bf16.mxu0 %v2374_v10  ;;  %v3071_v63 = vld [vmem:[%s3929_s3 + $0x1f8] sm:$0xff]  }
  0x6a   : > { %2817 = vmatprep.subr.bf16.mxu0 %v3043_v57 }
  0x6b   : > { %2726 = vmatpush3.bf16.msra.mxu1 %v3046_v22  ;;  %v2559_v22 = vld [vmem:[%s277_s11 + $0x18] sm:$0xff]  }
  0x6c   : > { %2727 = vmatprep.subr.bf16.mxu1 %v3048_v46  ;;  %v2535_v10 = vunpack.c.l.bf16 %v2559_v22 }
  0x6d   : > { %2818 = vmatpush3.bf16.msra.mxu0 %v3043_v57 }
  0x6e   : > { %2819 = vmatprep.subr.bf16.mxu0 %v3045_v36 }
  0x6f   : > { %2728 = vmatpush3.bf16.msra.mxu1 %v3048_v46  ;;  %v2536_v46 = vunpack.c.h.bf16 %v2559_v22 }
  0x70   : > { %2812 = vmatmul.mubr.bf16.gmra.mrb[4].mxu0 %v2375_v17  ;;  %2729 = vmatprep.subr.bf16.mxu1 %v3050_v26 }
  0x71   : > { %2820 = vmatpush3.bf16.msra.mxu0 %v3045_v36  ;;  %2831 = vmatprep.mubr.msk.bf16.mxu0 %vm3651_vm8, %v3638_v16  ;;  %v3053_v16 = vld [vmem:[%s3929_s3 + $0x1b0] sm:$0xff]   ;;  %v2531_v36 = vunpack.c.l.bf16 %v2558_v23 }
  0x72   : > { %2821 = vmatprep.subr.bf16.mxu0 %v3047_v14 }
  0x73   : > { %2730 = vmatpush3.bf16.msra.mxu1 %v3050_v26  ;;  %v2532_v26 = vunpack.c.h.bf16 %v2558_v23 }
  0x74   : > { %2731 = vmatprep.subr.bf16.mxu1 %v3052_v7 }
  0x75   : > { %2822 = vmatpush3.bf16.msra.mxu0 %v3047_v14 }
  0x76   : > { %2823 = vmatprep.subr.bf16.mxu0 %v3049_v55 }
  0x77   : > { %2732 = vmatpush3.bf16.msra.mxu1 %v3052_v7 }
  0x78   : > { %2733 = vmatprep.subr.bf16.mxu1 %v3054_v11 }
  0x79   : > { %2824 = vmatpush3.bf16.msra.mxu0 %v3049_v55 }
  0x7a   : > { %2825 = vmatprep.subr.bf16.mxu0 %v3051_v40 }
  0x7b   : > { %2734 = vmatpush3.bf16.msra.mxu1 %v3054_v11 }
  0x7c   : > { %2743 = vmatprep.subr.bf16.mxu1 %v3056_v50 }
  0x7d   : > { %2826 = vmatpush3.bf16.msra.mxu0 %v3051_v40 }
  0x7e   : > { %2827 = vmatprep.subr.bf16.mxu0 %v3053_v16  ;;  %2736 = vmatmul.mubr.bf16.vlgmr.msra.gmra.mrb[0].mxu1 %v3742_v38 }
  0x7f   : > { %2744 = vmatpush3.bf16.msra.mxu1 %v3056_v50  ;;  %2739 = vmatprep.mubr.bf16.mxu1 %v3744_v53  ;;  %v2522_v50 = vld [vmem:[%s277_s11] sm:$0xff]  }
  0x80   : > { %2745 = vmatprep.subr.bf16.mxu1 %v3058_v59 }
  0x81   : > { %2828 = vmatpush3.bf16.msra.mxu0 %v3053_v16 }
  0x82   : > { %2829 = vmatprep.subr.bf16.mxu0 %v3055_v60 }
  0x83   : > { %2746 = vmatpush3.bf16.msra.mxu1 %v3058_v59 }
  0x84   : > { %2747 = vmatprep.subr.bf16.mxu1 %v3060_v24 }
  0x85   : > { %2830 = vmatpush3.bf16.msra.mxu0 %v3055_v60 }
  0x86   : > { %2839 = vmatprep.subr.bf16.mxu0 %v3057_v33  ;;  %2740 = vmatmul.mubr.bf16.gmra.mrb[4].mxu1 %v3761_v1 }
  0x87   : > { %2748 = vmatpush3.bf16.msra.mxu1 %v3060_v24  ;;  %2759 = vmatprep.mubr.msk.bf16.mxu1 %vm3651_vm8, %v2499_v30  ;;  %v3067_v30 = vld [vmem:[%s3929_s3 + $0x1e8] sm:$0xff]  }
  0x88   : > { %2832 = vmatmul.mubr.msk.bf16.vlgmr.msra.gmra.mrb[0].mxu0 %vm3651_vm8, %v3657_v0  ;;  %2749 = vmatprep.subr.bf16.mxu1 %v3062_v58  ;;  %v3063_v0 = vld [vmem:[%s3929_s3 + $0x1d8] sm:$0xff]  }
  0x89   : > { %2840 = vmatpush3.bf16.msra.mxu0 %v3057_v33  ;;  %2835 = vmatprep.mubr.msk.bf16.mxu0 %vm3651_vm8, %v3689_v51  ;;  %v2523_v33 = vunpack.c.l.bf16 %v2522_v50 }
  0x8a   : > { %2841 = vmatprep.subr.bf16.mxu0 %v3059_v61 }
  0x8b   : > { %2750 = vmatpush3.bf16.msra.mxu1 %v3062_v58 }
  0x8c   : > { %2751 = vmatprep.subr.bf16.mxu1 %v3064_v8 }
  0x8d   : > { %2842 = vmatpush3.bf16.msra.mxu0 %v3059_v61 }
  0x8e   : > { %2843 = vmatprep.subr.bf16.mxu0 %v3061_v47 }
  0x8f   : > { %2752 = vmatpush3.bf16.msra.mxu1 %v3064_v8 }
  0x90   : > { %2836 = vmatmul.mubr.bf16.gmra.mrb[4].mxu0 %v2400_v18  ;;  %2753 = vmatprep.subr.bf16.mxu1 %v3066_v21  ;;  %v2524_v18 = vunpack.c.h.bf16 %v2522_v50 }
  0x91   : > { %2844 = vmatpush3.bf16.msra.mxu0 %v3061_v47  ;;  %2855 = vmatprep.mubr.bf16.mxu0 %v3469_v20  ;;  %v3069_v20 = vld [vmem:[%s3929_s3 + $0x1f0] sm:$0xff]  }
  0x92   : > { %2845 = vmatprep.subr.bf16.mxu0 %v3063_v0 }
  0x93   : > { %2754 = vmatpush3.bf16.msra.mxu1 %v3066_v21 }
  0x94   : > { %2755 = vmatprep.subr.bf16.mxu1 %v3068_v3 }
  0x95   : > { %2846 = vmatpush3.bf16.msra.mxu0 %v3063_v0 }
  0x96   : > { %2847 = vmatprep.subr.bf16.mxu0 %v3065_v6 }
  0x97   : > { %2756 = vmatpush3.bf16.msra.mxu1 %v3068_v3 }
  0x98   : > { %2757 = vmatprep.subr.bf16.mxu1 %v3070_v29 }
  0x99   : > { %2848 = vmatpush3.bf16.msra.mxu0 %v3065_v6 }
  0x9a   : > { %2849 = vmatprep.subr.bf16.mxu0 %v3067_v30 }
  0x9b   : > { %2758 = vmatpush3.bf16.msra.mxu1 %v3070_v29 }
  0x9c   : > { %2887 = vmatprep.subr.bf16.mxu1 %v3072_v56 }
  0x9d   : > { %2850 = vmatpush3.bf16.msra.mxu0 %v3067_v30 }
  0x9e   : > { %2851 = vmatprep.subr.bf16.mxu0 %v3069_v20  ;;  %2760 = vmatmul.mubr.msk.bf16.vlgmr.msra.gmra.mrb[0].mxu1 %vm3651_vm8, %v2502_v43 }
  0x9f   : > { %2895 = vmatpush3.bf16.msra.mxu1 %v3072_v56  ;;  %2763 = vmatprep.mubr.msk.bf16.mxu1 %vm3651_vm8, %v2505_v44 }
  0xa0   : > { %2888 = vmatprep.subr.bf16.mxu1 %v3073_v62 }
  0xa1   : > { %2852 = vmatpush3.bf16.msra.mxu0 %v3069_v20 }
  0xa2   : > { %2853 = vmatprep.subr.bf16.mxu0 %v3071_v63 }
  0xa3   : > { %2896 = vmatpush3.bf16.msra.mxu1 %v3073_v62 }
  0xa4   : > { %2889 = vmatprep.subr.bf16.mxu1 %v3074_v12 }
  0xa5   : > { %2854 = vmatpush3.bf16.msra.mxu0 %v3071_v63 }
  0xa6   : > { %2863 = vmatprep.subr.bf16.mxu0 %v3072_v56  ;;  %2764 = vmatmul.mubr.msk.bf16.gmra.mrb[4].mxu1 %vm3651_vm8, %v2508_v48 }
  0xa7   : > { %2897 = vmatpush3.bf16.msra.mxu1 %v3074_v12  ;;  %2883 = vmatprep.mubr.bf16.mxu1 %v3761_v1 }
  0xa8   : > { %2856 = vmatmul.mubr.bf16.vlgmr.msra.gmra.mrb[0].mxu0 %v3545_v31  ;;  %2890 = vmatprep.subr.bf16.mxu1 %v3075_v39 }
  0xa9   : > { %2864 = vmatpush3.bf16.msra.mxu0 %v3072_v56  ;;  %2859 = vmatprep.mubr.bf16.mxu0 %v3606_v34 }
  0xaa   : > { %2865 = vmatprep.subr.bf16.mxu0 %v3073_v62 }
  0xab   : > { %2898 = vmatpush3.bf16.msra.mxu1 %v3075_v39 }
  0xac   : > { %2891 = vmatprep.subr.bf16.mxu1 %v3076_v27 }
  0xad   : > { %2866 = vmatpush3.bf16.msra.mxu0 %v3073_v62 }
  0xae   : > { %2867 = vmatprep.subr.bf16.mxu0 %v3074_v12 }
  0xaf   : > { %2899 = vmatpush3.bf16.msra.mxu1 %v3076_v27 }
  0xb0   : > { %2860 = vmatmul.mubr.bf16.gmra.mrb[4].mxu0 %v2427_v32  ;;  %2892 = vmatprep.subr.bf16.mxu1 %v3077_v5 }
  0xb1   : > { %2868 = vmatpush3.bf16.msra.mxu0 %v3074_v12  ;;  %2879 = vmatprep.mubr.bf16.mxu0 %v3742_v38 }
  0xb2   : > { %2869 = vmatprep.subr.bf16.mxu0 %v3075_v39 }
  0xb3   : > { %2900 = vmatpush3.bf16.msra.mxu1 %v3077_v5 }
  0xb4   : > { %2893 = vmatprep.subr.bf16.mxu1 %v3078_v45 }
  0xb5   : > { %2870 = vmatpush3.bf16.msra.mxu0 %v3075_v39 }
  0xb6   : > { %2871 = vmatprep.subr.bf16.mxu0 %v3076_v27 }
  0xb7   : > { %2901 = vmatpush3.bf16.msra.mxu1 %v3078_v45 }
  0xb8   : > { %2894 = vmatprep.subr.bf16.mxu1 %v3079_v49 }
  0xb9   : > { %2872 = vmatpush3.bf16.msra.mxu0 %v3076_v27 }
  0xba   : > { %2873 = vmatprep.subr.bf16.mxu0 %v3077_v5 }
  0xbb   : > { %2902 = vmatpush3.bf16.msra.mxu1 %v3079_v49 }
  0xbd   : > { %2874 = vmatpush3.bf16.msra.mxu0 %v3077_v5 }
  0xbe   : > { %2875 = vmatprep.subr.bf16.mxu0 %v3078_v45  ;;  %2884 = vmatmul.mubr.bf16.vlgmr.msra.gmra.mrb[8].mxu1 %v2453_v13 }
  0xc1   : > { %2876 = vmatpush3.bf16.msra.mxu0 %v3078_v45 }
  0xc2   : > { %2877 = vmatprep.subr.bf16.mxu0 %v3079_v49 }
  0xc5   : > { %2878 = vmatpush3.bf16.msra.mxu0 %v3079_v49 }
  0xc8   : > { %2880 = vmatmul.mubr.bf16.vlgmr.msra.gmra.mrb[0].mxu0 %v3744_v53  ;;  %v2557_v53 = vld [vmem:[%s277_s11 + $0x8] sm:$0xff]   ;;  %s3086_s11 = scalar_lea.vmem %s3085_s10, 64 }
  0xc9   : > { %v2527_v58 = vunpack.c.l.bf16 %v2557_v53  ;;  %v2528_v2 = vunpack.c.h.bf16 %v2557_v53  ;;  %p3088_p1 = scmp.lt.s32.totalorder %s3086_s11, %s3080_s25 }
  0xcb   : > { %p3089_p2 = por %p3088_p1, %p3087_p0 }
  0xcd   : > { %p3090_p3 = pnand %p3089_p2, %p3083_p13 }
 0x171   : > { %v2761_v42 = vpop.f32.mrb[0].mxu1 }
 0x172   : > { %v1199_v28 = vpop.f32.mrb[1].mxu1 }
 0x173   : > { %v2762_v32 = vpop.f32.mrb[2].mxu1 }
 0x174   : > { %v1202_v41 = vpop.f32.mrb[3].mxu1 }
 0x179   : > { %v2765_v31 = vpop.f32.mrb[4].mxu1 }
 0x17a   : > { %v1215_v34 = vpop.f32.mrb[5].mxu1 }
 0x17b   : > { %v2766_v43 = vpop.f32.mrb[6].mxu1 }
 0x17c   : > { %v1218_v44 = vpop.f32.mrb[7].mxu1 }
 0x183   : > { %v2861_v48 = vpop.f32.mrb[4].mxu0 }
 0x184   : > { %v2907_v52 = vadd.f32 %v2861_v48, %v2765_v31  ;;  %v1830_v35 = vpop.f32.mrb[5].mxu0 }
 0x185   : > { %v2909_v51 = vadd.f32 %v1830_v35, %v1215_v34  ;;  %v2862_v4 = vpop.f32.mrb[6].mxu0 }
 0x186   : > { %v2911_v37 = vadd.f32 %v2862_v4, %v2766_v43  ;;  %v1833_v13 = vpop.f32.mrb[7].mxu0 }
 0x187   : > { %v2913_v19 = vadd.f32 %v1833_v13, %v1218_v44 }
 0x191   : > { %v2885_v54 = vpop.f32.mrb[8].mxu1 }
 0x192   : > { %v2908_v57 = vadd.f32 %v2907_v52, %v2885_v54  ;;  %v1975_v15 = vpop.f32.mrb[9].mxu1 }
 0x193   : > { %v2910_v25 = vadd.f32 %v2909_v51, %v1975_v15  ;;  %v2886_v17 = vpop.f32.mrb[10].mxu1 }
 0x194   : > { %v2912_v14 = vadd.f32 %v2911_v37, %v2886_v17  ;;  %v1978_v7 = vpop.f32.mrb[11].mxu1  ;;  %v2020_v11 = vadd.f32 %v2908_v57, %v2535_v10 }
 0x195   : > { %v2914_v55 = vadd.f32 %v2913_v19, %v1978_v7  ;;  %v2018_v16 = vadd.f32 %v2910_v25, %v2531_v36 }
 0x196   : > { %v2021_v40 = vadd.f32 %v2912_v14, %v2536_v46  ;;  %v2057_v48 = vmul.f32 %v2020_v11, %v2020_v11 }
 0x197   : > { %v2019_v38 = vadd.f32 %v2914_v55, %v2532_v26 }
 0x198   : > { %v2555_v59 = vpack.c.bf16 %v2021_v40, %v2020_v11  ;;  %v2058_v51 = vmul.f32 %v2021_v40, %v2021_v40 }
 0x199   : > { %v2550_v60 = vpack.c.bf16 %v2019_v38, %v2018_v16  ;;  %v2056_v43 = vmul.f32 %v2019_v38, %v2019_v38 }
 0x19a   : > { %2562 = vst [vmem:[%s3872_s13 + $0x18] sm:$0xff] %v2555_v59  }
 0x19b   : > { %v2881_v24 = vpop.f32.mrb[0].mxu0  ;;  %2561 = vst [vmem:[%s3872_s13 + $0x10] sm:$0xff] %v2550_v60  }
 0x19c   : > { %v2903_v1 = vadd.f32 %v2881_v24, %v2761_v42  ;;  %v1959_v61 = vpop.f32.mrb[1].mxu0 }
 0x19d   : > { %v2904_v8 = vadd.f32 %v1959_v61, %v1199_v28  ;;  %v2882_v47 = vpop.f32.mrb[2].mxu0 }
 0x19e   : > { %v2905_v21 = vadd.f32 %v2882_v47, %v2762_v32  ;;  %v1962_v0 = vpop.f32.mrb[3].mxu0  ;;  %v2016_v29 = vadd.f32 %v2903_v1, %v2527_v58  ;;  %v2055_v32 = vmul.f32 %v2018_v16, %v2018_v16 }
 0x19f   : > { %v2014_v3 = vadd.f32 %v2904_v8, %v2523_v33  ;;  %v2906_v6 = vadd.f32 %v1962_v0, %v1202_v41 }
 0x1a0   : > { %v2017_v30 = vadd.f32 %v2905_v21, %v2528_v2  ;;  %v2053_v27 = vmul.f32 %v2016_v29, %v2016_v29 }
 0x1a1   : > { %v2015_v56 = vadd.f32 %v2906_v6, %v2524_v18  ;;  %v2051_v62 = vmul.f32 %v2014_v3, %v2014_v3 }
 0x1a2   : > { %v2545_v20 = vpack.c.bf16 %v2017_v30, %v2016_v29  ;;  %v2054_v49 = vmul.f32 %v2017_v30, %v2017_v30 }
 0x1a3   : > { %v2540_v63 = vpack.c.bf16 %v2015_v56, %v2014_v3  ;;  %v2038_v12 = vadd.f32 %v2015_v56, %v2014_v3  ;;  %v2052_v39 = vmul.f32 %v2015_v56, %v2015_v56 }
 0x1a4   : > { %2560 = vst [vmem:[%s3872_s13 + $0x8] sm:$0xff] %v2545_v20  }
 0x1a5   : > { %2541 = vst [vmem:[%s3872_s13] sm:$0xff] %v2540_v63   ;;  %v2039_v5 = vadd.f32 %v2038_v12, %v2016_v29  ;;  %v2059_v45 = vadd.f32 %v2052_v39, %v2051_v62 }
 0x1a7   : > { %v2060_v42 = vadd.f32 %v2059_v45, %v2053_v27  ;;  %v2040_v28 = vadd.f32 %v2039_v5, %v2017_v30 }
 0x1a9   : > { %v2041_v31 = vadd.f32 %v2040_v28, %v2018_v16  ;;  %v2061_v41 = vadd.f32 %v2060_v42, %v2054_v49 }
 0x1ab   : > { %v2042_v34 = vadd.f32 %v2041_v31, %v2019_v38  ;;  %v2062_v44 = vadd.f32 %v2061_v41, %v2055_v32 }
 0x1ad   : > { %v2043_v52 = vadd.f32 %v2042_v34, %v2020_v11  ;;  %v2063_v35 = vadd.f32 %v2062_v44, %v2056_v43 }
 0x1af   : > { %v2044_v4 = vadd.f32 %v2043_v52, %v2021_v40  ;;  %v2064_v37 = vadd.f32 %v2063_v35, %v2057_v48 }
 0x1b1   : > { %v2045_v13 = vrot.slane %v2044_v4, 4  ;;  %v2065_v19 = vadd.f32 %v2064_v37, %v2058_v51 }
 0x1b3   : > { %v2046_v22 = vadd.f32 %v2045_v13, %v2044_v4  ;;  %v2066_v23 = vrot.slane %v2065_v19, 4 }
 0x1b5   : > { %v2047_v54 = vrot.slane %v2046_v22, 2  ;;  %v2067_v57 = vadd.f32 %v2066_v23, %v2065_v19 }
 0x1b7   : > { %v2048_v10 = vadd.f32 %v2047_v54, %v2046_v22  ;;  %v2068_v15 = vrot.slane %v2067_v57, 2 }
 0x1b9   : > { %v2049_v46 = vrot.slane %v2048_v10, 1  ;;  %v2069_v25 = vadd.f32 %v2068_v15, %v2067_v57 }
 0x1bb   : > { %v2070_v36 = vrot.slane %v2069_v25, 1  ;;  %v2050_v17 = vadd.f32 %v2049_v46, %v2048_v10 }
 0x1bd   : > { %v2071_v26 = vadd.f32 %v2070_v36, %v2069_v25 }
 0x1bf   : > { %v2073_v14 = vsel %vm2072_vm9, %v2050_v17, %v2071_v26 }
 0x1c0   : > { %2074 = vst [vmem:[%s267_s16] sm:$0x3] %v2073_v14 }
 0x1c1   : > { %3093 = shalt.err (!%p3090_p3)
}
 0x1c2   : > { %s3094_s17 = scalar_lea.hbm %s3884_s29, 32  ;;  %s3098_s19 = scalar_lea.hbm %s3932_s6, 64 }
 0x1c3   : > { %p3095_p4 = scmp.ne.s32.totalorder %s3884_s29, %s3094_s17  ;;  %p3099_p9 = scmp.lt.u32.totalorder %s3884_s29, %s3932_s6 }
 0x1c4   : > { %p3100_p10 = scmp.lt.u32.totalorder %s3098_s19, %s3094_s17  ;;  %p3102_p12 = scmp.lt.u32.totalorder %s3094_s17, %s3884_s29 }
 0x1c5   : > { %p3096_p7 = pnand %p3095_p4, %p3219_p5 }
 0x1c6   : > { %p3101_p11 = por %p3100_p10, %p3099_p9 }
 0x1c7   : > { %p3097_p8 = pneg %p3096_p7 }
 0x1c8   : > { %p3103_p13 = por %p3102_p12, %p3101_p11 }
 0x1ca   : > { %p3104_p0 = pnand %p3103_p13, %p3097_p8 }
 0x1cc   : > { %3107 = shalt.err (!%p3104_p0)
}
 0x1cd   : > { %2968 = dma.vmem_to_hbm [thread:$0]  (%p3219_p5), %s3886_s18, 32, %s3884_s29, %s2081_s9  }
 0x1ce PF: > { %p2974_p1 = scmp.ge.s32.totalorder %s3142_s24, 2  ;;  %s2117_s16 = sand.u32 1, %s3130_s21  }
 0x1cf   : > { %s2118_s20 = scalar_lea.sflag [#allocation3], %s2117_s16 }
 0x1d0   : > { %p2971_p2 = pnand %p2974_p1, %p3223_p6 }
 0x1d2   : > { %3125 = dma.done.wait (!%p2971_p2), %s2118_s20, 32  }
 0x1d3   : > { %3127 = vsyncadd (!%p2971_p2), %s2118_s20, 4294967264  ;;  %p17_p3 = scmp.ge.s32.totalorder %s3206_s27, 4   ;;  %s3941_s21 = smov %s3134_s22 }
 0x1d4   : > { %s3942_s22 = smov %s3138_s23  ;;  %s3943_s23 = smov %s3217_s30 }
 0x1d5   : > { %s3944_s24 = smov %s3206_s27  ;;  %19 = sbr.rel (!%p17_p3) target bundleno = 3 (0x3), region = 98 }
 0x1dc   :  { %2123 = vsyncpa [#allocation3], 1 }
 0x1dd   :  { %2125 = vsyncpa [#allocation3 + $0x1], 1 }

// kernel: _lambda_.9
= control target key start
LH: loop header
LB: loop body
LE: loop exit
PB: predicated region body
PF: predicated region fallthrough
CT: control target
= control target key end

     0   :  { %s2968_s1 = inlined_call_operand.vmem [shape: bf16[1152,128], index: 1, kind: input, shape index: {}]   ;;  %s2969_s0 = inlined_call_operand.vmem [shape: bf16[128,1152], index: 0, kind: input, shape index: {}]   ;;  %s2970_s2 = inlined_call_operand.vmem [shape: bf16[128,128], index: 2, kind: output, shape index: {0}]   ;;  %s2971_s3 = inlined_call_operand.vmem [shape: f32[1,2,128], index: 3, kind: output, shape index: {1}]  }
   0x1   :  { %v2217_v0 = vld [vmem:[%s2968_s1 + $0x40] sm:$0xff]   ;;  %v2221_v4 = vld [vmem:[%s2968_s1 + $0x48] sm:$0xff]   ;;  %v2225_v8 = vld [vmem:[%s2968_s1 + $0x50] sm:$0xff]  }
   0x2   :  { %v2218_v1 = vld [vmem:[%s2968_s1 + $0xc0] sm:$0xff]   ;;  %1897 = vmatprep.subr.bf16.mxu0 %v2217_v0  ;;  %v2222_v5 = vld [vmem:[%s2968_s1 + $0xc8] sm:$0xff]   ;;  %v2226_v9 = vld [vmem:[%s2968_s1 + $0xd0] sm:$0xff]  }
   0x3   :  { %v2219_v2 = vld [vmem:[%s2968_s1] sm:$0xff]   ;;  %1961 = vmatprep.subr.bf16.mxu1 %v2218_v1  ;;  %v2223_v6 = vld [vmem:[%s2968_s1 + $0x8] sm:$0xff]   ;;  %v2227_v10 = vld [vmem:[%s2968_s1 + $0x10] sm:$0xff]  }
   0x4   :  { %v2220_v3 = vld [vmem:[%s2968_s1 + $0x80] sm:$0xff]   ;;  %1898 = vmatpush3.bf16.msra.mxu0 %v2219_v2  ;;  %v2224_v7 = vld [vmem:[%s2968_s1 + $0x88] sm:$0xff]   ;;  %v2228_v11 = vld [vmem:[%s2968_s1 + $0x90] sm:$0xff]  }
   0x5   :  { %1962 = vmatpush3.bf16.msra.mxu1 %v2220_v3  ;;  %1899 = vmatprep.subr.bf16.mxu0 %v2221_v4  ;;  %v2229_v12 = vld [vmem:[%s2968_s1 + $0x58] sm:$0xff]   ;;  %v2233_v16 = vld [vmem:[%s2968_s1 + $0x60] sm:$0xff]   ;;  %v2237_v20 = vld [vmem:[%s2968_s1 + $0x68] sm:$0xff]  }
   0x6   :  { %1963 = vmatprep.subr.bf16.mxu1 %v2222_v5  ;;  %v2230_v13 = vld [vmem:[%s2968_s1 + $0xd8] sm:$0xff]   ;;  %v2234_v17 = vld [vmem:[%s2968_s1 + $0xe0] sm:$0xff]   ;;  %v2238_v21 = vld [vmem:[%s2968_s1 + $0xe8] sm:$0xff]  }
   0x7   :  { %v2231_v14 = vld [vmem:[%s2968_s1 + $0x18] sm:$0xff]   ;;  %v2235_v18 = vld [vmem:[%s2968_s1 + $0x20] sm:$0xff]   ;;  %v2239_v22 = vld [vmem:[%s2968_s1 + $0x28] sm:$0xff]  }
   0x8   :  { %1900 = vmatpush3.bf16.msra.mxu0 %v2223_v6  ;;  %v2232_v15 = vld [vmem:[%s2968_s1 + $0x98] sm:$0xff]   ;;  %v2236_v19 = vld [vmem:[%s2968_s1 + $0xa0] sm:$0xff]   ;;  %v2240_v23 = vld [vmem:[%s2968_s1 + $0xa8] sm:$0xff]  }
   0x9   :  { %1964 = vmatpush3.bf16.msra.mxu1 %v2224_v7  ;;  %1901 = vmatprep.subr.bf16.mxu0 %v2225_v8  ;;  %v2241_v24 = vld [vmem:[%s2968_s1 + $0x70] sm:$0xff]   ;;  %v2245_v28 = vld [vmem:[%s2968_s1 + $0x78] sm:$0xff]   ;;  %v2249_v32 = vld [vmem:[%s2969_s0] ss:$36 sps:$4 sm:$0xff]  }
   0xa   :  { %1965 = vmatprep.subr.bf16.mxu1 %v2226_v9  ;;  %v2242_v25 = vld [vmem:[%s2968_s1 + $0xf0] sm:$0xff]   ;;  %v2246_v29 = vld [vmem:[%s2968_s1 + $0xf8] sm:$0xff]   ;;  %v2251_v33 = vld [vmem:[%s2969_s0 + $0x4] ss:$36 sps:$4 sm:$0xff]  }
   0xb   :  { %v2243_v26 = vld [vmem:[%s2968_s1 + $0x30] sm:$0xff]   ;;  %v2247_v30 = vld [vmem:[%s2968_s1 + $0x38] sm:$0xff]   ;;  %v2252_v34 = vld [vmem:[%s2969_s0 + $0x8] ss:$36 sps:$4 sm:$0xff]   ;;  %1070 = vmatprep.mubr.bf16.mxu0 %v2251_v33 }
   0xc   :  { %1902 = vmatpush3.bf16.msra.mxu0 %v2227_v10  ;;  %v2244_v27 = vld [vmem:[%s2968_s1 + $0xb0] sm:$0xff]   ;;  %v2248_v31 = vld [vmem:[%s2968_s1 + $0xb8] sm:$0xff]   ;;  %v2255_v36 = vld [vmem:[%s2968_s1 + $0x140] sm:$0xff]  }
   0xd   :  { %1966 = vmatpush3.bf16.msra.mxu1 %v2228_v11  ;;  %1903 = vmatprep.subr.bf16.mxu0 %v2229_v12  ;;  %v2254_v35 = vld [vmem:[%s2969_s0 + $0xc] ss:$36 sps:$4 sm:$0xff]   ;;  %v2256_v37 = vld [vmem:[%s2968_s1 + $0x100] sm:$0xff]   ;;  %v2259_v39 = vld [vmem:[%s2969_s0 + $0x54] ss:$36 sps:$4 sm:$0xff]  }
   0xe   :  { %1967 = vmatprep.subr.bf16.mxu1 %v2230_v13  ;;  %1167 = vmatprep.mubr.bf16.mxu1 %v2254_v35  ;;  %v2257_v38 = vld [vmem:[%s2969_s0 + $0x4c] ss:$36 sps:$4 sm:$0xff]   ;;  %v2265_v44 = vld [vmem:[%s2969_s0 + $0x94] ss:$36 sps:$4 sm:$0xff]   ;;  %v2267_v45 = vld [vmem:[%s2969_s0 + $0x9c] ss:$36 sps:$4 sm:$0xff]  }
   0xf   :  { %v2261_v40 = vld [vmem:[%s2969_s0 + $0x48] ss:$36 sps:$4 sm:$0xff]   ;;  %v2262_v41 = vld [vmem:[%s2969_s0 + $0x50] ss:$36 sps:$4 sm:$0xff]   ;;  %v2272_v47 = vld [vmem:[%s2968_s1 + $0x1c0] sm:$0xff]  }
  0x10   :  { %1904 = vmatpush3.bf16.msra.mxu0 %v2231_v14  ;;  %v2263_v42 = vld [vmem:[%s2968_s1 + $0x148] sm:$0xff]   ;;  %v2271_v46 = vld [vmem:[%s2968_s1 + $0x150] sm:$0xff]   ;;  %v2274_v50 = vld [vmem:[%s2968_s1 + $0x180] sm:$0xff]  }
  0x11   :  { %1968 = vmatpush3.bf16.msra.mxu1 %v2232_v15  ;;  %1905 = vmatprep.subr.bf16.mxu0 %v2233_v16  ;;  %v2264_v43 = vld [vmem:[%s2968_s1 + $0x108] sm:$0xff]   ;;  %v2269_v48 = vld [vmem:[%s2969_s0 + $0x90] ss:$36 sps:$4 sm:$0xff]   ;;  %v2270_v51 = vld [vmem:[%s2969_s0 + $0x98] ss:$36 sps:$4 sm:$0xff]  }
  0x12   :  { %1969 = vmatprep.subr.bf16.mxu1 %v2234_v17  ;;  %v2273_v49 = vld [vmem:[%s2968_s1 + $0x110] sm:$0xff]   ;;  %v2275_v52 = vld [vmem:[%s2969_s0 + $0xdc] ss:$36 sps:$4 sm:$0xff]   ;;  %v2277_v53 = vld [vmem:[%s2969_s0 + $0xe4] ss:$36 sps:$4 sm:$0xff]  }
  0x13   :  { %v2281_v54 = vld [vmem:[%s2968_s1 + $0x158] sm:$0xff]   ;;  %v2282_v55 = vld [vmem:[%s2968_s1 + $0x1c8] sm:$0xff]   ;;  %v2280_v59 = vld [vmem:[%s2969_s0 + $0xe0] ss:$36 sps:$4 sm:$0xff]  }
  0x14   :  { %1906 = vmatpush3.bf16.msra.mxu0 %v2235_v18  ;;  %v2283_v56 = vld [vmem:[%s2968_s1 + $0x118] sm:$0xff]   ;;  %v2284_v57 = vld [vmem:[%s2968_s1 + $0x188] sm:$0xff]   ;;  %v2291_v62 = vld [vmem:[%s2968_s1 + $0x160] sm:$0xff]  }
  0x15   :  { %1970 = vmatpush3.bf16.msra.mxu1 %v2236_v19  ;;  %1907 = vmatprep.subr.bf16.mxu0 %v2237_v20  ;;  %v2279_v58 = vld [vmem:[%s2969_s0 + $0xd8] ss:$36 sps:$4 sm:$0xff]   ;;  %v2285_v60 = vld [vmem:[%s2969_s0 + $0x124] ss:$36 sps:$4 sm:$0xff]   ;;  %v2287_v61 = vld [vmem:[%s2969_s0 + $0x12c] ss:$36 sps:$4 sm:$0xff]  }
  0x16   :  { %1971 = vmatprep.subr.bf16.mxu1 %v2238_v21  ;;  %v2292_v63 = vld [vmem:[%s2968_s1 + $0x1d0] sm:$0xff]   ;;  %v2293_v0 = vld [vmem:[%s2968_s1 + $0x120] sm:$0xff]   ;;  %v2290_v3 = vld [vmem:[%s2969_s0 + $0x128] ss:$36 sps:$4 sm:$0xff]  }
  0x17   :  { %v2294_v1 = vld [vmem:[%s2968_s1 + $0x190] sm:$0xff]   ;;  %v2289_v2 = vld [vmem:[%s2969_s0 + $0x120] ss:$36 sps:$4 sm:$0xff]   ;;  %v2301_v6 = vld [vmem:[%s2968_s1 + $0x168] sm:$0xff]  }
  0x18   :  { %1908 = vmatpush3.bf16.msra.mxu0 %v2239_v22  ;;  %v2295_v4 = vld [vmem:[%s2969_s0 + $0x16c] ss:$36 sps:$4 sm:$0xff]   ;;  %v2297_v5 = vld [vmem:[%s2969_s0 + $0x174] ss:$36 sps:$4 sm:$0xff]   ;;  %v2307_v14 = vld [vmem:[%s2969_s0 + $0x1bc] ss:$36 sps:$4 sm:$0xff]  }
  0x19   :  { %1972 = vmatpush3.bf16.msra.mxu1 %v2240_v23  ;;  %1909 = vmatprep.subr.bf16.mxu0 %v2241_v24  ;;  %v2302_v7 = vld [vmem:[%s2968_s1 + $0x1d8] sm:$0xff]   ;;  %v2303_v8 = vld [vmem:[%s2968_s1 + $0x128] sm:$0xff]   ;;  %v2300_v11 = vld [vmem:[%s2969_s0 + $0x170] ss:$36 sps:$4 sm:$0xff]  }
  0x1a   :  { %1973 = vmatprep.subr.bf16.mxu1 %v2242_v25  ;;  %v2304_v9 = vld [vmem:[%s2968_s1 + $0x198] sm:$0xff]   ;;  %v2299_v10 = vld [vmem:[%s2969_s0 + $0x168] ss:$36 sps:$4 sm:$0xff]   ;;  %v2311_v13 = vld [vmem:[%s2968_s1 + $0x170] sm:$0xff]  }
  0x1b   :  { %v2305_v12 = vld [vmem:[%s2969_s0 + $0x1b4] ss:$36 sps:$4 sm:$0xff]   ;;  %v2312_v15 = vld [vmem:[%s2968_s1 + $0x1e0] sm:$0xff]   ;;  %v2315_v18 = vld [vmem:[%s2968_s1 + $0x1e8] sm:$0xff]  }
  0x1c   :  { %1910 = vmatpush3.bf16.msra.mxu0 %v2243_v26  ;;  %v2313_v16 = vld [vmem:[%s2968_s1 + $0x130] sm:$0xff]   ;;  %v2314_v17 = vld [vmem:[%s2968_s1 + $0x1a0] sm:$0xff]   ;;  %v2316_v19 = vld [vmem:[%s2968_s1 + $0x1a8] sm:$0xff]  }
  0x1d   :  { %1974 = vmatpush3.bf16.msra.mxu1 %v2244_v27  ;;  %1911 = vmatprep.subr.bf16.mxu0 %v2245_v28  ;;  %v2309_v20 = vld [vmem:[%s2969_s0 + $0x1b0] ss:$36 sps:$4 sm:$0xff]   ;;  %v2310_v21 = vld [vmem:[%s2969_s0 + $0x1b8] ss:$36 sps:$4 sm:$0xff]   ;;  %v2319_v23 = vld [vmem:[%s2969_s0 + $0x204] ss:$36 sps:$4 sm:$0xff]  }
  0x1e   :  { %1975 = vmatprep.subr.bf16.mxu1 %v2246_v29  ;;  %v2317_v22 = vld [vmem:[%s2969_s0 + $0x1fc] ss:$36 sps:$4 sm:$0xff]   ;;  %v2324_v25 = vld [vmem:[%s2968_s1 + $0x1f0] sm:$0xff]  }
  0x1f   :  { %v2323_v24 = vld [vmem:[%s2968_s1 + $0x178] sm:$0xff]   ;;  %v2326_v27 = vld [vmem:[%s2968_s1 + $0x1b0] sm:$0xff]  }
  0x20   :  { %1912 = vmatpush3.bf16.msra.mxu0 %v2247_v30  ;;  %v2325_v26 = vld [vmem:[%s2968_s1 + $0x138] sm:$0xff]   ;;  %v2322_v30 = vld [vmem:[%s2969_s0 + $0x200] ss:$36 sps:$4 sm:$0xff]   ;;  %v2329_v35 = vld [vmem:[%s2969_s0 + $0x10] ss:$36 sps:$4 sm:$0xff]  }
  0x21   :  { %1976 = vmatpush3.bf16.msra.mxu1 %v2248_v31  ;;  %2025 = vmatprep.subr.bf16.mxu0 %v2255_v36  ;;  %v2327_v28 = vld [vmem:[%s2968_s1 + $0x1f8] sm:$0xff]  }
  0x22   :  { %2089 = vmatprep.subr.bf16.mxu1 %v2272_v47  ;;  %v2321_v29 = vld [vmem:[%s2969_s0 + $0x1f8] ss:$36 sps:$4 sm:$0xff]   ;;  %v2347_v47 = vld [vmem:[%s2969_s0 + $0xa0] ss:$36 sps:$4 sm:$0xff]  }
  0x23   :  { %1071 = vmatmul.mubr.bf16.vlgmr.msra.gmra.mrb[0].mxu0 %v2249_v32  ;;  %v2328_v31 = vld [vmem:[%s2968_s1 + $0x1b8] sm:$0xff]   ;;  %v2335_v32 = vld [vmem:[%s2968_s1 + $0x200] sm:$0xff]  }
  0x24   :  { %1168 = vmatmul.mubr.bf16.vlgmr.msra.gmra.mrb[0].mxu1 %v2252_v34  ;;  %2026 = vmatpush3.bf16.msra.mxu0 %v2256_v37  ;;  %v2331_v33 = vld [vmem:[%s2969_s0 + $0x14] ss:$36 sps:$4 sm:$0xff]   ;;  %v2334_v34 = vld [vmem:[%s2969_s0 + $0x1c] ss:$36 sps:$4 sm:$0xff]  }
  0x25   :  { %1078 = vmatprep.mubr.bf16.mxu0 %v2257_v38  ;;  %1175 = vmatprep.mubr.bf16.mxu1 %v2259_v39  ;;  %v2332_v36 = vld [vmem:[%s2969_s0 + $0x18] ss:$36 sps:$4 sm:$0xff]   ;;  %v2338_v38 = vld [vmem:[%s2969_s0 + $0x64] ss:$36 sps:$4 sm:$0xff]  }
  0x26   :  { %2027 = vmatprep.subr.bf16.mxu0 %v2263_v42  ;;  %2090 = vmatpush3.bf16.msra.mxu1 %v2274_v50  ;;  %v2336_v37 = vld [vmem:[%s2969_s0 + $0x5c] ss:$36 sps:$4 sm:$0xff]   ;;  %v2342_v39 = vld [vmem:[%s2968_s1 + $0x208] sm:$0xff]   ;;  %v2352_v50 = vld [vmem:[%s2969_s0 + $0xf4] ss:$36 sps:$4 sm:$0xff]  }
  0x27   :  { %2091 = vmatprep.subr.bf16.mxu1 %v2282_v55  ;;  %v2341_v42 = vld [vmem:[%s2969_s0 + $0x60] ss:$36 sps:$4 sm:$0xff]   ;;  %v2357_v55 = vld [vmem:[%s2969_s0 + $0x134] ss:$36 sps:$4 sm:$0xff]  }
  0x28   :  { %2028 = vmatpush3.bf16.msra.mxu0 %v2264_v43  ;;  %v2343_v43 = vld [vmem:[%s2969_s0 + $0xa4] ss:$36 sps:$4 sm:$0xff]  }
  0x29   :  { %2029 = vmatprep.subr.bf16.mxu0 %v2271_v46  ;;  %v2363_v46 = vld [vmem:[%s2968_s1 + $0x220] sm:$0xff]  }
  0x2a   :  { %2092 = vmatpush3.bf16.msra.mxu1 %v2284_v57  ;;  %v2384_v57 = vld [vmem:[%s2968_s1 + $0x238] sm:$0xff]  }
  0x2b   :  { %1079 = vmatmul.mubr.bf16.gmra.mrb[4].mxu0 %v2261_v40  ;;  %2093 = vmatprep.subr.bf16.mxu1 %v2292_v63  ;;  %v2349_v40 = vld [vmem:[%s2968_s1 + $0x210] sm:$0xff]   ;;  %v2369_v63 = vld [vmem:[%s2969_s0 + $0x180] ss:$36 sps:$4 sm:$0xff]  }
  0x2c   :  { %1176 = vmatmul.mubr.bf16.gmra.mrb[4].mxu1 %v2262_v41  ;;  %1086 = vmatprep.mubr.bf16.mxu0 %v2265_v44  ;;  %v2340_v41 = vld [vmem:[%s2969_s0 + $0x58] ss:$36 sps:$4 sm:$0xff]   ;;  %v2345_v44 = vld [vmem:[%s2969_s0 + $0xac] ss:$36 sps:$4 sm:$0xff]  }
  0x2d   :  { %1183 = vmatprep.mubr.bf16.mxu1 %v2267_v45  ;;  %2030 = vmatpush3.bf16.msra.mxu0 %v2273_v49  ;;  %v2356_v45 = vld [vmem:[%s2968_s1 + $0x218] sm:$0xff]   ;;  %v2350_v49 = vld [vmem:[%s2969_s0 + $0xec] ss:$36 sps:$4 sm:$0xff]  }
  0x2e   :  { %2031 = vmatprep.subr.bf16.mxu0 %v2281_v54  ;;  %2094 = vmatpush3.bf16.msra.mxu1 %v2294_v1  ;;  %v2355_v54 = vld [vmem:[%s2969_s0 + $0xf0] ss:$36 sps:$4 sm:$0xff]  }
  0x2f   :  { %2095 = vmatprep.subr.bf16.mxu1 %v2302_v7  ;;  %v2373_v1 = vld [vmem:[%s2969_s0 + $0x1cc] ss:$36 sps:$4 sm:$0xff]  }
  0x30   :  { %v2383_v7 = vld [vmem:[%s2969_s0 + $0x210] ss:$36 sps:$4 sm:$0xff]  }
  0x31   :  { %2032 = vmatpush3.bf16.msra.mxu0 %v2283_v56  ;;  %v2359_v56 = vld [vmem:[%s2969_s0 + $0x13c] ss:$36 sps:$4 sm:$0xff]  }
  0x32   :  { %2033 = vmatprep.subr.bf16.mxu0 %v2291_v62  ;;  %2096 = vmatpush3.bf16.msra.mxu1 %v2304_v9  ;;  %v2368_v62 = vld [vmem:[%s2969_s0 + $0x178] ss:$36 sps:$4 sm:$0xff]   ;;  %v2386_v9 = vld [vmem:[%s2969_s0 + $0x140] ss:$36 sps:$4 sm:$0xff]  }
  0x33   :  { %1087 = vmatmul.mubr.bf16.gmra.mrb[8].mxu0 %v2269_v48  ;;  %2097 = vmatprep.subr.bf16.mxu1 %v2312_v15  ;;  %v2348_v48 = vld [vmem:[%s2969_s0 + $0xa8] ss:$36 sps:$4 sm:$0xff]   ;;  %v2392_v15 = vld [vmem:[%s2969_s0 + $0x218] ss:$36 sps:$4 sm:$0xff]  }
  0x34   :  { %1184 = vmatmul.mubr.bf16.gmra.mrb[8].mxu1 %v2270_v51  ;;  %1094 = vmatprep.mubr.bf16.mxu0 %v2275_v52  ;;  %v2370_v51 = vld [vmem:[%s2968_s1 + $0x228] sm:$0xff]  }
  0x35   :  { %1191 = vmatprep.mubr.bf16.mxu1 %v2277_v53  ;;  %2034 = vmatpush3.bf16.msra.mxu0 %v2293_v0  ;;  %v2354_v52 = vld [vmem:[%s2969_s0 + $0xe8] ss:$36 sps:$4 sm:$0xff]   ;;  %v2377_v53 = vld [vmem:[%s2968_s1 + $0x230] sm:$0xff]  }
  0x36   :  { %2035 = vmatprep.subr.bf16.mxu0 %v2301_v6  ;;  %2098 = vmatpush3.bf16.msra.mxu1 %v2314_v17  ;;  %v2371_v0 = vld [vmem:[%s2969_s0 + $0x1c4] ss:$36 sps:$4 sm:$0xff]  }
  0x37   :  { %2099 = vmatprep.subr.bf16.mxu1 %v2315_v18  ;;  %v2382_v6 = vld [vmem:[%s2969_s0 + $0x208] ss:$36 sps:$4 sm:$0xff]  }
  0x39   :  { %2036 = vmatpush3.bf16.msra.mxu0 %v2303_v8  ;;  %v2385_v8 = vld [vmem:[%s2969_s0 + $0x20] ss:$36 sps:$4 sm:$0xff]  }
  0x3a   :  { %2037 = vmatprep.subr.bf16.mxu0 %v2311_v13  ;;  %2100 = vmatpush3.bf16.msra.mxu1 %v2316_v19  ;;  %v2390_v13 = vld [vmem:[%s2969_s0 + $0x1d0] ss:$36 sps:$4 sm:$0xff]  }
  0x3b   :  { %1095 = vmatmul.mubr.bf16.gmra.mrb[12].mxu0 %v2279_v58  ;;  %2101 = vmatprep.subr.bf16.mxu1 %v2324_v25  ;;  %v2361_v58 = vld [vmem:[%s2969_s0 + $0x130] ss:$36 sps:$4 sm:$0xff]  }
  0x3c   :  { %1192 = vmatmul.mubr.bf16.gmra.mrb[12].mxu1 %v2280_v59  ;;  %1102 = vmatprep.mubr.bf16.mxu0 %v2285_v60  ;;  %v2362_v59 = vld [vmem:[%s2969_s0 + $0x138] ss:$36 sps:$4 sm:$0xff]  }
  0x3d   :  { %1199 = vmatprep.mubr.bf16.mxu1 %v2287_v61  ;;  %2038 = vmatpush3.bf16.msra.mxu0 %v2313_v16  ;;  %v2364_v60 = vld [vmem:[%s2969_s0 + $0x17c] ss:$36 sps:$4 sm:$0xff]   ;;  %v2366_v61 = vld [vmem:[%s2969_s0 + $0x184] ss:$36 sps:$4 sm:$0xff]  }
  0x3e   :  { %2039 = vmatprep.subr.bf16.mxu0 %v2323_v24  ;;  %2102 = vmatpush3.bf16.msra.mxu1 %v2326_v27 }
  0x3f   :  { %2103 = vmatprep.subr.bf16.mxu1 %v2327_v28 }
  0x41   :  { %2040 = vmatpush3.bf16.msra.mxu0 %v2325_v26 }
  0x42   :  { %2169 = vmatprep.subr.bf16.mxu0 %v2335_v32  ;;  %2104 = vmatpush3.bf16.msra.mxu1 %v2328_v31 }
  0x43   :  { %1103 = vmatmul.mubr.bf16.gmra.mrb[16].mxu0 %v2289_v2  ;;  %2201 = vmatprep.subr.bf16.mxu1 %v2335_v32  ;;  %v2375_v2 = vld [vmem:[%s2969_s0 + $0x1c0] ss:$36 sps:$4 sm:$0xff]  }
  0x44   :  { %1200 = vmatmul.mubr.bf16.gmra.mrb[16].mxu1 %v2290_v3  ;;  %1110 = vmatprep.mubr.bf16.mxu0 %v2295_v4  ;;  %v2376_v3 = vld [vmem:[%s2969_s0 + $0x1c8] ss:$36 sps:$4 sm:$0xff]  }
  0x45   :  { %1207 = vmatprep.mubr.bf16.mxu1 %v2297_v5  ;;  %v2378_v4 = vld [vmem:[%s2969_s0 + $0x20c] ss:$36 sps:$4 sm:$0xff]   ;;  %v2380_v5 = vld [vmem:[%s2969_s0 + $0x214] ss:$36 sps:$4 sm:$0xff]  }
  0x4b   :  { %1111 = vmatmul.mubr.bf16.gmra.mrb[20].mxu0 %v2299_v10  ;;  %v2387_v10 = vld [vmem:[%s2969_s0 + $0x68] ss:$36 sps:$4 sm:$0xff]  }
  0x4c   :  { %1208 = vmatmul.mubr.bf16.gmra.mrb[20].mxu1 %v2300_v11  ;;  %1118 = vmatprep.mubr.bf16.mxu0 %v2305_v12  ;;  %v2388_v11 = vld [vmem:[%s2969_s0 + $0x188] ss:$36 sps:$4 sm:$0xff]   ;;  %v2389_v12 = vld [vmem:[%s2969_s0 + $0xb0] ss:$36 sps:$4 sm:$0xff]  }
  0x4d   :  { %1215 = vmatprep.mubr.bf16.mxu1 %v2307_v14  ;;  %v2391_v14 = vld [vmem:[%s2969_s0 + $0xf8] ss:$36 sps:$4 sm:$0xff]  }
  0x53   :  { %1119 = vmatmul.mubr.bf16.gmra.mrb[24].mxu0 %v2309_v20 }
  0x54   :  { %1216 = vmatmul.mubr.bf16.gmra.mrb[24].mxu1 %v2310_v21  ;;  %1126 = vmatprep.mubr.bf16.mxu0 %v2317_v22 }
  0x55   :  { %1223 = vmatprep.mubr.bf16.mxu1 %v2319_v23 }
  0x5b   :  { %1127 = vmatmul.mubr.bf16.gmra.mrb[28].mxu0 %v2321_v29 }
  0x5c   :  { %1224 = vmatmul.mubr.bf16.gmra.mrb[28].mxu1 %v2322_v30  ;;  %1264 = vmatprep.mubr.bf16.mxu0 %v2331_v33 }
  0x5d   :  { %1361 = vmatprep.mubr.bf16.mxu1 %v2334_v34 }
  0x63   :  { %1265 = vmatmul.mubr.bf16.vlgmr.msra.gmra.mrb[32].mxu0 %v2329_v35 }
  0x64   :  { %1362 = vmatmul.mubr.bf16.vlgmr.msra.gmra.mrb[32].mxu1 %v2332_v36  ;;  %2170 = vmatpush3.bf16.msra.mxu0 %v2335_v32 }
  0x65   :  { %1272 = vmatprep.mubr.bf16.mxu0 %v2336_v37  ;;  %1369 = vmatprep.mubr.bf16.mxu1 %v2338_v38 }
  0x66   :  { %2171 = vmatprep.subr.bf16.mxu0 %v2342_v39  ;;  %2209 = vmatpush3.bf16.msra.mxu1 %v2335_v32 }
  0x67   :  { %2202 = vmatprep.subr.bf16.mxu1 %v2342_v39 }
  0x68   :  { %2172 = vmatpush3.bf16.msra.mxu0 %v2342_v39 }
  0x69   :  { %2173 = vmatprep.subr.bf16.mxu0 %v2349_v40 }
  0x6a   :  { %2210 = vmatpush3.bf16.msra.mxu1 %v2342_v39 }
  0x6b   :  { %1273 = vmatmul.mubr.bf16.gmra.mrb[36].mxu0 %v2340_v41  ;;  %2203 = vmatprep.subr.bf16.mxu1 %v2349_v40 }
  0x6c   :  { %1370 = vmatmul.mubr.bf16.gmra.mrb[36].mxu1 %v2341_v42  ;;  %1280 = vmatprep.mubr.bf16.mxu0 %v2343_v43 }
  0x6d   :  { %1377 = vmatprep.mubr.bf16.mxu1 %v2345_v44  ;;  %2174 = vmatpush3.bf16.msra.mxu0 %v2349_v40 }
  0x6e   :  { %2175 = vmatprep.subr.bf16.mxu0 %v2356_v45  ;;  %2211 = vmatpush3.bf16.msra.mxu1 %v2349_v40 }
  0x6f   :  { %2204 = vmatprep.subr.bf16.mxu1 %v2356_v45 }
  0x71   :  { %2176 = vmatpush3.bf16.msra.mxu0 %v2356_v45 }
  0x72   :  { %2177 = vmatprep.subr.bf16.mxu0 %v2363_v46  ;;  %2212 = vmatpush3.bf16.msra.mxu1 %v2356_v45 }
  0x73   :  { %1281 = vmatmul.mubr.bf16.gmra.mrb[40].mxu0 %v2347_v47  ;;  %2205 = vmatprep.subr.bf16.mxu1 %v2363_v46 }
  0x74   :  { %1378 = vmatmul.mubr.bf16.gmra.mrb[40].mxu1 %v2348_v48  ;;  %1288 = vmatprep.mubr.bf16.mxu0 %v2350_v49 }
  0x75   :  { %1385 = vmatprep.mubr.bf16.mxu1 %v2352_v50  ;;  %2178 = vmatpush3.bf16.msra.mxu0 %v2363_v46 }
  0x76   :  { %2179 = vmatprep.subr.bf16.mxu0 %v2370_v51  ;;  %2213 = vmatpush3.bf16.msra.mxu1 %v2363_v46 }
  0x77   :  { %2206 = vmatprep.subr.bf16.mxu1 %v2370_v51 }
  0x79   :  { %2180 = vmatpush3.bf16.msra.mxu0 %v2370_v51 }
  0x7a   :  { %2181 = vmatprep.subr.bf16.mxu0 %v2377_v53  ;;  %2214 = vmatpush3.bf16.msra.mxu1 %v2370_v51 }
  0x7b   :  { %1289 = vmatmul.mubr.bf16.gmra.mrb[44].mxu0 %v2354_v52  ;;  %2207 = vmatprep.subr.bf16.mxu1 %v2377_v53 }
  0x7c   :  { %1386 = vmatmul.mubr.bf16.gmra.mrb[44].mxu1 %v2355_v54  ;;  %1296 = vmatprep.mubr.bf16.mxu0 %v2357_v55 }
  0x7d   :  { %1393 = vmatprep.mubr.bf16.mxu1 %v2359_v56  ;;  %2182 = vmatpush3.bf16.msra.mxu0 %v2377_v53 }
  0x7e   :  { %2183 = vmatprep.subr.bf16.mxu0 %v2384_v57  ;;  %2215 = vmatpush3.bf16.msra.mxu1 %v2377_v53 }
  0x7f   :  { %2208 = vmatprep.subr.bf16.mxu1 %v2384_v57 }
  0x81   :  { %2184 = vmatpush3.bf16.msra.mxu0 %v2384_v57 }
  0x82   :  { %2216 = vmatpush3.bf16.msra.mxu1 %v2384_v57 }
  0x83   :  { %1297 = vmatmul.mubr.bf16.gmra.mrb[48].mxu0 %v2361_v58 }
  0x84   :  { %1394 = vmatmul.mubr.bf16.gmra.mrb[48].mxu1 %v2362_v59  ;;  %1304 = vmatprep.mubr.bf16.mxu0 %v2364_v60 }
  0x85   :  { %1401 = vmatprep.mubr.bf16.mxu1 %v2366_v61 }
  0x8b   :  { %1305 = vmatmul.mubr.bf16.gmra.mrb[52].mxu0 %v2368_v62 }
  0x8c   :  { %1402 = vmatmul.mubr.bf16.gmra.mrb[52].mxu1 %v2369_v63  ;;  %1312 = vmatprep.mubr.bf16.mxu0 %v2371_v0 }
  0x8d   :  { %1409 = vmatprep.mubr.bf16.mxu1 %v2373_v1 }
  0x93   :  { %1313 = vmatmul.mubr.bf16.gmra.mrb[56].mxu0 %v2375_v2 }
  0x94   :  { %1410 = vmatmul.mubr.bf16.gmra.mrb[56].mxu1 %v2376_v3  ;;  %1320 = vmatprep.mubr.bf16.mxu0 %v2378_v4 }
  0x95   :  { %1417 = vmatprep.mubr.bf16.mxu1 %v2380_v5 }
  0x9b   :  { %1321 = vmatmul.mubr.bf16.gmra.mrb[60].mxu0 %v2382_v6 }
  0x9c   :  { %1418 = vmatmul.mubr.bf16.gmra.mrb[60].mxu1 %v2383_v7  ;;  %2185 = vmatprep.mubr.bf16.mxu0 %v2385_v8 }
  0x9d   :  { %2193 = vmatprep.mubr.bf16.mxu1 %v2386_v9 }
  0xa3   :  { %2186 = vmatmul.mubr.bf16.vlgmr.msra.gmra.mrb[64].mxu0 %v2387_v10 }
  0xa4   :  { %2194 = vmatmul.mubr.bf16.vlgmr.msra.gmra.mrb[64].mxu1 %v2388_v11  ;;  %2189 = vmatprep.mubr.bf16.mxu0 %v2389_v12 }
  0xa5   :  { %2197 = vmatprep.mubr.bf16.mxu1 %v2390_v13 }
  0xab   :  { %2190 = vmatmul.mubr.bf16.gmra.mrb[68].mxu0 %v2391_v14 }
  0xac   :  { %2198 = vmatmul.mubr.bf16.gmra.mrb[68].mxu1 %v2392_v15 }
  0xf6   :  { %v1913_v16 = vpop.f32.mrb[0].mxu0 }
  0xf7   :  { %v1977_v17 = vpop.f32.mrb[0].mxu1  ;;  %v1914_v18 = vpop.f32.mrb[1].mxu0 }
  0xf8   :  { %v1915_v19 = vadd.f32 %v1914_v18, %v1913_v16  ;;  %v1978_v20 = vpop.f32.mrb[1].mxu1  ;;  %v1916_v21 = vpop.f32.mrb[2].mxu0 }
  0xf9   :  { %v1979_v22 = vadd.f32 %v1978_v20, %v1977_v17  ;;  %v1980_v23 = vpop.f32.mrb[2].mxu1  ;;  %v1917_v24 = vpop.f32.mrb[3].mxu0 }
  0xfa   :  { %v1918_v25 = vadd.f32 %v1917_v24, %v1916_v21  ;;  %v1981_v26 = vpop.f32.mrb[3].mxu1 }
  0xfb   :  { %v2845_v27 = vadd.f32 %v1979_v22, %v1915_v19  ;;  %v1982_v28 = vadd.f32 %v1981_v26, %v1980_v23 }
  0xfd   :  { %v2847_v29 = vadd.f32 %v1982_v28, %v1918_v25 }
  0xfe   :  { %v1919_v30 = vpop.f32.mrb[4].mxu0 }
  0xff   :  { %v1983_v31 = vpop.f32.mrb[4].mxu1  ;;  %v1920_v32 = vpop.f32.mrb[5].mxu0 }
 0x100   :  { %v1921_v33 = vadd.f32 %v1920_v32, %v1919_v30  ;;  %v1984_v34 = vpop.f32.mrb[5].mxu1  ;;  %v1922_v35 = vpop.f32.mrb[6].mxu0 }
 0x101   :  { %v1985_v36 = vadd.f32 %v1984_v34, %v1983_v31  ;;  %v1986_v37 = vpop.f32.mrb[6].mxu1  ;;  %v1923_v38 = vpop.f32.mrb[7].mxu0 }
 0x102   :  { %v1924_v39 = vadd.f32 %v1923_v38, %v1922_v35  ;;  %v1987_v40 = vpop.f32.mrb[7].mxu1 }
 0x103   :  { %v2849_v41 = vadd.f32 %v1985_v36, %v1921_v33  ;;  %v1988_v42 = vadd.f32 %v1987_v40, %v1986_v37 }
 0x105   :  { %v2851_v43 = vadd.f32 %v1988_v42, %v1924_v39 }
 0x106   :  { %v1925_v44 = vpop.f32.mrb[8].mxu0 }
 0x107   :  { %v1989_v45 = vpop.f32.mrb[8].mxu1  ;;  %v1926_v46 = vpop.f32.mrb[9].mxu0 }
 0x108   :  { %v1927_v47 = vadd.f32 %v1926_v46, %v1925_v44  ;;  %v1990_v48 = vpop.f32.mrb[9].mxu1  ;;  %v1928_v49 = vpop.f32.mrb[10].mxu0 }
 0x109   :  { %v1991_v50 = vadd.f32 %v1990_v48, %v1989_v45  ;;  %v1992_v51 = vpop.f32.mrb[10].mxu1  ;;  %v1929_v52 = vpop.f32.mrb[11].mxu0 }
 0x10a   :  { %v1930_v53 = vadd.f32 %v1929_v52, %v1928_v49  ;;  %v1993_v54 = vpop.f32.mrb[11].mxu1 }
 0x10b   :  { %v2853_v55 = vadd.f32 %v1991_v50, %v1927_v47  ;;  %v1994_v56 = vadd.f32 %v1993_v54, %v1992_v51 }
 0x10d   :  { %v2855_v57 = vadd.f32 %v1994_v56, %v1930_v53 }
 0x10e   :  { %v1931_v58 = vpop.f32.mrb[12].mxu0 }
 0x10f   :  { %v1995_v59 = vpop.f32.mrb[12].mxu1  ;;  %v1932_v60 = vpop.f32.mrb[13].mxu0 }
 0x110   :  { %v1933_v61 = vadd.f32 %v1932_v60, %v1931_v58  ;;  %v1996_v62 = vpop.f32.mrb[13].mxu1  ;;  %v1934_v63 = vpop.f32.mrb[14].mxu0 }
 0x111   :  { %v1997_v0 = vadd.f32 %v1996_v62, %v1995_v59  ;;  %v1998_v1 = vpop.f32.mrb[14].mxu1  ;;  %v1935_v2 = vpop.f32.mrb[15].mxu0 }
 0x112   :  { %v1936_v3 = vadd.f32 %v1935_v2, %v1934_v63  ;;  %v1999_v4 = vpop.f32.mrb[15].mxu1 }
 0x113   :  { %v2857_v5 = vadd.f32 %v1997_v0, %v1933_v61  ;;  %v2000_v6 = vadd.f32 %v1999_v4, %v1998_v1 }
 0x115   :  { %v2859_v7 = vadd.f32 %v2000_v6, %v1936_v3 }
 0x116   :  { %v1937_v8 = vpop.f32.mrb[16].mxu0 }
 0x117   :  { %v2001_v9 = vpop.f32.mrb[16].mxu1  ;;  %v1938_v10 = vpop.f32.mrb[17].mxu0 }
 0x118   :  { %v1939_v11 = vadd.f32 %v1938_v10, %v1937_v8  ;;  %v2002_v12 = vpop.f32.mrb[17].mxu1  ;;  %v1940_v13 = vpop.f32.mrb[18].mxu0 }
 0x119   :  { %v2003_v14 = vadd.f32 %v2002_v12, %v2001_v9  ;;  %v2004_v15 = vpop.f32.mrb[18].mxu1  ;;  %v1941_v16 = vpop.f32.mrb[19].mxu0 }
 0x11a   :  { %v1942_v17 = vadd.f32 %v1941_v16, %v1940_v13  ;;  %v2005_v18 = vpop.f32.mrb[19].mxu1 }
 0x11b   :  { %v2861_v19 = vadd.f32 %v2003_v14, %v1939_v11  ;;  %v2006_v20 = vadd.f32 %v2005_v18, %v2004_v15 }
 0x11d   :  { %v2863_v21 = vadd.f32 %v2006_v20, %v1942_v17 }
 0x11e   :  { %v1943_v22 = vpop.f32.mrb[20].mxu0 }
 0x11f   :  { %v2007_v23 = vpop.f32.mrb[20].mxu1  ;;  %v1944_v24 = vpop.f32.mrb[21].mxu0 }
 0x120   :  { %v1945_v25 = vadd.f32 %v1944_v24, %v1943_v22  ;;  %v2008_v26 = vpop.f32.mrb[21].mxu1  ;;  %v1946_v28 = vpop.f32.mrb[22].mxu0 }
 0x121   :  { %v2009_v30 = vadd.f32 %v2008_v26, %v2007_v23  ;;  %v2010_v31 = vpop.f32.mrb[22].mxu1  ;;  %v1947_v32 = vpop.f32.mrb[23].mxu0 }
 0x122   :  { %v1948_v33 = vadd.f32 %v1947_v32, %v1946_v28  ;;  %v2011_v34 = vpop.f32.mrb[23].mxu1 }
 0x123   :  { %v2865_v35 = vadd.f32 %v2009_v30, %v1945_v25  ;;  %v2012_v36 = vadd.f32 %v2011_v34, %v2010_v31 }
 0x125   :  { %v2867_v37 = vadd.f32 %v2012_v36, %v1948_v33 }
 0x126   :  { %v1949_v38 = vpop.f32.mrb[24].mxu0 }
 0x127   :  { %v2013_v39 = vpop.f32.mrb[24].mxu1  ;;  %v1950_v40 = vpop.f32.mrb[25].mxu0 }
 0x128   :  { %v1951_v42 = vadd.f32 %v1950_v40, %v1949_v38  ;;  %v2014_v44 = vpop.f32.mrb[25].mxu1  ;;  %v1952_v45 = vpop.f32.mrb[26].mxu0 }
 0x129   :  { %v2015_v46 = vadd.f32 %v2014_v44, %v2013_v39  ;;  %v2016_v47 = vpop.f32.mrb[26].mxu1  ;;  %v1953_v48 = vpop.f32.mrb[27].mxu0 }
 0x12a   :  { %v1954_v49 = vadd.f32 %v1953_v48, %v1952_v45  ;;  %v2017_v50 = vpop.f32.mrb[27].mxu1 }
 0x12b   :  { %v2869_v51 = vadd.f32 %v2015_v46, %v1951_v42  ;;  %v2018_v52 = vadd.f32 %v2017_v50, %v2016_v47 }
 0x12d   :  { %v2871_v53 = vadd.f32 %v2018_v52, %v1954_v49 }
 0x12e   :  { %v1955_v54 = vpop.f32.mrb[28].mxu0 }
 0x12f   :  { %v2019_v56 = vpop.f32.mrb[28].mxu1  ;;  %v1956_v58 = vpop.f32.mrb[29].mxu0 }
 0x130   :  { %v1957_v59 = vadd.f32 %v1956_v58, %v1955_v54  ;;  %v2020_v60 = vpop.f32.mrb[29].mxu1  ;;  %v1958_v61 = vpop.f32.mrb[30].mxu0 }
 0x131   :  { %v2021_v62 = vadd.f32 %v2020_v60, %v2019_v56  ;;  %v2022_v63 = vpop.f32.mrb[30].mxu1  ;;  %v1959_v0 = vpop.f32.mrb[31].mxu0 }
 0x132   :  { %v1960_v1 = vadd.f32 %v1959_v0, %v1958_v61  ;;  %v2023_v2 = vpop.f32.mrb[31].mxu1 }
 0x133   :  { %v2873_v3 = vadd.f32 %v2021_v62, %v1957_v59  ;;  %v2024_v4 = vadd.f32 %v2023_v2, %v2022_v63 }
 0x135   :  { %v2875_v6 = vadd.f32 %v2024_v4, %v1960_v1 }
 0x136   :  { %v2041_v8 = vpop.f32.mrb[32].mxu0 }
 0x137   :  { %v2042_v9 = vpop.f32.mrb[33].mxu0  ;;  %v2105_v10 = vpop.f32.mrb[32].mxu1 }
 0x138   :  { %v2043_v11 = vadd.f32 %v2042_v9, %v2041_v8  ;;  %v2044_v12 = vpop.f32.mrb[34].mxu0  ;;  %v2106_v13 = vpop.f32.mrb[33].mxu1 }
 0x139   :  { %v2045_v14 = vpop.f32.mrb[35].mxu0  ;;  %v2107_v15 = vadd.f32 %v2106_v13, %v2105_v10  ;;  %v2108_v16 = vpop.f32.mrb[34].mxu1 }
 0x13a   :  { %v1267_v17 = vadd.f32 %v2043_v11, %v2845_v27  ;;  %v2046_v18 = vadd.f32 %v2045_v14, %v2044_v12  ;;  %v2109_v20 = vpop.f32.mrb[35].mxu1 }
 0x13b   :  { %v2110_v22 = vadd.f32 %v2109_v20, %v2108_v16 }
 0x13c   :  { %v1270_v23 = vadd.f32 %v2046_v18, %v2847_v29  ;;  %v2879_v24 = vadd.f32 %v2107_v15, %v1267_v17 }
 0x13e   :  { %v2047_v25 = vpop.f32.mrb[36].mxu0  ;;  %v2881_v26 = vadd.f32 %v2110_v22, %v1270_v23 }
 0x13f   :  { %v2048_v28 = vpop.f32.mrb[37].mxu0  ;;  %v2111_v30 = vpop.f32.mrb[36].mxu1 }
 0x140   :  { %v2049_v31 = vadd.f32 %v2048_v28, %v2047_v25  ;;  %v2050_v32 = vpop.f32.mrb[38].mxu0  ;;  %v2112_v33 = vpop.f32.mrb[37].mxu1 }
 0x141   :  { %v2051_v34 = vpop.f32.mrb[39].mxu0  ;;  %v2113_v36 = vadd.f32 %v2112_v33, %v2111_v30  ;;  %v2114_v38 = vpop.f32.mrb[38].mxu1 }
 0x142   :  { %v1275_v27 = vadd.f32 %v2049_v31, %v2849_v41  ;;  %v2052_v39 = vadd.f32 %v2051_v34, %v2050_v32  ;;  %v2115_v40 = vpop.f32.mrb[39].mxu1 }
 0x143   :  { %v2116_v42 = vadd.f32 %v2115_v40, %v2114_v38 }
 0x144   :  { %v1278_v29 = vadd.f32 %v2052_v39, %v2851_v43  ;;  %v2885_v44 = vadd.f32 %v2113_v36, %v1275_v27 }
 0x146   :  { %v2053_v45 = vpop.f32.mrb[40].mxu0  ;;  %v2887_v46 = vadd.f32 %v2116_v42, %v1278_v29 }
 0x147   :  { %v2054_v47 = vpop.f32.mrb[41].mxu0  ;;  %v2117_v48 = vpop.f32.mrb[40].mxu1 }
 0x148   :  { %v2055_v49 = vadd.f32 %v2054_v47, %v2053_v45  ;;  %v2056_v50 = vpop.f32.mrb[42].mxu0  ;;  %v2118_v52 = vpop.f32.mrb[41].mxu1 }
 0x149   :  { %v2057_v54 = vpop.f32.mrb[43].mxu0  ;;  %v2119_v56 = vadd.f32 %v2118_v52, %v2117_v48  ;;  %v2120_v58 = vpop.f32.mrb[42].mxu1 }
 0x14a   :  { %v1283_v41 = vadd.f32 %v2055_v49, %v2853_v55  ;;  %v2058_v59 = vadd.f32 %v2057_v54, %v2056_v50  ;;  %v2121_v60 = vpop.f32.mrb[43].mxu1 }
 0x14b   :  { %v2122_v61 = vadd.f32 %v2121_v60, %v2120_v58 }
 0x14c   :  { %v1286_v43 = vadd.f32 %v2058_v59, %v2855_v57  ;;  %v2891_v62 = vadd.f32 %v2119_v56, %v1283_v41 }
 0x14e   :  { %v2059_v63 = vpop.f32.mrb[44].mxu0  ;;  %v2893_v0 = vadd.f32 %v2122_v61, %v1286_v43 }
 0x14f   :  { %v2060_v1 = vpop.f32.mrb[45].mxu0  ;;  %v2123_v2 = vpop.f32.mrb[44].mxu1 }
 0x150   :  { %v2061_v4 = vadd.f32 %v2060_v1, %v2059_v63  ;;  %v2062_v8 = vpop.f32.mrb[46].mxu0  ;;  %v2124_v9 = vpop.f32.mrb[45].mxu1 }
 0x151   :  { %v2063_v10 = vpop.f32.mrb[47].mxu0  ;;  %v2125_v11 = vadd.f32 %v2124_v9, %v2123_v2  ;;  %v2126_v12 = vpop.f32.mrb[46].mxu1 }
 0x152   :  { %v1291_v55 = vadd.f32 %v2061_v4, %v2857_v5  ;;  %v2064_v13 = vadd.f32 %v2063_v10, %v2062_v8  ;;  %v2127_v14 = vpop.f32.mrb[47].mxu1 }
 0x153   :  { %v2128_v15 = vadd.f32 %v2127_v14, %v2126_v12 }
 0x154   :  { %v1294_v57 = vadd.f32 %v2064_v13, %v2859_v7  ;;  %v2897_v16 = vadd.f32 %v2125_v11, %v1291_v55 }
 0x156   :  { %v2065_v17 = vpop.f32.mrb[48].mxu0  ;;  %v2899_v18 = vadd.f32 %v2128_v15, %v1294_v57 }
 0x157   :  { %v2066_v20 = vpop.f32.mrb[49].mxu0  ;;  %v2129_v22 = vpop.f32.mrb[48].mxu1 }
 0x158   :  { %v2067_v23 = vadd.f32 %v2066_v20, %v2065_v17  ;;  %v2068_v25 = vpop.f32.mrb[50].mxu0  ;;  %v2130_v28 = vpop.f32.mrb[49].mxu1 }
 0x159   :  { %v2069_v30 = vpop.f32.mrb[51].mxu0  ;;  %v2131_v31 = vadd.f32 %v2130_v28, %v2129_v22  ;;  %v2132_v32 = vpop.f32.mrb[50].mxu1 }
 0x15a   :  { %v1299_v5 = vadd.f32 %v2067_v23, %v2861_v19  ;;  %v2070_v33 = vadd.f32 %v2069_v30, %v2068_v25  ;;  %v2133_v34 = vpop.f32.mrb[51].mxu1 }
 0x15b   :  { %v2134_v36 = vadd.f32 %v2133_v34, %v2132_v32 }
 0x15c   :  { %v1302_v7 = vadd.f32 %v2070_v33, %v2863_v21  ;;  %v1396_v38 = vadd.f32 %v2131_v31, %v1299_v5 }
 0x15e   :  { %v2071_v27 = vpop.f32.mrb[52].mxu0  ;;  %v2903_v39 = vadd.f32 %v2134_v36, %v1302_v7 }
 0x15f   :  { %v2072_v40 = vpop.f32.mrb[53].mxu0  ;;  %v2135_v42 = vpop.f32.mrb[52].mxu1 }
 0x160   :  { %v2073_v29 = vadd.f32 %v2072_v40, %v2071_v27  ;;  %v2074_v45 = vpop.f32.mrb[54].mxu0  ;;  %v2136_v47 = vpop.f32.mrb[53].mxu1 }
 0x161   :  { %v2075_v48 = vpop.f32.mrb[55].mxu0  ;;  %v2137_v49 = vadd.f32 %v2136_v47, %v2135_v42  ;;  %v2138_v50 = vpop.f32.mrb[54].mxu1 }
 0x162   :  { %v1307_v52 = vadd.f32 %v2073_v29, %v2865_v35  ;;  %v2076_v19 = vadd.f32 %v2075_v48, %v2074_v45  ;;  %v2139_v54 = vpop.f32.mrb[55].mxu1 }
 0x163   :  { %v2140_v56 = vadd.f32 %v2139_v54, %v2138_v50 }
 0x164   :  { %v1310_v58 = vadd.f32 %v2076_v19, %v2867_v37  ;;  %v1404_v21 = vadd.f32 %v2137_v49, %v1307_v52 }
 0x166   :  { %v2077_v41 = vpop.f32.mrb[56].mxu0  ;;  %v1407_v59 = vadd.f32 %v2140_v56, %v1310_v58 }
 0x167   :  { %v2078_v60 = vpop.f32.mrb[57].mxu0  ;;  %v2141_v61 = vpop.f32.mrb[56].mxu1 }
 0x168   :  { %v2079_v43 = vadd.f32 %v2078_v60, %v2077_v41  ;;  %v2080_v63 = vpop.f32.mrb[58].mxu0  ;;  %v2142_v1 = vpop.f32.mrb[57].mxu1 }
 0x169   :  { %v2081_v2 = vpop.f32.mrb[59].mxu0  ;;  %v2143_v4 = vadd.f32 %v2142_v1, %v2141_v61  ;;  %v2144_v8 = vpop.f32.mrb[58].mxu1 }
 0x16a   :  { %v1315_v9 = vadd.f32 %v2079_v43, %v2869_v51  ;;  %v2082_v10 = vadd.f32 %v2081_v2, %v2080_v63  ;;  %v2145_v35 = vpop.f32.mrb[59].mxu1 }
 0x16b   :  { %v2146_v11 = vadd.f32 %v2145_v35, %v2144_v8 }
 0x16c   :  { %v1318_v12 = vadd.f32 %v2082_v10, %v2871_v53  ;;  %v1412_v55 = vadd.f32 %v2143_v4, %v1315_v9 }
 0x16e   :  { %v2083_v37 = vpop.f32.mrb[60].mxu0  ;;  %v2909_v13 = vadd.f32 %v2146_v11, %v1318_v12 }
 0x16f   :  { %v2084_v14 = vpop.f32.mrb[61].mxu0  ;;  %v2147_v15 = vpop.f32.mrb[60].mxu1 }
 0x170   :  { %v2085_v57 = vadd.f32 %v2084_v14, %v2083_v37  ;;  %v2086_v17 = vpop.f32.mrb[62].mxu0  ;;  %v2148_v20 = vpop.f32.mrb[61].mxu1 }
 0x171   :  { %v2087_v22 = vpop.f32.mrb[63].mxu0  ;;  %v2149_v23 = vadd.f32 %v2148_v20, %v2147_v15  ;;  %v2150_v25 = vpop.f32.mrb[62].mxu1 }
 0x172   :  { %v1323_v28 = vadd.f32 %v2085_v57, %v2873_v3  ;;  %v2088_v51 = vadd.f32 %v2087_v22, %v2086_v17  ;;  %v2151_v30 = vpop.f32.mrb[63].mxu1 }
 0x173   :  { %v2152_v31 = vadd.f32 %v2151_v30, %v2150_v25 }
 0x174   :  { %v1326_v32 = vadd.f32 %v2088_v51, %v2875_v6  ;;  %v1420_v53 = vadd.f32 %v2149_v23, %v1323_v28 }
 0x176   :  { %v2187_v5 = vpop.f32.mrb[64].mxu0  ;;  %v1423_v33 = vadd.f32 %v2152_v31, %v1326_v32 }
 0x177   :  { %v1469_v34 = vadd.f32 %v2187_v5, %v2885_v44  ;;  %v2195_v36 = vpop.f32.mrb[64].mxu1  ;;  %v1460_v7 = vpop.f32.mrb[65].mxu0 }
 0x178   :  { %v2914_v27 = vadd.f32 %v2195_v36, %v1404_v21  ;;  %v1461_v40 = vadd.f32 %v1460_v7, %v2879_v24  ;;  %v1492_v42 = vpop.f32.mrb[65].mxu1  ;;  %v2188_v29 = vpop.f32.mrb[66].mxu0 }
 0x179   :  { %v2917_v45 = vadd.f32 %v1492_v42, %v1396_v38  ;;  %v1472_v3 = vadd.f32 %v2188_v29, %v2887_v46  ;;  %v2196_v47 = vpop.f32.mrb[66].mxu1  ;;  %v1463_v48 = vpop.f32.mrb[67].mxu0  ;;  %v1626_v58 = vmul.f32 %v1469_v34, %v1469_v34 }
 0x17a   :  { %v2920_v6 = vadd.f32 %v2196_v47, %v1407_v59  ;;  %v1464_v49 = vadd.f32 %v1463_v48, %v2881_v26  ;;  %v1495_v50 = vpop.f32.mrb[67].mxu1  ;;  %v1624_v56 = vmul.f32 %v1461_v40, %v1461_v40  ;;  %v1634_v7 = vmul.f32 %v2914_v27, %v2914_v27 }
 0x17b   :  { %v1858_v44 = vpack.c.bf16 %v1472_v3, %v1469_v34  ;;  %v1496_v52 = vadd.f32 %v1495_v50, %v2903_v39  ;;  %v1627_v4 = vmul.f32 %v1472_v3, %v1472_v3  ;;  %v1632_v32 = vmul.f32 %v2917_v45, %v2917_v45 }
 0x17c   :  { %v1878_v19 = vpack.c.bf16 %v2920_v6, %v2914_v27  ;;  %v1853_v24 = vpack.c.bf16 %v1464_v49, %v1461_v40  ;;  %v1603_v54 = vadd.f32 %v1464_v49, %v1461_v40  ;;  %v1625_v46 = vmul.f32 %v1464_v49, %v1464_v49 }
 0x17d   :  { %1890 = vst [vmem:[%s2970_s2 + $0x8] sm:$0xff] %v1858_v44   ;;  %v1873_v38 = vpack.c.bf16 %v1496_v52, %v2917_v45  ;;  %v1635_v29 = vmul.f32 %v2920_v6, %v2920_v6 }
 0x17e   :  { %1894 = vst [vmem:[%s2970_s2 + $0x28] sm:$0xff] %v1878_v19   ;;  %1854 = vst [vmem:[%s2970_s2] sm:$0xff] %v1853_v24   ;;  %v1604_v26 = vadd.f32 %v1603_v54, %v1469_v34  ;;  %v2191_v39 = vpop.f32.mrb[68].mxu0  ;;  %v1640_v21 = vadd.f32 %v1625_v46, %v1624_v56 }
 0x17f   :  { %1893 = vst [vmem:[%s2970_s2 + $0x20] sm:$0xff] %v1873_v38   ;;  %v1485_v41 = vadd.f32 %v2191_v39, %v2897_v16  ;;  %v2199_v59 = vpop.f32.mrb[68].mxu1  ;;  %v1476_v60 = vpop.f32.mrb[69].mxu0 }
 0x180   :  { %v1517_v61 = vadd.f32 %v2199_v59, %v1420_v53  ;;  %v1477_v43 = vadd.f32 %v1476_v60, %v2891_v62  ;;  %v1605_v63 = vadd.f32 %v1604_v26, %v1472_v3  ;;  %v1508_v1 = vpop.f32.mrb[69].mxu1  ;;  %v2192_v2 = vpop.f32.mrb[70].mxu0  ;;  %v1641_v8 = vadd.f32 %v1640_v21, %v1626_v58 }
 0x181   :  { %v1509_v9 = vadd.f32 %v1508_v1, %v1412_v55  ;;  %v1488_v10 = vadd.f32 %v2192_v2, %v2899_v18  ;;  %v2200_v35 = vpop.f32.mrb[70].mxu1  ;;  %v1479_v11 = vpop.f32.mrb[71].mxu0  ;;  %v1630_v28 = vmul.f32 %v1485_v41, %v1485_v41  ;;  %v1661_v21 = vlaneseq }
 0x182   :  { %v1606_v12 = vadd.f32 %v1605_v63, %v1477_v43  ;;  %v1628_v37 = vmul.f32 %v1477_v43, %v1477_v43  ;;  %v1520_v14 = vadd.f32 %v2200_v35, %v1423_v33  ;;  %v1511_v15 = vpop.f32.mrb[71].mxu1  ;;  %v1642_v16 = vadd.f32 %v1641_v8, %v1627_v4 }
 0x183   :  { %v1868_v57 = vpack.c.bf16 %v1488_v10, %v1485_v41  ;;  %v1480_v20 = vadd.f32 %v1479_v11, %v2893_v0  ;;  %v1512_v62 = vadd.f32 %v1511_v15, %v2909_v13  ;;  %v1631_v51 = vmul.f32 %v1488_v10, %v1488_v10 }
 0x184   :  { %v1888_v17 = vpack.c.bf16 %v1520_v14, %v1517_v61  ;;  %v1643_v22 = vadd.f32 %v1642_v16, %v1628_v37  ;;  %v1633_v33 = vmul.f32 %v1496_v52, %v1496_v52  ;;  %v1636_v48 = vmul.f32 %v1509_v9, %v1509_v9 }
 0x185   :  { %1892 = vst [vmem:[%s2970_s2 + $0x18] sm:$0xff] %v1868_v57   ;;  %v1863_v18 = vpack.c.bf16 %v1480_v20, %v1477_v43  ;;  %v1607_v55 = vadd.f32 %v1606_v12, %v1480_v20  ;;  %v1629_v23 = vmul.f32 %v1480_v20, %v1480_v20  ;;  %v1883_v25 = vpack.c.bf16 %v1512_v62, %v1509_v9 }
 0x186   :  { %1896 = vst [vmem:[%s2970_s2 + $0x38] sm:$0xff] %v1888_v17   ;;  %v1637_v44 = vmul.f32 %v1512_v62, %v1512_v62  ;;  %v1638_v24 = vmul.f32 %v1517_v61, %v1517_v61  ;;  %v1639_v56 = vmul.f32 %v1520_v14, %v1520_v14  ;;  %v1662_v43 = vshrl.u32 %v1661_v21, 7 }
 0x187   :  { %1891 = vst [vmem:[%s2970_s2 + $0x10] sm:$0xff] %v1863_v18   ;;  %v1608_v0 = vadd.f32 %v1607_v55, %v1485_v41  ;;  %v1644_v13 = vadd.f32 %v1643_v22, %v1629_v23  ;;  %1895 = vst [vmem:[%s2970_s2 + $0x30] sm:$0xff] %v1883_v25  }
 0x188   :  { %vm1663_vm0 = vcmp.eq.s32.totalorder %v1662_v43, 0 }
 0x189   :  { %v1609_v30 = vadd.f32 %v1608_v0, %v1488_v10  ;;  %v1645_v31 = vadd.f32 %v1644_v13, %v1630_v28 }
 0x18b   :  { %v1610_v53 = vadd.f32 %v1609_v30, %v2917_v45  ;;  %v1646_v5 = vadd.f32 %v1645_v31, %v1631_v51 }
 0x18d   :  { %v1647_v34 = vadd.f32 %v1646_v5, %v1632_v32  ;;  %v1611_v36 = vadd.f32 %v1610_v53, %v1496_v52 }
 0x18f   :  { %v1612_v40 = vadd.f32 %v1611_v36, %v2914_v27  ;;  %v1648_v42 = vadd.f32 %v1647_v34, %v1633_v33 }
 0x191   :  { %v1613_v3 = vadd.f32 %v1612_v40, %v2920_v6  ;;  %v1649_v47 = vadd.f32 %v1648_v42, %v1634_v7 }
 0x193   :  { %v1614_v49 = vadd.f32 %v1613_v3, %v1509_v9  ;;  %v1650_v50 = vadd.f32 %v1649_v47, %v1635_v29 }
 0x195   :  { %v1615_v45 = vadd.f32 %v1614_v49, %v1512_v62  ;;  %v1651_v19 = vadd.f32 %v1650_v50, %v1636_v48 }
 0x197   :  { %v1616_v52 = vadd.f32 %v1615_v45, %v1517_v61  ;;  %v1652_v54 = vadd.f32 %v1651_v19, %v1637_v44 }
 0x199   :  { %v1617_v46 = vadd.f32 %v1616_v52, %v1520_v14  ;;  %v1653_v38 = vadd.f32 %v1652_v54, %v1638_v24 }
 0x19b   :  { %v1618_v27 = vrot.slane %v1617_v46, 4  ;;  %v1654_v26 = vadd.f32 %v1653_v38, %v1639_v56 }
 0x19d   :  { %v1619_v39 = vadd.f32 %v1618_v27, %v1617_v46  ;;  %v1655_v58 = vrot.slane %v1654_v26, 4 }
 0x19f   :  { %v1620_v41 = vrot.slane %v1619_v39, 2  ;;  %v1656_v6 = vadd.f32 %v1655_v58, %v1654_v26 }
 0x1a1   :  { %v1621_v59 = vadd.f32 %v1620_v41, %v1619_v39  ;;  %v1657_v60 = vrot.slane %v1656_v6, 2 }
 0x1a3   :  { %v1622_v63 = vrot.slane %v1621_v59, 1  ;;  %v1658_v1 = vadd.f32 %v1657_v60, %v1656_v6 }
 0x1a5   :  { %v1659_v2 = vrot.slane %v1658_v1, 1  ;;  %v1623_v4 = vadd.f32 %v1622_v63, %v1621_v59 }
 0x1a7   :  { %v1660_v61 = vadd.f32 %v1659_v2, %v1658_v1 }
 0x1a9   :  { %v1664_v8 = vsel %vm1663_vm0, %v1623_v4, %v1660_v61 }
 0x1aa   :  { %1665 = vst [vmem:[%s2971_s3] sm:$0x3] %v1664_v8 }

// kernel: _lambda_.12
= control target key start
LH: loop header
LB: loop body
LE: loop exit
PB: predicated region body
PF: predicated region fallthrough
CT: control target
= control target key end

     0   :  { %s2962_s18 = smov 0   ;;  %s3616_s0 = inlined_call_operand.vmem [shape: bf16[2,10,10,128], index: 0, kind: input, shape index: {}]   ;;  %s3617_s1 = inlined_call_operand.vmem [shape: f32[1,1,128], index: 1, kind: input, shape index: {}]   ;;  %s3618_s2 = inlined_call_operand.vmem [shape: f32[1,1,128], index: 2, kind: input, shape index: {}]   ;;  %s3619_s3 = inlined_call_operand.vmem [shape: bf16[9,128,128], index: 3, kind: input, shape index: {}]   ;;  %s3620_s4 = inlined_call_operand.vmem [shape: bf16[2,8,8,128], index: 4, kind: output, shape index: {0}]   ;;  %s3621_s5 = inlined_call_operand.vmem [shape: f32[2,2,128], index: 5, kind: output, shape index: {1}]  }
   0x1 LB: > { %s2090_s19 = sadd.s32 4294967295, %s2929_s18   ;;  %p2094_p0 = scmp.ge.s32.totalorder %s2929_s18, 1  ;;  %s2929_s18 = sphi %s2962_s18, %s16_s18  }
   0x2   : > { %p190_p1 = scmp.lt.s32.totalorder %s2929_s18, 3 }
   0x4   : > { %p191_p2 = pnand %p2094_p0, %p190_p1 }
   0x5   : > { %v2851_v0 = vld [vmem:[%s3619_s3 + $0x40] sm:$0xff] (!%p191_p2)   ;;  %p222_p3 = scmp.lt.s32.totalorder (!%p191_p2), %s2090_s19, 1  ;;  %v2853_v2 = vld [vmem:[%s3619_s3 + $0x48] sm:$0xff] (!%p191_p2)   ;;  %v371_v4 = vlaneseq (!%p191_p2)  ;;  %v2855_v5 = vld [vmem:[%s3619_s3 + $0x50] sm:$0xff] (!%p191_p2)   ;;  %v2931_v6 = vmov (!%p191_p2), 0.0|0.0   ;;  %vm854_vm5 = vcmask (!%p191_p2), 1042432  }
   0x6   : > { %194 = sbr.rel (%p191_p2) target bundleno = 438 (0x1b6), region = 36  ;;  %v2852_v1 = vld [vmem:[%s3619_s3 + $0x100] sm:$0xff] (!%p191_p2)   ;;  %2545 = vmatprep.subr.bf16.mxu1 (!%p191_p2), %v2851_v0  ;;  %v2854_v3 = vld [vmem:[%s3619_s3 + $0x108] sm:$0xff] (!%p191_p2)   ;;  %v2989_v7 = vcombine.low (!%p191_p2), %v2931_v6, %v2931_v6  ;;  %v2856_v8 = vld [vmem:[%s3619_s3 + $0x110] sm:$0xff] (!%p191_p2)   ;;  %v3002_v11 = vcombine.high (!%p191_p2), %v2931_v6, %v2931_v6  ;;  %vm472_vm2 = vsmask.f32 (!%p191_p2), 3328 }
   0x7   : > { %2641 = vmatprep.subr.bf16.mxu0 (!%p191_p2), %v2852_v1  ;;  %2546 = vmatpush3.bf16.msra.mxu1 (!%p191_p2), %v2851_v0  ;;  %v2995_v9 = vshrl.u32 (!%p191_p2), %v371_v4, 7  ;;  %v2857_v10 = vld [vmem:[%s3619_s3 + $0x58] sm:$0xff] (!%p191_p2)   ;;  %v2859_v18 = vld [vmem:[%s3619_s3 + $0x60] sm:$0xff] (!%p191_p2)   ;;  %v2861_v22 = vld [vmem:[%s3619_s3 + $0x68] sm:$0xff] (!%p191_p2)   ;;  %vm473_vm3 = vsmask.f32 (!%p191_p2), 7440 }
   0x8   : > { %2642 = vmatpush3.bf16.msra.mxu0 (!%p191_p2), %v2852_v1  ;;  %2547 = vmatprep.subr.bf16.mxu1 (!%p191_p2), %v2853_v2  ;;  %v476_v12 = vshrl.u32 (!%p191_p2), %v2989_v7, 16  ;;  %v2858_v13 = vld [vmem:[%s3619_s3 + $0x118] sm:$0xff] (!%p191_p2)   ;;  %v479_v14 = vshll.u32 (!%p191_p2), %v2989_v7, 16  ;;  %v485_v19 = vshll.u32 (!%p191_p2), %v3002_v11, 16  ;;  %v2860_v20 = vld [vmem:[%s3619_s3 + $0x120] sm:$0xff] (!%p191_p2)   ;;  %v2862_v23 = vld [vmem:[%s3619_s3 + $0x128] sm:$0xff] (!%p191_p2)  }
   0x9   : > { %2643 = vmatprep.subr.bf16.mxu0 (!%p191_p2), %v2854_v3  ;;  %v3010_v16 = vadd.s32 (!%p191_p2), 8, %v2995_v9  ;;  %vm374_vm0 = vcmp.ge.s32.totalorder (!%p191_p2), %v2995_v9, 1  ;;  %v3038_v33 = vld [vmem:[%s3617_s1] ss:$0 sm:$0xff] (!%p191_p2)  ;;  %v2863_v35 = vld [vmem:[%s3619_s3 + $0x70] sm:$0xff] (!%p191_p2)   ;;  %vm3052_vm4 = vmor (!%p191_p2), %vm472_vm2, %vm473_vm3  ;;  %vm855_vm6 = vcmask (!%p191_p2), 1046532  }
   0xa   : > { %v478_v15 = vrot.slane (!%p191_p2), %v476_v12, 4  ;;  %v481_v17 = vrot.slane (!%p191_p2), %v479_v14, 5  ;;  %v487_v25 = vrot.slane (!%p191_p2), %v485_v19, 5  ;;  %v3043_v34 = vld [vmem:[%s3618_s2] ss:$0 sm:$0xff] (!%p191_p2)  ;;  %v2864_v47 = vld [vmem:[%s3619_s3 + $0x130] sm:$0xff] (!%p191_p2)   ;;  %vm3320_vm7 = vmor (!%p191_p2), %vm854_vm5, %vm855_vm6 }
   0xb   : > { %2548 = vmatpush3.bf16.msra.mxu1 (!%p191_p2), %v2853_v2  ;;  %vm381_vm1 = vcmp.lt.s32.totalorder (!%p191_p2), %v3010_v16, 9  ;;  %v2865_v61 = vld [vmem:[%s3619_s3 + $0x78] sm:$0xff] (!%p191_p2)   ;;  %v3109_v19 = vld [vmem:[%s3619_s3] sm:$0xff] (!%p191_p2)   ;;  %vm3390_vm8 = vmpackc.low (!%p191_p2), %vm374_vm0, %vm374_vm0  ;;  %vm2001_vm9 = vcmp.eq.s32.totalorder (!%p191_p2), %v2995_v9, 0 }
   0xc   : > { %2644 = vmatpush3.bf16.msra.mxu0 (!%p191_p2), %v2854_v3  ;;  %2549 = vmatprep.subr.bf16.mxu1 (!%p191_p2), %v2855_v5  ;;  %v482_v21 = vor.u32 (!%p191_p2), %v481_v17, %v478_v15  ;;  %v2866_v62 = vld [vmem:[%s3619_s3 + $0x138] sm:$0xff] (!%p191_p2)  }
   0xd   : > { %s3629_s19 = smov (!%p222_p3, %s2090_s19), 1  ;;  %2645 = vmatprep.subr.bf16.mxu0 %v2856_v8 }
   0xe   : > { %s2841_s7 = smul.u32 80, %s3629_s19  ;;  %v483_v24 = vrot.slane %v482_v21, 4  ;;  %s2360_s9 = sshll.u32 %s3629_s19, 5 }
   0xf   : > { %2550 = vmatpush3.bf16.msra.mxu1 %v2855_v5  ;;  %s231_s12 = scalar_lea.vmem %s3620_s4, %s2360_s9  ;;  %s2098_s13 = sshll.u32 %s3629_s19, 1 }
  0x10   : > { %2646 = vmatpush3.bf16.msra.mxu0 %v2856_v8  ;;  %2551 = vmatprep.subr.bf16.mxu1 %v2857_v10  ;;  %s3022_s20 = scalar_lea.vmem %s3616_s0, %s2841_s7  ;;  %v3059_v42 = vsel %vm3052_vm4, %v483_v24, %v487_v25  ;;  %v3130_v25 = vld [vmem:[%s3619_s3 + $0x140] sm:$0xff]   ;;  %s235_s16 = scalar_lea.vmem %s3621_s5, %s2098_s13 }
  0x11   : > { %2647 = vmatprep.subr.bf16.mxu0 %v2858_v13  ;;  %v239_v26 = vld [vmem:[%s3022_s20 + $0x8] ss:$56 sps:$4 sm:$0xff]   ;;  %v240_v27 = vld [vmem:[%s3022_s20 + $0xc] sm:$0x1]  ;;  %v254_v28 = vld [vmem:[%s3022_s20 + $0x44] sm:$0x1] }
  0x12   : > { %v259_v29 = vunpack.c.l.bf16 %v239_v26  ;;  %v260_v30 = vunpack.c.l.bf16 %v240_v27  ;;  %v273_v31 = vunpack.c.h.bf16 %v239_v26  ;;  %v274_v32 = vunpack.c.l.bf16 %v254_v28  ;;  %v241_v41 = vld [vmem:[%s3022_s20 + $0x10] ss:$8 sps:$4 sm:$0xff]   ;;  %v242_v43 = vld [vmem:[%s3022_s20 + $0x14] sm:$0x1]  ;;  %v244_v44 = vld [vmem:[%s3022_s20 + $0x1c] sm:$0x1] }
  0x13   : > { %2552 = vmatpush3.bf16.msra.mxu1 %v2857_v10  ;;  %v261_v45 = vunpack.c.l.bf16 %v241_v41  ;;  %v263_v46 = vunpack.c.h.bf16 %v241_v41  ;;  %v3071_v52 = vld [vmem:[%s3022_s20 + $0x20] ss:$8 sps:$4 sm:$0xff]   ;;  %v262_v53 = vunpack.c.l.bf16 %v242_v43  ;;  %v264_v54 = vunpack.c.l.bf16 %v244_v44 }
  0x14   : > { %2648 = vmatpush3.bf16.msra.mxu0 %v2858_v13  ;;  %2553 = vmatprep.subr.bf16.mxu1 %v2859_v18  ;;  %v286_v36 = vmul.f32 %v3038_v33, %v259_v29  ;;  %v287_v37 = vmul.f32 %v3038_v33, %v260_v30  ;;  %v300_v38 = vmul.f32 %v3038_v33, %v273_v31  ;;  %v265_v60 = vunpack.c.l.bf16 %v3071_v52 }
  0x15   : > { %2649 = vmatprep.subr.bf16.mxu0 %v2860_v20  ;;  %v301_v39 = vmul.f32 %v3038_v33, %v274_v32  ;;  %v288_v55 = vmul.f32 %v3038_v33, %v261_v45  ;;  %v290_v56 = vmul.f32 %v3038_v33, %v263_v46  ;;  %v289_v0 = vmul.f32 %v3038_v33, %v262_v53 }
  0x16   : > { %v313_v48 = vadd.f32 %v3043_v34, %v286_v36  ;;  %v314_v49 = vadd.f32 %v3043_v34, %v287_v37  ;;  %v327_v50 = vadd.f32 %v3043_v34, %v300_v38  ;;  %v291_v1 = vmul.f32 %v3038_v33, %v264_v54 }
  0x17   : > { %2554 = vmatpush3.bf16.msra.mxu1 %v2859_v18  ;;  %v328_v51 = vadd.f32 %v3043_v34, %v301_v39  ;;  %v315_v2 = vadd.f32 %v3043_v34, %v288_v55  ;;  %v317_v8 = vadd.f32 %v3043_v34, %v290_v56  ;;  %v316_v12 = vadd.f32 %v3043_v34, %v289_v0  ;;  %v246_v0 = vld [vmem:[%s3022_s20 + $0x24] sm:$0x1] }
  0x18   : > { %2650 = vmatpush3.bf16.msra.mxu0 %v2860_v20  ;;  %2555 = vmatprep.subr.bf16.mxu1 %v2861_v22  ;;  %v333_v57 = vmul.f32 0.1, %v313_v48  ;;  %v334_v58 = vmul.f32 0.1, %v314_v49  ;;  %v347_v59 = vmul.f32 0.1, %v327_v50  ;;  %v318_v13 = vadd.f32 %v3043_v34, %v291_v1 }
  0x19   : > { %2651 = vmatprep.subr.bf16.mxu0 %v2862_v23  ;;  %v348_v63 = vmul.f32 0.1, %v328_v51  ;;  %v335_v14 = vmul.f32 0.1, %v315_v2  ;;  %v337_v20 = vmul.f32 0.1, %v317_v8 }
  0x1a   : > { %v3085_v3 = vmax.f32 %v313_v48, %v333_v57  ;;  %v354_v4 = vmax.f32 %v314_v49, %v334_v58  ;;  %v3087_v5 = vmax.f32 %v327_v50, %v347_v59  ;;  %v336_v27 = vmul.f32 0.1, %v316_v12 }
  0x1b   : > { %2556 = vmatpush3.bf16.msra.mxu1 %v2861_v22  ;;  %v368_v10 = vmax.f32 %v328_v51, %v348_v63  ;;  %v338_v28 = vmul.f32 0.1, %v318_v13  ;;  %v3136_v29 = vmax.f32 %v315_v2, %v335_v14  ;;  %v3144_v39 = vmax.f32 %v317_v8, %v337_v20  ;;  %v248_v20 = vld [vmem:[%s3022_s20 + $0x2c] sm:$0x1] }
  0x1c   : > { %2652 = vmatpush3.bf16.msra.mxu0 %v2862_v23  ;;  %2557 = vmatprep.subr.bf16.mxu1 %v2863_v35  ;;  %v3095_v15 = vsel %vm374_vm0, %v3085_v3, 0.0  ;;  %v3099_v17 = vsel %vm381_vm1, %v354_v4, 0.0  ;;  %v3104_v18 = vsel %vm374_vm0, %v3087_v5, 0.0  ;;  %v356_v38 = vmax.f32 %v316_v12, %v336_v27 }
  0x1d   : > { %2653 = vmatprep.subr.bf16.mxu0 %v2864_v47  ;;  %v3113_v21 = vsel %vm381_vm1, %v368_v10, 0.0  ;;  %v3117_v22 = vpack.c.bf16 %v3095_v15, %v3095_v15  ;;  %v3121_v23 = vpack.c.bf16 %v3099_v17, %v3099_v17  ;;  %v3125_v24 = vpack.c.bf16 %v3104_v18, %v3104_v18 }
  0x1e   : > { %v3134_v26 = vpack.c.bf16 %v3113_v21, %v3113_v21  ;;  %v358_v48 = vmax.f32 %v318_v13, %v338_v28  ;;  %v390_v49 = vsel %vm374_vm0, %v3136_v29, 0.0  ;;  %v391_v51 = vsel %vm381_vm1, %v356_v38, 0.0  ;;  %v249_v38 = vld [vmem:[%s3022_s20 + $0x30] ss:$8 sps:$4 sm:$0xff]  }
  0x1f   : > { %2558 = vmatpush3.bf16.msra.mxu1 %v2863_v35  ;;  %v490_v30 = vshrl.u32 %v3117_v22, 16  ;;  %v493_v31 = vshll.u32 %v3117_v22, 16  ;;  %v499_v32 = vshll.u32 %v3121_v23, 16  ;;  %v1195_v35 = vshrl.u32 %v3125_v24, 16 }
  0x20   : > { %2654 = vmatpush3.bf16.msra.mxu0 %v2864_v47  ;;  %2559 = vmatprep.subr.bf16.mxu1 %v2865_v61  ;;  %v1198_v36 = vshll.u32 %v3125_v24, 16  ;;  %v1204_v37 = vshll.u32 %v3134_v26, 16  ;;  %v392_v53 = vsel %vm374_vm0, %v3144_v39, 0.0  ;;  %v3156_v54 = vpack.c.bf16 %v390_v49, %v390_v49 }
  0x21   : > { %2655 = vmatprep.subr.bf16.mxu0 %v2866_v62  ;;  %v492_v41 = vrot.slane %v490_v30, 4  ;;  %v495_v43 = vrot.slane %v493_v31, 5  ;;  %v501_v44 = vrot.slane %v499_v32, 5  ;;  %v1197_v45 = vrot.slane %v1195_v35, 4 }
  0x22   : > { %v1200_v46 = vrot.slane %v1198_v36, 5  ;;  %v1206_v47 = vrot.slane %v1204_v37, 5  ;;  %v393_v56 = vsel %vm381_vm1, %v358_v48, 0.0  ;;  %v3160_v57 = vpack.c.bf16 %v391_v51, %v391_v51 }
  0x23   : > { %2560 = vmatpush3.bf16.msra.mxu1 %v2865_v61  ;;  %v496_v50 = vor.u32 %v495_v43, %v492_v41  ;;  %v3162_v58 = vpack.c.bf16 %v392_v53, %v392_v53  ;;  %v3164_v61 = vpack.c.bf16 %v393_v56, %v393_v56  ;;  %v507_v63 = vshll.u32 %v3156_v54, 16  ;;  %v250_v41 = vld [vmem:[%s3022_s20 + $0x34] sm:$0x1] }
  0x24   : > { %2656 = vmatpush3.bf16.msra.mxu0 %v2866_v62  ;;  %2569 = vmatprep.subr.bf16.mxu1 %v3109_v19  ;;  %v1201_v55 = vor.u32 %v1200_v46, %v1197_v45  ;;  %v504_v62 = vshrl.u32 %v3156_v54, 16  ;;  %v513_v2 = vshll.u32 %v3160_v57, 16  ;;  %v266_v43 = vunpack.c.l.bf16 %v246_v0 }
  0x25   : > { %2665 = vmatprep.subr.bf16.mxu0 %v3130_v25  ;;  %v497_v59 = vrot.slane %v496_v50, 4  ;;  %v518_v4 = vshrl.u32 %v3162_v58, 16  ;;  %v521_v8 = vshll.u32 %v3162_v58, 16  ;;  %v509_v13 = vrot.slane %v507_v63, 5 }
  0x26   : > { %v1202_v1 = vrot.slane %v1201_v55, 4  ;;  %v506_v12 = vrot.slane %v504_v62, 4  ;;  %v527_v14 = vshll.u32 %v3164_v61, 16  ;;  %v515_v30 = vrot.slane %v513_v2, 5 }
  0x27   : > { %v502_v10 = vsel %vm3052_vm4, %v497_v59, %v501_v44  ;;  %v520_v31 = vrot.slane %v518_v4, 4  ;;  %v523_v36 = vrot.slane %v521_v8, 5  ;;  %v292_v44 = vmul.f32 %v3038_v33, %v265_v60 }
  0x28   : > { %v2133_v27 = vcombine.low %v3059_v42, %v502_v10  ;;  %v3179_v28 = vsel %vm3052_vm4, %v1202_v1, %v1206_v47  ;;  %v510_v35 = vor.u32 %v509_v13, %v506_v12  ;;  %v529_v37 = vrot.slane %v527_v14, 5  ;;  %v252_v14 = vld [vmem:[%s3022_s20 + $0x3c] sm:$0x1] }
  0x29   : > { %v2323_v32 = vcombine.low %v3179_v28, %v3059_v42  ;;  %v267_v45 = vunpack.c.h.bf16 %v3071_v52  ;;  %v268_v46 = vunpack.c.l.bf16 %v248_v20  ;;  %v524_v48 = vor.u32 %v523_v36, %v520_v31 }
  0x2a   : > { %2561 = vmatprep.mubr.bf16.mxu1 %v2133_v27  ;;  %v511_v47 = vrot.slane %v510_v35, 4  ;;  %v269_v49 = vunpack.c.l.bf16 %v249_v38  ;;  %v270_v50 = vunpack.c.l.bf16 %v250_v41  ;;  %v293_v51 = vmul.f32 %v3038_v33, %v266_v43 }
  0x2b   : > { %v319_v53 = vadd.f32 %v3043_v34, %v292_v44  ;;  %v294_v55 = vmul.f32 %v3038_v33, %v267_v45  ;;  %v295_v56 = vmul.f32 %v3038_v33, %v268_v46  ;;  %v525_v60 = vrot.slane %v524_v48, 4 }
  0x2c   : > { %v516_v59 = vsel %vm3052_vm4, %v511_v47, %v515_v30  ;;  %v296_v52 = vmul.f32 %v3038_v33, %v269_v49  ;;  %v297_v62 = vmul.f32 %v3038_v33, %v270_v50  ;;  %v320_v0 = vadd.f32 %v3043_v34, %v293_v51  ;;  %v2869_v30 = vld [vmem:[%s3619_s3 + $0x8] sm:$0xff]   ;;  %v2871_v51 = vld [vmem:[%s3619_s3 + $0x10] sm:$0xff]  }
  0x2d   : > { %v2239_v63 = vcombine.low %v502_v10, %v516_v59  ;;  %v339_v1 = vmul.f32 0.1, %v319_v53  ;;  %v321_v2 = vadd.f32 %v3043_v34, %v294_v55  ;;  %v3201_v4 = vsel %vm3052_vm4, %v525_v60, %v529_v37 }
  0x2e   : > { %v322_v8 = vadd.f32 %v3043_v34, %v295_v56  ;;  %v323_v12 = vadd.f32 %v3043_v34, %v296_v52  ;;  %v324_v13 = vadd.f32 %v3043_v34, %v297_v62  ;;  %v3208_v20 = vcombine.low %v516_v59, %v3201_v4 }
  0x2f   : > { %2657 = vmatprep.mubr.bf16.mxu0 %v2239_v63  ;;  %v340_v10 = vmul.f32 0.1, %v320_v0  ;;  %v3210_v27 = vmax.f32 %v319_v53, %v339_v1  ;;  %v341_v31 = vmul.f32 0.1, %v321_v2  ;;  %v271_v41 = vunpack.c.h.bf16 %v249_v38 }
  0x30   : > { %v342_v35 = vmul.f32 0.1, %v322_v8  ;;  %v343_v36 = vmul.f32 0.1, %v323_v12  ;;  %v344_v37 = vmul.f32 0.1, %v324_v13  ;;  %2562 = vmatmul.mubr.bf16.vlgmr.msra.gmra.mrb[0].mxu1 %v3208_v20  ;;  %v272_v46 = vunpack.c.l.bf16 %v252_v14 }
  0x31   : > { %v360_v43 = vmax.f32 %v320_v0, %v340_v10  ;;  %v394_v44 = vsel %vm374_vm0, %v3210_v27, 0.0  ;;  %v3219_v45 = vmax.f32 %v321_v2, %v341_v31  ;;  %2570 = vmatpush3.bf16.msra.mxu1 %v3109_v19  ;;  %v298_v19 = vmul.f32 %v3038_v33, %v271_v41 }
  0x32   : > { %v3222_v47 = vpack.c.bf16 %v394_v44, %v394_v44  ;;  %v362_v48 = vmax.f32 %v322_v8, %v342_v35  ;;  %v3224_v49 = vmax.f32 %v323_v12, %v343_v36  ;;  %v364_v50 = vmax.f32 %v324_v13, %v344_v37  ;;  %2571 = vmatprep.subr.bf16.mxu1 %v2869_v30  ;;  %v2873_v13 = vld [vmem:[%s3619_s3 + $0x18] sm:$0xff]  }
  0x33   : > { %v395_v38 = vsel %vm381_vm1, %v360_v43, 0.0  ;;  %v396_v53 = vsel %vm374_vm0, %v3219_v45, 0.0  ;;  %v299_v55 = vmul.f32 %v3038_v33, %v272_v46 }
  0x34   : > { %v3236_v56 = vpack.c.bf16 %v395_v38, %v395_v38  ;;  %v532_v59 = vshrl.u32 %v3222_v47, 16  ;;  %v535_v60 = vshll.u32 %v3222_v47, 16  ;;  %v397_v52 = vsel %vm381_vm1, %v362_v48, 0.0 }
  0x35   : > { %v3242_v62 = vpack.c.bf16 %v396_v53, %v396_v53  ;;  %v3244_v63 = vpack.c.bf16 %v397_v52, %v397_v52  ;;  %v398_v0 = vsel %vm374_vm0, %v3224_v49, 0.0  ;;  %v399_v33 = vsel %vm381_vm1, %v364_v50, 0.0  ;;  %2572 = vmatpush3.bf16.msra.mxu1 %v2869_v30 }
  0x36   : > { %v534_v1 = vrot.slane %v532_v59, 4  ;;  %v537_v2 = vrot.slane %v535_v60, 5  ;;  %v541_v8 = vshll.u32 %v3236_v56, 16  ;;  %v3252_v12 = vpack.c.bf16 %v398_v0, %v398_v0  ;;  %2573 = vmatprep.subr.bf16.mxu1 %v2871_v51  ;;  %v2875_v59 = vld [vmem:[%s3619_s3 + $0x20] sm:$0xff]  }
  0x37   : > { %v546_v14 = vshrl.u32 %v3242_v62, 16  ;;  %v549_v10 = vshll.u32 %v3242_v62, 16  ;;  %v555_v31 = vshll.u32 %v3244_v63, 16  ;;  %v3260_v35 = vpack.c.bf16 %v399_v33, %v399_v33 }
  0x38   : > { %v538_v36 = vor.u32 %v537_v2, %v534_v1  ;;  %v543_v37 = vrot.slane %v541_v8, 5  ;;  %v560_v41 = vshrl.u32 %v3252_v12, 16  ;;  %v563_v30 = vshll.u32 %v3252_v12, 16 }
  0x39   : > { %v548_v43 = vrot.slane %v546_v14, 4  ;;  %v551_v44 = vrot.slane %v549_v10, 5  ;;  %v569_v46 = vshll.u32 %v3260_v35, 16  ;;  %2574 = vmatpush3.bf16.msra.mxu1 %v2871_v51  ;;  %v325_v53 = vadd.f32 %v3043_v34, %v298_v19  ;;  %v2870_v19 = vld [vmem:[%s3619_s3 + $0x148] sm:$0xff]  }
  0x3a   : > { %v539_v48 = vrot.slane %v538_v36, 4  ;;  %v562_v50 = vrot.slane %v560_v41, 4  ;;  %v565_v38 = vrot.slane %v563_v30, 5  ;;  %2575 = vmatprep.subr.bf16.mxu1 %v2873_v13  ;;  %v557_v52 = vrot.slane %v555_v31, 5  ;;  %v2872_v30 = vld [vmem:[%s3619_s3 + $0x150] sm:$0xff]  }
  0x3b   : > { %v552_v60 = vor.u32 %v551_v44, %v548_v43  ;;  %v326_v0 = vadd.f32 %v3043_v34, %v299_v55  ;;  %v571_v2 = vrot.slane %v569_v46, 5  ;;  %v345_v8 = vmul.f32 0.1, %v325_v53  ;;  %v2877_v34 = vld [vmem:[%s3619_s3 + $0x28] sm:$0xff]  }
  0x3c   : > { %v544_v33 = vsel %vm3052_vm4, %v539_v48, %v543_v37  ;;  %v566_v1 = vor.u32 %v565_v38, %v562_v50  ;;  %v2874_v48 = vld [vmem:[%s3619_s3 + $0x158] sm:$0xff]   ;;  %v2879_v50 = vld [vmem:[%s3619_s3 + $0x30] sm:$0xff]  }
  0x3d   : > { %v2240_v51 = vcombine.low %v3201_v4, %v544_v33  ;;  %v553_v14 = vrot.slane %v552_v60, 4  ;;  %v346_v10 = vmul.f32 0.1, %v326_v0  ;;  %2576 = vmatpush3.bf16.msra.mxu1 %v2873_v13  ;;  %v3276_v41 = vmax.f32 %v325_v53, %v345_v8 }
  0x3e   : > { %v567_v36 = vrot.slane %v566_v1, 4  ;;  %2577 = vmatprep.subr.bf16.mxu1 %v2875_v59  ;;  %v2159_v1 = vrot.slane %v3156_v54, 9 }
  0x3f   : > { %2658 = vmatmul.mubr.bf16.vlgmr.msra.gmra.mrb[0].mxu0 %v2240_v51  ;;  %v558_v55 = vsel %vm3052_vm4, %v553_v14, %v557_v52  ;;  %v366_v4 = vmax.f32 %v326_v0, %v346_v10  ;;  %v400_v37 = vsel %vm374_vm0, %v3276_v41, 0.0  ;;  %v2881_v52 = vld [vmem:[%s3619_s3 + $0x38] sm:$0xff]   ;;  %v2158_v0 = vrot.slane %v3117_v22, 9 }
  0x40   : > { %2666 = vmatpush3.bf16.msra.mxu0 %v3130_v25  ;;  %v3284_v31 = vcombine.low %v544_v33, %v558_v55  ;;  %v572_v13 = vsel %vm3052_vm4, %v567_v36, %v571_v2  ;;  %v3296_v46 = vpack.c.bf16 %v400_v37, %v400_v37  ;;  %v863_v33 = vrot.slane %v3121_v23, 5  ;;  %v2876_v23 = vld [vmem:[%s3619_s3 + $0x160] sm:$0xff]   ;;  %v2890_v14 = vld [vmem:[%s3619_s3 + $0x198] sm:$0xff]  }
  0x41   : > { %2667 = vmatprep.subr.bf16.mxu0 %v2870_v19  ;;  %v2241_v43 = vcombine.low %v558_v55, %v572_v13  ;;  %v401_v44 = vsel %vm381_vm1, %v366_v4, 0.0  ;;  %2578 = vmatpush3.bf16.msra.mxu1 %v2875_v59  ;;  %v867_v2 = vrot.slane %v3160_v57, 5  ;;  %v2251_v22 = vrot.slane %v3125_v24, 9 }
  0x42   : > { %2565 = vmatprep.mubr.bf16.mxu1 %v3284_v31  ;;  %v3299_v25 = vpack.c.bf16 %v401_v44, %v401_v44  ;;  %2579 = vmatprep.subr.bf16.mxu1 %v2877_v34  ;;  %v574_v16 = vshrl.u32 %v3296_v46, 16  ;;  %v577_v38 = vshll.u32 %v3296_v46, 16  ;;  %v1357_v57 = vrot.slane %v3134_v26, 5 }
  0x43   : > { %2661 = vmatprep.mubr.bf16.mxu0 %v2241_v43  ;;  %v2157_v10 = vrot.slane %v2989_v7, 9  ;;  %v3339_v24 = vsel %vm3320_vm7, %v2159_v1, %v867_v2  ;;  %v859_v36 = vrot.slane %v3002_v11, 5  ;;  %v2878_v11 = vld [vmem:[%s3619_s3 + $0x168] sm:$0xff]   ;;  %v2395_v43 = vpack.c.bf16 %v3210_v27, %v3144_v39 }
  0x44   : > { %2668 = vmatpush3.bf16.msra.mxu0 %v2870_v19  ;;  %v583_v53 = vshll.u32 %v3299_v25, 16  ;;  %v576_v59 = vrot.slane %v574_v16, 4  ;;  %v579_v60 = vrot.slane %v577_v38, 5  ;;  %v407_v19 = vpack.c.bf16 %v3099_v17, %v3095_v15  ;;  %v2883_v15 = vld [vmem:[%s3619_s3 + $0x80] sm:$0xff]   ;;  %v2885_v38 = vld [vmem:[%s3619_s3 + $0x88] sm:$0xff]  }
  0x45   : > { %2669 = vmatprep.subr.bf16.mxu0 %v2872_v30  ;;  %2580 = vmatpush3.bf16.msra.mxu1 %v2877_v34  ;;  %v3335_v17 = vsel %vm3320_vm7, %v2158_v0, %v863_v33  ;;  %v3350_v4 = vsel %vm3320_vm7, %v2251_v22, %v1357_v57  ;;  %v3354_v37 = vsel %vm3320_vm7, %v2157_v10, %v859_v36  ;;  %v2161_v33 = vrot.slane %v3222_v47, 9  ;;  %v2889_v22 = vld [vmem:[%s3619_s3 + $0x98] sm:$0xff]   ;;  %v2886_v57 = vld [vmem:[%s3619_s3 + $0x188] sm:$0xff]   ;;  %v2888_v36 = vld [vmem:[%s3619_s3 + $0x190] sm:$0xff]  }
  0x46   : > { %2581 = vmatprep.subr.bf16.mxu1 %v2879_v50  ;;  %v580_v8 = vor.u32 %v579_v60, %v576_v59  ;;  %v585_v51 = vrot.slane %v583_v53, 5  ;;  %v2145_v7 = vcombine.low %v2931_v6, %v407_v19  ;;  %v2268_v40 = vcombine.low %v3335_v17, %v3339_v24  ;;  %v2882_v53 = vld [vmem:[%s3619_s3 + $0x178] sm:$0xff]  }
  0x47   : > { %v2398_v44 = vpack.c.bf16 %v3224_v49, %v3219_v45  ;;  %v3377_v16 = vpack.c.bf16 %v3144_v39, %v3136_v29  ;;  %v2160_v59 = vrot.slane %v3162_v58, 9  ;;  %v871_v60 = vrot.slane %v3164_v61, 5  ;;  %v2918_v39 = vld [vmem:[%s3619_s3 + $0x218] sm:$0xff]  }
  0x48   : > { %2670 = vmatpush3.bf16.msra.mxu0 %v2872_v30  ;;  %v581_v54 = vrot.slane %v580_v8, 4  ;;  %v2392_v30 = vpack.c.bf16 %v3136_v29, %v3085_v3  ;;  %v3396_v0 = vpack.c.bf16 %v3219_v45, %v3210_v27  ;;  %v875_v1 = vrot.slane %v3236_v56, 5  ;;  %v2911_v3 = vld [vmem:[%s3619_s3 + $0xf0] sm:$0xff]   ;;  %v2913_v29 = vld [vmem:[%s3619_s3 + $0xf8] sm:$0xff]   ;;  %v2919_v27 = vld [vmem:[%s3619_s3 + $0x220] sm:$0xff]  }
  0x49   : > { %2671 = vmatprep.subr.bf16.mxu0 %v2874_v48  ;;  %2582 = vmatpush3.bf16.msra.mxu1 %v2879_v50  ;;  %v2880_v50 = vld [vmem:[%s3619_s3 + $0x170] sm:$0xff]   ;;  %v2162_v58 = vrot.slane %v3242_v62, 9  ;;  %v879_v61 = vrot.slane %v3244_v63, 5  ;;  %v2163_v2 = vrot.slane %v3252_v12, 9  ;;  %v883_v8 = vrot.slane %v3260_v35, 5  ;;  %v2884_v63 = vld [vmem:[%s3619_s3 + $0x180] sm:$0xff]  }
  0x4a   : > { %v586_v26 = vsel %vm3052_vm4, %v581_v54, %v585_v51  ;;  %2583 = vmatprep.subr.bf16.mxu1 %v2881_v52  ;;  %v872_v47 = vsel %vm3320_vm7, %v2160_v59, %v871_v60  ;;  %v876_v56 = vsel %vm3320_vm7, %v2161_v33, %v875_v1  ;;  %v2887_v62 = vld [vmem:[%s3619_s3 + $0x90] sm:$0xff]   ;;  %v3428_v51 = vpack.c.bf16 %v3276_v41, %v3224_v49  ;;  %v2901_v59 = vld [vmem:[%s3619_s3 + $0xc8] sm:$0xff]   ;;  %v2898_v60 = vld [vmem:[%s3619_s3 + $0x1b8] sm:$0xff]  }
  0x4b   : > { %v3345_v34 = vcombine.low %v572_v13, %v586_v26  ;;  %v2242_v55 = vcombine.low %v586_v26, %v3179_v28  ;;  %v2349_v13 = vcombine.low %v3350_v4, %v3354_v37  ;;  %v880_v12 = vsel %vm3320_vm7, %v2162_v58, %v879_v61  ;;  %v2893_v26 = vld [vmem:[%s3619_s3 + $0xa8] sm:$0xff]   ;;  %v2900_v33 = vld [vmem:[%s3619_s3 + $0x1c0] sm:$0xff]   ;;  %v2905_v58 = vld [vmem:[%s3619_s3 + $0xd8] sm:$0xff]  }
  0x4c   : > { %2672 = vmatpush3.bf16.msra.mxu0 %v2874_v48  ;;  %v2401_v48 = vpack.c.bf16 %v3087_v5, %v3276_v41  ;;  %v3424_v35 = vsel %vm3320_vm7, %v2163_v2, %v883_v8  ;;  %v2269_v19 = vcombine.low %v872_v47, %v876_v56  ;;  %v887_v54 = vrot.slane %v3299_v25, 5  ;;  %v2902_v61 = vld [vmem:[%s3619_s3 + $0x1c8] sm:$0xff]   ;;  %v2907_v8 = vld [vmem:[%s3619_s3 + $0xe0] sm:$0xff]   ;;  %v2921_v45 = vld [vmem:[%s3619_s3 + $0x230] sm:$0xff]  }
  0x4d   : > { %2673 = vmatprep.subr.bf16.mxu0 %v2876_v23  ;;  %2566 = vmatmul.mubr.bf16.gmra.mrb[4].mxu1 %v3345_v34  ;;  %v2270_v10 = vcombine.low %v880_v12, %v3424_v35  ;;  %v414_v2 = vpack.c.bf16 %v3113_v21, %v3104_v18  ;;  %v2909_v21 = vld [vmem:[%s3619_s3 + $0xe8] sm:$0xff]   ;;  %v2922_v49 = vld [vmem:[%s3619_s3 + $0x238] sm:$0xff]  }
  0x4e   : > { %2662 = vmatmul.mubr.bf16.gmra.mrb[4].mxu0 %v2242_v55  ;;  %2584 = vmatpush3.bf16.msra.mxu1 %v2881_v52  ;;  %v2892_v55 = vld [vmem:[%s3619_s3 + $0x1a0] sm:$0xff]   ;;  %v2920_v5 = vld [vmem:[%s3619_s3 + $0x228] sm:$0xff]  }
  0x4f   : > { %2585 = vmatprep.mubr.bf16.mxu1 %v2145_v7  ;;  %2593 = vmatprep.subr.bf16.mxu1 %v2883_v15  ;;  %v2895_v7 = vld [vmem:[%s3619_s3 + $0xb0] sm:$0xff]   ;;  %v2296_v18 = vcombine.low %v414_v2, %v2931_v6  ;;  %v2908_v6 = vld [vmem:[%s3619_s3 + $0x1e0] sm:$0xff]  }
  0x50   : > { %2674 = vmatpush3.bf16.msra.mxu0 %v2876_v23  ;;  %2681 = vmatprep.mubr.bf16.mxu0 %v2268_v40  ;;  %v2164_v23 = vrot.slane %v3296_v46, 9  ;;  %v2891_v46 = vld [vmem:[%s3619_s3 + $0xa0] sm:$0xff]   ;;  %v2894_v40 = vld [vmem:[%s3619_s3 + $0x1a8] sm:$0xff]  }
  0x51   : > { %2675 = vmatprep.subr.bf16.mxu0 %v2878_v11 }
  0x52   : > { %v888_v25 = vsel %vm3320_vm7, %v2164_v23, %v887_v54 }
  0x53   : > { %v3500_v1 = vcombine.low %v3424_v35, %v888_v25 }
  0x54   : > { %2676 = vmatpush3.bf16.msra.mxu0 %v2878_v11  ;;  %v2897_v11 = vld [vmem:[%s3619_s3 + $0xb8] sm:$0xff]  }
  0x55   : > { %2677 = vmatprep.subr.bf16.mxu0 %v2880_v50  ;;  %2586 = vmatmul.mubr.msk.bf16.vlgmr.msra.gmra.mrb[0].mxu1 %vm3390_vm8, %v3377_v16 }
  0x56   : > { %2594 = vmatpush3.bf16.msra.mxu1 %v2883_v15  ;;  %2589 = vmatprep.mubr.msk.bf16.mxu1 %vm3390_vm8, %v3396_v0  ;;  %v2181_v15 = vcombine.low %v3354_v37, %v3335_v17  ;;  %v2271_v17 = vcombine.low %v888_v25, %v3350_v4 }
  0x57   : > { %2595 = vmatprep.subr.bf16.mxu1 %v2885_v38 }
  0x58   : > { %2678 = vmatpush3.bf16.msra.mxu0 %v2880_v50  ;;  %v2899_v50 = vld [vmem:[%s3619_s3 + $0xc0] sm:$0xff]  }
  0x59   : > { %2679 = vmatprep.subr.bf16.mxu0 %v2882_v53 }
  0x5a   : > { %2596 = vmatpush3.bf16.msra.mxu1 %v2885_v38  ;;  %v3481_v38 = vcombine.low %v3339_v24, %v872_v47  ;;  %v2903_v24 = vld [vmem:[%s3619_s3 + $0xd0] sm:$0xff]  }
  0x5b   : > { %2597 = vmatprep.subr.bf16.mxu1 %v2887_v62  ;;  %v2904_v47 = vld [vmem:[%s3619_s3 + $0x1d0] sm:$0xff]  }
  0x5c   : > { %2680 = vmatpush3.bf16.msra.mxu0 %v2882_v53  ;;  %v3483_v53 = vcombine.low %v876_v56, %v880_v12  ;;  %v2915_v56 = vld [vmem:[%s3619_s3 + $0x200] sm:$0xff]   ;;  %v2917_v12 = vld [vmem:[%s3619_s3 + $0x210] sm:$0xff]  }
  0x5d   : > { %2689 = vmatprep.subr.bf16.mxu0 %v2884_v63  ;;  %2590 = vmatmul.mubr.msk.bf16.gmra.mrb[4].mxu1 %vm3390_vm8, %v3428_v51 }
  0x5e   : > { %2598 = vmatpush3.bf16.msra.mxu1 %v2887_v62  ;;  %2609 = vmatprep.mubr.bf16.mxu1 %v2181_v15  ;;  %v2916_v62 = vld [vmem:[%s3619_s3 + $0x208] sm:$0xff]  }
  0x5f   : > { %2682 = vmatmul.mubr.bf16.vlgmr.msra.gmra.mrb[0].mxu0 %v2269_v19  ;;  %2599 = vmatprep.subr.bf16.mxu1 %v2889_v22 }
  0x60   : > { %2690 = vmatpush3.bf16.msra.mxu0 %v2884_v63  ;;  %2685 = vmatprep.mubr.bf16.mxu0 %v2270_v10  ;;  %v2914_v63 = vld [vmem:[%s3619_s3 + $0x1f8] sm:$0xff]  }
  0x61   : > { %2691 = vmatprep.subr.bf16.mxu0 %v2886_v57 }
  0x62   : > { %2600 = vmatpush3.bf16.msra.mxu1 %v2889_v22 }
  0x63   : > { %2601 = vmatprep.subr.bf16.mxu1 %v2891_v46 }
  0x64   : > { %2692 = vmatpush3.bf16.msra.mxu0 %v2886_v57 }
  0x65   : > { %2693 = vmatprep.subr.bf16.mxu0 %v2888_v36 }
  0x66   : > { %2602 = vmatpush3.bf16.msra.mxu1 %v2891_v46 }
  0x67   : > { %2686 = vmatmul.mubr.bf16.gmra.mrb[4].mxu0 %v2271_v17  ;;  %2603 = vmatprep.subr.bf16.mxu1 %v2893_v26 }
  0x68   : > { %2694 = vmatpush3.bf16.msra.mxu0 %v2888_v36  ;;  %2705 = vmatprep.mubr.msk.bf16.mxu0 %vm3390_vm8, %v3377_v16  ;;  %v2896_v16 = vld [vmem:[%s3619_s3 + $0x1b0] sm:$0xff]  }
  0x69   : > { %2695 = vmatprep.subr.bf16.mxu0 %v2890_v14 }
  0x6a   : > { %2604 = vmatpush3.bf16.msra.mxu1 %v2893_v26 }
  0x6b   : > { %2605 = vmatprep.subr.bf16.mxu1 %v2895_v7 }
  0x6c   : > { %2696 = vmatpush3.bf16.msra.mxu0 %v2890_v14 }
  0x6d   : > { %2697 = vmatprep.subr.bf16.mxu0 %v2892_v55 }
  0x6e   : > { %2606 = vmatpush3.bf16.msra.mxu1 %v2895_v7 }
  0x6f   : > { %2607 = vmatprep.subr.bf16.mxu1 %v2897_v11 }
  0x70   : > { %2698 = vmatpush3.bf16.msra.mxu0 %v2892_v55 }
  0x71   : > { %2699 = vmatprep.subr.bf16.mxu0 %v2894_v40 }
  0x72   : > { %2608 = vmatpush3.bf16.msra.mxu1 %v2897_v11 }
  0x73   : > { %2617 = vmatprep.subr.bf16.mxu1 %v2899_v50 }
  0x74   : > { %2700 = vmatpush3.bf16.msra.mxu0 %v2894_v40 }
  0x75   : > { %2701 = vmatprep.subr.bf16.mxu0 %v2896_v16  ;;  %2610 = vmatmul.mubr.bf16.vlgmr.msra.gmra.mrb[0].mxu1 %v3481_v38 }
  0x76   : > { %2618 = vmatpush3.bf16.msra.mxu1 %v2899_v50  ;;  %2613 = vmatprep.mubr.bf16.mxu1 %v3483_v53 }
  0x77   : > { %2619 = vmatprep.subr.bf16.mxu1 %v2901_v59 }
  0x78   : > { %2702 = vmatpush3.bf16.msra.mxu0 %v2896_v16 }
  0x79   : > { %2703 = vmatprep.subr.bf16.mxu0 %v2898_v60 }
  0x7a   : > { %2620 = vmatpush3.bf16.msra.mxu1 %v2901_v59 }
  0x7b   : > { %2621 = vmatprep.subr.bf16.mxu1 %v2903_v24 }
  0x7c   : > { %2704 = vmatpush3.bf16.msra.mxu0 %v2898_v60 }
  0x7d   : > { %2713 = vmatprep.subr.bf16.mxu0 %v2900_v33  ;;  %2614 = vmatmul.mubr.bf16.gmra.mrb[4].mxu1 %v3500_v1 }
  0x7e   : > { %2622 = vmatpush3.bf16.msra.mxu1 %v2903_v24  ;;  %2633 = vmatprep.mubr.msk.bf16.mxu1 %vm3390_vm8, %v2392_v30  ;;  %v2910_v30 = vld [vmem:[%s3619_s3 + $0x1e8] sm:$0xff]  }
  0x7f   : > { %2706 = vmatmul.mubr.msk.bf16.vlgmr.msra.gmra.mrb[0].mxu0 %vm3390_vm8, %v3396_v0  ;;  %2623 = vmatprep.subr.bf16.mxu1 %v2905_v58  ;;  %v2906_v0 = vld [vmem:[%s3619_s3 + $0x1d8] sm:$0xff]  }
  0x80   : > { %2714 = vmatpush3.bf16.msra.mxu0 %v2900_v33  ;;  %2709 = vmatprep.mubr.msk.bf16.mxu0 %vm3390_vm8, %v3428_v51 }
  0x81   : > { %2715 = vmatprep.subr.bf16.mxu0 %v2902_v61 }
  0x82   : > { %2624 = vmatpush3.bf16.msra.mxu1 %v2905_v58 }
  0x83   : > { %2625 = vmatprep.subr.bf16.mxu1 %v2907_v8 }
  0x84   : > { %2716 = vmatpush3.bf16.msra.mxu0 %v2902_v61 }
  0x85   : > { %2717 = vmatprep.subr.bf16.mxu0 %v2904_v47 }
  0x86   : > { %2626 = vmatpush3.bf16.msra.mxu1 %v2907_v8 }
  0x87   : > { %2710 = vmatmul.mubr.bf16.gmra.mrb[4].mxu0 %v2296_v18  ;;  %2627 = vmatprep.subr.bf16.mxu1 %v2909_v21 }
  0x88   : > { %2718 = vmatpush3.bf16.msra.mxu0 %v2904_v47  ;;  %2729 = vmatprep.mubr.bf16.mxu0 %v3208_v20  ;;  %v2912_v20 = vld [vmem:[%s3619_s3 + $0x1f0] sm:$0xff]  }
  0x89   : > { %2719 = vmatprep.subr.bf16.mxu0 %v2906_v0 }
  0x8a   : > { %2628 = vmatpush3.bf16.msra.mxu1 %v2909_v21 }
  0x8b   : > { %2629 = vmatprep.subr.bf16.mxu1 %v2911_v3 }
  0x8c   : > { %2720 = vmatpush3.bf16.msra.mxu0 %v2906_v0 }
  0x8d   : > { %2721 = vmatprep.subr.bf16.mxu0 %v2908_v6 }
  0x8e   : > { %2630 = vmatpush3.bf16.msra.mxu1 %v2911_v3 }
  0x8f   : > { %2631 = vmatprep.subr.bf16.mxu1 %v2913_v29 }
  0x90   : > { %2722 = vmatpush3.bf16.msra.mxu0 %v2908_v6 }
  0x91   : > { %2723 = vmatprep.subr.bf16.mxu0 %v2910_v30 }
  0x92   : > { %2632 = vmatpush3.bf16.msra.mxu1 %v2913_v29 }
  0x93   : > { %2761 = vmatprep.subr.bf16.mxu1 %v2915_v56 }
  0x94   : > { %2724 = vmatpush3.bf16.msra.mxu0 %v2910_v30 }
  0x95   : > { %2725 = vmatprep.subr.bf16.mxu0 %v2912_v20  ;;  %2634 = vmatmul.mubr.msk.bf16.vlgmr.msra.gmra.mrb[0].mxu1 %vm3390_vm8, %v2395_v43 }
  0x96   : > { %2769 = vmatpush3.bf16.msra.mxu1 %v2915_v56  ;;  %2637 = vmatprep.mubr.msk.bf16.mxu1 %vm3390_vm8, %v2398_v44 }
  0x97   : > { %2762 = vmatprep.subr.bf16.mxu1 %v2916_v62 }
  0x98   : > { %2726 = vmatpush3.bf16.msra.mxu0 %v2912_v20 }
  0x99   : > { %2727 = vmatprep.subr.bf16.mxu0 %v2914_v63 }
  0x9a   : > { %2770 = vmatpush3.bf16.msra.mxu1 %v2916_v62 }
  0x9b   : > { %2763 = vmatprep.subr.bf16.mxu1 %v2917_v12 }
  0x9c   : > { %2728 = vmatpush3.bf16.msra.mxu0 %v2914_v63 }
  0x9d   : > { %2737 = vmatprep.subr.bf16.mxu0 %v2915_v56  ;;  %2638 = vmatmul.mubr.msk.bf16.gmra.mrb[4].mxu1 %vm3390_vm8, %v2401_v48 }
  0x9e   : > { %2771 = vmatpush3.bf16.msra.mxu1 %v2917_v12  ;;  %2757 = vmatprep.mubr.bf16.mxu1 %v3500_v1 }
  0x9f   : > { %2730 = vmatmul.mubr.bf16.vlgmr.msra.gmra.mrb[0].mxu0 %v3284_v31  ;;  %2764 = vmatprep.subr.bf16.mxu1 %v2918_v39 }
  0xa0   : > { %2738 = vmatpush3.bf16.msra.mxu0 %v2915_v56  ;;  %2733 = vmatprep.mubr.bf16.mxu0 %v3345_v34 }
  0xa1   : > { %2739 = vmatprep.subr.bf16.mxu0 %v2916_v62 }
  0xa2   : > { %2772 = vmatpush3.bf16.msra.mxu1 %v2918_v39 }
  0xa3   : > { %2765 = vmatprep.subr.bf16.mxu1 %v2919_v27 }
  0xa4   : > { %2740 = vmatpush3.bf16.msra.mxu0 %v2916_v62 }
  0xa5   : > { %2741 = vmatprep.subr.bf16.mxu0 %v2917_v12 }
  0xa6   : > { %2773 = vmatpush3.bf16.msra.mxu1 %v2919_v27 }
  0xa7   : > { %2734 = vmatmul.mubr.bf16.gmra.mrb[4].mxu0 %v2323_v32  ;;  %2766 = vmatprep.subr.bf16.mxu1 %v2920_v5 }
  0xa8   : > { %2742 = vmatpush3.bf16.msra.mxu0 %v2917_v12  ;;  %2753 = vmatprep.mubr.bf16.mxu0 %v3481_v38 }
  0xa9   : > { %2743 = vmatprep.subr.bf16.mxu0 %v2918_v39 }
  0xaa   : > { %2774 = vmatpush3.bf16.msra.mxu1 %v2920_v5 }
  0xab   : > { %2767 = vmatprep.subr.bf16.mxu1 %v2921_v45 }
  0xac   : > { %2744 = vmatpush3.bf16.msra.mxu0 %v2918_v39 }
  0xad   : > { %2745 = vmatprep.subr.bf16.mxu0 %v2919_v27 }
  0xae   : > { %2775 = vmatpush3.bf16.msra.mxu1 %v2921_v45 }
  0xaf   : > { %2768 = vmatprep.subr.bf16.mxu1 %v2922_v49 }
  0xb0   : > { %2746 = vmatpush3.bf16.msra.mxu0 %v2919_v27 }
  0xb1   : > { %2747 = vmatprep.subr.bf16.mxu0 %v2920_v5 }
  0xb2   : > { %2776 = vmatpush3.bf16.msra.mxu1 %v2922_v49 }
  0xb4   : > { %2748 = vmatpush3.bf16.msra.mxu0 %v2920_v5 }
  0xb5   : > { %2749 = vmatprep.subr.bf16.mxu0 %v2921_v45  ;;  %2758 = vmatmul.mubr.bf16.vlgmr.msra.gmra.mrb[8].mxu1 %v2349_v13 }
  0xb8   : > { %2750 = vmatpush3.bf16.msra.mxu0 %v2921_v45 }
  0xb9   : > { %2751 = vmatprep.subr.bf16.mxu0 %v2922_v49 }
  0xbc   : > { %2752 = vmatpush3.bf16.msra.mxu0 %v2922_v49 }
  0xbf   : > { %2754 = vmatmul.mubr.bf16.vlgmr.msra.gmra.mrb[0].mxu0 %v3483_v53 }
 0x168   : > { %v2635_v42 = vpop.f32.mrb[0].mxu1 }
 0x169   : > { %v1152_v28 = vpop.f32.mrb[1].mxu1 }
 0x16a   : > { %v2636_v32 = vpop.f32.mrb[2].mxu1 }
 0x16b   : > { %v1155_v41 = vpop.f32.mrb[3].mxu1 }
 0x170   : > { %v2639_v31 = vpop.f32.mrb[4].mxu1 }
 0x171   : > { %v1168_v34 = vpop.f32.mrb[5].mxu1 }
 0x172   : > { %v2640_v43 = vpop.f32.mrb[6].mxu1 }
 0x173   : > { %v1171_v44 = vpop.f32.mrb[7].mxu1 }
 0x17a   : > { %v2735_v48 = vpop.f32.mrb[4].mxu0 }
 0x17b   : > { %v2781_v52 = vadd.f32 %v2735_v48, %v2639_v31  ;;  %v1783_v35 = vpop.f32.mrb[5].mxu0 }
 0x17c   : > { %v2783_v51 = vadd.f32 %v1783_v35, %v1168_v34  ;;  %v2736_v4 = vpop.f32.mrb[6].mxu0 }
 0x17d   : > { %v2785_v37 = vadd.f32 %v2736_v4, %v2640_v43  ;;  %v1786_v13 = vpop.f32.mrb[7].mxu0 }
 0x17e   : > { %v2787_v19 = vadd.f32 %v1786_v13, %v1171_v44 }
 0x188   : > { %v2759_v22 = vpop.f32.mrb[8].mxu1 }
 0x189   : > { %v2782_v23 = vadd.f32 %v2781_v52, %v2759_v22  ;;  %v1928_v54 = vpop.f32.mrb[9].mxu1 }
 0x18a   : > { %v2784_v57 = vadd.f32 %v2783_v51, %v1928_v54  ;;  %v2760_v10 = vpop.f32.mrb[10].mxu1 }
 0x18b   : > { %v2786_v15 = vadd.f32 %v2785_v37, %v2760_v10  ;;  %v1931_v46 = vpop.f32.mrb[11].mxu1  ;;  %v1986_v29 = vmul.f32 %v2782_v23, %v2782_v23 }
 0x18c   : > { %v2788_v25 = vadd.f32 %v2787_v19, %v1931_v46  ;;  %v1984_v47 = vmul.f32 %v2784_v57, %v2784_v57 }
 0x18d   : > { %v2432_v36 = vpack.c.bf16 %v2786_v15, %v2782_v23  ;;  %v1987_v20 = vmul.f32 %v2786_v15, %v2786_v15 }
 0x18e   : > { %v2427_v17 = vpack.c.bf16 %v2788_v25, %v2784_v57  ;;  %v1985_v3 = vmul.f32 %v2788_v25, %v2788_v25 }
 0x18f   : > { %2436 = vst [vmem:[%s231_s12 + $0x18] sm:$0xff] %v2432_v36  }
 0x190   : > { %2435 = vst [vmem:[%s231_s12 + $0x10] sm:$0xff] %v2427_v17  }
 0x192   : > { %v2755_v26 = vpop.f32.mrb[0].mxu0 }
 0x193   : > { %v2777_v14 = vadd.f32 %v2755_v26, %v2635_v42  ;;  %v1912_v7 = vpop.f32.mrb[1].mxu0 }
 0x194   : > { %v2778_v55 = vadd.f32 %v1912_v7, %v1152_v28  ;;  %v2756_v11 = vpop.f32.mrb[2].mxu0 }
 0x195   : > { %v2779_v40 = vadd.f32 %v2756_v11, %v2636_v32  ;;  %v1915_v50 = vpop.f32.mrb[3].mxu0  ;;  %v1982_v33 = vmul.f32 %v2777_v14, %v2777_v14 }
 0x196   : > { %v2780_v16 = vadd.f32 %v1915_v50, %v1155_v41  ;;  %v1980_v53 = vmul.f32 %v2778_v55, %v2778_v55 }
 0x197   : > { %v2422_v38 = vpack.c.bf16 %v2779_v40, %v2777_v14  ;;  %v1983_v61 = vmul.f32 %v2779_v40, %v2779_v40 }
 0x198   : > { %v2417_v59 = vpack.c.bf16 %v2780_v16, %v2778_v55  ;;  %v1967_v60 = vadd.f32 %v2780_v16, %v2778_v55  ;;  %v1981_v24 = vmul.f32 %v2780_v16, %v2780_v16 }
 0x199   : > { %2434 = vst [vmem:[%s231_s12 + $0x8] sm:$0xff] %v2422_v38  }
 0x19a   : > { %2418 = vst [vmem:[%s231_s12] sm:$0xff] %v2417_v59   ;;  %v1968_v1 = vadd.f32 %v2777_v14, %v1967_v60  ;;  %v1988_v58 = vadd.f32 %v1981_v24, %v1980_v53 }
 0x19c   : > { %v1989_v2 = vadd.f32 %v1988_v58, %v1982_v33  ;;  %v1969_v8 = vadd.f32 %v2779_v40, %v1968_v1 }
 0x19e   : > { %v1970_v18 = vadd.f32 %v2784_v57, %v1969_v8  ;;  %v1990_v21 = vadd.f32 %v1989_v2, %v1983_v61 }
 0x1a0   : > { %v1971_v0 = vadd.f32 %v2788_v25, %v1970_v18  ;;  %v1991_v6 = vadd.f32 %v1990_v21, %v1984_v47 }
 0x1a2   : > { %v1972_v30 = vadd.f32 %v2782_v23, %v1971_v0  ;;  %v1992_v56 = vadd.f32 %v1991_v6, %v1985_v3 }
 0x1a4   : > { %v1973_v62 = vadd.f32 %v2786_v15, %v1972_v30  ;;  %v1993_v63 = vadd.f32 %v1992_v56, %v1986_v29 }
 0x1a6   : > { %v1974_v12 = vrot.slane %v1973_v62, 4  ;;  %v1994_v39 = vadd.f32 %v1993_v63, %v1987_v20 }
 0x1a8   : > { %v1975_v27 = vadd.f32 %v1974_v12, %v1973_v62  ;;  %v1995_v5 = vrot.slane %v1994_v39, 4 }
 0x1aa   : > { %v1976_v45 = vrot.slane %v1975_v27, 2  ;;  %v1996_v49 = vadd.f32 %v1995_v5, %v1994_v39 }
 0x1ac   : > { %v1977_v42 = vadd.f32 %v1976_v45, %v1975_v27  ;;  %v1997_v28 = vrot.slane %v1996_v49, 2 }
 0x1ae   : > { %v1978_v32 = vrot.slane %v1977_v42, 1  ;;  %v1998_v41 = vadd.f32 %v1997_v28, %v1996_v49 }
 0x1b0   : > { %v1999_v31 = vrot.slane %v1998_v41, 1  ;;  %v1979_v34 = vadd.f32 %v1978_v32, %v1977_v42 }
 0x1b2   : > { %v2000_v43 = vadd.f32 %v1999_v31, %v1998_v41 }
 0x1b4   : > { %v2002_v44 = vsel %vm2001_vm9, %v1979_v34, %v2000_v43 }
 0x1b5   : > { %2003 = vst [vmem:[%s235_s16] sm:$0x3] %v2002_v44 }
 0x1b6 PF: > { %s16_s18 = sadd.s32 1, %s2929_s18  }
 0x1b7   : > { %p13_p4 = scmp.ge.s32.totalorder %s16_s18, 4  }
 0x1b9   :  { %15 = sbr.rel (!%p13_p4) target bundleno = 1 (0x1), region = 86 }

</bundles_post_ra>
